<compile_context>
chip_gen: v7x
topology: tpu7x:2x2x1
jax: 0.10.0
libtpu: 0.0.40
codegen_flags: <defaults>
</compile_context>

<pallas_src>
import jax
import jax.numpy as jnp
from jax.experimental import pallas as pl
from jax.experimental.pallas import tpu as pltpu


def _cdiv(a, b):
    return (a + b - 1) // b


def _round_up(n, m):
    return _cdiv(n, m) * m


def _gen_disp_kernel(x_ref,
                     w1_ref, t1_ref,
                     w2_ref, t2_ref,
                     w3_ref, t3_ref,
                     w4_ref, b4_ref,
                     o_ref):
    """Fused 4-layer pointwise MLP: relu(h @ w + t) x3  ->  h @ w4 + b4.

    Matmuls run in bf16 on the MXU with f32 accumulation; the bias / folded-BN /
    ReLU epilogue stays in f32.
    """
    h = x_ref[...]                                            # bf16 (tm, Cin_pad)

    # layer 1: conv1 + bn1 (folded) + relu
    a = jnp.dot(h, w1_ref[...], preferred_element_type=jnp.float32)
    a = jnp.maximum(a + t1_ref[...], 0.0)

    # layer 2
    a = jnp.dot(a.astype(jnp.bfloat16), w2_ref[...],
                preferred_element_type=jnp.float32)
    a = jnp.maximum(a + t2_ref[...], 0.0)

    # layer 3
    a = jnp.dot(a.astype(jnp.bfloat16), w3_ref[...],
                preferred_element_type=jnp.float32)
    a = jnp.maximum(a + t3_ref[...], 0.0)

    # layer 4: conv4 (no bn, no relu)
    a = jnp.dot(a.astype(jnp.bfloat16), w4_ref[...],
                preferred_element_type=jnp.float32) + b4_ref[...]

    o_ref[...] = a.astype(o_ref.dtype)


def prepare_params(params):
    """Fold conv-bias + BN into weights, pad to MXU-friendly shapes, cast to bf16.

    Input: 14-tuple (w, b, bn_scale, bn_shift per layer 1-3; w4, b4) as produced by
    make_params.  Output 8-tuple (w1, t1, w2, t2, w3, t3, w4, b4) where w* are bf16
    (Cin_pad, Cout_pad) matmul weights and t*/b4 are f32 (1, Cout_pad) adds.
    """
    (w1, b1, s1, t1, w2, b2, s2, t2, w3, b3, s3, t3, w4, b4) = params

    def fold(w, b, s, t):      # (h @ w + b) * s + t == h @ (w*s) + (b*s + t)
        return w * s, b * s + t

    w1f, t1f = fold(w1, b1, s1, t1)
    w2f, t2f = fold(w2, b2, s2, t2)
    w3f, t3f = fold(w3, b3, s3, t3)
    w4f, t4f = w4, b4

    cin = w1f.shape[0]
    cin_pad = _round_up(cin, 128)                 # 1091 -> 1152
    c3_pad = _round_up(w3f.shape[1], 128)         # 64   -> 128
    c4_pad = _round_up(w4f.shape[1], 128)         # 3    -> 128

    w1f = jnp.pad(w1f, ((0, cin_pad - cin), (0, 0)))
    w3f = jnp.pad(w3f, ((0, 0), (0, c3_pad - w3f.shape[1])))
    t3f = jnp.pad(t3f, ((0, 0), (0, c3_pad - t3f.shape[1])))
    w4f = jnp.pad(w4f, ((0, c3_pad - w4f.shape[0]), (0, c4_pad - w4f.shape[1])))
    t4f = jnp.pad(t4f, ((0, 0), (0, c4_pad - t4f.shape[1])))

    bf16 = lambda a: a.astype(jnp.bfloat16)
    f32 = lambda a: a.astype(jnp.float32)
    return (bf16(w1f), f32(t1f),
            bf16(w2f), f32(t2f),
            bf16(w3f), f32(t3f),
            bf16(w4f), f32(t4f))


def generator_displacement_pallas(x_ncl, prepared, *, tm=512):
    """x_ncl: (B, C_in, N) float32.  prepared: output of prepare_params.
    Returns (B, 3, N) float32."""
    B, C_in, N = x_ncl.shape
    (w1, t1, w2, t2, w3, t3, w4, b4) = prepared
    cin_pad = w1.shape[0]
    c1, c2, c3p, c4p = w1.shape[1], w2.shape[1], w3.shape[1], w4.shape[1]

    M = B * N
    # Row-tile selection: never wider than the (padded) data; keep >=2 grid steps
    # when there is enough work so both v7x TensorCores get a share.
    tm = max(256, min(tm, _round_up(M, 256)))
    if tm > 256 and _cdiv(M, tm) < 2:
        tm = max(256, _round_up(_cdiv(M, 2), 256))
    M_pad = _cdiv(M, tm) * tm

    # (B, C, N) -> (B, N, C) -> (M, C) channels-last slab; pad rows + channels.
    x2d = jnp.transpose(x_ncl, (0, 2, 1)).reshape(M, C_in).astype(jnp.bfloat16)
    x2d = jnp.pad(x2d, ((0, M_pad - M), (0, cin_pad - C_in)))

    def full(shape):
        # whole-array block, same block every grid step (weights stay resident)
        return pl.BlockSpec(shape, lambda i: (0, 0))

    grid_spec = pltpu.PrefetchScalarGridSpec(
        num_scalar_prefetch=0,
        grid=(M_pad // tm,),
        in_specs=[
            pl.BlockSpec((tm, cin_pad), lambda i: (i, 0)),   # x row tile
            full((cin_pad, c1)), full((1, c1)),
            full((c1, c2)),      full((1, c2)),
            full((c2, c3p)),     full((1, c3p)),
            full((c3p, c4p)),    full((1, c4p)),
        ],
        out_specs=pl.BlockSpec((tm, c4p), lambda i: (i, 0)),
    )

    flops = 2 * M_pad * (cin_pad * c1 + c1 * c2 + c2 * c3p + c3p * c4p)
    bytes_accessed = (int(x2d.size) * 2
                      + sum(int(p.size) * p.dtype.itemsize for p in prepared)
                      + M_pad * c4p * 4)

    out2d = pl.pallas_call(
        _gen_disp_kernel,
        out_shape=jax.ShapeDtypeStruct((M_pad, c4p), jnp.float32),
        grid_spec=grid_spec,
        compiler_params=pltpu.CompilerParams(
            dimension_semantics=("parallel",),
            vmem_limit_bytes=48 * 1024 * 1024,   # fits v7x's 64 MiB VMEM with headroom
        ),
        cost_estimate=pl.CostEstimate(
            flops=flops, transcendentals=0, bytes_accessed=bytes_accessed),
    )(x2d, *prepared)

    # (M_pad, 128) -> (M, 3) -> (B, N, 3) -> (B, 3, N)
    out = out2d[:M, :3]
    return jnp.transpose(out.reshape(B, N, 3), (0, 2, 1)).astype(x_ncl.dtype)


def make_params(dim, key):
    """Deterministic synthetic parameters matching the PyTorch module shapes."""
    C_in = dim + 1024 + 64
    dims = [C_in, 1024, 512, 64, 3]
    eps = 1e-5

    keys = jax.random.split(key, 32)
    ki = iter(range(32))

    params = []
    for li in range(4):
        cin, cout = dims[li], dims[li + 1]
        # Conv1d weight (cout, cin, 1) stored transposed as (cin, cout) for matmul
        w = jax.random.normal(keys[next(ki)], (cin, cout), jnp.float32) * 0.02
        b = jax.random.normal(keys[next(ki)], (1, cout), jnp.float32) * 0.02
        params.extend([w, b])
        if li < 3:
            # BatchNorm1d(cout), inference mode: fold into scale/shift
            gamma = 1.0 + 0.1 * jax.random.normal(keys[next(ki)], (1, cout), jnp.float32)
            beta = 0.1 * jax.random.normal(keys[next(ki)], (1, cout), jnp.float32)
            rmean = 0.05 * jax.random.normal(keys[next(ki)], (1, cout), jnp.float32)
            rvar = jax.random.uniform(keys[next(ki)], (1, cout), jnp.float32, 0.5, 1.5)
            scale = gamma / jnp.sqrt(rvar + eps)
            shift = beta - rmean * scale
            params.extend([scale, shift])
    return tuple(params)


def reference_forward_f32(x_ncl, params):
    """Pure-JAX f32 reference of the original module math (no folding, no bf16)."""
    B, C_in, N = x_ncl.shape
    h = jnp.transpose(x_ncl, (0, 2, 1)).reshape(B * N, C_in)
    (w1, b1, s1, t1, w2, b2, s2, t2, w3, b3, s3, t3, w4, b4) = params
    h = jnp.maximum((h @ w1 + b1) * s1 + t1, 0.0)
    h = jnp.maximum((h @ w2 + b2) * s2 + t2, 0.0)
    h = jnp.maximum((h @ w3 + b3) * s3 + t3, 0.0)
    h = h @ w4 + b4
    return jnp.transpose(h.reshape(B, N, 3), (0, 2, 1))


def reference_forward_mixed(x_ncl, prepared, C_in):
    """Pure-JAX reference with the same folded / padded / bf16 math as the kernel."""
    (w1, t1, w2, t2, w3, t3, w4, b4) = prepared
    B, _, N = x_ncl.shape
    cin_pad = w1.shape[0]
    h = jnp.transpose(x_ncl, (0, 2, 1)).reshape(B * N, C_in).astype(jnp.bfloat16)
    h = jnp.pad(h, ((0, 0), (0, cin_pad - C_in)))
    a = jnp.dot(h, w1, preferred_element_type=jnp.float32)
    a = jnp.maximum(a + t1, 0.0)
    a = jnp.dot(a.astype(jnp.bfloat16), w2, preferred_element_type=jnp.float32)
    a = jnp.maximum(a + t2, 0.0)
    a = jnp.dot(a.astype(jnp.bfloat16), w3, preferred_element_type=jnp.float32)
    a = jnp.maximum(a + t3, 0.0)
    a = jnp.dot(a.astype(jnp.bfloat16), w4, preferred_element_type=jnp.float32) + b4
    out = a[:, :3]
    return jnp.transpose(out.reshape(B, N, 3), (0, 2, 1))


if __name__ == "__main__":
    dim = 3                      # point-cloud xyz features
    B, N = 2, 256                # small batch / number of points
    C_in = dim + 1024 + 64       # 1091 input channels

    key = jax.random.PRNGKey(0)
    kx, kp = jax.random.split(key)
    x = jax.random.normal(kx, (B, C_in, N), jnp.float32)
    params = make_params(dim, kp)
    prepared = prepare_params(params)       # fold + pad + bf16 cast, once

    fwd = jax.jit(generator_displacement_pallas)
    out = jax.block_until_ready(fwd(x, prepared))
    assert out.shape == (B, 3, N), out.shape

    # tight check vs. a pure-JAX mirror of the kernel's mixed-precision math
    ref_mix = jax.block_until_ready(reference_forward_mixed(x, prepared, C_in))
    assert jnp.allclose(out, ref_mix, atol=2e-3, rtol=2e-3), "mismatch vs mixed ref"

    # loose check vs. the exact f32 module math (bf16 MXU introduces ~1e-4 error)
    ref_f32 = jax.block_until_ready(reference_forward_f32(x, params))
    assert jnp.allclose(out, ref_f32, atol=2e-2, rtol=2e-2), "mismatch vs f32 ref"

    print("KERNEL_OK")
</pallas_src>

<mosaic_0001>
module attributes {stable_mosaic.version = 11 : i64} {
  func.func @_gen_disp_kernel(%arg0: i32, %arg1: memref<256x1152xbf16, #tpu.memory_space<vmem>>, %arg2: memref<1152x1024xbf16, #tpu.memory_space<vmem>>, %arg3: memref<1x1024xf32, #tpu.memory_space<vmem>>, %arg4: memref<1024x512xbf16, #tpu.memory_space<vmem>>, %arg5: memref<1x512xf32, #tpu.memory_space<vmem>>, %arg6: memref<512x128xbf16, #tpu.memory_space<vmem>>, %arg7: memref<1x128xf32, #tpu.memory_space<vmem>>, %arg8: memref<128x128xbf16, #tpu.memory_space<vmem>>, %arg9: memref<1x128xf32, #tpu.memory_space<vmem>>, %arg10: memref<256x128xf32, #tpu.memory_space<vmem>>) attributes {dimension_semantics = [#tpu.dimension_semantics<parallel>], iteration_bounds = array<i64: 2>, scalar_prefetch = 0 : i64, scratch_operands = 0 : i64, tpu.core_type = #tpu.core_type<tc>, window_params = [{transform_indices = @transform_0, window_bounds = array<i64: 256, 1152>}, {pipeline_mode = #tpu.pipeline_mode<synchronous>, transform_indices = @transform_1, window_bounds = array<i64: 1152, 1024>}, {pipeline_mode = #tpu.pipeline_mode<synchronous>, transform_indices = @transform_2, window_bounds = array<i64: 1, 1024>}, {pipeline_mode = #tpu.pipeline_mode<synchronous>, transform_indices = @transform_3, window_bounds = array<i64: 1024, 512>}, {pipeline_mode = #tpu.pipeline_mode<synchronous>, transform_indices = @transform_4, window_bounds = array<i64: 1, 512>}, {pipeline_mode = #tpu.pipeline_mode<synchronous>, transform_indices = @transform_5, window_bounds = array<i64: 512, 128>}, {pipeline_mode = #tpu.pipeline_mode<synchronous>, transform_indices = @transform_6, window_bounds = array<i64: 1, 128>}, {pipeline_mode = #tpu.pipeline_mode<synchronous>, transform_indices = @transform_7, window_bounds = array<i64: 128, 128>}, {pipeline_mode = #tpu.pipeline_mode<synchronous>, transform_indices = @transform_8, window_bounds = array<i64: 1, 128>}, {transform_indices = @transform_9, window_bounds = array<i64: 256, 128>}]} {
    %c0 = arith.constant 0 : index
    %c0_0 = arith.constant 0 : index
    %0 = vector.load %arg1[%c0, %c0_0] : memref<256x1152xbf16, #tpu.memory_space<vmem>>, vector<256x1152xbf16>
    %c0_1 = arith.constant 0 : index
    %c0_2 = arith.constant 0 : index
    %1 = vector.load %arg2[%c0_1, %c0_2] : memref<1152x1024xbf16, #tpu.memory_space<vmem>>, vector<1152x1024xbf16>
    %cst = arith.constant dense<0.000000e+00> : vector<256x1024xf32>
    %2 = tpu.matmul %0, %1, %cst {dimension_numbers = #tpu.dot_dimension_numbers<[1], [0], [0], [1], [0, 0, 1, 1], [], []>} : vector<256x1152xbf16>, vector<1152x1024xbf16>, vector<256x1024xf32> -> vector<256x1024xf32>
    %c0_3 = arith.constant 0 : index
    %c0_4 = arith.constant 0 : index
    %3 = vector.load %arg3[%c0_3, %c0_4] : memref<1x1024xf32, #tpu.memory_space<vmem>>, vector<1x1024xf32>
    %4 = vector.broadcast %3 : vector<1x1024xf32> to vector<256x1024xf32>
    %5 = arith.addf %2, %4 : vector<256x1024xf32>
    %cst_5 = arith.constant 0.000000e+00 : f32
    %6 = vector.broadcast %cst_5 : f32 to vector<256x1024xf32>
    %7 = arith.maximumf %5, %6 : vector<256x1024xf32>
    %8 = arith.truncf %7 : vector<256x1024xf32> to vector<256x1024xbf16>
    %c0_6 = arith.constant 0 : index
    %c0_7 = arith.constant 0 : index
    %9 = vector.load %arg4[%c0_6, %c0_7] : memref<1024x512xbf16, #tpu.memory_space<vmem>>, vector<1024x512xbf16>
    %cst_8 = arith.constant dense<0.000000e+00> : vector<256x512xf32>
    %10 = tpu.matmul %8, %9, %cst_8 {dimension_numbers = #tpu.dot_dimension_numbers<[1], [0], [0], [1], [0, 0, 1, 1], [], []>} : vector<256x1024xbf16>, vector<1024x512xbf16>, vector<256x512xf32> -> vector<256x512xf32>
    %c0_9 = arith.constant 0 : index
    %c0_10 = arith.constant 0 : index
    %11 = vector.load %arg5[%c0_9, %c0_10] : memref<1x512xf32, #tpu.memory_space<vmem>>, vector<1x512xf32>
    %12 = vector.broadcast %11 : vector<1x512xf32> to vector<256x512xf32>
    %13 = arith.addf %10, %12 : vector<256x512xf32>
    %cst_11 = arith.constant 0.000000e+00 : f32
    %14 = vector.broadcast %cst_11 : f32 to vector<256x512xf32>
    %15 = arith.maximumf %13, %14 : vector<256x512xf32>
    %16 = arith.truncf %15 : vector<256x512xf32> to vector<256x512xbf16>
    %c0_12 = arith.constant 0 : index
    %c0_13 = arith.constant 0 : index
    %17 = vector.load %arg6[%c0_12, %c0_13] : memref<512x128xbf16, #tpu.memory_space<vmem>>, vector<512x128xbf16>
    %cst_14 = arith.constant dense<0.000000e+00> : vector<256x128xf32>
    %18 = tpu.matmul %16, %17, %cst_14 {dimension_numbers = #tpu.dot_dimension_numbers<[1], [0], [0], [1], [0, 0, 1, 1], [], []>} : vector<256x512xbf16>, vector<512x128xbf16>, vector<256x128xf32> -> vector<256x128xf32>
    %c0_15 = arith.constant 0 : index
    %c0_16 = arith.constant 0 : index
    %19 = vector.load %arg7[%c0_15, %c0_16] : memref<1x128xf32, #tpu.memory_space<vmem>>, vector<1x128xf32>
    %20 = vector.broadcast %19 : vector<1x128xf32> to vector<256x128xf32>
    %21 = arith.addf %18, %20 : vector<256x128xf32>
    %cst_17 = arith.constant 0.000000e+00 : f32
    %22 = vector.broadcast %cst_17 : f32 to vector<256x128xf32>
    %23 = arith.maximumf %21, %22 : vector<256x128xf32>
    %24 = arith.truncf %23 : vector<256x128xf32> to vector<256x128xbf16>
    %c0_18 = arith.constant 0 : index
    %c0_19 = arith.constant 0 : index
    %25 = vector.load %arg8[%c0_18, %c0_19] : memref<128x128xbf16, #tpu.memory_space<vmem>>, vector<128x128xbf16>
    %cst_20 = arith.constant dense<0.000000e+00> : vector<256x128xf32>
    %26 = tpu.matmul %24, %25, %cst_20 {dimension_numbers = #tpu.dot_dimension_numbers<[1], [0], [0], [1], [0, 0, 1, 1], [], []>} : vector<256x128xbf16>, vector<128x128xbf16>, vector<256x128xf32> -> vector<256x128xf32>
    %c0_21 = arith.constant 0 : index
    %c0_22 = arith.constant 0 : index
    %27 = vector.load %arg9[%c0_21, %c0_22] : memref<1x128xf32, #tpu.memory_space<vmem>>, vector<1x128xf32>
    %28 = vector.broadcast %27 : vector<1x128xf32> to vector<256x128xf32>
    %29 = arith.addf %26, %28 : vector<256x128xf32>
    %c0_23 = arith.constant 0 : index
    %c0_24 = arith.constant 0 : index
    %30 = vector.load %arg10[%c0_23, %c0_24] : memref<256x128xf32, #tpu.memory_space<vmem>>, vector<256x128xf32>
    tpu.vector_store %arg10[%c0_23, %c0_24], %29 {strides = array<i32>} : memref<256x128xf32, #tpu.memory_space<vmem>>, vector<256x128xf32>,
    return
  }
  func.func @transform_0(%arg0: i32) -> (i32, i32) {
    %c0_i32 = arith.constant 0 : i32
    %c0_i32_0 = arith.constant 0 : i32
    return %arg0, %c0_i32 : i32, i32
  }
  func.func @transform_1(%arg0: i32) -> (i32, i32) {
    %c0_i32 = arith.constant 0 : i32
    %c0_i32_0 = arith.constant 0 : i32
    %c0_i32_1 = arith.constant 0 : i32
    return %c0_i32, %c0_i32_0 : i32, i32
  }
  func.func @transform_2(%arg0: i32) -> (i32, i32) {
    %c0_i32 = arith.constant 0 : i32
    %c0_i32_0 = arith.constant 0 : i32
    %c0_i32_1 = arith.constant 0 : i32
    return %c0_i32, %c0_i32_0 : i32, i32
  }
  func.func @transform_3(%arg0: i32) -> (i32, i32) {
    %c0_i32 = arith.constant 0 : i32
    %c0_i32_0 = arith.constant 0 : i32
    %c0_i32_1 = arith.constant 0 : i32
    return %c0_i32, %c0_i32_0 : i32, i32
  }
  func.func @transform_4(%arg0: i32) -> (i32, i32) {
    %c0_i32 = arith.constant 0 : i32
    %c0_i32_0 = arith.constant 0 : i32
    %c0_i32_1 = arith.constant 0 : i32
    return %c0_i32, %c0_i32_0 : i32, i32
  }
  func.func @transform_5(%arg0: i32) -> (i32, i32) {
    %c0_i32 = arith.constant 0 : i32
    %c0_i32_0 = arith.constant 0 : i32
    %c0_i32_1 = arith.constant 0 : i32
    return %c0_i32, %c0_i32_0 : i32, i32
  }
  func.func @transform_6(%arg0: i32) -> (i32, i32) {
    %c0_i32 = arith.constant 0 : i32
    %c0_i32_0 = arith.constant 0 : i32
    %c0_i32_1 = arith.constant 0 : i32
    return %c0_i32, %c0_i32_0 : i32, i32
  }
  func.func @transform_7(%arg0: i32) -> (i32, i32) {
    %c0_i32 = arith.constant 0 : i32
    %c0_i32_0 = arith.constant 0 : i32
    %c0_i32_1 = arith.constant 0 : i32
    return %c0_i32, %c0_i32_0 : i32, i32
  }
  func.func @transform_8(%arg0: i32) -> (i32, i32) {
    %c0_i32 = arith.constant 0 : i32
    %c0_i32_0 = arith.constant 0 : i32
    %c0_i32_1 = arith.constant 0 : i32
    return %c0_i32, %c0_i32_0 : i32, i32
  }
  func.func @transform_9(%arg0: i32) -> (i32, i32) {
    %c0_i32 = arith.constant 0 : i32
    %c0_i32_0 = arith.constant 0 : i32
    return %arg0, %c0_i32 : i32, i32
  }
}

</mosaic_0001>

<bundles_post_ra>
// kernel: generator_displacement_pallas.1
= control target key start
LH: loop header
LB: loop body
LE: loop exit
PB: predicated region body
PF: predicated region fallthrough
CT: control target
= control target key end

     0   :  { %s17212_s30 = smov 0   ;;  %s22601_s0 = inlined_call_operand.vmem [shape: bf16[512,1152], index: 0, kind: input, shape index: {}]   ;;  %s22602_s1 = inlined_call_operand.vmem [shape: bf16[1152,1024], index: 1, kind: input, shape index: {}]   ;;  %s22603_s2 = inlined_call_operand.vmem [shape: f32[1,1024], index: 2, kind: input, shape index: {}]   ;;  %s22604_s3 = inlined_call_operand.vmem [shape: bf16[1024,512], index: 3, kind: input, shape index: {}]   ;;  %s22605_s4 = inlined_call_operand.vmem [shape: f32[1,512], index: 4, kind: input, shape index: {}]   ;;  %s22606_s5 = inlined_call_operand.vmem [shape: bf16[512,128], index: 5, kind: input, shape index: {}]   ;;  %s22607_s6 = inlined_call_operand.vmem [shape: f32[1,128], index: 6, kind: input, shape index: {}]   ;;  %s22608_s7 = inlined_call_operand.vmem [shape: bf16[128,128], index: 7, kind: input, shape index: {}]   ;;  %s22609_s8 = inlined_call_operand.vmem [shape: f32[1,128], index: 8, kind: input, shape index: {}]   ;;  %s22610_s9 = inlined_call_operand.vmem [shape: f32[512,128], index: 9, kind: output, shape index: {}]  }
   0x1 LB: > { %s13225_s10 = sadd.s32 4294967295, %s17159_s30   ;;  %p13229_p0 = scmp.ge.s32.totalorder %s17159_s30, 1  ;;  %s17159_s30 = sphi %s17212_s30, %s19_s30  }
   0x2   : > { %p289_p1 = scmp.lt.s32.totalorder %s17159_s30, 3 }
   0x4   : > { %p290_p2 = pnand %p13229_p0, %p289_p1 }
   0x6   : > { %293 = sbr.rel (%p290_p2) target bundleno = 2562 (0xa02), region = 56 }
   0xd   : > { %v500_v0 = vld [vmem:[%s22602_s1] sm:$0xff]  ;;  %s13230_s17 = sshll.u32 %s13225_s10, 5  ;;  %v22611_v8 = vmov 0  }
   0xe   : > { %v504_v1 = vld [vmem:[%s22602_s1 + $0x20] sm:$0xff]  ;;  %5618 = vmatprep.mubr.bf16.mxu1 %v22611_v8  ;;  %p327_p3 = scmp.lt.s32.totalorder %s13230_s17, 63 }
   0xf   : > { %v1012_v2 = vld [vmem:[%s22602_s1 + $0x1000] sm:$0xff]  ;;  %v13379_v3 = vcombine.high %v500_v0, %v504_v1  ;;  %v13378_v5 = vcombine.low %v500_v0, %v504_v1 }
  0x10   : > { %v1016_v4 = vld [vmem:[%s22602_s1 + $0x1020] sm:$0xff]  ;;  %s22905_s17 = smov (!%p327_p3, %s13230_s17), 63 }
  0x11   : > { %v508_v6 = vld [vmem:[%s22602_s1 + $0x40] sm:$0xff]  ;;  %v17239_v9 = vcombine.high %v1012_v2, %v1016_v4  ;;  %v17241_v10 = vcombine.low %v1012_v2, %v1016_v4  ;;  %4734 = vmatprep.subr.bf16.mxu0 %v13379_v3  ;;  %s16358_s21 = smul.u32 36, %s22905_s17  ;;  %v501_v2 = vld [vmem:[%s22602_s1 + $0x8] sm:$0xff]  ;;  %s13233_s29 = sshll.u32 %s22905_s17, 3 }
  0x12   : > { %v512_v7 = vld [vmem:[%s22602_s1 + $0x60] sm:$0xff]  ;;  %4735 = vmatpush1.bf16.msra.mxu0 %v13378_v5  ;;  %v505_v3 = vld [vmem:[%s22602_s1 + $0x28] sm:$0xff]  ;;  %s22532_s15 = scalar_lea.vmem %s22610_s9, %s13233_s29 }
  0x13   : > { %v13387_v11 = vcombine.high %v508_v6, %v512_v7  ;;  %v1020_v12 = vld [vmem:[%s22602_s1 + $0x1040] sm:$0xff]  ;;  %14550 = vmatprep.subr.bf16.mxu1 %v17239_v9  ;;  %v13386_v19 = vcombine.low %v508_v6, %v512_v7  ;;  %s17303_s14 = scalar_lea.vmem %s22601_s0, %s16358_s21 }
  0x14   : > { %v1024_v13 = vld [vmem:[%s22602_s1 + $0x1060] sm:$0xff]  ;;  %14558 = vmatpush1.bf16.msra.mxu1 %v17241_v10 }
  0x15   : > { %v516_v14 = vld [vmem:[%s22602_s1 + $0x80] sm:$0xff]  ;;  %v17252_v15 = vcombine.high %v1020_v12, %v1024_v13  ;;  %4736 = vmatprep.subr.bf16.mxu0 %v13387_v11  ;;  %v17267_v20 = vcombine.low %v1020_v12, %v1024_v13  ;;  %v13381_v11 = vcombine.high %v501_v2, %v505_v3  ;;  %v509_v13 = vld [vmem:[%s22602_s1 + $0x48] sm:$0xff] }
  0x16   : > { %v520_v16 = vld [vmem:[%s22602_s1 + $0xa0] sm:$0xff]  ;;  %4737 = vmatpush1.bf16.msra.mxu0 %v13386_v19 }
  0x17   : > { %v1028_v17 = vld [vmem:[%s22602_s1 + $0x1080] sm:$0xff]  ;;  %v13395_v21 = vcombine.high %v516_v14, %v520_v16  ;;  %14551 = vmatprep.subr.bf16.mxu1 %v17252_v15  ;;  %v13394_v27 = vcombine.low %v516_v14, %v520_v16  ;;  %v513_v14 = vld [vmem:[%s22602_s1 + $0x68] sm:$0xff] }
  0x18   : > { %v1032_v18 = vld [vmem:[%s22602_s1 + $0x10a0] sm:$0xff]  ;;  %14559 = vmatpush1.bf16.msra.mxu1 %v17267_v20 }
  0x19   : > { %v17270_v22 = vcombine.high %v1028_v17, %v1032_v18  ;;  %v524_v23 = vld [vmem:[%s22602_s1 + $0xc0] sm:$0xff]  ;;  %4738 = vmatprep.subr.bf16.mxu0 %v13395_v21  ;;  %v17286_v28 = vcombine.low %v1028_v17, %v1032_v18  ;;  %v13380_v18 = vcombine.low %v501_v2, %v505_v3 }
  0x1a   : > { %v528_v24 = vld [vmem:[%s22602_s1 + $0xe0] sm:$0xff]  ;;  %4739 = vmatpush1.bf16.msra.mxu0 %v13394_v27 }
  0x1b   : > { %v1036_v25 = vld [vmem:[%s22602_s1 + $0x10c0] sm:$0xff]  ;;  %v13403_v29 = vcombine.high %v524_v23, %v528_v24  ;;  %14552 = vmatprep.subr.bf16.mxu1 %v17270_v22  ;;  %v13402_v35 = vcombine.low %v524_v23, %v528_v24  ;;  %v13389_v23 = vcombine.high %v509_v13, %v513_v14 }
  0x1c   : > { %v1040_v26 = vld [vmem:[%s22602_s1 + $0x10e0] sm:$0xff]  ;;  %14560 = vmatpush1.bf16.msra.mxu1 %v17286_v28 }
  0x1d   : > { %v17289_v30 = vcombine.high %v1036_v25, %v1040_v26  ;;  %v532_v31 = vld [vmem:[%s22602_s1 + $0x100] sm:$0xff]  ;;  %4740 = vmatprep.subr.bf16.mxu0 %v13403_v29  ;;  %v17309_v36 = vcombine.low %v1036_v25, %v1040_v26  ;;  %v517_v25 = vld [vmem:[%s22602_s1 + $0x88] sm:$0xff]  ;;  %v13388_v29 = vcombine.low %v509_v13, %v513_v14 }
  0x1e   : > { %v536_v32 = vld [vmem:[%s22602_s1 + $0x120] sm:$0xff]  ;;  %4741 = vmatpush1.bf16.msra.mxu0 %v13402_v35  ;;  %v521_v26 = vld [vmem:[%s22602_s1 + $0xa8] sm:$0xff] }
  0x1f   : > { %v1044_v33 = vld [vmem:[%s22602_s1 + $0x1100] sm:$0xff]  ;;  %v13411_v37 = vcombine.high %v532_v31, %v536_v32  ;;  %14553 = vmatprep.subr.bf16.mxu1 %v17289_v30  ;;  %v13410_v43 = vcombine.low %v532_v31, %v536_v32  ;;  %v13397_v32 = vcombine.high %v517_v25, %v521_v26  ;;  %v525_v35 = vld [vmem:[%s22602_s1 + $0xc8] sm:$0xff] }
  0x20   : > { %v1048_v34 = vld [vmem:[%s22602_s1 + $0x1120] sm:$0xff]  ;;  %14561 = vmatpush1.bf16.msra.mxu1 %v17309_v36 }
  0x21   : > { %v17312_v38 = vcombine.high %v1044_v33, %v1048_v34  ;;  %v540_v39 = vld [vmem:[%s22602_s1 + $0x140] sm:$0xff]  ;;  %4742 = vmatprep.subr.bf16.mxu0 %v13411_v37  ;;  %v17327_v44 = vcombine.low %v1044_v33, %v1048_v34  ;;  %v529_v37 = vld [vmem:[%s22602_s1 + $0xe8] sm:$0xff] }
  0x22   : > { %v544_v40 = vld [vmem:[%s22602_s1 + $0x160] sm:$0xff]  ;;  %4743 = vmatpush1.bf16.msra.mxu0 %v13410_v43 }
  0x23   : > { %v1052_v41 = vld [vmem:[%s22602_s1 + $0x1140] sm:$0xff]  ;;  %v13419_v45 = vcombine.high %v540_v39, %v544_v40  ;;  %14554 = vmatprep.subr.bf16.mxu1 %v17312_v38  ;;  %v13418_v51 = vcombine.low %v540_v39, %v544_v40  ;;  %v16369_v39 = vld [vmem:[%s17303_s14 + $0x2a8] ss:$36 sps:$4 sm:$0xff]  }
  0x24   : > { %v1056_v42 = vld [vmem:[%s22602_s1 + $0x1160] sm:$0xff]  ;;  %14562 = vmatpush1.bf16.msra.mxu1 %v17327_v44 }
  0x25   : > { %v17330_v46 = vcombine.high %v1052_v41, %v1056_v42  ;;  %v548_v47 = vld [vmem:[%s22602_s1 + $0x180] sm:$0xff]  ;;  %4744 = vmatprep.subr.bf16.mxu0 %v13419_v45  ;;  %v17345_v52 = vcombine.low %v1052_v41, %v1056_v42  ;;  %v13396_v41 = vcombine.low %v517_v25, %v521_v26  ;;  %v13405_v45 = vcombine.high %v525_v35, %v529_v37 }
  0x26   : > { %v552_v48 = vld [vmem:[%s22602_s1 + $0x1a0] sm:$0xff]  ;;  %4745 = vmatpush1.bf16.msra.mxu0 %v13418_v51  ;;  %v13404_v51 = vcombine.low %v525_v35, %v529_v37 }
  0x27   : > { %v1060_v49 = vld [vmem:[%s22602_s1 + $0x1180] sm:$0xff]  ;;  %v13427_v53 = vcombine.high %v548_v47, %v552_v48  ;;  %14555 = vmatprep.subr.bf16.mxu1 %v17330_v46  ;;  %v13426_v59 = vcombine.low %v548_v47, %v552_v48  ;;  %v533_v48 = vld [vmem:[%s22602_s1 + $0x108] sm:$0xff] }
  0x28   : > { %v1064_v50 = vld [vmem:[%s22602_s1 + $0x11a0] sm:$0xff]  ;;  %14563 = vmatpush1.bf16.msra.mxu1 %v17345_v52 }
  0x29   : > { %v556_v54 = vld [vmem:[%s22602_s1 + $0x1c0] sm:$0xff]  ;;  %v17351_v55 = vcombine.high %v1060_v49, %v1064_v50  ;;  %4746 = vmatprep.subr.bf16.mxu0 %v13427_v53  ;;  %v17363_v60 = vcombine.low %v1060_v49, %v1064_v50  ;;  %v537_v49 = vld [vmem:[%s22602_s1 + $0x128] sm:$0xff] }
  0x2a   : > { %v560_v56 = vld [vmem:[%s22602_s1 + $0x1e0] sm:$0xff]  ;;  %4747 = vmatpush1.bf16.msra.mxu0 %v13426_v59  ;;  %v545_v59 = vld [vmem:[%s22602_s1 + $0x168] sm:$0xff] }
  0x2b   : > { %v1068_v57 = vld [vmem:[%s22602_s1 + $0x11c0] sm:$0xff]  ;;  %v13435_v61 = vcombine.high %v556_v54, %v560_v56  ;;  %14556 = vmatprep.subr.bf16.mxu1 %v17351_v55  ;;  %v13434_v4 = vcombine.low %v556_v54, %v560_v56  ;;  %v13413_v56 = vcombine.high %v533_v48, %v537_v49 }
  0x2c   : > { %v1072_v58 = vld [vmem:[%s22602_s1 + $0x11e0] sm:$0xff]  ;;  %14564 = vmatpush1.bf16.msra.mxu1 %v17363_v60 }
  0x2d   : > { %v564_v62 = vld [vmem:[%s22602_s1 + $0x200] sm:$0xff]  ;;  %v17369_v63 = vcombine.high %v1068_v57, %v1072_v58  ;;  %4748 = vmatprep.subr.bf16.mxu0 %v13435_v61  ;;  %v17385_v5 = vcombine.low %v1068_v57, %v1072_v58  ;;  %v541_v58 = vld [vmem:[%s22602_s1 + $0x148] sm:$0xff]  ;;  %v16370_v61 = vld [vmem:[%s17303_s14 + $0x2f0] ss:$36 sps:$4 sm:$0xff]  }
  0x2e   : > { %v568_v0 = vld [vmem:[%s22602_s1 + $0x220] sm:$0xff]  ;;  %4749 = vmatpush1.bf16.msra.mxu0 %v13434_v4  ;;  %v13421_v3 = vcombine.high %v541_v58, %v545_v59  ;;  %v13420_v13 = vcombine.low %v541_v58, %v545_v59 }
  0x2f   : > { %v17375_v1 = vld [vmem:[%s17303_s14 + $0x4] ss:$36 sps:$4 sm:$0xff]   ;;  %v13443_v6 = vcombine.high %v564_v62, %v568_v0  ;;  %14557 = vmatprep.subr.bf16.mxu1 %v17369_v63  ;;  %v13442_v17 = vcombine.low %v564_v62, %v568_v0  ;;  %v13412_v0 = vcombine.low %v533_v48, %v537_v49 }
  0x30   : > { %4766 = vmatprep.mubr.bf16.mxu0 %v17375_v1  ;;  %v572_v7 = vld [vmem:[%s22602_s1 + $0x240] sm:$0xff]  ;;  %14565 = vmatpush1.bf16.msra.mxu1 %v17385_v5 }
  0x31   : > { %v576_v12 = vld [vmem:[%s22602_s1 + $0x260] sm:$0xff]  ;;  %4750 = vmatprep.subr.bf16.mxu0 %v13443_v6  ;;  %5699 = vmatprep.subr.bf16.mxu1 %v13381_v11  ;;  %v553_v11 = vld [vmem:[%s22602_s1 + $0x1a8] sm:$0xff] }
  0x32   : > { %v16368_v16 = vld [vmem:[%s17303_s14 + $0x260] ss:$36 sps:$4 sm:$0xff]   ;;  %v13451_v19 = vcombine.high %v572_v7, %v576_v12  ;;  %4751 = vmatpush1.bf16.msra.mxu0 %v13442_v17  ;;  %v13450_v27 = vcombine.low %v572_v7, %v576_v12  ;;  %v549_v7 = vld [vmem:[%s22602_s1 + $0x188] sm:$0xff] }
  0x33   : > { %v580_v21 = vld [vmem:[%s22602_s1 + $0x280] sm:$0xff]  ;;  %5619 = vmatmul.mubr.bf16.vlgmr.msra.gmra.mrb[0].mxu1 %v16368_v16  ;;  %v13429_v16 = vcombine.high %v549_v7, %v553_v11  ;;  %v13428_v25 = vcombine.low %v549_v7, %v553_v11  ;;  %v17538_v7 = vld [vmem:[%s17303_s14 + $0x94] ss:$36 sps:$4 sm:$0xff]  }
  0x34   : > { %v584_v24 = vld [vmem:[%s22602_s1 + $0x2a0] sm:$0xff]  ;;  %5700 = vmatpush1.bf16.msra.mxu1 %v13380_v18  ;;  %4752 = vmatprep.subr.bf16.mxu0 %v13451_v19  ;;  %v557_v19 = vld [vmem:[%s22602_s1 + $0x1c8] sm:$0xff] }
  0x35   : > { %v13459_v31 = vcombine.high %v580_v21, %v584_v24  ;;  %5701 = vmatprep.subr.bf16.mxu1 %v13389_v23  ;;  %5628 = vmatprep.mubr.bf16.mxu1 %v22611_v8  ;;  %v588_v33 = vld [vmem:[%s22602_s1 + $0x2c0] sm:$0xff]  ;;  %v13458_v40 = vcombine.low %v580_v21, %v584_v24  ;;  %v561_v21 = vld [vmem:[%s22602_s1 + $0x1e8] sm:$0xff]  ;;  %v16371_v23 = vld [vmem:[%s17303_s14 + $0x338] ss:$36 sps:$4 sm:$0xff]  }
  0x36   : > { %v592_v34 = vld [vmem:[%s22602_s1 + $0x2e0] sm:$0xff]  ;;  %4753 = vmatpush1.bf16.msra.mxu0 %v13450_v27  ;;  %v13436_v35 = vcombine.low %v557_v19, %v561_v21 }
  0x37   : > { %4754 = vmatprep.subr.bf16.mxu0 %v13459_v31  ;;  %v13467_v42 = vcombine.high %v588_v33, %v592_v34  ;;  %v596_v43 = vld [vmem:[%s22602_s1 + $0x300] sm:$0xff]  ;;  %v13466_v50 = vcombine.low %v588_v33, %v592_v34  ;;  %v569_v33 = vld [vmem:[%s22602_s1 + $0x228] sm:$0xff] }
  0x38   : > { %5702 = vmatpush1.bf16.msra.mxu1 %v13388_v29  ;;  %v600_v47 = vld [vmem:[%s22602_s1 + $0x320] sm:$0xff]  ;;  %v13437_v29 = vcombine.high %v557_v19, %v561_v21 }
  0x39   : > { %5703 = vmatprep.subr.bf16.mxu1 %v13397_v32  ;;  %v13475_v53 = vcombine.high %v596_v43, %v600_v47  ;;  %v604_v54 = vld [vmem:[%s22602_s1 + $0x340] sm:$0xff]  ;;  %v13474_v62 = vcombine.low %v596_v43, %v600_v47  ;;  %v565_v32 = vld [vmem:[%s22602_s1 + $0x208] sm:$0xff] }
  0x3a   : > { %4755 = vmatpush1.bf16.msra.mxu0 %v13458_v40  ;;  %v608_v57 = vld [vmem:[%s22602_s1 + $0x360] sm:$0xff]  ;;  %v577_v43 = vld [vmem:[%s22602_s1 + $0x268] sm:$0xff]  ;;  %v13444_v49 = vcombine.low %v565_v32, %v569_v33 }
  0x3b   : > { %5629 = vmatmul.mubr.bf16.gmra.mrb[4].mxu1 %v16369_v39  ;;  %4756 = vmatprep.subr.bf16.mxu0 %v13467_v42  ;;  %v13483_v2 = vcombine.high %v604_v54, %v608_v57  ;;  %v612_v4 = vld [vmem:[%s22602_s1 + $0x380] sm:$0xff]  ;;  %v13482_v12 = vcombine.low %v604_v54, %v608_v57  ;;  %v573_v42 = vld [vmem:[%s22602_s1 + $0x248] sm:$0xff] }
  0x3c   : > { %5704 = vmatpush1.bf16.msra.mxu1 %v13396_v41  ;;  %5638 = vmatprep.mubr.bf16.mxu1 %v22611_v8  ;;  %v616_v6 = vld [vmem:[%s22602_s1 + $0x3a0] sm:$0xff]  ;;  %v13445_v41 = vcombine.high %v565_v32, %v569_v33  ;;  %v585_v54 = vld [vmem:[%s22602_s1 + $0x2a8] sm:$0xff]  ;;  %v13452_v59 = vcombine.low %v573_v42, %v577_v43 }
  0x3d   : > { %5705 = vmatprep.subr.bf16.mxu1 %v13405_v45  ;;  %v13491_v14 = vcombine.high %v612_v4, %v616_v6  ;;  %v620_v17 = vld [vmem:[%s22602_s1 + $0x3c0] sm:$0xff]  ;;  %v13490_v24 = vcombine.low %v612_v4, %v616_v6  ;;  %v17504_v45 = vld [vmem:[%s17303_s14 + $0x4c] ss:$36 sps:$4 sm:$0xff]  }
  0x3e   : > { %4757 = vmatpush1.bf16.msra.mxu0 %v13466_v50  ;;  %v624_v18 = vld [vmem:[%s22602_s1 + $0x3e0] sm:$0xff]  ;;  %v13453_v50 = vcombine.high %v573_v42, %v577_v43  ;;  %v593_v4 = vld [vmem:[%s22602_s1 + $0x2e8] sm:$0xff] }
  0x3f   : > { %4758 = vmatprep.subr.bf16.mxu0 %v13475_v53  ;;  %v13499_v26 = vcombine.high %v620_v17, %v624_v18  ;;  %v628_v27 = vld [vmem:[%s22602_s1 + $0x400] sm:$0xff]  ;;  %v13498_v34 = vcombine.low %v620_v17, %v624_v18  ;;  %v581_v53 = vld [vmem:[%s22602_s1 + $0x288] sm:$0xff] }
  0x40   : > { %5706 = vmatpush1.bf16.msra.mxu1 %v13404_v51  ;;  %v632_v31 = vld [vmem:[%s22602_s1 + $0x420] sm:$0xff]  ;;  %v597_v17 = vld [vmem:[%s22602_s1 + $0x308] sm:$0xff] }
  0x41   : > { %5707 = vmatprep.subr.bf16.mxu1 %v13413_v56  ;;  %v13507_v37 = vcombine.high %v628_v27, %v632_v31  ;;  %v17494_v39 = vld [vmem:[%s17303_s14] ss:$36 sps:$4 sm:$0xff]   ;;  %v13506_v51 = vcombine.low %v628_v27, %v632_v31  ;;  %v601_v18 = vld [vmem:[%s22602_s1 + $0x328] sm:$0xff]  ;;  %v16383_v27 = vld [vmem:[%s17303_s14 + $0x410] ss:$36 sps:$4 sm:$0xff]  }
  0x42   : > { %4759 = vmatpush1.bf16.msra.mxu0 %v13474_v62  ;;  %v16375_v40 = vld [vmem:[%s17303_s14 + $0x380] ss:$36 sps:$4 sm:$0xff]   ;;  %v16379_v62 = vld [vmem:[%s17303_s14 + $0x3c8] ss:$36 sps:$4 sm:$0xff]  }
  0x43   : > { %5639 = vmatmul.mubr.bf16.gmra.mrb[8].mxu1 %v16370_v61  ;;  %4760 = vmatprep.subr.bf16.mxu0 %v13483_v2  ;;  %v636_v47 = vld [vmem:[%s22602_s1 + $0x440] sm:$0xff]  ;;  %v17528_v61 = vld [vmem:[%s17303_s14 + $0x48] ss:$36 sps:$4 sm:$0xff]  }
  0x44   : > { %5708 = vmatpush1.bf16.msra.mxu1 %v13412_v0  ;;  %5648 = vmatprep.mubr.bf16.mxu1 %v22611_v8  ;;  %v640_v48 = vld [vmem:[%s22602_s1 + $0x460] sm:$0xff]  ;;  %v13461_v0 = vcombine.high %v581_v53, %v585_v54  ;;  %v589_v2 = vld [vmem:[%s22602_s1 + $0x2c8] sm:$0xff] }
  0x45   : > { %5709 = vmatprep.subr.bf16.mxu1 %v13421_v3  ;;  %v13515_v56 = vcombine.high %v636_v47, %v640_v48  ;;  %v644_v57 = vld [vmem:[%s22602_s1 + $0x480] sm:$0xff]  ;;  %v13514_v3 = vcombine.low %v636_v47, %v640_v48  ;;  %v609_v31 = vld [vmem:[%s22602_s1 + $0x368] sm:$0xff] }
  0x46   : > { %4761 = vmatpush1.bf16.msra.mxu0 %v13482_v12  ;;  %v648_v58 = vld [vmem:[%s22602_s1 + $0x4a0] sm:$0xff]  ;;  %v617_v42 = vld [vmem:[%s22602_s1 + $0x3a8] sm:$0xff] }
  0x47   : > { %4762 = vmatprep.subr.bf16.mxu0 %v13491_v14  ;;  %v13523_v6 = vcombine.high %v644_v57, %v648_v58  ;;  %v652_v11 = vld [vmem:[%s22602_s1 + $0x4c0] sm:$0xff]  ;;  %v13469_v14 = vcombine.high %v589_v2, %v593_v4 }
  0x48   : > { %5710 = vmatpush1.bf16.msra.mxu1 %v13420_v13  ;;  %v656_v12 = vld [vmem:[%s22602_s1 + $0x4e0] sm:$0xff]  ;;  %v13460_v13 = vcombine.low %v581_v53, %v585_v54  ;;  %v17596_v53 = vld [vmem:[%s17303_s14 + $0xd8] ss:$36 sps:$4 sm:$0xff]   ;;  %v621_v54 = vld [vmem:[%s22602_s1 + $0x3c8] sm:$0xff] }
  0x49   : > { %5711 = vmatprep.subr.bf16.mxu1 %v13429_v16  ;;  %v13522_v16 = vcombine.low %v644_v57, %v648_v58  ;;  %v13531_v19 = vcombine.high %v652_v11, %v656_v12  ;;  %v660_v21 = vld [vmem:[%s22602_s1 + $0x500] sm:$0xff]  ;;  %v13530_v33 = vcombine.low %v652_v11, %v656_v12  ;;  %v16387_v57 = vld [vmem:[%s17303_s14 + $0x458] ss:$36 sps:$4 sm:$0xff]   ;;  %v633_v11 = vld [vmem:[%s22602_s1 + $0x428] sm:$0xff] }
  0x4a   : > { %4763 = vmatpush1.bf16.msra.mxu0 %v13490_v24  ;;  %v13468_v24 = vcombine.low %v589_v2, %v593_v4  ;;  %v17572_v32 = vld [vmem:[%s17303_s14 + $0xdc] ss:$36 sps:$4 sm:$0xff]  }
  0x4b   : > { %5649 = vmatmul.mubr.bf16.gmra.mrb[12].mxu1 %v16371_v23  ;;  %4764 = vmatprep.subr.bf16.mxu0 %v13499_v26  ;;  %v664_v23 = vld [vmem:[%s22602_s1 + $0x520] sm:$0xff]  ;;  %v605_v26 = vld [vmem:[%s22602_s1 + $0x348] sm:$0xff] }
  0x4c   : > { %5712 = vmatpush1.bf16.msra.mxu1 %v13428_v25  ;;  %5658 = vmatprep.mubr.bf16.mxu1 %v22611_v8  ;;  %v17562_v25 = vld [vmem:[%s17303_s14 + $0x90] ss:$36 sps:$4 sm:$0xff]   ;;  %v13485_v43 = vcombine.high %v605_v26, %v609_v31  ;;  %v13538_v47 = vcombine.low %v660_v21, %v664_v23  ;;  %v688_v2 = vld [vmem:[%s22602_s1 + $0x5e0] sm:$0xff] }
  0x4d   : > { %5713 = vmatprep.subr.bf16.mxu1 %v13437_v29  ;;  %v13477_v29 = vcombine.high %v597_v17, %v601_v18 }
  0x4e   : > { %4765 = vmatpush1.bf16.msra.mxu0 %v13498_v34  ;;  %v13539_v34 = vcombine.high %v660_v21, %v664_v23  ;;  %v637_v21 = vld [vmem:[%s22602_s1 + $0x448] sm:$0xff] }
  0x4f   : > { %4927 = vmatprep.subr.bf16.mxu0 %v13507_v37  ;;  %v672_v37 = vld [vmem:[%s22602_s1 + $0x560] sm:$0xff]  ;;  %v641_v23 = vld [vmem:[%s22602_s1 + $0x468] sm:$0xff] }
  0x50   : > { %5714 = vmatpush1.bf16.msra.mxu1 %v13436_v35  ;;  %v668_v35 = vld [vmem:[%s22602_s1 + $0x540] sm:$0xff] }
  0x51   : > { %5715 = vmatprep.subr.bf16.mxu1 %v13445_v41  ;;  %4767 = vmatmul.mubr.bf16.vlgmr.msra.gmra.mrb[0].mxu0 %v17494_v39  ;;  %v613_v41 = vld [vmem:[%s22602_s1 + $0x388] sm:$0xff]  ;;  %v13547_v48 = vcombine.high %v668_v35, %v672_v37 }
  0x52   : > { %4776 = vmatprep.mubr.bf16.mxu0 %v17504_v45  ;;  %4928 = vmatpush1.bf16.msra.mxu0 %v13506_v51  ;;  %v13484_v51 = vcombine.low %v605_v26, %v609_v31  ;;  %v13493_v58 = vcombine.high %v613_v41, %v617_v42  ;;  %v13492_v4 = vcombine.low %v613_v41, %v617_v42  ;;  %v17639_v26 = vld [vmem:[%s17303_s14 + $0x16c] ss:$36 sps:$4 sm:$0xff]   ;;  %v708_v41 = vld [vmem:[%s22602_s1 + $0x680] sm:$0xff] }
  0x53   : > { %5659 = vmatmul.mubr.bf16.gmra.mrb[16].mxu1 %v16375_v40  ;;  %4929 = vmatprep.subr.bf16.mxu0 %v13515_v56  ;;  %v13476_v40 = vcombine.low %v597_v17, %v601_v18  ;;  %v625_v56 = vld [vmem:[%s22602_s1 + $0x3e8] sm:$0xff]  ;;  %v696_v17 = vld [vmem:[%s22602_s1 + $0x620] sm:$0xff] }
  0x54   : > { %5716 = vmatpush1.bf16.msra.mxu1 %v13444_v49  ;;  %5668 = vmatprep.mubr.bf16.mxu1 %v22611_v8  ;;  %v676_v49 = vld [vmem:[%s22602_s1 + $0x580] sm:$0xff]  ;;  %v13501_v12 = vcombine.high %v621_v54, %v625_v56  ;;  %v13500_v18 = vcombine.low %v621_v54, %v625_v56  ;;  %v17685_v56 = vld [vmem:[%s17303_s14 + $0x1b4] ss:$36 sps:$4 sm:$0xff]  }
  0x55   : > { %5717 = vmatprep.subr.bf16.mxu1 %v13453_v50  ;;  %v680_v50 = vld [vmem:[%s22602_s1 + $0x5a0] sm:$0xff] }
  0x56   : > { %4930 = vmatpush1.bf16.msra.mxu0 %v13514_v3  ;;  %v13555_v3 = vcombine.high %v676_v49, %v680_v50  ;;  %v712_v42 = vld [vmem:[%s22602_s1 + $0x6a0] sm:$0xff] }
  0x57   : > { %4931 = vmatprep.subr.bf16.mxu0 %v13523_v6  ;;  %v629_v6 = vld [vmem:[%s22602_s1 + $0x408] sm:$0xff] }
  0x58   : > { %5718 = vmatpush1.bf16.msra.mxu1 %v13452_v59  ;;  %v17606_v59 = vld [vmem:[%s17303_s14 + $0x124] ss:$36 sps:$4 sm:$0xff]  }
  0x59   : > { %5719 = vmatprep.subr.bf16.mxu1 %v13461_v0  ;;  %4777 = vmatmul.mubr.bf16.gmra.mrb[4].mxu0 %v17528_v61  ;;  %v684_v0 = vld [vmem:[%s22602_s1 + $0x5c0] sm:$0xff] }
  0x5a   : > { %4786 = vmatprep.mubr.bf16.mxu0 %v17538_v7  ;;  %4932 = vmatpush1.bf16.msra.mxu0 %v13522_v16  ;;  %v692_v16 = vld [vmem:[%s22602_s1 + $0x600] sm:$0xff] }
  0x5b   : > { %5669 = vmatmul.mubr.bf16.gmra.mrb[20].mxu1 %v16379_v62  ;;  %4933 = vmatprep.subr.bf16.mxu0 %v13531_v19  ;;  %v13546_v62 = vcombine.low %v668_v35, %v672_v37  ;;  %v17630_v19 = vld [vmem:[%s17303_s14 + $0x120] ss:$36 sps:$4 sm:$0xff]   ;;  %v13571_v31 = vcombine.high %v692_v16, %v696_v17  ;;  %v649_v35 = vld [vmem:[%s22602_s1 + $0x4a8] sm:$0xff]  ;;  %v13517_v37 = vcombine.high %v637_v21, %v641_v23 }
  0x5c   : > { %5720 = vmatpush1.bf16.msra.mxu1 %v13460_v13  ;;  %5678 = vmatprep.mubr.bf16.mxu1 %v22611_v8  ;;  %v13554_v13 = vcombine.low %v676_v49, %v680_v50  ;;  %v17674_v49 = vld [vmem:[%s17303_s14 + $0x168] ss:$36 sps:$4 sm:$0xff]   ;;  %v13516_v50 = vcombine.low %v637_v21, %v641_v23  ;;  %v17719_v21 = vld [vmem:[%s17303_s14 + $0x1fc] ss:$36 sps:$4 sm:$0xff]  }
  0x5d   : > { %5721 = vmatprep.subr.bf16.mxu1 %v13469_v14  ;;  %v13563_v14 = vcombine.high %v684_v0, %v688_v2 }
  0x5e   : > { %4934 = vmatpush1.bf16.msra.mxu0 %v13530_v33  ;;  %v13508_v33 = vcombine.low %v629_v6, %v633_v11 }
  0x5f   : > { %4935 = vmatprep.subr.bf16.mxu0 %v13539_v34  ;;  %v645_v34 = vld [vmem:[%s22602_s1 + $0x488] sm:$0xff] }
  0x60   : > { %5722 = vmatpush1.bf16.msra.mxu1 %v13468_v24  ;;  %v13509_v24 = vcombine.high %v629_v6, %v633_v11  ;;  %v13586_v11 = vcombine.low %v708_v41, %v712_v42 }
  0x61   : > { %5723 = vmatprep.subr.bf16.mxu1 %v13477_v29  ;;  %4787 = vmatmul.mubr.bf16.gmra.mrb[8].mxu0 %v17562_v25  ;;  %v704_v29 = vld [vmem:[%s22602_s1 + $0x660] sm:$0xff] }
  0x62   : > { %4796 = vmatprep.mubr.bf16.mxu0 %v17572_v32  ;;  %4936 = vmatpush1.bf16.msra.mxu0 %v13538_v47  ;;  %v17665_v47 = vld [vmem:[%s22602_s1 + $0x808] sm:$0xff] }
  0x63   : > { %5679 = vmatmul.mubr.bf16.gmra.mrb[24].mxu1 %v16383_v27  ;;  %4937 = vmatprep.subr.bf16.mxu0 %v13547_v48  ;;  %v13562_v27 = vcombine.low %v684_v0, %v688_v2  ;;  %v17670_v48 = vld [vmem:[%s22602_s1 + $0x828] sm:$0xff]  ;;  %v13587_v0 = vcombine.high %v708_v41, %v712_v42  ;;  %v13524_v2 = vcombine.low %v645_v34, %v649_v35  ;;  %v744_v41 = vld [vmem:[%s22602_s1 + $0x7a0] sm:$0xff]  ;;  %v17744_v42 = vld [vmem:[%s17303_s14 + $0x1f8] ss:$36 sps:$4 sm:$0xff]  }
  0x64   : > { %5724 = vmatpush1.bf16.msra.mxu1 %v13476_v40  ;;  %5688 = vmatprep.mubr.bf16.mxu1 %v22611_v8  ;;  %v13570_v40 = vcombine.low %v692_v16, %v696_v17  ;;  %v13636_v54 = vcombine.low %v17665_v47, %v17670_v48  ;;  %v17710_v16 = vld [vmem:[%s17303_s14 + $0x1b0] ss:$36 sps:$4 sm:$0xff]  }
  0x65   : > { %5725 = vmatprep.subr.bf16.mxu1 %v13485_v43 }
  0x66   : > { %4938 = vmatpush1.bf16.msra.mxu0 %v13546_v62  ;;  %v720_v62 = vld [vmem:[%s22602_s1 + $0x6e0] sm:$0xff] }
  0x67   : > { %4939 = vmatprep.subr.bf16.mxu0 %v13555_v3  ;;  %v661_v3 = vld [vmem:[%s22602_s1 + $0x508] sm:$0xff] }
  0x68   : > { %5726 = vmatpush1.bf16.msra.mxu1 %v13484_v51  ;;  %v657_v51 = vld [vmem:[%s22602_s1 + $0x4e8] sm:$0xff] }
  0x69   : > { %5727 = vmatprep.subr.bf16.mxu1 %v13493_v58  ;;  %4797 = vmatmul.mubr.bf16.gmra.mrb[12].mxu0 %v17596_v53  ;;  %v716_v58 = vld [vmem:[%s22602_s1 + $0x6c0] sm:$0xff] }
  0x6a   : > { %4806 = vmatprep.mubr.bf16.mxu0 %v17606_v59  ;;  %4940 = vmatpush1.bf16.msra.mxu0 %v13554_v13  ;;  %v724_v13 = vld [vmem:[%s22602_s1 + $0x700] sm:$0xff] }
  0x6b   : > { %5689 = vmatmul.mubr.bf16.gmra.mrb[28].mxu1 %v16387_v57  ;;  %4941 = vmatprep.subr.bf16.mxu0 %v13563_v14  ;;  %v13525_v57 = vcombine.high %v645_v34, %v649_v35  ;;  %v728_v14 = vld [vmem:[%s22602_s1 + $0x720] sm:$0xff] }
  0x6c   : > { %5728 = vmatpush1.bf16.msra.mxu1 %v13492_v4  ;;  %5731 = vmatprep.mubr.bf16.mxu1 %v17375_v1  ;;  %v700_v1 = vld [vmem:[%s22602_s1 + $0x640] sm:$0xff]  ;;  %v665_v4 = vld [vmem:[%s22602_s1 + $0x528] sm:$0xff]  ;;  %v13602_v35 = vcombine.low %v724_v13, %v728_v14 }
  0x6d   : > { %5729 = vmatprep.subr.bf16.mxu1 %v13501_v12  ;;  %v13579_v43 = vcombine.high %v700_v1, %v704_v29  ;;  %v13595_v12 = vcombine.high %v716_v58, %v720_v62  ;;  %v13541_v23 = vcombine.high %v661_v3, %v665_v4 }
  0x6e   : > { %4942 = vmatpush1.bf16.msra.mxu0 %v13562_v27  ;;  %v736_v27 = vld [vmem:[%s22602_s1 + $0x760] sm:$0xff] }
  0x6f   : > { %4943 = vmatprep.subr.bf16.mxu0 %v13571_v31  ;;  %v677_v31 = vld [vmem:[%s22602_s1 + $0x588] sm:$0xff] }
  0x70   : > { %5730 = vmatpush1.bf16.msra.mxu1 %v13500_v18  ;;  %v673_v18 = vld [vmem:[%s22602_s1 + $0x568] sm:$0xff] }
  0x71   : > { %5892 = vmatprep.subr.bf16.mxu1 %v13509_v24  ;;  %4807 = vmatmul.mubr.bf16.gmra.mrb[16].mxu0 %v17630_v19  ;;  %v13594_v24 = vcombine.low %v716_v58, %v720_v62 }
  0x72   : > { %4816 = vmatprep.mubr.bf16.mxu0 %v17639_v26  ;;  %4944 = vmatpush1.bf16.msra.mxu0 %v13570_v40  ;;  %v740_v40 = vld [vmem:[%s22602_s1 + $0x780] sm:$0xff] }
  0x73   : > { %5732 = vmatmul.mubr.bf16.vlgmr.msra.gmra.mrb[32].mxu1 %v17494_v39  ;;  %v653_v39 = vld [vmem:[%s22602_s1 + $0x4c8] sm:$0xff]  ;;  %4945 = vmatprep.subr.bf16.mxu0 %v13579_v43  ;;  %v13619_v58 = vcombine.high %v740_v40, %v744_v41 }
  0x74   : > { %5893 = vmatpush1.bf16.msra.mxu1 %v13508_v33  ;;  %5741 = vmatprep.mubr.bf16.mxu1 %v17504_v45  ;;  %v13578_v45 = vcombine.low %v700_v1, %v704_v29  ;;  %v13533_v6 = vcombine.high %v653_v39, %v657_v51  ;;  %v13532_v17 = vcombine.low %v653_v39, %v657_v51  ;;  %v681_v33 = vld [vmem:[%s22602_s1 + $0x5a8] sm:$0xff] }
  0x75   : > { %5894 = vmatprep.subr.bf16.mxu1 %v13517_v37  ;;  %v13603_v1 = vcombine.high %v724_v13, %v728_v14  ;;  %v13540_v29 = vcombine.low %v661_v3, %v665_v4  ;;  %v17753_v39 = vld [vmem:[%s17303_s14 + $0x244] ss:$36 sps:$4 sm:$0xff]   ;;  %v13557_v51 = vcombine.high %v677_v31, %v681_v33  ;;  %v13556_v62 = vcombine.low %v677_v31, %v681_v33 }
  0x76   : > { %4946 = vmatpush1.bf16.msra.mxu0 %v13578_v45  ;;  %v752_v45 = vld [vmem:[%s22602_s1 + $0x7e0] sm:$0xff]  ;;  %v697_v3 = vld [vmem:[%s22602_s1 + $0x628] sm:$0xff]  ;;  %v13618_v4 = vcombine.low %v740_v40, %v744_v41 }
  0x77   : > { %4947 = vmatprep.subr.bf16.mxu0 %v13587_v0  ;;  %v693_v0 = vld [vmem:[%s22602_s1 + $0x608] sm:$0xff] }
  0x78   : > { %5895 = vmatpush1.bf16.msra.mxu1 %v13516_v50  ;;  %v689_v50 = vld [vmem:[%s22602_s1 + $0x5e8] sm:$0xff] }
  0x79   : > { %5896 = vmatprep.subr.bf16.mxu1 %v13525_v57  ;;  %4817 = vmatmul.mubr.bf16.gmra.mrb[20].mxu0 %v17674_v49  ;;  %v701_v13 = vld [vmem:[%s22602_s1 + $0x648] sm:$0xff] }
  0x7a   : > { %4826 = vmatprep.mubr.bf16.mxu0 %v17685_v56  ;;  %4948 = vmatpush1.bf16.msra.mxu0 %v13586_v11  ;;  %v17772_v11 = vld [vmem:[%s17303_s14 + $0x240] ss:$36 sps:$4 sm:$0xff]   ;;  %v705_v14 = vld [vmem:[%s22602_s1 + $0x668] sm:$0xff] }
  0x7b   : > { %5742 = vmatmul.mubr.bf16.gmra.mrb[36].mxu1 %v17528_v61  ;;  %v669_v61 = vld [vmem:[%s22602_s1 + $0x548] sm:$0xff]  ;;  %4949 = vmatprep.subr.bf16.mxu0 %v13595_v12  ;;  %v13580_v31 = vcombine.low %v701_v13, %v705_v14 }
  0x7c   : > { %5751 = vmatprep.mubr.bf16.mxu1 %v17538_v7  ;;  %5897 = vmatpush1.bf16.msra.mxu1 %v13524_v2  ;;  %v732_v7 = vld [vmem:[%s22602_s1 + $0x740] sm:$0xff]  ;;  %v13549_v34 = vcombine.high %v669_v61, %v673_v18  ;;  %v13548_v43 = vcombine.low %v669_v61, %v673_v18  ;;  %v709_v18 = vld [vmem:[%s22602_s1 + $0x688] sm:$0xff] }
  0x7d   : > { %5898 = vmatprep.subr.bf16.mxu1 %v13533_v6  ;;  %v13611_v37 = vcombine.high %v732_v7, %v736_v27  ;;  %v13610_v57 = vcombine.low %v732_v7, %v736_v27  ;;  %v13581_v7 = vcombine.high %v701_v13, %v705_v14  ;;  %v713_v27 = vld [vmem:[%s22602_s1 + $0x6a8] sm:$0xff] }
  0x7e   : > { %4950 = vmatpush1.bf16.msra.mxu0 %v13594_v24  ;;  %v17794_v24 = vld [vmem:[%s22602_s1 + $0x820] sm:$0xff]  ;;  %v717_v33 = vld [vmem:[%s22602_s1 + $0x6c8] sm:$0xff] }
  0x7f   : > { %4951 = vmatprep.subr.bf16.mxu0 %v13603_v1  ;;  %v729_v41 = vld [vmem:[%s22602_s1 + $0x728] sm:$0xff] }
  0x80   : > { %5899 = vmatpush1.bf16.msra.mxu1 %v13532_v17  ;;  %v17781_v17 = vld [vmem:[%s17303_s14 + $0x28c] ss:$36 sps:$4 sm:$0xff]  }
  0x81   : > { %5900 = vmatprep.subr.bf16.mxu1 %v13541_v23  ;;  %4827 = vmatmul.mubr.bf16.gmra.mrb[24].mxu0 %v17710_v16  ;;  %v17789_v23 = vld [vmem:[%s22602_s1 + $0x800] sm:$0xff]  ;;  %v16415_v14 = vld [vmem:[%s17303_s14 + $0x3ac] ss:$36 sps:$4 sm:$0xff]  }
  0x82   : > { %4836 = vmatprep.mubr.bf16.mxu0 %v17719_v21  ;;  %4952 = vmatpush1.bf16.msra.mxu0 %v13602_v35  ;;  %v13635_v1 = vcombine.high %v17789_v23, %v17794_v24  ;;  %v17815_v35 = vld [vmem:[%s17303_s14 + $0x2d4] ss:$36 sps:$4 sm:$0xff]  }
  0x83   : > { %5752 = vmatmul.mubr.bf16.gmra.mrb[40].mxu1 %v17562_v25  ;;  %v685_v25 = vld [vmem:[%s22602_s1 + $0x5c8] sm:$0xff]  ;;  %4953 = vmatprep.subr.bf16.mxu0 %v13611_v37 }
  0x84   : > { %5761 = vmatprep.mubr.bf16.mxu1 %v17572_v32  ;;  %5901 = vmatpush1.bf16.msra.mxu1 %v13540_v29  ;;  %v748_v32 = vld [vmem:[%s22602_s1 + $0x7c0] sm:$0xff]  ;;  %v13565_v2 = vcombine.high %v685_v25, %v689_v50  ;;  %v13564_v12 = vcombine.low %v685_v25, %v689_v50  ;;  %v17806_v29 = vld [vmem:[%s17303_s14 + $0x288] ss:$36 sps:$4 sm:$0xff]  }
  0x85   : > { %5902 = vmatprep.subr.bf16.mxu1 %v13549_v34  ;;  %v13627_v6 = vcombine.high %v748_v32, %v752_v45  ;;  %v13626_v61 = vcombine.low %v748_v32, %v752_v45  ;;  %v721_v34 = vld [vmem:[%s22602_s1 + $0x6e8] sm:$0xff] }
  0x86   : > { %4954 = vmatpush1.bf16.msra.mxu0 %v13610_v57  ;;  %v725_v37 = vld [vmem:[%s22602_s1 + $0x708] sm:$0xff]  ;;  %v13597_v40 = vcombine.high %v717_v33, %v721_v34  ;;  %v13596_v25 = vcombine.low %v717_v33, %v721_v34  ;;  %v16409_v57 = vld [vmem:[%s17303_s14 + $0x31c] ss:$36 sps:$4 sm:$0xff]  }
  0x87   : > { %4955 = vmatprep.subr.bf16.mxu0 %v13619_v58  ;;  %v733_v50 = vld [vmem:[%s22602_s1 + $0x748] sm:$0xff]  ;;  %v13605_v32 = vcombine.high %v725_v37, %v729_v41  ;;  %v776_v33 = vld [vmem:[%s22602_s1 + $0x8a0] sm:$0xff] }
  0x88   : > { %5903 = vmatpush1.bf16.msra.mxu1 %v13548_v43  ;;  %v16408_v43 = vld [vmem:[%s17303_s14 + $0x2d0] ss:$36 sps:$4 sm:$0xff]   ;;  %v745_v58 = vld [vmem:[%s22602_s1 + $0x7a8] sm:$0xff] }
  0x89   : > { %5904 = vmatprep.subr.bf16.mxu1 %v13557_v51  ;;  %4837 = vmatmul.mubr.bf16.gmra.mrb[28].mxu0 %v17744_v42  ;;  %v737_v51 = vld [vmem:[%s22602_s1 + $0x768] sm:$0xff] }
  0x8a   : > { %4846 = vmatprep.mubr.bf16.mxu0 %v17753_v39  ;;  %4956 = vmatpush1.bf16.msra.mxu0 %v13618_v4  ;;  %v13613_v45 = vcombine.high %v733_v50, %v737_v51  ;;  %v16412_v4 = vld [vmem:[%s17303_s14 + $0x364] ss:$36 sps:$4 sm:$0xff]  }
  0x8b   : > { %5762 = vmatmul.mubr.bf16.gmra.mrb[44].mxu1 %v17596_v53  ;;  %v13573_v53 = vcombine.high %v693_v0, %v697_v3  ;;  %4957 = vmatprep.subr.bf16.mxu0 %v13627_v6 }
  0x8c   : > { %5771 = vmatprep.mubr.bf16.mxu1 %v17606_v59  ;;  %5905 = vmatpush1.bf16.msra.mxu1 %v13556_v62  ;;  %v13572_v59 = vcombine.low %v693_v0, %v697_v3  ;;  %v16411_v62 = vld [vmem:[%s17303_s14 + $0x318] ss:$36 sps:$4 sm:$0xff]   ;;  %v13612_v0 = vcombine.low %v733_v50, %v737_v51  ;;  %v753_v3 = vld [vmem:[%s22602_s1 + $0x7e8] sm:$0xff] }
  0x8d   : > { %5906 = vmatprep.subr.bf16.mxu1 %v13565_v2  ;;  %v749_v2 = vld [vmem:[%s22602_s1 + $0x7c8] sm:$0xff]  ;;  %v17916_v50 = vld [vmem:[%s17303_s14 + $0x98] ss:$36 sps:$4 sm:$0xff]  }
  0x8e   : > { %4958 = vmatpush1.bf16.msra.mxu0 %v13626_v61  ;;  %v13628_v13 = vcombine.low %v749_v2, %v753_v3  ;;  %v16420_v61 = vld [vmem:[%s17303_s14 + $0x3f0] ss:$36 sps:$4 sm:$0xff]  }
  0x8f   : > { %5120 = vmatprep.subr.bf16.mxu0 %v13635_v1  ;;  %v17883_v1 = vld [vmem:[%s17303_s14 + $0x54] ss:$36 sps:$4 sm:$0xff]  }
  0x90   : > { %5907 = vmatpush1.bf16.msra.mxu1 %v13564_v12  ;;  %v16414_v12 = vld [vmem:[%s17303_s14 + $0x360] ss:$36 sps:$4 sm:$0xff]  }
  0x91   : > { %5908 = vmatprep.subr.bf16.mxu1 %v13573_v53  ;;  %4847 = vmatmul.mubr.bf16.gmra.mrb[32].mxu0 %v17772_v11  ;;  %v13637_v53 = vcombine.high %v17665_v47, %v17670_v48 }
  0x92   : > { %4856 = vmatprep.mubr.bf16.mxu0 %v17781_v17 }
  0x93   : > { %5772 = vmatmul.mubr.bf16.gmra.mrb[48].mxu1 %v17630_v19  ;;  %v13589_v19 = vcombine.high %v709_v18, %v713_v27 }
  0x94   : > { %5781 = vmatprep.mubr.bf16.mxu1 %v17639_v26  ;;  %5909 = vmatpush1.bf16.msra.mxu1 %v13572_v59  ;;  %v13588_v26 = vcombine.low %v709_v18, %v713_v27  ;;  %v16421_v59 = vld [vmem:[%s17303_s14 + $0x43c] ss:$36 sps:$4 sm:$0xff]   ;;  %v17869_v18 = vld [vmem:[%s17303_s14 + $0xc] ss:$36 sps:$4 sm:$0xff]  }
  0x95   : > { %5910 = vmatprep.subr.bf16.mxu1 %v13581_v7  ;;  %v764_v7 = vld [vmem:[%s22602_s1 + $0x840] sm:$0xff] }
  0x96   : > { %v768_v27 = vld [vmem:[%s22602_s1 + $0x860] sm:$0xff] }
  0x97   : > { %v13643_v34 = vcombine.high %v764_v7, %v768_v27 }
  0x98   : > { %5911 = vmatpush1.bf16.msra.mxu1 %v13580_v31  ;;  %v772_v31 = vld [vmem:[%s22602_s1 + $0x880] sm:$0xff] }
  0x99   : > { %5912 = vmatprep.subr.bf16.mxu1 %v13589_v19  ;;  %4857 = vmatmul.mubr.bf16.gmra.mrb[36].mxu0 %v17806_v29  ;;  %v13642_v19 = vcombine.low %v764_v7, %v768_v27  ;;  %v17967_v7 = vld [vmem:[%s17303_s14 + $0x174] ss:$36 sps:$4 sm:$0xff]   ;;  %v832_v27 = vld [vmem:[%s22602_s1 + $0xa60] sm:$0xff] }
  0x9a   : > { %4866 = vmatprep.mubr.bf16.mxu0 %v17815_v35 }
  0x9b   : > { %5782 = vmatmul.mubr.bf16.gmra.mrb[52].mxu1 %v17674_v49  ;;  %v13604_v49 = vcombine.low %v725_v37, %v729_v41  ;;  %v13651_v37 = vcombine.high %v772_v31, %v776_v33  ;;  %v788_v41 = vld [vmem:[%s22602_s1 + $0x900] sm:$0xff] }
  0x9c   : > { %5791 = vmatprep.mubr.bf16.mxu1 %v17685_v56  ;;  %5913 = vmatpush1.bf16.msra.mxu1 %v13588_v26  ;;  %v741_v56 = vld [vmem:[%s22602_s1 + $0x788] sm:$0xff]  ;;  %v17905_v26 = vld [vmem:[%s17303_s14 + $0x9c] ss:$36 sps:$4 sm:$0xff]  }
  0x9d   : > { %5914 = vmatprep.subr.bf16.mxu1 %v13597_v40  ;;  %v13621_v6 = vcombine.high %v741_v56, %v745_v58  ;;  %v13650_v40 = vcombine.low %v772_v31, %v776_v33  ;;  %v777_v31 = vld [vmem:[%s22602_s1 + $0x8a8] sm:$0xff] }
  0xa0   : > { %5915 = vmatpush1.bf16.msra.mxu1 %v13596_v25 }
  0xa1   : > { %5916 = vmatprep.subr.bf16.mxu1 %v13605_v32  ;;  %4867 = vmatmul.mubr.bf16.gmra.mrb[40].mxu0 %v16408_v43  ;;  %v800_v32 = vld [vmem:[%s22602_s1 + $0x960] sm:$0xff] }
  0xa2   : > { %4876 = vmatprep.mubr.bf16.mxu0 %v16409_v57 }
  0xa3   : > { %5792 = vmatmul.mubr.bf16.gmra.mrb[56].mxu1 %v17710_v16  ;;  %v13620_v16 = vcombine.low %v741_v56, %v745_v58  ;;  %v804_v58 = vld [vmem:[%s22602_s1 + $0x980] sm:$0xff] }
  0xa4   : > { %5801 = vmatprep.mubr.bf16.mxu1 %v17719_v21  ;;  %5917 = vmatpush1.bf16.msra.mxu1 %v13604_v49  ;;  %v13629_v21 = vcombine.high %v749_v2, %v753_v3  ;;  %v17925_v49 = vld [vmem:[%s17303_s14 + $0xe4] ss:$36 sps:$4 sm:$0xff]  }
  0xa5   : > { %5918 = vmatprep.subr.bf16.mxu1 %v13613_v45  ;;  %v17936_v2 = vld [vmem:[%s17303_s14 + $0xe0] ss:$36 sps:$4 sm:$0xff]  }
  0xa8   : > { %5919 = vmatpush1.bf16.msra.mxu1 %v13612_v0 }
  0xa9   : > { %5920 = vmatprep.subr.bf16.mxu1 %v13621_v6  ;;  %4877 = vmatmul.mubr.bf16.gmra.mrb[44].mxu0 %v16411_v62  ;;  %v816_v6 = vld [vmem:[%s22602_s1 + $0x9e0] sm:$0xff] }
  0xaa   : > { %4886 = vmatprep.mubr.bf16.mxu0 %v16412_v4 }
  0xab   : > { %5802 = vmatmul.mubr.bf16.gmra.mrb[60].mxu1 %v17744_v42  ;;  %v16417_v42 = vld [vmem:[%s17303_s14 + $0x3a8] ss:$36 sps:$4 sm:$0xff]  }
  0xac   : > { %5811 = vmatprep.mubr.bf16.mxu1 %v17753_v39  ;;  %5921 = vmatpush1.bf16.msra.mxu1 %v13620_v16  ;;  %v16418_v39 = vld [vmem:[%s17303_s14 + $0x3f4] ss:$36 sps:$4 sm:$0xff]   ;;  %v17945_v16 = vld [vmem:[%s17303_s14 + $0x12c] ss:$36 sps:$4 sm:$0xff]  }
  0xad   : > { %5922 = vmatprep.subr.bf16.mxu1 %v13629_v21 }
  0xb0   : > { %5923 = vmatpush1.bf16.msra.mxu1 %v13628_v13  ;;  %v820_v13 = vld [vmem:[%s22602_s1 + $0xa00] sm:$0xff] }
  0xb1   : > { %6085 = vmatprep.subr.bf16.mxu1 %v13637_v53  ;;  %4887 = vmatmul.mubr.bf16.gmra.mrb[48].mxu0 %v16414_v12 }
  0xb2   : > { %4896 = vmatprep.mubr.bf16.mxu0 %v16415_v14 }
  0xb3   : > { %5812 = vmatmul.mubr.bf16.gmra.mrb[64].mxu1 %v17772_v11  ;;  %v17866_v11 = vld [vmem:[%s17303_s14 + $0x438] ss:$36 sps:$4 sm:$0xff]  }
  0xb4   : > { %5821 = vmatprep.mubr.bf16.mxu1 %v17781_v17  ;;  %v17874_v17 = vld [vmem:[%s17303_s14 + $0x8] ss:$36 sps:$4 sm:$0xff]  }
  0xb9   : > { %4897 = vmatmul.mubr.bf16.gmra.mrb[52].mxu0 %v16417_v42 }
  0xba   : > { %4906 = vmatprep.mubr.bf16.mxu0 %v16418_v39 }
  0xbb   : > { %5822 = vmatmul.mubr.bf16.gmra.mrb[68].mxu1 %v17806_v29  ;;  %v13634_v29 = vcombine.low %v17789_v23, %v17794_v24  ;;  %v780_v23 = vld [vmem:[%s22602_s1 + $0x8c0] sm:$0xff] }
  0xbc   : > { %5831 = vmatprep.mubr.bf16.mxu1 %v17815_v35  ;;  %v17896_v35 = vld [vmem:[%s17303_s14 + $0x50] ss:$36 sps:$4 sm:$0xff]   ;;  %v784_v24 = vld [vmem:[%s22602_s1 + $0x8e0] sm:$0xff] }
  0xbd   : > { %v13659_v25 = vcombine.high %v780_v23, %v784_v24  ;;  %v13658_v51 = vcombine.low %v780_v23, %v784_v24  ;;  %v840_v23 = vld [vmem:[%s22602_s1 + $0xaa0] sm:$0xff] }
  0xc1   : > { %4907 = vmatmul.mubr.bf16.gmra.mrb[56].mxu0 %v16420_v61 }
  0xc2   : > { %4916 = vmatprep.mubr.bf16.mxu0 %v16421_v59 }
  0xc3   : > { %5832 = vmatmul.mubr.bf16.gmra.mrb[72].mxu1 %v16408_v43  ;;  %v792_v43 = vld [vmem:[%s22602_s1 + $0x920] sm:$0xff] }
  0xc4   : > { %5841 = vmatprep.mubr.bf16.mxu1 %v16409_v57  ;;  %v796_v57 = vld [vmem:[%s22602_s1 + $0x940] sm:$0xff]  ;;  %v13667_v56 = vcombine.high %v788_v41, %v792_v43  ;;  %v13666_v45 = vcombine.low %v788_v41, %v792_v43  ;;  %v18005_v41 = vld [vmem:[%s17303_s14 + $0x170] ss:$36 sps:$4 sm:$0xff]   ;;  %v781_v43 = vld [vmem:[%s22602_s1 + $0x8c8] sm:$0xff] }
  0xc5   : > { %v13675_v0 = vcombine.high %v796_v57, %v800_v32  ;;  %v13674_v3 = vcombine.low %v796_v57, %v800_v32  ;;  %v18016_v57 = vld [vmem:[%s17303_s14 + $0x1bc] ss:$36 sps:$4 sm:$0xff]  }
  0xc9   : > { %4917 = vmatmul.mubr.bf16.gmra.mrb[60].mxu0 %v17866_v11 }
  0xca   : > { %4959 = vmatprep.mubr.bf16.mxu0 %v17869_v18 }
  0xcb   : > { %5842 = vmatmul.mubr.bf16.gmra.mrb[76].mxu1 %v16411_v62  ;;  %v808_v62 = vld [vmem:[%s22602_s1 + $0x9a0] sm:$0xff] }
  0xcc   : > { %5851 = vmatprep.mubr.bf16.mxu1 %v16412_v4  ;;  %v812_v4 = vld [vmem:[%s22602_s1 + $0x9c0] sm:$0xff]  ;;  %v13683_v21 = vcombine.high %v804_v58, %v808_v62 }
  0xcd   : > { %v13691_v53 = vcombine.high %v812_v4, %v816_v6 }
  0xd1   : > { %4960 = vmatmul.mubr.bf16.vlgmr.msra.gmra.mrb[0].mxu0 %v17874_v17 }
  0xd2   : > { %4969 = vmatprep.mubr.bf16.mxu0 %v17883_v1  ;;  %5121 = vmatpush1.bf16.msra.mxu0 %v13634_v29  ;;  %v773_v29 = vld [vmem:[%s22602_s1 + $0x888] sm:$0xff] }
  0xd3   : > { %5852 = vmatmul.mubr.bf16.gmra.mrb[80].mxu1 %v16414_v12  ;;  %5122 = vmatprep.subr.bf16.mxu0 %v13643_v34  ;;  %v13682_v12 = vcombine.low %v804_v58, %v808_v62  ;;  %v13653_v47 = vcombine.high %v773_v29, %v777_v31  ;;  %v793_v58 = vld [vmem:[%s22602_s1 + $0x928] sm:$0xff] }
  0xd4   : > { %5861 = vmatprep.mubr.bf16.mxu1 %v16415_v14  ;;  %v824_v14 = vld [vmem:[%s22602_s1 + $0xa20] sm:$0xff] }
  0xd5   : > { %v13698_v34 = vcombine.low %v820_v13, %v824_v14 }
  0xd6   : > { %5123 = vmatpush1.bf16.msra.mxu0 %v13642_v19  ;;  %v836_v19 = vld [vmem:[%s22602_s1 + $0xa80] sm:$0xff] }
  0xd7   : > { %5124 = vmatprep.subr.bf16.mxu0 %v13651_v37  ;;  %v17993_v37 = vld [vmem:[%s22602_s1 + $0xc08] sm:$0xff]  ;;  %v13715_v32 = vcombine.high %v836_v19, %v840_v23 }
  0xd9   : > { %4970 = vmatmul.mubr.bf16.gmra.mrb[4].mxu0 %v17896_v35 }
  0xda   : > { %4979 = vmatprep.mubr.bf16.mxu0 %v17905_v26  ;;  %5125 = vmatpush1.bf16.msra.mxu0 %v13650_v40  ;;  %v17998_v40 = vld [vmem:[%s22602_s1 + $0xc28] sm:$0xff] }
  0xdb   : > { %5862 = vmatmul.mubr.bf16.gmra.mrb[84].mxu1 %v16417_v42  ;;  %5126 = vmatprep.subr.bf16.mxu0 %v13659_v25  ;;  %v17958_v42 = vld [vmem:[%s17303_s14 + $0x128] ss:$36 sps:$4 sm:$0xff]  }
  0xdc   : > { %5871 = vmatprep.mubr.bf16.mxu1 %v16418_v39  ;;  %v765_v39 = vld [vmem:[%s22602_s1 + $0x848] sm:$0xff] }
  0xdd   : > { %v785_v25 = vld [vmem:[%s22602_s1 + $0x8e8] sm:$0xff] }
  0xde   : > { %5127 = vmatpush1.bf16.msra.mxu0 %v13658_v51  ;;  %v13661_v62 = vcombine.high %v781_v43, %v785_v25 }
  0xdf   : > { %5128 = vmatprep.subr.bf16.mxu0 %v13667_v56  ;;  %v13652_v56 = vcombine.low %v773_v29, %v777_v31 }
  0xe1   : > { %4980 = vmatmul.mubr.bf16.gmra.mrb[8].mxu0 %v17916_v50 }
  0xe2   : > { %4989 = vmatprep.mubr.bf16.mxu0 %v17925_v49  ;;  %5129 = vmatpush1.bf16.msra.mxu0 %v13666_v45  ;;  %v789_v45 = vld [vmem:[%s22602_s1 + $0x908] sm:$0xff] }
  0xe3   : > { %5872 = vmatmul.mubr.bf16.gmra.mrb[88].mxu1 %v16420_v61  ;;  %5130 = vmatprep.subr.bf16.mxu0 %v13675_v0  ;;  %v769_v61 = vld [vmem:[%s22602_s1 + $0x868] sm:$0xff]  ;;  %v13714_v0 = vcombine.low %v836_v19, %v840_v23  ;;  %v872_v19 = vld [vmem:[%s22602_s1 + $0xba0] sm:$0xff] }
  0xe4   : > { %5881 = vmatprep.mubr.bf16.mxu1 %v16421_v59  ;;  %v13690_v59 = vcombine.low %v812_v4, %v816_v6  ;;  %v13645_v33 = vcombine.high %v765_v39, %v769_v61  ;;  %v852_v4 = vld [vmem:[%s22602_s1 + $0xb00] sm:$0xff] }
  0xe5   : > { %v856_v6 = vld [vmem:[%s22602_s1 + $0xb20] sm:$0xff] }
  0xe6   : > { %5131 = vmatpush1.bf16.msra.mxu0 %v13674_v3  ;;  %v13730_v31 = vcombine.low %v852_v4, %v856_v6  ;;  %v18075_v23 = vld [vmem:[%s17303_s14 + $0x200] ss:$36 sps:$4 sm:$0xff]  }
  0xe7   : > { %5132 = vmatprep.subr.bf16.mxu0 %v13683_v21  ;;  %v18041_v21 = vld [vmem:[%s17303_s14 + $0x1b8] ss:$36 sps:$4 sm:$0xff]  }
  0xe9   : > { %4990 = vmatmul.mubr.bf16.gmra.mrb[12].mxu0 %v17936_v2 }
  0xea   : > { %4999 = vmatprep.mubr.bf16.mxu0 %v17945_v16  ;;  %5133 = vmatpush1.bf16.msra.mxu0 %v13682_v12  ;;  %v13660_v12 = vcombine.low %v781_v43, %v785_v25  ;;  %v18084_v43 = vld [vmem:[%s17303_s14 + $0x24c] ss:$36 sps:$4 sm:$0xff]  }
  0xeb   : > { %5882 = vmatmul.mubr.bf16.gmra.mrb[92].mxu1 %v17866_v11  ;;  %5134 = vmatprep.subr.bf16.mxu0 %v13691_v53  ;;  %v13699_v11 = vcombine.high %v820_v13, %v824_v14  ;;  %v801_v13 = vld [vmem:[%s22602_s1 + $0x968] sm:$0xff]  ;;  %v13669_v53 = vcombine.high %v789_v45, %v793_v58 }
  0xec   : > { %5924 = vmatprep.mubr.bf16.mxu1 %v17869_v18  ;;  %v828_v18 = vld [vmem:[%s22602_s1 + $0xa40] sm:$0xff] }
  0xed   : > { %v13707_v24 = vcombine.high %v828_v18, %v832_v27  ;;  %v13706_v48 = vcombine.low %v828_v18, %v832_v27  ;;  %v18050_v14 = vld [vmem:[%s17303_s14 + $0x204] ss:$36 sps:$4 sm:$0xff]  }
  0xee   : > { %5135 = vmatpush1.bf16.msra.mxu0 %v13690_v59  ;;  %v13731_v59 = vcombine.high %v852_v4, %v856_v6  ;;  %v805_v18 = vld [vmem:[%s22602_s1 + $0x988] sm:$0xff] }
  0xef   : > { %5136 = vmatprep.subr.bf16.mxu0 %v13699_v11  ;;  %v13668_v11 = vcombine.low %v789_v45, %v793_v58  ;;  %v809_v27 = vld [vmem:[%s22602_s1 + $0x9a8] sm:$0xff] }
  0xf0   : > { %v13685_v25 = vcombine.high %v805_v18, %v809_v27  ;;  %v13684_v45 = vcombine.low %v805_v18, %v809_v27  ;;  %v821_v58 = vld [vmem:[%s22602_s1 + $0xa08] sm:$0xff]  ;;  %v18134_v27 = vld [vmem:[%s22602_s1 + $0xc00] sm:$0xff] }
  0xf1   : > { %5000 = vmatmul.mubr.bf16.gmra.mrb[16].mxu0 %v17958_v42  ;;  %v837_v18 = vld [vmem:[%s22602_s1 + $0xa88] sm:$0xff] }
  0xf2   : > { %5009 = vmatprep.mubr.bf16.mxu0 %v17967_v7  ;;  %5137 = vmatpush1.bf16.msra.mxu0 %v13698_v34  ;;  %v868_v34 = vld [vmem:[%s22602_s1 + $0xb80] sm:$0xff] }
  0xf3   : > { %5925 = vmatmul.mubr.bf16.vlgmr.msra.gmra.mrb[32].mxu1 %v17874_v17  ;;  %v13644_v17 = vcombine.low %v765_v39, %v769_v61  ;;  %5138 = vmatprep.subr.bf16.mxu0 %v13707_v24  ;;  %v864_v61 = vld [vmem:[%s22602_s1 + $0xb60] sm:$0xff]  ;;  %v13746_v4 = vcombine.low %v868_v34, %v872_v19 }
  0xf4   : > { %6086 = vmatpush1.bf16.msra.mxu1 %v13636_v54  ;;  %5934 = vmatprep.mubr.bf16.mxu1 %v17883_v1  ;;  %v844_v54 = vld [vmem:[%s22602_s1 + $0xac0] sm:$0xff] }
  0xf5   : > { %6087 = vmatprep.subr.bf16.mxu1 %v13645_v33  ;;  %v848_v1 = vld [vmem:[%s22602_s1 + $0xae0] sm:$0xff] }
  0xf6   : > { %5139 = vmatpush1.bf16.msra.mxu0 %v13706_v48  ;;  %v13723_v3 = vcombine.high %v844_v54, %v848_v1  ;;  %v13722_v39 = vcombine.low %v844_v54, %v848_v1  ;;  %v876_v54 = vld [vmem:[%s22602_s1 + $0xbc0] sm:$0xff] }
  0xf7   : > { %5140 = vmatprep.subr.bf16.mxu0 %v13715_v32  ;;  %v880_v32 = vld [vmem:[%s22602_s1 + $0xbe0] sm:$0xff] }
  0xf8   : > { %6088 = vmatpush1.bf16.msra.mxu1 %v13644_v17  ;;  %v817_v17 = vld [vmem:[%s22602_s1 + $0x9e8] sm:$0xff]  ;;  %v13755_v6 = vcombine.high %v876_v54, %v880_v32 }
  0xf9   : > { %6089 = vmatprep.subr.bf16.mxu1 %v13653_v47  ;;  %5010 = vmatmul.mubr.bf16.gmra.mrb[20].mxu0 %v18005_v41 }
  0xfa   : > { %5019 = vmatprep.mubr.bf16.mxu0 %v18016_v57  ;;  %5141 = vmatpush1.bf16.msra.mxu0 %v13714_v0 }
  0xfb   : > { %5935 = vmatmul.mubr.bf16.gmra.mrb[36].mxu1 %v17896_v35  ;;  %v797_v35 = vld [vmem:[%s22602_s1 + $0x948] sm:$0xff]  ;;  %5142 = vmatprep.subr.bf16.mxu0 %v13723_v3 }
  0xfc   : > { %5944 = vmatprep.mubr.bf16.mxu1 %v17905_v26  ;;  %6090 = vmatpush1.bf16.msra.mxu1 %v13652_v56  ;;  %v860_v26 = vld [vmem:[%s22602_s1 + $0xb40] sm:$0xff]  ;;  %v13677_v29 = vcombine.high %v797_v35, %v801_v13  ;;  %v13676_v24 = vcombine.low %v797_v35, %v801_v13  ;;  %v825_v3 = vld [vmem:[%s22602_s1 + $0xa28] sm:$0xff] }
  0xfd   : > { %6091 = vmatprep.subr.bf16.mxu1 %v13661_v62  ;;  %v13739_v33 = vcombine.high %v860_v26, %v864_v61  ;;  %v13738_v47 = vcombine.low %v860_v26, %v864_v61  ;;  %v829_v13 = vld [vmem:[%s22602_s1 + $0xa48] sm:$0xff]  ;;  %v13754_v26 = vcombine.low %v876_v54, %v880_v32 }
  0xfe   : > { %5143 = vmatpush1.bf16.msra.mxu0 %v13722_v39  ;;  %v13701_v39 = vcombine.high %v821_v58, %v825_v3 }
  0xff   : > { %5144 = vmatprep.subr.bf16.mxu0 %v13731_v59 }
 0x100   : > { %6092 = vmatpush1.bf16.msra.mxu1 %v13660_v12  ;;  %v18111_v12 = vld [vmem:[%s17303_s14 + $0x248] ss:$36 sps:$4 sm:$0xff]  }
 0x101   : > { %6093 = vmatprep.subr.bf16.mxu1 %v13669_v53  ;;  %5020 = vmatmul.mubr.bf16.gmra.mrb[24].mxu0 %v18041_v21  ;;  %v18117_v53 = vld [vmem:[%s17303_s14 + $0x294] ss:$36 sps:$4 sm:$0xff]  }
 0x102   : > { %5029 = vmatprep.mubr.bf16.mxu0 %v18050_v14  ;;  %5145 = vmatpush1.bf16.msra.mxu0 %v13730_v31 }
 0x103   : > { %5945 = vmatmul.mubr.bf16.gmra.mrb[40].mxu1 %v17916_v50  ;;  %v813_v50 = vld [vmem:[%s22602_s1 + $0x9c8] sm:$0xff]  ;;  %5146 = vmatprep.subr.bf16.mxu0 %v13739_v33 }
 0x104   : > { %5954 = vmatprep.mubr.bf16.mxu1 %v17925_v49  ;;  %6094 = vmatpush1.bf16.msra.mxu1 %v13668_v11  ;;  %v13747_v49 = vcombine.high %v868_v34, %v872_v19  ;;  %v13693_v0 = vcombine.high %v813_v50, %v817_v17  ;;  %v13692_v35 = vcombine.low %v813_v50, %v817_v17  ;;  %v841_v34 = vld [vmem:[%s22602_s1 + $0xaa8] sm:$0xff] }
 0x105   : > { %6095 = vmatprep.subr.bf16.mxu1 %v13677_v29  ;;  %v13700_v11 = vcombine.low %v821_v58, %v825_v3  ;;  %v18139_v29 = vld [vmem:[%s22602_s1 + $0xc20] sm:$0xff]  ;;  %v845_v17 = vld [vmem:[%s22602_s1 + $0xac8] sm:$0xff]  ;;  %v13716_v32 = vcombine.low %v837_v18, %v841_v34 }
 0x106   : > { %v18086_v48 = vpop.f32.mrb[0].mxu1  ;;  %5147 = vmatpush1.bf16.msra.mxu0 %v13738_v47  ;;  %v13763_v19 = vcombine.high %v18134_v27, %v18139_v29  ;;  %v13717_v47 = vcombine.high %v837_v18, %v841_v34  ;;  %v857_v3 = vld [vmem:[%s22602_s1 + $0xb28] sm:$0xff] }
 0x107   : > { %v18091_v1 = vpop.f32.mrb[1].mxu1  ;;  %5148 = vmatprep.subr.bf16.mxu0 %v13747_v49  ;;  %v869_v18 = vld [vmem:[%s22602_s1 + $0xb88] sm:$0xff] }
 0x108   : > { %v18096_v56 = vpop.f32.mrb[2].mxu1  ;;  %6096 = vmatpush1.bf16.msra.mxu1 %v13676_v24  ;;  %v18153_v24 = vld [vmem:[%s17303_s14 + $0x290] ss:$36 sps:$4 sm:$0xff]  }
 0x109   : > { %v18101_v62 = vpop.f32.mrb[3].mxu1  ;;  %6097 = vmatprep.subr.bf16.mxu1 %v13685_v25  ;;  %5030 = vmatmul.mubr.bf16.gmra.mrb[28].mxu0 %v18075_v23  ;;  %v18159_v25 = vld [vmem:[%s17303_s14 + $0x2dc] ss:$36 sps:$4 sm:$0xff]  }
 0x10a   : > { %5039 = vmatprep.mubr.bf16.mxu0 %v18084_v43  ;;  %5149 = vmatpush1.bf16.msra.mxu0 %v13746_v4  ;;  %v18183_v4 = vld [vmem:[%s17303_s14 + $0x2d8] ss:$36 sps:$4 sm:$0xff]  }
 0x10b   : > { %5955 = vmatmul.mubr.bf16.gmra.mrb[44].mxu1 %v17936_v2  ;;  %v833_v2 = vld [vmem:[%s22602_s1 + $0xa68] sm:$0xff]  ;;  %5150 = vmatprep.subr.bf16.mxu0 %v13755_v6 }
 0x10c   : > { %5964 = vmatprep.mubr.bf16.mxu1 %v17945_v16  ;;  %6098 = vmatpush1.bf16.msra.mxu1 %v13684_v45  ;;  %v13709_v33 = vcombine.high %v829_v13, %v833_v2  ;;  %v13708_v50 = vcombine.low %v829_v13, %v833_v2  ;;  %v853_v45 = vld [vmem:[%s22602_s1 + $0xb08] sm:$0xff] }
 0x10d   : > { %6099 = vmatprep.subr.bf16.mxu1 %v13693_v0  ;;  %v18189_v13 = vld [vmem:[%s17303_s14 + $0x324] ss:$36 sps:$4 sm:$0xff]  }
 0x10e   : > { %v18119_v61 = vpop.f32.mrb[4].mxu1  ;;  %5151 = vmatpush1.bf16.msra.mxu0 %v13754_v26 }
 0x10f   : > { %v18124_v16 = vpop.f32.mrb[5].mxu1  ;;  %5313 = vmatprep.subr.bf16.mxu0 %v13763_v19  ;;  %v873_v19 = vld [vmem:[%s22602_s1 + $0xba8] sm:$0xff] }
 0x110   : > { %v18126_v59 = vpop.f32.mrb[6].mxu1  ;;  %6100 = vmatpush1.bf16.msra.mxu1 %v13692_v35  ;;  %v861_v35 = vld [vmem:[%s22602_s1 + $0xb48] sm:$0xff] }
 0x111   : > { %v18141_v31 = vpop.f32.mrb[7].mxu1  ;;  %6101 = vmatprep.subr.bf16.mxu1 %v13701_v39  ;;  %5040 = vmatmul.mubr.bf16.gmra.mrb[32].mxu0 %v18111_v12  ;;  %v13733_v39 = vcombine.high %v853_v45, %v857_v3 }
 0x112   : > { %5049 = vmatprep.mubr.bf16.mxu0 %v18117_v53 }
 0x113   : > { %5965 = vmatmul.mubr.bf16.gmra.mrb[48].mxu1 %v17958_v42  ;;  %v849_v42 = vld [vmem:[%s22602_s1 + $0xae8] sm:$0xff] }
 0x114   : > { %5974 = vmatprep.mubr.bf16.mxu1 %v17967_v7  ;;  %6102 = vmatpush1.bf16.msra.mxu1 %v13700_v11  ;;  %v13725_v0 = vcombine.high %v845_v17, %v849_v42  ;;  %v13724_v6 = vcombine.low %v845_v17, %v849_v42  ;;  %v13732_v11 = vcombine.low %v853_v45, %v857_v3  ;;  %v881_v45 = vld [vmem:[%s22602_s1 + $0xbe8] sm:$0xff] }
 0x115   : > { %6103 = vmatprep.subr.bf16.mxu1 %v13709_v33  ;;  %v13749_v42 = vcombine.high %v869_v18, %v873_v19  ;;  %v13748_v3 = vcombine.low %v869_v18, %v873_v19  ;;  %v16462_v18 = vld [vmem:[%s17303_s14 + $0x368] ss:$36 sps:$4 sm:$0xff]   ;;  %v16463_v19 = vld [vmem:[%s17303_s14 + $0x3b4] ss:$36 sps:$4 sm:$0xff]  }
 0x116   : > { %v18161_v49 = vpop.f32.mrb[8].mxu1 }
 0x117   : > { %v18166_v7 = vpop.f32.mrb[9].mxu1 }
 0x118   : > { %v18168_v54 = vpop.f32.mrb[10].mxu1  ;;  %6104 = vmatpush1.bf16.msra.mxu1 %v13708_v50  ;;  %v16459_v50 = vld [vmem:[%s17303_s14 + $0x320] ss:$36 sps:$4 sm:$0xff]  }
 0x119   : > { %v18173_v58 = vpop.f32.mrb[11].mxu1  ;;  %6105 = vmatprep.subr.bf16.mxu1 %v13717_v47  ;;  %5050 = vmatmul.mubr.bf16.gmra.mrb[36].mxu0 %v18153_v24  ;;  %v877_v47 = vld [vmem:[%s22602_s1 + $0xbc8] sm:$0xff] }
 0x11a   : > { %5059 = vmatprep.mubr.bf16.mxu0 %v18159_v25 }
 0x11b   : > { %5975 = vmatmul.mubr.bf16.gmra.mrb[52].mxu1 %v18005_v41  ;;  %v865_v41 = vld [vmem:[%s22602_s1 + $0xb68] sm:$0xff] }
 0x11c   : > { %5984 = vmatprep.mubr.bf16.mxu1 %v18016_v57  ;;  %6106 = vmatpush1.bf16.msra.mxu1 %v13716_v32  ;;  %v13741_v34 = vcombine.high %v861_v35, %v865_v41  ;;  %v13740_v17 = vcombine.low %v861_v35, %v865_v41  ;;  %v13757_v35 = vcombine.high %v877_v47, %v881_v45 }
 0x11d   : > { %6107 = vmatprep.subr.bf16.mxu1 %v13725_v0  ;;  %v16460_v0 = vld [vmem:[%s17303_s14 + $0x36c] ss:$36 sps:$4 sm:$0xff]   ;;  %v13765_v41 = vcombine.high %v17993_v37, %v17998_v40 }
 0x11e   : > { %v18191_v26 = vpop.f32.mrb[12].mxu1 }
 0x11f   : > { %v18196_v57 = vpop.f32.mrb[13].mxu1 }
 0x120   : > { %v18198_v2 = vpop.f32.mrb[14].mxu1  ;;  %6108 = vmatpush1.bf16.msra.mxu1 %v13724_v6 }
 0x121   : > { %v18203_v33 = vpop.f32.mrb[15].mxu1  ;;  %6109 = vmatprep.subr.bf16.mxu1 %v13733_v39  ;;  %5060 = vmatmul.mubr.bf16.gmra.mrb[40].mxu0 %v18183_v4  ;;  %v13756_v39 = vcombine.low %v877_v47, %v881_v45  ;;  %v16465_v47 = vld [vmem:[%s17303_s14 + $0x3b0] ss:$36 sps:$4 sm:$0xff]   ;;  %v16466_v45 = vld [vmem:[%s17303_s14 + $0x3fc] ss:$36 sps:$4 sm:$0xff]  }
 0x122   : > { %5069 = vmatprep.mubr.bf16.mxu0 %v18189_v13 }
 0x123   : > { %5985 = vmatmul.mubr.bf16.gmra.mrb[56].mxu1 %v18041_v21 }
 0x124   : > { %5994 = vmatprep.mubr.bf16.mxu1 %v18050_v14  ;;  %6110 = vmatpush1.bf16.msra.mxu1 %v13732_v11 }
 0x125   : > { %6111 = vmatprep.subr.bf16.mxu1 %v13741_v34 }
 0x126   : > { %v18216_v32 = vpop.f32.mrb[16].mxu1 }
 0x127   : > { %v18221_v21 = vpop.f32.mrb[17].mxu1 }
 0x128   : > { %22697 = vst [vmem:[#allocation2_spill] sm:$0xff] %v18221_v21  ;;  %v18224_v14 = vpop.f32.mrb[18].mxu1  ;;  %6112 = vmatpush1.bf16.msra.mxu1 %v13740_v17  ;;  %v909_v21 = vld [vmem:[%s22602_s1 + $0xcc8] sm:$0xff] }
 0x129   : > { %22698 = vst [vmem:[#allocation3_spill] sm:$0xff] %v18224_v14  ;;  %v18226_v6 = vpop.f32.mrb[19].mxu1  ;;  %6113 = vmatprep.subr.bf16.mxu1 %v13749_v42  ;;  %5070 = vmatmul.mubr.bf16.gmra.mrb[44].mxu0 %v16459_v50  ;;  %v18410_v14 = vld [vmem:[%s17303_s14 + $0x178] ss:$36 sps:$4 sm:$0xff]  }
 0x12a   : > { %22699 = vst [vmem:[#allocation4_spill] sm:$0xff] %v18226_v6  ;;  %5079 = vmatprep.mubr.bf16.mxu0 %v16460_v0 }
 0x12b   : > { %5995 = vmatmul.mubr.bf16.gmra.mrb[60].mxu1 %v18075_v23 }
 0x12c   : > { %6004 = vmatprep.mubr.bf16.mxu1 %v18084_v43  ;;  %6114 = vmatpush1.bf16.msra.mxu1 %v13748_v3 }
 0x12d   : > { %6115 = vmatprep.subr.bf16.mxu1 %v13757_v35 }
 0x12e   : > { %v18232_v11 = vpop.f32.mrb[20].mxu1 }
 0x12f   : > { %22700 = vst [vmem:[#allocation5_spill] sm:$0xff] %v18232_v11  ;;  %v18235_v34 = vpop.f32.mrb[21].mxu1 }
 0x130   : > { %22701 = vst [vmem:[#allocation6_spill] sm:$0xff] %v18235_v34  ;;  %v18238_v17 = vpop.f32.mrb[22].mxu1  ;;  %6116 = vmatpush1.bf16.msra.mxu1 %v13756_v39  ;;  %v18453_v34 = vld [vmem:[%s17303_s14 + $0x20c] ss:$36 sps:$4 sm:$0xff]  }
 0x131   : > { %22702 = vst [vmem:[#allocation7_spill] sm:$0xff] %v18238_v17  ;;  %v18240_v23 = vpop.f32.mrb[23].mxu1  ;;  %6278 = vmatprep.subr.bf16.mxu1 %v13765_v41  ;;  %5080 = vmatmul.mubr.bf16.gmra.mrb[48].mxu0 %v16462_v18  ;;  %v16469_v41 = vld [vmem:[%s17303_s14 + $0x444] ss:$36 sps:$4 sm:$0xff]  }
 0x132   : > { %22703 = vst [vmem:[#allocation8_spill] sm:$0xff] %v18240_v23  ;;  %5089 = vmatprep.mubr.bf16.mxu0 %v16463_v19  ;;  %v964_v17 = vld [vmem:[%s22602_s1 + $0xe80] sm:$0xff] }
 0x133   : > { %6005 = vmatmul.mubr.bf16.gmra.mrb[64].mxu1 %v18111_v12 }
 0x134   : > { %6014 = vmatprep.mubr.bf16.mxu1 %v18117_v53  ;;  %v16468_v53 = vld [vmem:[%s17303_s14 + $0x3f8] ss:$36 sps:$4 sm:$0xff]  }
 0x136   : > { %v18244_v43 = vpop.f32.mrb[24].mxu1 }
 0x137   : > { %22704 = vst [vmem:[#allocation9_spill] sm:$0xff] %v18244_v43  ;;  %v18247_v42 = vpop.f32.mrb[25].mxu1  ;;  %v18308_v43 = vld [vmem:[%s17303_s14 + $0xa4] ss:$36 sps:$4 sm:$0xff]  }
 0x138   : > { %22705 = vst [vmem:[#allocation10_spill] sm:$0xff] %v18247_v42  ;;  %v18250_v3 = vpop.f32.mrb[26].mxu1  ;;  %v912_v42 = vld [vmem:[%s22602_s1 + $0xce0] sm:$0xff] }
 0x139   : > { %22706 = vst [vmem:[#allocation11_spill] sm:$0xff] %v18250_v3  ;;  %v18252_v35 = vpop.f32.mrb[27].mxu1  ;;  %5090 = vmatmul.mubr.bf16.gmra.mrb[52].mxu0 %v16465_v47 }
 0x13a   : > { %22707 = vst [vmem:[#allocation12_spill] sm:$0xff] %v18252_v35  ;;  %5099 = vmatprep.mubr.bf16.mxu0 %v16466_v45 }
 0x13b   : > { %6015 = vmatmul.mubr.bf16.gmra.mrb[68].mxu1 %v18153_v24  ;;  %v18269_v24 = vld [vmem:[%s17303_s14 + $0x440] ss:$36 sps:$4 sm:$0xff]  }
 0x13c   : > { %6024 = vmatprep.mubr.bf16.mxu1 %v18159_v25  ;;  %v18272_v25 = vld [vmem:[%s17303_s14 + $0x14] ss:$36 sps:$4 sm:$0xff]  }
 0x13e   : > { %v18256_v12 = vpop.f32.mrb[28].mxu1 }
 0x13f   : > { %22708 = vst [vmem:[#allocation13_spill] sm:$0xff] %v18256_v12  ;;  %v18259_v39 = vpop.f32.mrb[29].mxu1  ;;  %v904_v12 = vld [vmem:[%s22602_s1 + $0xca0] sm:$0xff] }
 0x140   : > { %22709 = vst [vmem:[#allocation14_spill] sm:$0xff] %v18259_v39  ;;  %v18262_v8 = vpop.f32.mrb[30].mxu1  ;;  %v18277_v39 = vld [vmem:[%s17303_s14 + $0x10] ss:$36 sps:$4 sm:$0xff]  }
 0x141   : > { %22710 = vst [vmem:[#allocation15_spill] sm:$0xff] %v18262_v8  ;;  %v18264_v51 = vpop.f32.mrb[31].mxu1  ;;  %5100 = vmatmul.mubr.bf16.gmra.mrb[56].mxu0 %v16468_v53 }
 0x142   : > { %22711 = vst [vmem:[#allocation16_spill] sm:$0xff] %v18264_v51  ;;  %5109 = vmatprep.mubr.bf16.mxu0 %v16469_v41  ;;  %v18286_v51 = vld [vmem:[%s17303_s14 + $0x5c] ss:$36 sps:$4 sm:$0xff]  }
 0x143   : > { %6025 = vmatmul.mubr.bf16.gmra.mrb[72].mxu1 %v18183_v4  ;;  %v892_v4 = vld [vmem:[%s22602_s1 + $0xc40] sm:$0xff] }
 0x144   : > { %6034 = vmatprep.mubr.bf16.mxu1 %v18189_v13  ;;  %v896_v13 = vld [vmem:[%s22602_s1 + $0xc60] sm:$0xff] }
 0x145   : > { %v13771_v8 = vcombine.high %v892_v4, %v896_v13  ;;  %v13770_v35 = vcombine.low %v892_v4, %v896_v13  ;;  %v920_v4 = vld [vmem:[%s22602_s1 + $0xd20] sm:$0xff] }
 0x146   : > { %v924_v13 = vld [vmem:[%s22602_s1 + $0xd40] sm:$0xff] }
 0x149   : > { %5110 = vmatmul.mubr.bf16.gmra.mrb[60].mxu0 %v18269_v24 }
 0x14a   : > { %5152 = vmatprep.mubr.bf16.mxu0 %v18272_v25 }
 0x14b   : > { %6035 = vmatmul.mubr.bf16.gmra.mrb[76].mxu1 %v16459_v50  ;;  %v13762_v50 = vcombine.low %v18134_v27, %v18139_v29  ;;  %v18299_v27 = vld [vmem:[%s17303_s14 + $0x58] ss:$36 sps:$4 sm:$0xff]   ;;  %v908_v29 = vld [vmem:[%s22602_s1 + $0xcc0] sm:$0xff] }
 0x14c   : > { %6044 = vmatprep.mubr.bf16.mxu1 %v16460_v0  ;;  %v900_v0 = vld [vmem:[%s22602_s1 + $0xc80] sm:$0xff] }
 0x14d   : > { %v13779_v3 = vcombine.high %v900_v0, %v904_v12 }
 0x151   : > { %5153 = vmatmul.mubr.bf16.vlgmr.msra.gmra.mrb[0].mxu0 %v18277_v39 }
 0x152   : > { %5162 = vmatprep.mubr.bf16.mxu0 %v18286_v51  ;;  %5314 = vmatpush1.bf16.msra.mxu0 %v13762_v50  ;;  %v928_v50 = vld [vmem:[%s22602_s1 + $0xd60] sm:$0xff] }
 0x153   : > { %6045 = vmatmul.mubr.bf16.gmra.mrb[80].mxu1 %v16462_v18  ;;  %5315 = vmatprep.subr.bf16.mxu0 %v13771_v8  ;;  %v13778_v18 = vcombine.low %v900_v0, %v904_v12  ;;  %v916_v8 = vld [vmem:[%s22602_s1 + $0xd00] sm:$0xff]  ;;  %v18328_v0 = vld [vmem:[%s17303_s14 + $0xec] ss:$36 sps:$4 sm:$0xff]  }
 0x154   : > { %6054 = vmatprep.mubr.bf16.mxu1 %v16463_v19  ;;  %v13787_v19 = vcombine.high %v908_v29, %v912_v42  ;;  %v13795_v12 = vcombine.high %v916_v8, %v920_v4 }
 0x156   : > { %5316 = vmatpush1.bf16.msra.mxu0 %v13770_v35  ;;  %v13786_v35 = vcombine.low %v908_v29, %v912_v42  ;;  %v13803_v42 = vcombine.high %v924_v13, %v928_v50  ;;  %v936_v29 = vld [vmem:[%s22602_s1 + $0xda0] sm:$0xff] }
 0x157   : > { %5317 = vmatprep.subr.bf16.mxu0 %v13779_v3  ;;  %v18319_v3 = vld [vmem:[%s17303_s14 + $0xa0] ss:$36 sps:$4 sm:$0xff]  }
 0x159   : > { %5163 = vmatmul.mubr.bf16.gmra.mrb[4].mxu0 %v18299_v27 }
 0x15a   : > { %5172 = vmatprep.mubr.bf16.mxu0 %v18308_v43  ;;  %5318 = vmatpush1.bf16.msra.mxu0 %v13778_v18  ;;  %v13802_v18 = vcombine.low %v924_v13, %v928_v50  ;;  %v948_v13 = vld [vmem:[%s22602_s1 + $0xe00] sm:$0xff] }
 0x15b   : > { %6055 = vmatmul.mubr.bf16.gmra.mrb[84].mxu1 %v16465_v47  ;;  %5319 = vmatprep.subr.bf16.mxu0 %v13787_v19  ;;  %v13794_v47 = vcombine.low %v916_v8, %v920_v4  ;;  %v18339_v8 = vld [vmem:[%s17303_s14 + $0xe8] ss:$36 sps:$4 sm:$0xff]   ;;  %v940_v4 = vld [vmem:[%s22602_s1 + $0xdc0] sm:$0xff] }
 0x15c   : > { %6064 = vmatprep.mubr.bf16.mxu1 %v16466_v45  ;;  %v932_v45 = vld [vmem:[%s22602_s1 + $0xd80] sm:$0xff] }
 0x15d   : > { %v13811_v19 = vcombine.high %v932_v45, %v936_v29  ;;  %v952_v50 = vld [vmem:[%s22602_s1 + $0xe20] sm:$0xff] }
 0x15e   : > { %5320 = vmatpush1.bf16.msra.mxu0 %v13786_v35  ;;  %v944_v35 = vld [vmem:[%s22602_s1 + $0xde0] sm:$0xff] }
 0x15f   : > { %5321 = vmatprep.subr.bf16.mxu0 %v13795_v12  ;;  %v18348_v12 = vld [vmem:[%s17303_s14 + $0x134] ss:$36 sps:$4 sm:$0xff]  }
 0x161   : > { %5173 = vmatmul.mubr.bf16.gmra.mrb[8].mxu0 %v18319_v3 }
 0x162   : > { %5182 = vmatprep.mubr.bf16.mxu0 %v18328_v0  ;;  %5322 = vmatpush1.bf16.msra.mxu0 %v13794_v47  ;;  %v13818_v47 = vcombine.low %v940_v4, %v944_v35 }
 0x163   : > { %6065 = vmatmul.mubr.bf16.gmra.mrb[88].mxu1 %v16468_v53  ;;  %5323 = vmatprep.subr.bf16.mxu0 %v13803_v42  ;;  %v13810_v53 = vcombine.low %v932_v45, %v936_v29  ;;  %v13827_v42 = vcombine.high %v948_v13, %v952_v50  ;;  %v18361_v45 = vld [vmem:[%s17303_s14 + $0x130] ss:$36 sps:$4 sm:$0xff]   ;;  %v893_v29 = vld [vmem:[%s22602_s1 + $0xc48] sm:$0xff] }
 0x164   : > { %6074 = vmatprep.mubr.bf16.mxu1 %v16469_v41  ;;  %v13819_v41 = vcombine.high %v940_v4, %v944_v35  ;;  %v13826_v35 = vcombine.low %v948_v13, %v952_v50  ;;  %v968_v13 = vld [vmem:[%s22602_s1 + $0xea0] sm:$0xff]  ;;  %v18396_v50 = vld [vmem:[%s22602_s1 + $0x1008] sm:$0xff] }
 0x166   : > { %5324 = vmatpush1.bf16.msra.mxu0 %v13802_v18  ;;  %v897_v18 = vld [vmem:[%s22602_s1 + $0xc68] sm:$0xff] }
 0x167   : > { %5325 = vmatprep.subr.bf16.mxu0 %v13811_v19  ;;  %v18370_v19 = vld [vmem:[%s17303_s14 + $0x17c] ss:$36 sps:$4 sm:$0xff]   ;;  %v13773_v4 = vcombine.high %v893_v29, %v897_v18 }
 0x169   : > { %5183 = vmatmul.mubr.bf16.gmra.mrb[12].mxu0 %v18339_v8 }
 0x16a   : > { %5192 = vmatprep.mubr.bf16.mxu0 %v18348_v12  ;;  %5326 = vmatpush1.bf16.msra.mxu0 %v13810_v53  ;;  %v901_v53 = vld [vmem:[%s22602_s1 + $0xc88] sm:$0xff] }
 0x16b   : > { %6075 = vmatmul.mubr.bf16.gmra.mrb[92].mxu1 %v18269_v24  ;;  %5327 = vmatprep.subr.bf16.mxu0 %v13819_v41  ;;  %v956_v24 = vld [vmem:[%s22602_s1 + $0xe40] sm:$0xff]  ;;  %v905_v41 = vld [vmem:[%s22602_s1 + $0xca8] sm:$0xff] }
 0x16c   : > { %6117 = vmatprep.mubr.bf16.mxu1 %v18272_v25  ;;  %v960_v25 = vld [vmem:[%s22602_s1 + $0xe60] sm:$0xff]  ;;  %v13781_v11 = vcombine.high %v901_v53, %v905_v41 }
 0x16d   : > { %v13835_v23 = vcombine.high %v956_v24, %v960_v25  ;;  %v13834_v6 = vcombine.low %v956_v24, %v960_v25  ;;  %v13780_v24 = vcombine.low %v901_v53, %v905_v41 }
 0x16e   : > { %5328 = vmatpush1.bf16.msra.mxu0 %v13818_v47  ;;  %v18401_v47 = vld [vmem:[%s22602_s1 + $0x1028] sm:$0xff] }
 0x16f   : > { %5329 = vmatprep.subr.bf16.mxu0 %v13827_v42  ;;  %v13772_v42 = vcombine.low %v893_v29, %v897_v18  ;;  %v972_v29 = vld [vmem:[%s22602_s1 + $0xec0] sm:$0xff] }
 0x170   : > { %v976_v18 = vld [vmem:[%s22602_s1 + $0xee0] sm:$0xff] }
 0x171   : > { %5193 = vmatmul.mubr.bf16.gmra.mrb[16].mxu0 %v18361_v45  ;;  %v13850_v41 = vcombine.low %v972_v29, %v976_v18 }
 0x172   : > { %5202 = vmatprep.mubr.bf16.mxu0 %v18370_v19  ;;  %5330 = vmatpush1.bf16.msra.mxu0 %v13826_v35  ;;  %v921_v35 = vld [vmem:[%s22602_s1 + $0xd28] sm:$0xff] }
 0x173   : > { %6118 = vmatmul.mubr.bf16.vlgmr.msra.gmra.mrb[32].mxu1 %v18277_v39  ;;  %v22712_v39 = vcombine.low %v17993_v37, %v17998_v40  ;;  %v913_v37 = vld [vmem:[%s22602_s1 + $0xce8] sm:$0xff]  ;;  %5331 = vmatprep.subr.bf16.mxu0 %v13835_v23  ;;  %v13843_v40 = vcombine.high %v964_v17, %v968_v13 }
 0x174   : > { %6127 = vmatprep.mubr.bf16.mxu1 %v18286_v51  ;;  %v18419_v51 = vld [vmem:[%s17303_s14 + $0x1c4] ss:$36 sps:$4 sm:$0xff]   ;;  %v13789_v25 = vcombine.high %v909_v21, %v913_v37 }
 0x175   : > { %6279 = vmatpush1.bf16.msra.mxu1 %v22712_v39  ;;  %v917_v23 = vld [vmem:[%s22602_s1 + $0xd08] sm:$0xff]  ;;  %v13851_v39 = vcombine.high %v972_v29, %v976_v18 }
 0x176   : > { %6280 = vmatprep.subr.bf16.mxu1 %v13773_v4  ;;  %5332 = vmatpush1.bf16.msra.mxu0 %v13834_v6  ;;  %v13842_v4 = vcombine.low %v964_v17, %v968_v13  ;;  %v980_v6 = vld [vmem:[%s22602_s1 + $0xf00] sm:$0xff]  ;;  %v13788_v17 = vcombine.low %v909_v21, %v913_v37  ;;  %v13797_v53 = vcombine.high %v917_v23, %v921_v35  ;;  %v925_v13 = vld [vmem:[%s22602_s1 + $0xd48] sm:$0xff] }
 0x177   : > { %5333 = vmatprep.subr.bf16.mxu0 %v13843_v40  ;;  %v988_v21 = vld [vmem:[%s22602_s1 + $0xf40] sm:$0xff]  ;;  %v13796_v37 = vcombine.low %v917_v23, %v921_v35 }
 0x178   : > { %v996_v23 = vld [vmem:[%s22602_s1 + $0xf80] sm:$0xff] }
 0x179   : > { %6281 = vmatpush1.bf16.msra.mxu1 %v13772_v42  ;;  %5203 = vmatmul.mubr.bf16.gmra.mrb[20].mxu0 %v18410_v14  ;;  %v929_v42 = vld [vmem:[%s22602_s1 + $0xd68] sm:$0xff]  ;;  %v1000_v35 = vld [vmem:[%s22602_s1 + $0xfa0] sm:$0xff] }
 0x17a   : > { %6282 = vmatprep.subr.bf16.mxu1 %v13781_v11  ;;  %5212 = vmatprep.mubr.bf16.mxu0 %v18419_v51  ;;  %v984_v11 = vld [vmem:[%s22602_s1 + $0xf20] sm:$0xff]  ;;  %v13805_v29 = vcombine.high %v925_v13, %v929_v42 }
 0x17b   : > { %6128 = vmatmul.mubr.bf16.gmra.mrb[36].mxu1 %v18299_v27  ;;  %5334 = vmatpush1.bf16.msra.mxu0 %v13842_v4  ;;  %v18444_v27 = vld [vmem:[%s17303_s14 + $0x1c0] ss:$36 sps:$4 sm:$0xff]   ;;  %v13859_v40 = vcombine.high %v980_v6, %v984_v11  ;;  %v13858_v18 = vcombine.low %v980_v6, %v984_v11 }
 0x17c   : > { %6137 = vmatprep.mubr.bf16.mxu1 %v18308_v43  ;;  %5335 = vmatprep.subr.bf16.mxu0 %v13851_v39  ;;  %v992_v43 = vld [vmem:[%s22602_s1 + $0xf60] sm:$0xff]  ;;  %v13804_v39 = vcombine.low %v925_v13, %v929_v42 }
 0x17d   : > { %6283 = vmatpush1.bf16.msra.mxu1 %v13780_v24  ;;  %v933_v24 = vld [vmem:[%s22602_s1 + $0xd88] sm:$0xff]  ;;  %v13867_v4 = vcombine.high %v988_v21, %v992_v43  ;;  %v13866_v11 = vcombine.low %v988_v21, %v992_v43  ;;  %v1008_v13 = vld [vmem:[%s22602_s1 + $0xfe0] sm:$0xff]  ;;  %v13874_v43 = vcombine.low %v996_v23, %v1000_v35 }
 0x17e   : > { %6284 = vmatprep.subr.bf16.mxu1 %v13789_v25  ;;  %v937_v25 = vld [vmem:[%s22602_s1 + $0xda8] sm:$0xff] }
 0x17f   : > { %5336 = vmatpush1.bf16.msra.mxu0 %v13850_v41  ;;  %v13813_v6 = vcombine.high %v933_v24, %v937_v25  ;;  %v13875_v41 = vcombine.high %v996_v23, %v1000_v35  ;;  %v13812_v42 = vcombine.low %v933_v24, %v937_v25  ;;  %v18506_v23 = vld [vmem:[%s17303_s14 + $0x250] ss:$36 sps:$4 sm:$0xff]   ;;  %v957_v35 = vld [vmem:[%s22602_s1 + $0xe48] sm:$0xff] }
 0x180   : > { %5337 = vmatprep.subr.bf16.mxu0 %v13859_v40  ;;  %v18487_v40 = vld [vmem:[%s17303_s14 + $0x254] ss:$36 sps:$4 sm:$0xff]  }
 0x181   : > { %6285 = vmatpush1.bf16.msra.mxu1 %v13788_v17  ;;  %5213 = vmatmul.mubr.bf16.gmra.mrb[24].mxu0 %v18444_v27  ;;  %v941_v17 = vld [vmem:[%s22602_s1 + $0xdc8] sm:$0xff] }
 0x182   : > { %6286 = vmatprep.subr.bf16.mxu1 %v13797_v53  ;;  %5222 = vmatprep.mubr.bf16.mxu0 %v18453_v34  ;;  %v945_v53 = vld [vmem:[%s22602_s1 + $0xde8] sm:$0xff] }
 0x183   : > { %6138 = vmatmul.mubr.bf16.gmra.mrb[40].mxu1 %v18319_v3  ;;  %5338 = vmatpush1.bf16.msra.mxu0 %v13858_v18  ;;  %v18478_v3 = vld [vmem:[%s17303_s14 + $0x208] ss:$36 sps:$4 sm:$0xff]   ;;  %v13821_v21 = vcombine.high %v941_v17, %v945_v53  ;;  %v13820_v24 = vcombine.low %v941_v17, %v945_v53 }
 0x184   : > { %6147 = vmatprep.mubr.bf16.mxu1 %v18328_v0  ;;  %5339 = vmatprep.subr.bf16.mxu0 %v13867_v4  ;;  %v1004_v0 = vld [vmem:[%s22602_s1 + $0xfc0] sm:$0xff]  ;;  %v969_v17 = vld [vmem:[%s22602_s1 + $0xea8] sm:$0xff] }
 0x185   : > { %6287 = vmatpush1.bf16.msra.mxu1 %v13796_v37  ;;  %v949_v37 = vld [vmem:[%s22602_s1 + $0xe08] sm:$0xff]  ;;  %v13883_v18 = vcombine.high %v1004_v0, %v1008_v13  ;;  %v13882_v4 = vcombine.low %v1004_v0, %v1008_v13  ;;  %v16501_v0 = vld [vmem:[%s17303_s14 + $0x298] ss:$36 sps:$4 sm:$0xff]  }
 0x186   : > { %6288 = vmatprep.subr.bf16.mxu1 %v13805_v29  ;;  %v953_v29 = vld [vmem:[%s22602_s1 + $0xe28] sm:$0xff] }
 0x187   : > { %5340 = vmatpush1.bf16.msra.mxu0 %v13866_v11  ;;  %v13829_v25 = vcombine.high %v949_v37, %v953_v29  ;;  %v965_v11 = vld [vmem:[%s22602_s1 + $0xe88] sm:$0xff] }
 0x188   : > { %5341 = vmatprep.subr.bf16.mxu0 %v13875_v41  ;;  %v13845_v41 = vcombine.high %v965_v11, %v969_v17  ;;  %v973_v13 = vld [vmem:[%s22602_s1 + $0xec8] sm:$0xff] }
 0x189   : > { %6289 = vmatpush1.bf16.msra.mxu1 %v13804_v39  ;;  %5223 = vmatmul.mubr.bf16.gmra.mrb[28].mxu0 %v18478_v3  ;;  %v18515_v39 = vld [vmem:[%s17303_s14 + $0x29c] ss:$36 sps:$4 sm:$0xff]  }
 0x18a   : > { %6290 = vmatprep.subr.bf16.mxu1 %v13813_v6  ;;  %5232 = vmatprep.mubr.bf16.mxu0 %v18487_v40 }
 0x18b   : > { %6148 = vmatmul.mubr.bf16.gmra.mrb[44].mxu1 %v18339_v8  ;;  %5342 = vmatpush1.bf16.msra.mxu0 %v13874_v43  ;;  %v961_v8 = vld [vmem:[%s22602_s1 + $0xe68] sm:$0xff] }
 0x18c   : > { %6157 = vmatprep.mubr.bf16.mxu1 %v18348_v12  ;;  %5343 = vmatprep.subr.bf16.mxu0 %v13883_v18  ;;  %v13828_v12 = vcombine.low %v949_v37, %v953_v29  ;;  %v13837_v6 = vcombine.high %v957_v35, %v961_v8  ;;  %v13836_v53 = vcombine.low %v957_v35, %v961_v8  ;;  %v985_v43 = vld [vmem:[%s22602_s1 + $0xf28] sm:$0xff]  ;;  %v16504_v18 = vld [vmem:[%s17303_s14 + $0x2e0] ss:$36 sps:$4 sm:$0xff]  }
 0x18d   : > { %6291 = vmatpush1.bf16.msra.mxu1 %v13812_v42  ;;  %v977_v42 = vld [vmem:[%s22602_s1 + $0xee8] sm:$0xff] }
 0x18e   : > { %6292 = vmatprep.subr.bf16.mxu1 %v13821_v21  ;;  %v981_v21 = vld [vmem:[%s22602_s1 + $0xf08] sm:$0xff]  ;;  %v13852_v37 = vcombine.low %v973_v13, %v977_v42 }
 0x18f   : > { %5344 = vmatpush1.bf16.msra.mxu0 %v13882_v4  ;;  %v13861_v29 = vcombine.high %v981_v21, %v985_v43  ;;  %v16505_v4 = vld [vmem:[%s17303_s14 + $0x32c] ss:$36 sps:$4 sm:$0xff]  }
 0x190   : > { %5506 = vmatprep.subr.bf16.mxu0 %v17239_v9  ;;  %v16502_v9 = vld [vmem:[%s17303_s14 + $0x2e4] ss:$36 sps:$4 sm:$0xff]  }
 0x191   : > { %6293 = vmatpush1.bf16.msra.mxu1 %v13820_v24  ;;  %5233 = vmatmul.mubr.bf16.gmra.mrb[32].mxu0 %v18506_v23  ;;  %v989_v24 = vld [vmem:[%s22602_s1 + $0xf48] sm:$0xff] }
 0x192   : > { %6294 = vmatprep.subr.bf16.mxu1 %v13829_v25  ;;  %5242 = vmatprep.mubr.bf16.mxu0 %v18515_v39  ;;  %v993_v25 = vld [vmem:[%s22602_s1 + $0xf68] sm:$0xff] }
 0x193   : > { %6158 = vmatmul.mubr.bf16.gmra.mrb[48].mxu1 %v18361_v45  ;;  %v13844_v45 = vcombine.low %v965_v11, %v969_v17  ;;  %v997_v35 = vld [vmem:[%s22602_s1 + $0xf88] sm:$0xff] }
 0x194   : > { %6167 = vmatprep.mubr.bf16.mxu1 %v18370_v19  ;;  %v13853_v19 = vcombine.high %v973_v13, %v977_v42  ;;  %v1001_v8 = vld [vmem:[%s22602_s1 + $0xfa8] sm:$0xff]  ;;  %v13893_v42 = vcombine.high %v18396_v50, %v18401_v47 }
 0x195   : > { %6295 = vmatpush1.bf16.msra.mxu1 %v13828_v12  ;;  %v13868_v12 = vcombine.low %v989_v24, %v993_v25  ;;  %v16507_v11 = vld [vmem:[%s17303_s14 + $0x328] ss:$36 sps:$4 sm:$0xff]  }
 0x196   : > { %6296 = vmatprep.subr.bf16.mxu1 %v13837_v6  ;;  %v13877_v6 = vcombine.high %v997_v35, %v1001_v8  ;;  %v1005_v17 = vld [vmem:[%s22602_s1 + $0xfc8] sm:$0xff] }
 0x199   : > { %6297 = vmatpush1.bf16.msra.mxu1 %v13836_v53  ;;  %5243 = vmatmul.mubr.bf16.gmra.mrb[36].mxu0 %v16501_v0  ;;  %v1009_v53 = vld [vmem:[%s22602_s1 + $0xfe8] sm:$0xff] }
 0x19a   : > { %6298 = vmatprep.subr.bf16.mxu1 %v13845_v41  ;;  %5252 = vmatprep.mubr.bf16.mxu0 %v16502_v9  ;;  %v16508_v41 = vld [vmem:[%s17303_s14 + $0x374] ss:$36 sps:$4 sm:$0xff]   ;;  %v13884_v13 = vcombine.low %v1005_v17, %v1009_v53 }
 0x19b   : > { %6168 = vmatmul.mubr.bf16.gmra.mrb[52].mxu1 %v18410_v14  ;;  %v13860_v14 = vcombine.low %v981_v21, %v985_v43  ;;  %v16516_v21 = vld [vmem:[%s17303_s14 + $0x400] ss:$36 sps:$4 sm:$0xff]   ;;  %v16517_v43 = vld [vmem:[%s17303_s14 + $0x44c] ss:$36 sps:$4 sm:$0xff]  }
 0x19c   : > { %6177 = vmatprep.mubr.bf16.mxu1 %v18419_v51  ;;  %v13869_v51 = vcombine.high %v989_v24, %v993_v25  ;;  %v16525_v24 = vld [vmem:[%s17303_s14 + $0x60] ss:$36 sps:$4 sm:$0xff]   ;;  %v16526_v25 = vld [vmem:[%s17303_s14 + $0xac] ss:$36 sps:$4 sm:$0xff]  }
 0x19d   : > { %6299 = vmatpush1.bf16.msra.mxu1 %v13844_v45  ;;  %v16510_v45 = vld [vmem:[%s17303_s14 + $0x370] ss:$36 sps:$4 sm:$0xff]  }
 0x19e   : > { %6300 = vmatprep.subr.bf16.mxu1 %v13853_v19  ;;  %v16511_v19 = vld [vmem:[%s17303_s14 + $0x3bc] ss:$36 sps:$4 sm:$0xff]  }
 0x1a1   : > { %6301 = vmatpush1.bf16.msra.mxu1 %v13852_v37  ;;  %5253 = vmatmul.mubr.bf16.gmra.mrb[40].mxu0 %v16504_v18  ;;  %v16519_v37 = vld [vmem:[%s17303_s14 + $0x448] ss:$36 sps:$4 sm:$0xff]  }
 0x1a2   : > { %6302 = vmatprep.subr.bf16.mxu1 %v13861_v29  ;;  %5262 = vmatprep.mubr.bf16.mxu0 %v16505_v4  ;;  %v16523_v29 = vld [vmem:[%s17303_s14 + $0x64] ss:$36 sps:$4 sm:$0xff]  }
 0x1a3   : > { %6178 = vmatmul.mubr.bf16.gmra.mrb[56].mxu1 %v18444_v27  ;;  %v13876_v27 = vcombine.low %v997_v35, %v1001_v8  ;;  %v16537_v35 = vld [vmem:[%s17303_s14 + $0x180] ss:$36 sps:$4 sm:$0xff]   ;;  %v1037_v8 = vld [vmem:[%s22602_s1 + $0x10c8] sm:$0xff] }
 0x1a4   : > { %6187 = vmatprep.mubr.bf16.mxu1 %v18453_v34  ;;  %v13885_v34 = vcombine.high %v1005_v17, %v1009_v53  ;;  %v1049_v17 = vld [vmem:[%s22602_s1 + $0x1128] sm:$0xff] }
 0x1a5   : > { %6303 = vmatpush1.bf16.msra.mxu1 %v13860_v14 }
 0x1a6   : > { %6304 = vmatprep.subr.bf16.mxu1 %v13869_v51 }
 0x1a9   : > { %6305 = vmatpush1.bf16.msra.mxu1 %v13868_v12  ;;  %5263 = vmatmul.mubr.bf16.gmra.mrb[44].mxu0 %v16507_v11  ;;  %v1041_v12 = vld [vmem:[%s22602_s1 + $0x10e8] sm:$0xff] }
 0x1aa   : > { %6306 = vmatprep.subr.bf16.mxu1 %v13877_v6  ;;  %5272 = vmatprep.mubr.bf16.mxu0 %v16508_v41  ;;  %v16538_v6 = vld [vmem:[%s17303_s14 + $0x1cc] ss:$36 sps:$4 sm:$0xff]   ;;  %v13916_v53 = vcombine.low %v1037_v8, %v1041_v12 }
 0x1ab   : > { %6188 = vmatmul.mubr.bf16.gmra.mrb[60].mxu1 %v18478_v3  ;;  %v16513_v3 = vld [vmem:[%s17303_s14 + $0x3b8] ss:$36 sps:$4 sm:$0xff]  }
 0x1ac   : > { %6197 = vmatprep.mubr.bf16.mxu1 %v18487_v40  ;;  %v16514_v40 = vld [vmem:[%s17303_s14 + $0x404] ss:$36 sps:$4 sm:$0xff]  }
 0x1ad   : > { %6307 = vmatpush1.bf16.msra.mxu1 %v13876_v27  ;;  %v16540_v27 = vld [vmem:[%s17303_s14 + $0x1c8] ss:$36 sps:$4 sm:$0xff]  }
 0x1ae   : > { %6308 = vmatprep.subr.bf16.mxu1 %v13885_v34  ;;  %v1053_v34 = vld [vmem:[%s22602_s1 + $0x1148] sm:$0xff] }
 0x1b1   : > { %6309 = vmatpush1.bf16.msra.mxu1 %v13884_v13  ;;  %5273 = vmatmul.mubr.bf16.gmra.mrb[48].mxu0 %v16510_v45  ;;  %v1057_v13 = vld [vmem:[%s22602_s1 + $0x1168] sm:$0xff] }
 0x1b2   : > { %6471 = vmatprep.subr.bf16.mxu1 %v13893_v42  ;;  %5282 = vmatprep.mubr.bf16.mxu0 %v16511_v19  ;;  %v16541_v42 = vld [vmem:[%s17303_s14 + $0x214] ss:$36 sps:$4 sm:$0xff]  }
 0x1b3   : > { %6198 = vmatmul.mubr.bf16.gmra.mrb[64].mxu1 %v18506_v23  ;;  %v16522_v23 = vld [vmem:[%s17303_s14 + $0x1c] ss:$36 sps:$4 sm:$0xff]  }
 0x1b4   : > { %6207 = vmatprep.mubr.bf16.mxu1 %v18515_v39  ;;  %v16520_v39 = vld [vmem:[%s17303_s14 + $0x18] ss:$36 sps:$4 sm:$0xff]  }
 0x1b9   : > { %5283 = vmatmul.mubr.bf16.gmra.mrb[52].mxu0 %v16513_v3 }
 0x1ba   : > { %5292 = vmatprep.mubr.bf16.mxu0 %v16514_v40 }
 0x1bb   : > { %6208 = vmatmul.mubr.bf16.gmra.mrb[68].mxu1 %v16501_v0  ;;  %v18587_v0 = vld [vmem:[%s22602_s1 + $0x10] sm:$0xff] }
 0x1bc   : > { %6217 = vmatprep.mubr.bf16.mxu1 %v16502_v9  ;;  %v18592_v9 = vld [vmem:[%s22602_s1 + $0x30] sm:$0xff] }
 0x1c1   : > { %5293 = vmatmul.mubr.bf16.gmra.mrb[56].mxu0 %v16516_v21 }
 0x1c2   : > { %5302 = vmatprep.mubr.bf16.mxu0 %v16517_v43 }
 0x1c3   : > { %6218 = vmatmul.mubr.bf16.gmra.mrb[72].mxu1 %v16504_v18  ;;  %v13382_v18 = vcombine.low %v18587_v0, %v18592_v9 }
 0x1c4   : > { %6227 = vmatprep.mubr.bf16.mxu1 %v16505_v4  ;;  %v18605_v4 = vld [vmem:[%s17303_s14 + $0xa8] ss:$36 sps:$4 sm:$0xff]  }
 0x1c9   : > { %5303 = vmatmul.mubr.bf16.gmra.mrb[60].mxu0 %v16519_v37 }
 0x1ca   : > { %5345 = vmatprep.mubr.bf16.mxu0 %v16522_v23 }
 0x1cb   : > { %6228 = vmatmul.mubr.bf16.gmra.mrb[76].mxu1 %v16507_v11  ;;  %v1045_v11 = vld [vmem:[%s22602_s1 + $0x1108] sm:$0xff] }
 0x1cc   : > { %6237 = vmatprep.mubr.bf16.mxu1 %v16508_v41  ;;  %v13925_v41 = vcombine.high %v1045_v11, %v1049_v17 }
 0x1d1   : > { %5346 = vmatmul.mubr.bf16.vlgmr.msra.gmra.mrb[0].mxu0 %v16520_v39 }
 0x1d2   : > { %5355 = vmatprep.mubr.bf16.mxu0 %v16523_v29  ;;  %5507 = vmatpush1.bf16.msra.mxu0 %v17241_v10  ;;  %v18608_v10 = vld [vmem:[%s17303_s14 + $0xf4] ss:$36 sps:$4 sm:$0xff]  }
 0x1d3   : > { %6238 = vmatmul.mubr.bf16.gmra.mrb[80].mxu1 %v16510_v45  ;;  %5508 = vmatprep.subr.bf16.mxu0 %v17252_v15  ;;  %v18617_v15 = vld [vmem:[%s17303_s14 + $0xf0] ss:$36 sps:$4 sm:$0xff]   ;;  %v13924_v45 = vcombine.low %v1045_v11, %v1049_v17 }
 0x1d4   : > { %6247 = vmatprep.mubr.bf16.mxu1 %v16511_v19  ;;  %v13933_v19 = vcombine.high %v1053_v34, %v1057_v13  ;;  %v518_v17 = vld [vmem:[%s22602_s1 + $0x90] sm:$0xff] }
 0x1d6   : > { %5509 = vmatpush1.bf16.msra.mxu0 %v17267_v20  ;;  %v18620_v20 = vld [vmem:[%s17303_s14 + $0x13c] ss:$36 sps:$4 sm:$0xff]  }
 0x1d7   : > { %5510 = vmatprep.subr.bf16.mxu0 %v17270_v22  ;;  %v13383_v22 = vcombine.high %v18587_v0, %v18592_v9 }
 0x1d9   : > { %5356 = vmatmul.mubr.bf16.gmra.mrb[4].mxu0 %v16525_v24 }
 0x1da   : > { %5365 = vmatprep.mubr.bf16.mxu0 %v16526_v25  ;;  %5511 = vmatpush1.bf16.msra.mxu0 %v17286_v28  ;;  %v18631_v28 = vld [vmem:[%s17303_s14 + $0x138] ss:$36 sps:$4 sm:$0xff]  }
 0x1db   : > { %6248 = vmatmul.mubr.bf16.gmra.mrb[84].mxu1 %v16513_v3  ;;  %5512 = vmatprep.subr.bf16.mxu0 %v17289_v30  ;;  %v1021_v30 = vld [vmem:[%s22602_s1 + $0x1048] sm:$0xff] }
 0x1dc   : > { %6257 = vmatprep.mubr.bf16.mxu1 %v16514_v40  ;;  %v1061_v3 = vld [vmem:[%s22602_s1 + $0x1188] sm:$0xff] }
 0x1dd   : > { %v1065_v40 = vld [vmem:[%s22602_s1 + $0x11a8] sm:$0xff] }
 0x1de   : > { %5513 = vmatpush1.bf16.msra.mxu0 %v17309_v36  ;;  %v1025_v36 = vld [vmem:[%s22602_s1 + $0x1068] sm:$0xff] }
 0x1df   : > { %5514 = vmatprep.subr.bf16.mxu0 %v17312_v38  ;;  %v18640_v38 = vld [vmem:[%s17303_s14 + $0x184] ss:$36 sps:$4 sm:$0xff]  }
 0x1e1   : > { %5366 = vmatmul.mubr.bf16.gmra.mrb[8].mxu0 %v18605_v4 }
 0x1e2   : > { %5375 = vmatprep.mubr.bf16.mxu0 %v18608_v10  ;;  %5515 = vmatpush1.bf16.msra.mxu0 %v17327_v44  ;;  %v13901_v44 = vcombine.high %v1021_v30, %v1025_v36 }
 0x1e3   : > { %6258 = vmatmul.mubr.bf16.gmra.mrb[88].mxu1 %v16516_v21  ;;  %5516 = vmatprep.subr.bf16.mxu0 %v17330_v46  ;;  %v1029_v46 = vld [vmem:[%s22602_s1 + $0x1088] sm:$0xff]  ;;  %v13932_v21 = vcombine.low %v1053_v34, %v1057_v13  ;;  %v526_v34 = vld [vmem:[%s22602_s1 + $0xd0] sm:$0xff] }
 0x1e4   : > { %6267 = vmatprep.mubr.bf16.mxu1 %v16517_v43  ;;  %v13941_v43 = vcombine.high %v1061_v3, %v1065_v40  ;;  %v530_v13 = vld [vmem:[%s22602_s1 + $0xf0] sm:$0xff] }
 0x1e5   : > { %v13407_v9 = vcombine.high %v526_v34, %v530_v13 }
 0x1e6   : > { %5517 = vmatpush1.bf16.msra.mxu0 %v17345_v52  ;;  %v1033_v52 = vld [vmem:[%s22602_s1 + $0x10a8] sm:$0xff] }
 0x1e7   : > { %5518 = vmatprep.subr.bf16.mxu0 %v17351_v55  ;;  %v18654_v55 = vld [vmem:[%s22602_s1 + $0x18] sm:$0xff]  ;;  %v13909_v51 = vcombine.high %v1029_v46, %v1033_v52 }
 0x1e9   : > { %5376 = vmatmul.mubr.bf16.gmra.mrb[12].mxu0 %v18617_v15 }
 0x1ea   : > { %5385 = vmatprep.mubr.bf16.mxu0 %v18620_v20  ;;  %5519 = vmatpush1.bf16.msra.mxu0 %v17363_v60  ;;  %v18659_v60 = vld [vmem:[%s22602_s1 + $0x38] sm:$0xff] }
 0x1eb   : > { %6268 = vmatmul.mubr.bf16.gmra.mrb[92].mxu1 %v16519_v37  ;;  %5520 = vmatprep.subr.bf16.mxu0 %v17369_v63  ;;  %v22713_v63 = vcombine.low %v18396_v50, %v18401_v47  ;;  %v13384_v14 = vcombine.low %v18654_v55, %v18659_v60  ;;  %v13908_v50 = vcombine.low %v1029_v46, %v1033_v52  ;;  %v16543_v37 = vld [vmem:[%s17303_s14 + $0x210] ss:$36 sps:$4 sm:$0xff]   ;;  %v16556_v46 = vld [vmem:[%s17303_s14 + $0x37c] ss:$36 sps:$4 sm:$0xff]   ;;  %v16559_v52 = vld [vmem:[%s17303_s14 + $0x3c4] ss:$36 sps:$4 sm:$0xff]  }
 0x1ec   : > { %6310 = vmatprep.mubr.bf16.mxu1 %v16522_v23  ;;  %v13917_v47 = vcombine.high %v1037_v8, %v1041_v12  ;;  %v1069_v23 = vld [vmem:[%s22602_s1 + $0x11c8] sm:$0xff]  ;;  %v16567_v8 = vld [vmem:[%s17303_s14 + $0x450] ss:$36 sps:$4 sm:$0xff]   ;;  %v22714_v12 = vmov 0  }
 0x1ee   : > { %5521 = vmatpush1.bf16.msra.mxu0 %v17385_v5  ;;  %v13900_v5 = vcombine.low %v1021_v30, %v1025_v36  ;;  %v16547_v30 = vld [vmem:[%s17303_s14 + $0x2a4] ss:$36 sps:$4 sm:$0xff]  }
 0x1ef   : > { %6664 = vmatprep.subr.bf16.mxu0 %v13383_v22  ;;  %v16546_v22 = vld [vmem:[%s17303_s14 + $0x258] ss:$36 sps:$4 sm:$0xff]   ;;  %v16552_v36 = vld [vmem:[%s17303_s14 + $0x2e8] ss:$36 sps:$4 sm:$0xff]  }
 0x1f1   : > { %5386 = vmatmul.mubr.bf16.gmra.mrb[16].mxu0 %v18631_v28 }
 0x1f2   : > { %5395 = vmatprep.mubr.bf16.mxu0 %v18640_v38 }
 0x1f3   : > { %6311 = vmatmul.mubr.bf16.vlgmr.msra.gmra.mrb[32].mxu1 %v16520_v39  ;;  %v1073_v39 = vld [vmem:[%s22602_s1 + $0x11e8] sm:$0xff] }
 0x1f4   : > { %6472 = vmatpush1.bf16.msra.mxu1 %v22713_v63  ;;  %6320 = vmatprep.mubr.bf16.mxu1 %v16523_v29  ;;  %v16544_v29 = vld [vmem:[%s17303_s14 + $0x25c] ss:$36 sps:$4 sm:$0xff]  }
 0x1f5   : > { %6473 = vmatprep.subr.bf16.mxu1 %v13901_v44  ;;  %v16553_v44 = vld [vmem:[%s17303_s14 + $0x334] ss:$36 sps:$4 sm:$0xff]   ;;  %v16561_v63 = vld [vmem:[%s17303_s14 + $0x3c0] ss:$36 sps:$4 sm:$0xff]  }
 0x1f8   : > { %6474 = vmatpush1.bf16.msra.mxu1 %v13900_v5  ;;  %v16562_v5 = vld [vmem:[%s17303_s14 + $0x40c] ss:$36 sps:$4 sm:$0xff]  }
 0x1f9   : > { %6475 = vmatprep.subr.bf16.mxu1 %v13909_v51  ;;  %5396 = vmatmul.mubr.bf16.gmra.mrb[20].mxu0 %v16537_v35  ;;  %v16564_v51 = vld [vmem:[%s17303_s14 + $0x408] ss:$36 sps:$4 sm:$0xff]  }
 0x1fa   : > { %5405 = vmatprep.mubr.bf16.mxu0 %v16538_v6 }
 0x1fb   : > { %6321 = vmatmul.mubr.bf16.gmra.mrb[36].mxu1 %v16525_v24  ;;  %v13940_v24 = vcombine.low %v1061_v3, %v1065_v40  ;;  %v542_v40 = vld [vmem:[%s22602_s1 + $0x150] sm:$0xff] }
 0x1fc   : > { %6330 = vmatprep.mubr.bf16.mxu1 %v16526_v25  ;;  %6476 = vmatpush1.bf16.msra.mxu1 %v13908_v50  ;;  %v13949_v25 = vcombine.high %v1069_v23, %v1073_v39  ;;  %v514_v50 = vld [vmem:[%s22602_s1 + $0x70] sm:$0xff] }
 0x1fd   : > { %6477 = vmatprep.subr.bf16.mxu1 %v13917_v47  ;;  %v18733_v47 = vld [vmem:[%s17303_s14 + $0x20] ss:$36 sps:$4 sm:$0xff]  }
 0x200   : > { %6478 = vmatpush1.bf16.msra.mxu1 %v13916_v53  ;;  %v522_v53 = vld [vmem:[%s22602_s1 + $0xb0] sm:$0xff] }
 0x201   : > { %6479 = vmatprep.subr.bf16.mxu1 %v13925_v41  ;;  %5406 = vmatmul.mubr.bf16.gmra.mrb[24].mxu0 %v16540_v27  ;;  %v13398_v0 = vcombine.low %v518_v17, %v522_v53 }
 0x202   : > { %5415 = vmatprep.mubr.bf16.mxu0 %v16541_v42 }
 0x203   : > { %6331 = vmatmul.mubr.bf16.gmra.mrb[40].mxu1 %v18605_v4  ;;  %v13948_v4 = vcombine.low %v1069_v23, %v1073_v39  ;;  %v550_v39 = vld [vmem:[%s22602_s1 + $0x190] sm:$0xff] }
 0x204   : > { %6340 = vmatprep.mubr.bf16.mxu1 %v18608_v10  ;;  %6480 = vmatpush1.bf16.msra.mxu1 %v13924_v45  ;;  %v13385_v10 = vcombine.high %v18654_v55, %v18659_v60  ;;  %v538_v45 = vld [vmem:[%s22602_s1 + $0x130] sm:$0xff]  ;;  %v18841_v55 = vld [vmem:[%s22602_s1 + $0x418] sm:$0xff] }
 0x205   : > { %6481 = vmatprep.subr.bf16.mxu1 %v13933_v19  ;;  %v13406_v19 = vcombine.low %v526_v34, %v530_v13  ;;  %v590_v34 = vld [vmem:[%s22602_s1 + $0x2d0] sm:$0xff]  ;;  %v18846_v60 = vld [vmem:[%s22602_s1 + $0x438] sm:$0xff] }
 0x208   : > { %6482 = vmatpush1.bf16.msra.mxu1 %v13932_v21  ;;  %v546_v21 = vld [vmem:[%s22602_s1 + $0x170] sm:$0xff] }
 0x209   : > { %6483 = vmatprep.subr.bf16.mxu1 %v13941_v43  ;;  %5416 = vmatmul.mubr.bf16.gmra.mrb[28].mxu0 %v16543_v37  ;;  %v18770_v43 = vld [vmem:[%s17303_s14 + $0xb0] ss:$36 sps:$4 sm:$0xff]   ;;  %v13423_v23 = vcombine.high %v542_v40, %v546_v21 }
 0x20a   : > { %5425 = vmatprep.mubr.bf16.mxu0 %v16544_v29 }
 0x20b   : > { %6341 = vmatmul.mubr.bf16.gmra.mrb[44].mxu1 %v18617_v15  ;;  %v16549_v15 = vld [vmem:[%s17303_s14 + $0x2a0] ss:$36 sps:$4 sm:$0xff]  }
 0x20c   : > { %6350 = vmatprep.mubr.bf16.mxu1 %v18620_v20  ;;  %6484 = vmatpush1.bf16.msra.mxu1 %v13940_v24  ;;  %v16550_v20 = vld [vmem:[%s17303_s14 + $0x2ec] ss:$36 sps:$4 sm:$0xff]   ;;  %v13422_v24 = vcombine.low %v542_v40, %v546_v21 }
 0x20d   : > { %6485 = vmatprep.subr.bf16.mxu1 %v13949_v25  ;;  %v602_v40 = vld [vmem:[%s22602_s1 + $0x330] sm:$0xff] }
 0x210   : > { %6486 = vmatpush1.bf16.msra.mxu1 %v13948_v4  ;;  %v558_v4 = vld [vmem:[%s22602_s1 + $0x1d0] sm:$0xff] }
 0x211   : > { %7629 = vmatprep.subr.bf16.mxu1 %v13385_v10  ;;  %5426 = vmatmul.mubr.bf16.gmra.mrb[32].mxu0 %v16546_v22  ;;  %v562_v10 = vld [vmem:[%s22602_s1 + $0x1f0] sm:$0xff] }
 0x212   : > { %5435 = vmatprep.mubr.bf16.mxu0 %v16547_v30 }
 0x213   : > { %6351 = vmatmul.mubr.bf16.gmra.mrb[48].mxu1 %v18631_v28  ;;  %v16555_v28 = vld [vmem:[%s17303_s14 + $0x330] ss:$36 sps:$4 sm:$0xff]  }
 0x214   : > { %6360 = vmatprep.mubr.bf16.mxu1 %v18640_v38  ;;  %v16558_v38 = vld [vmem:[%s17303_s14 + $0x378] ss:$36 sps:$4 sm:$0xff]  }
 0x219   : > { %5436 = vmatmul.mubr.bf16.gmra.mrb[36].mxu0 %v16549_v15 }
 0x21a   : > { %5445 = vmatprep.mubr.bf16.mxu0 %v16550_v20 }
 0x21b   : > { %6361 = vmatmul.mubr.bf16.gmra.mrb[52].mxu1 %v16537_v35  ;;  %v16565_v35 = vld [vmem:[%s17303_s14 + $0x454] ss:$36 sps:$4 sm:$0xff]  }
 0x21c   : > { %6370 = vmatprep.mubr.bf16.mxu1 %v16538_v6  ;;  %v510_v6 = vld [vmem:[%s22602_s1 + $0x50] sm:$0xff] }
 0x21d   : > { %v13391_v11 = vcombine.high %v510_v6, %v514_v50  ;;  %v13390_v41 = vcombine.low %v510_v6, %v514_v50  ;;  %v586_v6 = vld [vmem:[%s22602_s1 + $0x2b0] sm:$0xff] }
 0x221   : > { %5446 = vmatmul.mubr.bf16.gmra.mrb[40].mxu0 %v16552_v36 }
 0x222   : > { %5455 = vmatprep.mubr.bf16.mxu0 %v16553_v44 }
 0x223   : > { %6371 = vmatmul.mubr.bf16.gmra.mrb[56].mxu1 %v16540_v27  ;;  %v13399_v27 = vcombine.high %v518_v17, %v522_v53  ;;  %v523_v17 = vld [vmem:[%s22602_s1 + $0xb8] sm:$0xff] }
 0x224   : > { %6380 = vmatprep.mubr.bf16.mxu1 %v16541_v42  ;;  %v18753_v42 = vld [vmem:[%s17303_s14 + $0x68] ss:$36 sps:$4 sm:$0xff]  }
 0x229   : > { %5456 = vmatmul.mubr.bf16.gmra.mrb[44].mxu0 %v16555_v28 }
 0x22a   : > { %5465 = vmatprep.mubr.bf16.mxu0 %v16556_v46 }
 0x22b   : > { %6381 = vmatmul.mubr.bf16.gmra.mrb[60].mxu1 %v16543_v37 }
 0x22c   : > { %6390 = vmatprep.mubr.bf16.mxu1 %v16544_v29  ;;  %v554_v29 = vld [vmem:[%s22602_s1 + $0x1b0] sm:$0xff] }
 0x22d   : > { %v13431_v25 = vcombine.high %v550_v39, %v554_v29 }
 0x231   : > { %5466 = vmatmul.mubr.bf16.gmra.mrb[48].mxu0 %v16558_v38 }
 0x232   : > { %5475 = vmatprep.mubr.bf16.mxu0 %v16559_v52 }
 0x233   : > { %6391 = vmatmul.mubr.bf16.gmra.mrb[64].mxu1 %v16546_v22  ;;  %v18787_v22 = vld [vmem:[%s17303_s14 + $0xf8] ss:$36 sps:$4 sm:$0xff]  }
 0x234   : > { %6400 = vmatprep.mubr.bf16.mxu1 %v16547_v30  ;;  %v13430_v30 = vcombine.low %v550_v39, %v554_v29  ;;  %v535_v39 = vld [vmem:[%s22602_s1 + $0x118] sm:$0xff] }
 0x235   : > { %v539_v29 = vld [vmem:[%s22602_s1 + $0x138] sm:$0xff] }
 0x239   : > { %5476 = vmatmul.mubr.bf16.gmra.mrb[52].mxu0 %v16561_v63 }
 0x23a   : > { %5485 = vmatprep.mubr.bf16.mxu0 %v16562_v5 }
 0x23b   : > { %6401 = vmatmul.mubr.bf16.gmra.mrb[68].mxu1 %v16549_v15  ;;  %v13439_v15 = vcombine.high %v558_v4, %v562_v10 }
 0x23c   : > { %6410 = vmatprep.mubr.bf16.mxu1 %v16550_v20  ;;  %v566_v20 = vld [vmem:[%s22602_s1 + $0x210] sm:$0xff] }
 0x241   : > { %5486 = vmatmul.mubr.bf16.gmra.mrb[56].mxu0 %v16564_v51 }
 0x242   : > { %5495 = vmatprep.mubr.bf16.mxu0 %v16565_v35 }
 0x243   : > { %6411 = vmatmul.mubr.bf16.gmra.mrb[72].mxu1 %v16552_v36  ;;  %v570_v36 = vld [vmem:[%s22602_s1 + $0x230] sm:$0xff] }
 0x244   : > { %6420 = vmatprep.mubr.bf16.mxu1 %v16553_v44  ;;  %v13438_v44 = vcombine.low %v558_v4, %v562_v10  ;;  %v18882_v10 = vld [vmem:[%s17303_s14 + $0x1d0] ss:$36 sps:$4 sm:$0xff]  }
 0x249   : > { %5496 = vmatmul.mubr.bf16.gmra.mrb[60].mxu0 %v16567_v8 }
 0x24a   : > { %5538 = vmatprep.mubr.bf16.mxu0 %v22714_v12 }
 0x24b   : > { %6421 = vmatmul.mubr.bf16.gmra.mrb[76].mxu1 %v16555_v28  ;;  %v13447_v28 = vcombine.high %v566_v20, %v570_v36 }
 0x24c   : > { %6430 = vmatprep.mubr.bf16.mxu1 %v16556_v46  ;;  %v574_v46 = vld [vmem:[%s22602_s1 + $0x250] sm:$0xff] }
 0x251   : > { %5539 = vmatmul.mubr.bf16.vlgmr.msra.gmra.mrb[0].mxu0 %v18733_v47 }
 0x252   : > { %6665 = vmatpush1.bf16.msra.mxu0 %v13382_v18  ;;  %5548 = vmatprep.mubr.bf16.mxu0 %v22714_v12  ;;  %v534_v18 = vld [vmem:[%s22602_s1 + $0x110] sm:$0xff] }
 0x253   : > { %6431 = vmatmul.mubr.bf16.gmra.mrb[80].mxu1 %v16558_v38  ;;  %6666 = vmatprep.subr.bf16.mxu0 %v13391_v11  ;;  %v13415_v3 = vcombine.high %v534_v18, %v538_v45  ;;  %v13414_v37 = vcombine.low %v534_v18, %v538_v45  ;;  %v578_v38 = vld [vmem:[%s22602_s1 + $0x270] sm:$0xff]  ;;  %v519_v11 = vld [vmem:[%s22602_s1 + $0x98] sm:$0xff] }
 0x254   : > { %6440 = vmatprep.mubr.bf16.mxu1 %v16559_v52  ;;  %v18805_v52 = vld [vmem:[%s17303_s14 + $0x140] ss:$36 sps:$4 sm:$0xff]   ;;  %v13454_v53 = vcombine.low %v574_v46, %v578_v38  ;;  %v13401_v13 = vcombine.high %v519_v11, %v523_v17  ;;  %v527_v18 = vld [vmem:[%s22602_s1 + $0xd8] sm:$0xff]  ;;  %v13400_v21 = vcombine.low %v519_v11, %v523_v17 }
 0x255   : > { %v531_v45 = vld [vmem:[%s22602_s1 + $0xf8] sm:$0xff] }
 0x256   : > { %6667 = vmatpush1.bf16.msra.mxu0 %v13390_v41  ;;  %v13408_v4 = vcombine.low %v527_v18, %v531_v45  ;;  %v18913_v11 = vld [vmem:[%s17303_s14 + $0x218] ss:$36 sps:$4 sm:$0xff]  }
 0x257   : > { %6668 = vmatprep.subr.bf16.mxu0 %v13399_v27 }
 0x259   : > { %5549 = vmatmul.mubr.bf16.gmra.mrb[4].mxu0 %v18753_v42 }
 0x25a   : > { %6669 = vmatpush1.bf16.msra.mxu0 %v13398_v0  ;;  %5558 = vmatprep.mubr.bf16.mxu0 %v22714_v12 }
 0x25b   : > { %6441 = vmatmul.mubr.bf16.gmra.mrb[84].mxu1 %v16561_v63  ;;  %6670 = vmatprep.subr.bf16.mxu0 %v13407_v9  ;;  %v13446_v63 = vcombine.low %v566_v20, %v570_v36  ;;  %v543_v20 = vld [vmem:[%s22602_s1 + $0x158] sm:$0xff] }
 0x25c   : > { %6450 = vmatprep.mubr.bf16.mxu1 %v16562_v5  ;;  %v511_v5 = vld [vmem:[%s22602_s1 + $0x58] sm:$0xff] }
 0x25d   : > { %v547_v36 = vld [vmem:[%s22602_s1 + $0x178] sm:$0xff] }
 0x25e   : > { %6671 = vmatpush1.bf16.msra.mxu0 %v13406_v19 }
 0x25f   : > { %6672 = vmatprep.subr.bf16.mxu0 %v13415_v3  ;;  %v598_v3 = vld [vmem:[%s22602_s1 + $0x310] sm:$0xff] }
 0x261   : > { %5559 = vmatmul.mubr.bf16.gmra.mrb[8].mxu0 %v18770_v43 }
 0x262   : > { %6673 = vmatpush1.bf16.msra.mxu0 %v13414_v37  ;;  %5568 = vmatprep.mubr.bf16.mxu0 %v22714_v12  ;;  %v13409_v37 = vcombine.high %v527_v18, %v531_v45 }
 0x263   : > { %6451 = vmatmul.mubr.bf16.gmra.mrb[88].mxu1 %v16564_v51  ;;  %6674 = vmatprep.subr.bf16.mxu0 %v13423_v23  ;;  %v515_v51 = vld [vmem:[%s22602_s1 + $0x78] sm:$0xff] }
 0x264   : > { %6460 = vmatprep.mubr.bf16.mxu1 %v16565_v35  ;;  %v13455_v35 = vcombine.high %v574_v46, %v578_v38  ;;  %v13393_v50 = vcombine.high %v511_v5, %v515_v51  ;;  %v13392_v27 = vcombine.low %v511_v5, %v515_v51  ;;  %v618_v46 = vld [vmem:[%s22602_s1 + $0x3b0] sm:$0xff]  ;;  %v13416_v38 = vcombine.low %v535_v39, %v539_v29  ;;  %v551_v51 = vld [vmem:[%s22602_s1 + $0x198] sm:$0xff] }
 0x266   : > { %6675 = vmatpush1.bf16.msra.mxu0 %v13422_v24  ;;  %v13479_v24 = vcombine.high %v598_v3, %v602_v40 }
 0x267   : > { %6676 = vmatprep.subr.bf16.mxu0 %v13431_v25  ;;  %v610_v25 = vld [vmem:[%s22602_s1 + $0x370] sm:$0xff] }
 0x269   : > { %5569 = vmatmul.mubr.bf16.gmra.mrb[12].mxu0 %v18787_v22 }
 0x26a   : > { %6677 = vmatpush1.bf16.msra.mxu0 %v13430_v30  ;;  %5578 = vmatprep.mubr.bf16.mxu0 %v22714_v12  ;;  %v13417_v30 = vcombine.high %v535_v39, %v539_v29  ;;  %v642_v39 = vld [vmem:[%s22602_s1 + $0x470] sm:$0xff]  ;;  %v575_v29 = vld [vmem:[%s22602_s1 + $0x258] sm:$0xff] }
 0x26b   : > { %6461 = vmatmul.mubr.bf16.gmra.mrb[92].mxu1 %v16567_v8  ;;  %6678 = vmatprep.subr.bf16.mxu0 %v13439_v15  ;;  %v582_v8 = vld [vmem:[%s22602_s1 + $0x290] sm:$0xff]  ;;  %v13478_v15 = vcombine.low %v598_v3, %v602_v40  ;;  %v571_v3 = vld [vmem:[%s22602_s1 + $0x238] sm:$0xff] }
 0x26c   : > { %6503 = vmatprep.mubr.bf16.mxu1 %v22714_v12  ;;  %v13463_v41 = vcombine.high %v582_v8, %v586_v6  ;;  %v13462_v9 = vcombine.low %v582_v8, %v586_v6  ;;  %v626_v6 = vld [vmem:[%s22602_s1 + $0x3f0] sm:$0xff] }
 0x26e   : > { %6679 = vmatpush1.bf16.msra.mxu0 %v13438_v44 }
 0x26f   : > { %6680 = vmatprep.subr.bf16.mxu0 %v13447_v28  ;;  %v614_v28 = vld [vmem:[%s22602_s1 + $0x390] sm:$0xff] }
 0x270   : > { %v13495_v8 = vcombine.high %v614_v28, %v618_v46 }
 0x271   : > { %5579 = vmatmul.mubr.bf16.gmra.mrb[16].mxu0 %v18805_v52 }
 0x272   : > { %6681 = vmatpush1.bf16.msra.mxu0 %v13446_v63  ;;  %5588 = vmatprep.mubr.bf16.mxu0 %v22714_v12  ;;  %v13425_v63 = vcombine.high %v543_v20, %v547_v36 }
 0x273   : > { %6504 = vmatmul.mubr.bf16.vlgmr.msra.gmra.mrb[32].mxu1 %v18733_v47  ;;  %6682 = vmatprep.subr.bf16.mxu0 %v13455_v35  ;;  %v594_v47 = vld [vmem:[%s22602_s1 + $0x2f0] sm:$0xff]  ;;  %v555_v35 = vld [vmem:[%s22602_s1 + $0x1b8] sm:$0xff] }
 0x274   : > { %7630 = vmatpush1.bf16.msra.mxu1 %v13384_v14  ;;  %6513 = vmatprep.mubr.bf16.mxu1 %v22714_v12  ;;  %v18849_v14 = vld [vmem:[%s17303_s14 + $0x188] ss:$36 sps:$4 sm:$0xff]   ;;  %v13471_v19 = vcombine.high %v590_v34, %v594_v47  ;;  %v13470_v23 = vcombine.low %v590_v34, %v594_v47  ;;  %v13433_v17 = vcombine.high %v551_v51, %v555_v35 }
 0x275   : > { %7631 = vmatprep.subr.bf16.mxu1 %v13393_v50  ;;  %v13424_v50 = vcombine.low %v543_v20, %v547_v36  ;;  %v13432_v47 = vcombine.low %v551_v51, %v555_v35  ;;  %v646_v20 = vld [vmem:[%s22602_s1 + $0x490] sm:$0xff] }
 0x276   : > { %6683 = vmatpush1.bf16.msra.mxu0 %v13454_v53  ;;  %v13494_v53 = vcombine.low %v614_v28, %v618_v46  ;;  %v650_v36 = vld [vmem:[%s22602_s1 + $0x4b0] sm:$0xff]  ;;  %v583_v28 = vld [vmem:[%s22602_s1 + $0x298] sm:$0xff] }
 0x277   : > { %6684 = vmatprep.subr.bf16.mxu0 %v13463_v41  ;;  %v559_v41 = vld [vmem:[%s22602_s1 + $0x1d8] sm:$0xff]  ;;  %v654_v51 = vld [vmem:[%s22602_s1 + $0x4d0] sm:$0xff] }
 0x278   : > { %7632 = vmatpush1.bf16.msra.mxu1 %v13392_v27  ;;  %v563_v27 = vld [vmem:[%s22602_s1 + $0x1f8] sm:$0xff]  ;;  %v658_v35 = vld [vmem:[%s22602_s1 + $0x4f0] sm:$0xff] }
 0x279   : > { %7633 = vmatprep.subr.bf16.mxu1 %v13401_v13  ;;  %5589 = vmatmul.mubr.bf16.gmra.mrb[20].mxu0 %v18849_v14  ;;  %v630_v13 = vld [vmem:[%s22602_s1 + $0x410] sm:$0xff]  ;;  %v13441_v18 = vcombine.high %v559_v41, %v563_v27  ;;  %v587_v46 = vld [vmem:[%s22602_s1 + $0x2b8] sm:$0xff] }
 0x27a   : > { %6685 = vmatpush1.bf16.msra.mxu0 %v13462_v9  ;;  %5598 = vmatprep.mubr.bf16.mxu0 %v22714_v12  ;;  %v634_v9 = vld [vmem:[%s22602_s1 + $0x430] sm:$0xff] }
 0x27b   : > { %6514 = vmatmul.mubr.bf16.gmra.mrb[36].mxu1 %v18753_v42  ;;  %6686 = vmatprep.subr.bf16.mxu0 %v13471_v19  ;;  %v606_v42 = vld [vmem:[%s22602_s1 + $0x350] sm:$0xff]  ;;  %v567_v19 = vld [vmem:[%s22602_s1 + $0x218] sm:$0xff]  ;;  %v13511_v40 = vcombine.high %v630_v13, %v634_v9 }
 0x27c   : > { %6523 = vmatprep.mubr.bf16.mxu1 %v22714_v12  ;;  %7634 = vmatpush1.bf16.msra.mxu1 %v13400_v21  ;;  %v13487_v44 = vcombine.high %v606_v42, %v610_v25  ;;  %v13486_v5 = vcombine.low %v606_v42, %v610_v25  ;;  %v18937_v21 = vld [vmem:[%s17303_s14 + $0x4] ss:$36 sps:$4 sm:$0xff]   ;;  %v13510_v42 = vcombine.low %v630_v13, %v634_v9  ;;  %v599_v13 = vld [vmem:[%s22602_s1 + $0x318] sm:$0xff] }
 0x27d   : > { %7635 = vmatprep.subr.bf16.mxu1 %v13409_v37  ;;  %v13449_v37 = vcombine.high %v567_v19, %v571_v3  ;;  %v13448_v25 = vcombine.low %v567_v19, %v571_v3  ;;  %v603_v9 = vld [vmem:[%s22602_s1 + $0x338] sm:$0xff]  ;;  %v670_v3 = vld [vmem:[%s22602_s1 + $0x550] sm:$0xff] }
 0x27e   : > { %6687 = vmatpush1.bf16.msra.mxu0 %v13470_v23  ;;  %v638_v23 = vld [vmem:[%s22602_s1 + $0x450] sm:$0xff]  ;;  %v13481_v19 = vcombine.high %v599_v13, %v603_v9 }
 0x27f   : > { %6688 = vmatprep.subr.bf16.mxu0 %v13479_v24  ;;  %v579_v24 = vld [vmem:[%s22602_s1 + $0x278] sm:$0xff] }
 0x280   : > { %7636 = vmatpush1.bf16.msra.mxu1 %v13408_v4  ;;  %v13519_v4 = vcombine.high %v638_v23, %v642_v39 }
 0x281   : > { %5599 = vmatmul.mubr.bf16.gmra.mrb[24].mxu0 %v18882_v10  ;;  %7637 = vmatprep.subr.bf16.mxu1 %v13417_v30  ;;  %v18953_v30 = vld [vmem:[%s17303_s14] ss:$36 sps:$4 sm:$0xff]  }
 0x282   : > { %6689 = vmatpush1.bf16.msra.mxu0 %v13478_v15  ;;  %5608 = vmatprep.mubr.bf16.mxu0 %v22714_v12  ;;  %v13457_v15 = vcombine.high %v575_v29, %v579_v24 }
 0x283   : > { %6524 = vmatmul.mubr.bf16.gmra.mrb[40].mxu1 %v18770_v43  ;;  %6690 = vmatprep.subr.bf16.mxu0 %v13487_v44  ;;  %v622_v43 = vld [vmem:[%s22602_s1 + $0x3d0] sm:$0xff] }
 0x284   : > { %6533 = vmatprep.mubr.bf16.mxu1 %v22714_v12  ;;  %7638 = vmatpush1.bf16.msra.mxu1 %v13416_v38  ;;  %v13503_v34 = vcombine.high %v622_v43, %v626_v6  ;;  %v13502_v45 = vcombine.low %v622_v43, %v626_v6  ;;  %v18964_v44 = vld [vmem:[%s17303_s14 + $0x4c] ss:$36 sps:$4 sm:$0xff]   ;;  %v13518_v38 = vcombine.low %v638_v23, %v642_v39  ;;  %v595_v43 = vld [vmem:[%s22602_s1 + $0x2f8] sm:$0xff] }
 0x285   : > { %7639 = vmatprep.subr.bf16.mxu1 %v13425_v63  ;;  %v13456_v63 = vcombine.low %v575_v29, %v579_v24  ;;  %v13526_v6 = vcombine.low %v646_v20, %v650_v36  ;;  %v13480_v39 = vcombine.low %v599_v13, %v603_v9  ;;  %v19021_v24 = vld [vmem:[%s17303_s14 + $0x90] ss:$36 sps:$4 sm:$0xff]  }
 0x286   : > { %6691 = vmatpush1.bf16.msra.mxu0 %v13486_v5  ;;  %v13465_v5 = vcombine.high %v583_v28, %v587_v46 }
 0x287   : > { %6692 = vmatprep.subr.bf16.mxu0 %v13495_v8  ;;  %v591_v8 = vld [vmem:[%s22602_s1 + $0x2d8] sm:$0xff] }
 0x288   : > { %7640 = vmatpush1.bf16.msra.mxu1 %v13424_v50  ;;  %v13464_v50 = vcombine.low %v583_v28, %v587_v46 }
 0x289   : > { %5609 = vmatmul.mubr.bf16.gmra.mrb[28].mxu0 %v18913_v11  ;;  %7641 = vmatprep.subr.bf16.mxu1 %v13433_v17  ;;  %v13535_v17 = vcombine.high %v654_v51, %v658_v35 }
 0x28a   : > { %6693 = vmatpush1.bf16.msra.mxu0 %v13494_v53  ;;  %6696 = vmatprep.mubr.bf16.mxu0 %v18937_v21  ;;  %v18987_v53 = vld [vmem:[%s17303_s14 + $0x48] ss:$36 sps:$4 sm:$0xff]  }
 0x28b   : > { %6534 = vmatmul.mubr.bf16.gmra.mrb[44].mxu1 %v18787_v22  ;;  %6694 = vmatprep.subr.bf16.mxu0 %v13503_v34  ;;  %v13440_v22 = vcombine.low %v559_v41, %v563_v27  ;;  %v13473_v41 = vcombine.high %v591_v8, %v595_v43  ;;  %v662_v27 = vld [vmem:[%s22602_s1 + $0x510] sm:$0xff] }
 0x28c   : > { %6543 = vmatprep.mubr.bf16.mxu1 %v22714_v12  ;;  %7642 = vmatpush1.bf16.msra.mxu1 %v13432_v47  ;;  %v666_v34 = vld [vmem:[%s22602_s1 + $0x530] sm:$0xff] }
 0x28d   : > { %7643 = vmatprep.subr.bf16.mxu1 %v13441_v18  ;;  %v18998_v47 = vld [vmem:[%s17303_s14 + $0x94] ss:$36 sps:$4 sm:$0xff]   ;;  %v13534_v18 = vcombine.low %v654_v51, %v658_v35  ;;  %v13542_v23 = vcombine.low %v662_v27, %v666_v34 }
 0x28e   : > { %6695 = vmatpush1.bf16.msra.mxu0 %v13502_v45  ;;  %v13472_v45 = vcombine.low %v591_v8, %v595_v43  ;;  %v627_v51 = vld [vmem:[%s22602_s1 + $0x3f8] sm:$0xff] }
 0x28f   : > { %6857 = vmatprep.subr.bf16.mxu0 %v13511_v40  ;;  %v674_v40 = vld [vmem:[%s22602_s1 + $0x570] sm:$0xff] }
 0x290   : > { %7644 = vmatpush1.bf16.msra.mxu1 %v13440_v22  ;;  %v607_v22 = vld [vmem:[%s22602_s1 + $0x358] sm:$0xff]  ;;  %v13551_v29 = vcombine.high %v670_v3, %v674_v40  ;;  %v13550_v28 = vcombine.low %v670_v3, %v674_v40  ;;  %v19079_v3 = vld [vmem:[%s17303_s14 + $0x120] ss:$36 sps:$4 sm:$0xff]   ;;  %v710_v40 = vld [vmem:[%s22602_s1 + $0x690] sm:$0xff] }
 0x291   : > { %6697 = vmatmul.mubr.bf16.vlgmr.msra.gmra.mrb[64].mxu0 %v18953_v30  ;;  %7645 = vmatprep.subr.bf16.mxu1 %v13449_v37  ;;  %v611_v37 = vld [vmem:[%s22602_s1 + $0x378] sm:$0xff] }
 0x292   : > { %6706 = vmatprep.mubr.bf16.mxu0 %v18964_v44  ;;  %6858 = vmatpush1.bf16.msra.mxu0 %v13510_v42  ;;  %v13489_v42 = vcombine.high %v607_v22, %v611_v37  ;;  %v13488_v46 = vcombine.low %v607_v22, %v611_v37  ;;  %v714_v22 = vld [vmem:[%s22602_s1 + $0x6b0] sm:$0xff]  ;;  %v17010_v37 = vld [vmem:[%s17303_s14 + $0x260] ss:$36 sps:$4 sm:$0xff]  }
 0x293   : > { %6544 = vmatmul.mubr.bf16.gmra.mrb[48].mxu1 %v18805_v52  ;;  %6859 = vmatprep.subr.bf16.mxu0 %v13519_v4  ;;  %v13527_v52 = vcombine.high %v646_v20, %v650_v36  ;;  %v682_v4 = vld [vmem:[%s22602_s1 + $0x5b0] sm:$0xff]  ;;  %v615_v20 = vld [vmem:[%s22602_s1 + $0x398] sm:$0xff] }
 0x294   : > { %6553 = vmatprep.mubr.bf16.mxu1 %v22714_v12  ;;  %7646 = vmatpush1.bf16.msra.mxu1 %v13448_v25  ;;  %v678_v25 = vld [vmem:[%s22602_s1 + $0x590] sm:$0xff]  ;;  %v619_v36 = vld [vmem:[%s22602_s1 + $0x3b8] sm:$0xff] }
 0x295   : > { %7647 = vmatprep.subr.bf16.mxu1 %v13457_v15  ;;  %v19032_v15 = vld [vmem:[%s17303_s14 + $0xdc] ss:$36 sps:$4 sm:$0xff]   ;;  %v13558_v35 = vcombine.low %v678_v25, %v682_v4  ;;  %v13496_v8 = vcombine.low %v615_v20, %v619_v36 }
 0x296   : > { %6860 = vmatpush1.bf16.msra.mxu0 %v13518_v38  ;;  %v13497_v38 = vcombine.high %v615_v20, %v619_v36  ;;  %v19101_v36 = vld [vmem:[%s17303_s14 + $0x168] ss:$36 sps:$4 sm:$0xff]  }
 0x297   : > { %6861 = vmatprep.subr.bf16.mxu0 %v13527_v52  ;;  %v690_v52 = vld [vmem:[%s22602_s1 + $0x5f0] sm:$0xff] }
 0x298   : > { %7648 = vmatpush1.bf16.msra.mxu1 %v13456_v63  ;;  %v686_v63 = vld [vmem:[%s22602_s1 + $0x5d0] sm:$0xff] }
 0x299   : > { %6707 = vmatmul.mubr.bf16.gmra.mrb[68].mxu0 %v18987_v53  ;;  %7649 = vmatprep.subr.bf16.mxu1 %v13465_v5  ;;  %v623_v5 = vld [vmem:[%s22602_s1 + $0x3d8] sm:$0xff]  ;;  %v13567_v43 = vcombine.high %v686_v63, %v690_v52 }
 0x29a   : > { %6716 = vmatprep.mubr.bf16.mxu0 %v18998_v47  ;;  %6862 = vmatpush1.bf16.msra.mxu0 %v13526_v6  ;;  %v19055_v6 = vld [vmem:[%s17303_s14 + $0xd8] ss:$36 sps:$4 sm:$0xff]   ;;  %v13504_v13 = vcombine.low %v623_v5, %v627_v51 }
 0x29b   : > { %6554 = vmatmul.mubr.bf16.gmra.mrb[52].mxu1 %v18849_v14  ;;  %6863 = vmatprep.subr.bf16.mxu0 %v13535_v17  ;;  %v13543_v14 = vcombine.high %v662_v27, %v666_v34  ;;  %v694_v17 = vld [vmem:[%s22602_s1 + $0x610] sm:$0xff]  ;;  %v19066_v27 = vld [vmem:[%s17303_s14 + $0x124] ss:$36 sps:$4 sm:$0xff]   ;;  %v13566_v34 = vcombine.low %v686_v63, %v690_v52 }
 0x29c   : > { %6563 = vmatprep.mubr.bf16.mxu1 %v22714_v12  ;;  %7650 = vmatpush1.bf16.msra.mxu1 %v13464_v50  ;;  %v13505_v50 = vcombine.high %v623_v5, %v627_v51  ;;  %v734_v5 = vld [vmem:[%s22602_s1 + $0x750] sm:$0xff] }
 0x29d   : > { %7651 = vmatprep.subr.bf16.mxu1 %v13473_v41  ;;  %v698_v41 = vld [vmem:[%s22602_s1 + $0x630] sm:$0xff] }
 0x29e   : > { %6864 = vmatpush1.bf16.msra.mxu0 %v13534_v18  ;;  %v13575_v9 = vcombine.high %v694_v17, %v698_v41  ;;  %v13513_v18 = vcombine.high %v18841_v55, %v18846_v60  ;;  %v738_v51 = vld [vmem:[%s22602_s1 + $0x770] sm:$0xff] }
 0x29f   : > { %6865 = vmatprep.subr.bf16.mxu0 %v13543_v14  ;;  %v13574_v14 = vcombine.low %v694_v17, %v698_v41  ;;  %v746_v17 = vld [vmem:[%s22602_s1 + $0x7b0] sm:$0xff] }
 0x2a0   : > { %7652 = vmatpush1.bf16.msra.mxu1 %v13472_v45  ;;  %v706_v45 = vld [vmem:[%s22602_s1 + $0x670] sm:$0xff] }
 0x2a1   : > { %6717 = vmatmul.mubr.bf16.gmra.mrb[72].mxu0 %v19021_v24  ;;  %7653 = vmatprep.subr.bf16.mxu1 %v13481_v19  ;;  %v17016_v41 = vld [vmem:[%s17303_s14 + $0x2f0] ss:$36 sps:$4 sm:$0xff]  }
 0x2a2   : > { %6726 = vmatprep.mubr.bf16.mxu0 %v19032_v15  ;;  %6866 = vmatpush1.bf16.msra.mxu0 %v13542_v23  ;;  %v19090_v23 = vld [vmem:[%s17303_s14 + $0x16c] ss:$36 sps:$4 sm:$0xff]  }
 0x2a3   : > { %6564 = vmatmul.mubr.bf16.gmra.mrb[56].mxu1 %v18882_v10  ;;  %6867 = vmatprep.subr.bf16.mxu0 %v13551_v29  ;;  %v13559_v10 = vcombine.high %v678_v25, %v682_v4  ;;  %v13591_v29 = vcombine.high %v710_v40, %v714_v22  ;;  %v722_v25 = vld [vmem:[%s22602_s1 + $0x6f0] sm:$0xff]  ;;  %v13590_v4 = vcombine.low %v710_v40, %v714_v22  ;;  %v17019_v40 = vld [vmem:[%s17303_s14 + $0x338] ss:$36 sps:$4 sm:$0xff]   ;;  %v19150_v22 = vld [vmem:[%s17303_s14 + $0x244] ss:$36 sps:$4 sm:$0xff]  }
 0x2a4   : > { %6573 = vmatprep.mubr.bf16.mxu1 %v22714_v12  ;;  %7654 = vmatpush1.bf16.msra.mxu1 %v13480_v39 }
 0x2a5   : > { %7655 = vmatprep.subr.bf16.mxu1 %v13489_v42  ;;  %v718_v42 = vld [vmem:[%s22602_s1 + $0x6d0] sm:$0xff] }
 0x2a6   : > { %6868 = vmatpush1.bf16.msra.mxu0 %v13550_v28  ;;  %v13599_v20 = vcombine.high %v718_v42, %v722_v25  ;;  %v726_v28 = vld [vmem:[%s22602_s1 + $0x710] sm:$0xff]  ;;  %v13598_v63 = vcombine.low %v718_v42, %v722_v25  ;;  %v19167_v25 = vld [vmem:[%s17303_s14 + $0x240] ss:$36 sps:$4 sm:$0xff]  }
 0x2a7   : > { %6869 = vmatprep.subr.bf16.mxu0 %v13559_v10  ;;  %v17013_v10 = vld [vmem:[%s17303_s14 + $0x2a8] ss:$36 sps:$4 sm:$0xff]  }
 0x2a8   : > { %7656 = vmatpush1.bf16.msra.mxu1 %v13488_v46  ;;  %v730_v46 = vld [vmem:[%s22602_s1 + $0x730] sm:$0xff] }
 0x2a9   : > { %6727 = vmatmul.mubr.bf16.gmra.mrb[76].mxu0 %v19055_v6  ;;  %7657 = vmatprep.subr.bf16.mxu1 %v13497_v38  ;;  %v19112_v38 = vld [vmem:[%s17303_s14 + $0x1b4] ss:$36 sps:$4 sm:$0xff]   ;;  %v13607_v52 = vcombine.high %v726_v28, %v730_v46 }
 0x2aa   : > { %6736 = vmatprep.mubr.bf16.mxu0 %v19066_v27  ;;  %6870 = vmatpush1.bf16.msra.mxu0 %v13558_v35  ;;  %v13606_v35 = vcombine.low %v726_v28, %v730_v46  ;;  %v19174_v28 = vld [vmem:[%s17303_s14 + $0x28c] ss:$36 sps:$4 sm:$0xff]   ;;  %v1078_v46 = vlaneseq }
 0x2ab   : > { %6574 = vmatmul.mubr.bf16.gmra.mrb[60].mxu1 %v18913_v11  ;;  %6871 = vmatprep.subr.bf16.mxu0 %v13567_v43  ;;  %v702_v11 = vld [vmem:[%s22602_s1 + $0x650] sm:$0xff] }
 0x2ac   : > { %6583 = vmatprep.mubr.bf16.mxu1 %v22714_v12  ;;  %7658 = vmatpush1.bf16.msra.mxu1 %v13496_v8  ;;  %v13583_v19 = vcombine.high %v702_v11, %v706_v45  ;;  %v13582_v39 = vcombine.low %v702_v11, %v706_v45  ;;  %v13615_v8 = vcombine.high %v734_v5, %v738_v51  ;;  %v19123_v43 = vld [vmem:[%s17303_s14 + $0x1b0] ss:$36 sps:$4 sm:$0xff]  }
 0x2ad   : > { %7659 = vmatprep.subr.bf16.mxu1 %v13505_v50  ;;  %v742_v50 = vld [vmem:[%s22602_s1 + $0x790] sm:$0xff] }
 0x2ae   : > { %6872 = vmatpush1.bf16.msra.mxu0 %v13566_v34  ;;  %v19134_v34 = vld [vmem:[%s17303_s14 + $0x1fc] ss:$36 sps:$4 sm:$0xff]   ;;  %v754_v11 = vld [vmem:[%s22602_s1 + $0x7f0] sm:$0xff]  ;;  %v13622_v45 = vcombine.low %v742_v50, %v746_v17 }
 0x2af   : > { %6873 = vmatprep.subr.bf16.mxu0 %v13575_v9  ;;  %v13623_v9 = vcombine.high %v742_v50, %v746_v17  ;;  %v19198_v50 = vld [vmem:[%s17303_s14 + $0x2d0] ss:$36 sps:$4 sm:$0xff]  }
 0x2b0   : > { %7660 = vmatpush1.bf16.msra.mxu1 %v13504_v13  ;;  %v13614_v13 = vcombine.low %v734_v5, %v738_v51  ;;  %v19186_v5 = vld [vmem:[%s17303_s14 + $0x2d4] ss:$36 sps:$4 sm:$0xff]  }
 0x2b1   : > { %6737 = vmatmul.mubr.bf16.gmra.mrb[80].mxu0 %v19079_v3  ;;  %7822 = vmatprep.subr.bf16.mxu1 %v13513_v18  ;;  %v750_v18 = vld [vmem:[%s22602_s1 + $0x7d0] sm:$0xff] }
 0x2b2   : > { %6746 = vmatprep.mubr.bf16.mxu0 %v19090_v23  ;;  %6874 = vmatpush1.bf16.msra.mxu0 %v13574_v14  ;;  %v13631_v14 = vcombine.high %v750_v18, %v754_v11 }
 0x2b3   : > { %6584 = vmatmul.mubr.bf16.gmra.mrb[64].mxu1 %v17010_v37  ;;  %6875 = vmatprep.subr.bf16.mxu0 %v13583_v19  ;;  %v19145_v19 = vld [vmem:[%s17303_s14 + $0x1f8] ss:$36 sps:$4 sm:$0xff]   ;;  %v13630_v37 = vcombine.low %v750_v18, %v754_v11 }
 0x2b4   : > { %6593 = vmatprep.mubr.bf16.mxu1 %v22714_v12 }
 0x2b6   : > { %6876 = vmatpush1.bf16.msra.mxu0 %v13582_v39  ;;  %v19157_v39 = vld [vmem:[%s22602_s1 + $0x810] sm:$0xff] }
 0x2b7   : > { %6877 = vmatprep.subr.bf16.mxu0 %v13591_v29  ;;  %v19162_v29 = vld [vmem:[%s22602_s1 + $0x830] sm:$0xff] }
 0x2b8   : > { %v13639_v42 = vcombine.high %v19157_v39, %v19162_v29 }
 0x2b9   : > { %6747 = vmatmul.mubr.bf16.gmra.mrb[84].mxu0 %v19101_v36 }
 0x2ba   : > { %6756 = vmatprep.mubr.bf16.mxu0 %v19112_v38  ;;  %6878 = vmatpush1.bf16.msra.mxu0 %v13590_v4 }
 0x2bb   : > { %6594 = vmatmul.mubr.bf16.gmra.mrb[68].mxu1 %v17013_v10  ;;  %6879 = vmatprep.subr.bf16.mxu0 %v13599_v20  ;;  %v17022_v20 = vld [vmem:[%s17303_s14 + $0x380] ss:$36 sps:$4 sm:$0xff]   ;;  %v19179_v10 = vld [vmem:[%s17303_s14 + $0x288] ss:$36 sps:$4 sm:$0xff]  }
 0x2bc   : > { %6603 = vmatprep.mubr.bf16.mxu1 %v22714_v12 }
 0x2be   : > { %6880 = vmatpush1.bf16.msra.mxu0 %v13598_v63  ;;  %v19182_v63 = vshrl.u32 %v1078_v46, 7 }
 0x2bf   : > { %6881 = vmatprep.subr.bf16.mxu0 %v13607_v52  ;;  %v17025_v52 = vld [vmem:[%s17303_s14 + $0x3c8] ss:$36 sps:$4 sm:$0xff]  }
 0x2c0   : > { %22715 = vst [vmem:[#allocation17_spill] sm:$0xff] %v19182_v63  ;;  %v22614_v51 = vsub.s32 0, %v19182_v63 }
 0x2c1   : > { %6757 = vmatmul.mubr.bf16.gmra.mrb[88].mxu0 %v19123_v43 }
 0x2c2   : > { %6766 = vmatprep.mubr.bf16.mxu0 %v19134_v34  ;;  %6882 = vmatpush1.bf16.msra.mxu0 %v13606_v35  ;;  %v19194_v35 = vld [vmem:[%s22603_s2] sm:$0xff] }
 0x2c3   : > { %6604 = vmatmul.mubr.bf16.gmra.mrb[72].mxu1 %v17016_v41  ;;  %6883 = vmatprep.subr.bf16.mxu0 %v13615_v8  ;;  %v22613_v8 = vsub.s32 1, %v19182_v63  ;;  %v19204_v17 = vrot.slane %v19194_v35, %v22614_v51  ;;  %v17028_v41 = vld [vmem:[%s17303_s14 + $0x410] ss:$36 sps:$4 sm:$0xff]   ;;  %v17031_v51 = vld [vmem:[%s17303_s14 + $0x458] ss:$36 sps:$4 sm:$0xff]  }
 0x2c4   : > { %6613 = vmatprep.mubr.bf16.mxu1 %v22714_v12 }
 0x2c6   : > { %6884 = vmatpush1.bf16.msra.mxu0 %v13614_v13  ;;  %v19210_v13 = vrot.slane %v19194_v35, %v22613_v8  ;;  %v19225_v8 = vld [vmem:[%s17303_s14 + $0x318] ss:$36 sps:$4 sm:$0xff]  }
 0x2c7   : > { %6885 = vmatprep.subr.bf16.mxu0 %v13623_v9  ;;  %v19213_v9 = vld [vmem:[%s17303_s14 + $0x31c] ss:$36 sps:$4 sm:$0xff]  }
 0x2c9   : > { %6767 = vmatmul.mubr.bf16.gmra.mrb[92].mxu0 %v19145_v19 }
 0x2ca   : > { %6776 = vmatprep.mubr.bf16.mxu0 %v19150_v22  ;;  %6886 = vmatpush1.bf16.msra.mxu0 %v13622_v45 }
 0x2cb   : > { %6614 = vmatmul.mubr.bf16.gmra.mrb[76].mxu1 %v17019_v40  ;;  %6887 = vmatprep.subr.bf16.mxu0 %v13631_v14 }
 0x2cc   : > { %6623 = vmatprep.mubr.bf16.mxu1 %v22714_v12 }
 0x2ce   : > { %6888 = vmatpush1.bf16.msra.mxu0 %v13630_v37 }
 0x2cf   : > { %7050 = vmatprep.subr.bf16.mxu0 %v13639_v42 }
 0x2d1   : > { %6777 = vmatmul.mubr.bf16.gmra.mrb[96].mxu0 %v19167_v25 }
 0x2d2   : > { %6786 = vmatprep.mubr.bf16.mxu0 %v19174_v28 }
 0x2d3   : > { %6624 = vmatmul.mubr.bf16.gmra.mrb[80].mxu1 %v17022_v20 }
 0x2d4   : > { %6633 = vmatprep.mubr.bf16.mxu1 %v22714_v12 }
 0x2d9   : > { %6787 = vmatmul.mubr.bf16.gmra.mrb[100].mxu0 %v19179_v10 }
 0x2da   : > { %6796 = vmatprep.mubr.bf16.mxu0 %v19186_v5 }
 0x2db   : > { %6634 = vmatmul.mubr.bf16.gmra.mrb[84].mxu1 %v17025_v52 }
 0x2dc   : > { %6643 = vmatprep.mubr.bf16.mxu1 %v22714_v12 }
 0x2e1   : > { %6797 = vmatmul.mubr.bf16.gmra.mrb[104].mxu0 %v19198_v50 }
 0x2e2   : > { %6806 = vmatprep.mubr.bf16.mxu0 %v19213_v9 }
 0x2e3   : > { %6644 = vmatmul.mubr.bf16.gmra.mrb[88].mxu1 %v17028_v41 }
 0x2e4   : > { %6653 = vmatprep.mubr.bf16.mxu1 %v22714_v12  ;;  %v5427_v18 = vpop.f32.mrb[32].mxu0 }
 0x2e5   : > { %v14598_v11 = vadd.f32 %v5427_v18, %v19204_v17  ;;  %v5429_v45 = vpop.f32.mrb[33].mxu0 }
 0x2e6   : > { %v14600_v14 = vadd.f32 %v5429_v45, %v19210_v13  ;;  %v5431_v40 = vpop.f32.mrb[34].mxu0  ;;  %v19231_v45 = vld [vmem:[%s17303_s14 + $0x364] ss:$36 sps:$4 sm:$0xff]  }
 0x2e7   : > { %v14599_v37 = vadd.f32 %v14598_v11, %v18086_v48  ;;  %v14602_v42 = vadd.f32 %v5431_v40, %v19204_v17  ;;  %v5433_v20 = vpop.f32.mrb[35].mxu0  ;;  %22716 = vst [vmem:[#allocation18_spill] sm:$0xff] %v19231_v45 }
 0x2e8   : > { %v14601_v46 = vadd.f32 %v14600_v14, %v18091_v1  ;;  %v14604_v52 = vadd.f32 %v5433_v20, %v19210_v13 }
 0x2e9   : > { %v14603_v41 = vadd.f32 %v14602_v42, %v18096_v56  ;;  %6807 = vmatmul.mubr.bf16.gmra.mrb[108].mxu0 %v19225_v8  ;;  %v8722_v40 = vmax.f32 %v14599_v37, 0.0 }
 0x2ea   : > { %v14605_v18 = vadd.f32 %v14604_v52, %v18101_v62  ;;  %6816 = vmatprep.mubr.bf16.mxu0 %v19231_v45  ;;  %v8723_v11 = vmax.f32 %v14601_v46, 0.0  ;;  %v639_v62 = vld [vmem:[%s22602_s1 + $0x458] sm:$0xff]  ;;  %v19253_v45 = vld [vmem:[%s17303_s14 + $0x360] ss:$36 sps:$4 sm:$0xff]  }
 0x2eb   : > { %6654 = vmatmul.mubr.bf16.gmra.mrb[92].mxu1 %v17031_v51  ;;  %v8730_v48 = vmax.f32 %v14603_v41, 0.0  ;;  %v643_v51 = vld [vmem:[%s22602_s1 + $0x478] sm:$0xff] }
 0x2ec   : > { %7661 = vmatprep.mubr.bf16.mxu1 %v18937_v21  ;;  %v5437_v1 = vpop.f32.mrb[36].mxu0  ;;  %v8731_v14 = vmax.f32 %v14605_v18, 0.0  ;;  %v13521_v0 = vcombine.high %v639_v62, %v643_v51 }
 0x2ed   : > { %v14606_v56 = vadd.f32 %v5437_v1, %v19204_v17  ;;  %v5439_v42 = vpop.f32.mrb[37].mxu0  ;;  %v19245_v46 = vpack.c.bf16 %v8730_v48, %v8722_v40  ;;  %v647_v48 = vld [vmem:[%s22602_s1 + $0x498] sm:$0xff]  ;;  %v22719_v40 = vcombine.low %v18841_v55, %v18846_v60 }
 0x2ee   : > { %v14608_v20 = vadd.f32 %v5439_v42, %v19210_v13  ;;  %v5441_v21 = vpop.f32.mrb[38].mxu0  ;;  %v19243_v52 = vpack.c.bf16 %v8731_v14, %v8723_v11  ;;  %v19282_v55 = vld [vmem:[%s22602_s1 + $0x818] sm:$0xff] }
 0x2ef   : > { %22718 = vst [vmem:[#allocation20_spill] sm:$0xff] %v19245_v46  ;;  %v14607_v37 = vadd.f32 %v14606_v56, %v18119_v61  ;;  %v14610_v41 = vadd.f32 %v5441_v21, %v19204_v17  ;;  %v5443_v18 = vpop.f32.mrb[39].mxu0  ;;  %v651_v61 = vld [vmem:[%s22602_s1 + $0x4b8] sm:$0xff]  ;;  %v13520_v56 = vcombine.low %v639_v62, %v643_v51 }
 0x2f0   : > { %22717 = vst [vmem:[#allocation19_spill] sm:$0xff] %v19243_v52  ;;  %v14609_v1 = vadd.f32 %v14608_v20, %v18124_v16  ;;  %v14612_v4 = vadd.f32 %v5443_v18, %v19210_v13  ;;  %v19265_v16 = vld [vmem:[%s17303_s14 + $0x3ac] ss:$36 sps:$4 sm:$0xff]   ;;  %v19287_v60 = vld [vmem:[%s22602_s1 + $0x838] sm:$0xff] }
 0x2f1   : > { %v14611_v12 = vadd.f32 %v14610_v41, %v18126_v59  ;;  %6817 = vmatmul.mubr.bf16.gmra.mrb[112].mxu0 %v19253_v45  ;;  %v8738_v59 = vmax.f32 %v14607_v37, 0.0  ;;  %v19773_v46 = vld [vmem:[%s17303_s14 + $0x2dc] ss:$36 sps:$4 sm:$0xff]  }
 0x2f2   : > { %v14613_v11 = vadd.f32 %v14612_v4, %v18141_v31  ;;  %6826 = vmatprep.mubr.bf16.mxu0 %v19265_v16  ;;  %v8739_v42 = vmax.f32 %v14609_v1, 0.0  ;;  %v13529_v31 = vcombine.high %v647_v48, %v651_v61 }
 0x2f3   : > { %7662 = vmatmul.mubr.bf16.vlgmr.msra.gmra.mrb[96].mxu1 %v18953_v30  ;;  %v8746_v14 = vmax.f32 %v14611_v12, 0.0  ;;  %v655_v30 = vld [vmem:[%s22602_s1 + $0x4d8] sm:$0xff] }
 0x2f4   : > { %7823 = vmatpush1.bf16.msra.mxu1 %v22719_v40  ;;  %7671 = vmatprep.mubr.bf16.mxu1 %v18964_v44  ;;  %v8747_v20 = vmax.f32 %v14613_v11, 0.0  ;;  %v5447_v21 = vpop.f32.mrb[40].mxu0  ;;  %v659_v12 = vld [vmem:[%s22602_s1 + $0x4f8] sm:$0xff]  ;;  %v13528_v40 = vcombine.low %v647_v48, %v651_v61 }
 0x2f5   : > { %7824 = vmatprep.subr.bf16.mxu1 %v13521_v0  ;;  %v14614_v4 = vadd.f32 %v5447_v21, %v19204_v17  ;;  %v5449_v37 = vpop.f32.mrb[41].mxu0  ;;  %v19289_v0 = vpack.c.bf16 %v8746_v14, %v8738_v59  ;;  %v13537_v14 = vcombine.high %v655_v30, %v659_v12  ;;  %v667_v48 = vld [vmem:[%s22602_s1 + $0x538] sm:$0xff] }
 0x2f6   : > { %v14616_v44 = vadd.f32 %v5449_v37, %v19210_v13  ;;  %v5451_v62 = vpop.f32.mrb[42].mxu0  ;;  %v19294_v41 = vpack.c.bf16 %v8747_v20, %v8739_v42  ;;  %v19314_v61 = vld [vmem:[%s17303_s14 + $0x3f4] ss:$36 sps:$4 sm:$0xff]   ;;  %v13536_v42 = vcombine.low %v655_v30, %v659_v12 }
 0x2f7   : > { %22720 = vst [vmem:[#allocation21_spill] sm:$0xff] %v19289_v0  ;;  %v14615_v18 = vadd.f32 %v14614_v4, %v18161_v49  ;;  %v14618_v1 = vadd.f32 %v5451_v62, %v19204_v17  ;;  %v5453_v11 = vpop.f32.mrb[43].mxu0  ;;  %v19302_v0 = vld [vmem:[%s17303_s14 + $0x3a8] ss:$36 sps:$4 sm:$0xff]   ;;  %v663_v49 = vld [vmem:[%s22602_s1 + $0x518] sm:$0xff] }
 0x2f8   : > { %22721 = vst [vmem:[#allocation22_spill] sm:$0xff] %v19294_v41  ;;  %7825 = vmatpush1.bf16.msra.mxu1 %v13520_v56  ;;  %v14617_v21 = vadd.f32 %v14616_v44, %v18166_v7  ;;  %v14620_v59 = vadd.f32 %v5453_v11, %v19210_v13  ;;  %v13545_v44 = vcombine.high %v663_v49, %v667_v48 }
 0x2f9   : > { %7826 = vmatprep.subr.bf16.mxu1 %v13529_v31  ;;  %v14619_v37 = vadd.f32 %v14618_v1, %v18168_v54  ;;  %6827 = vmatmul.mubr.bf16.gmra.mrb[116].mxu0 %v19302_v0  ;;  %v8754_v54 = vmax.f32 %v14615_v18, 0.0  ;;  %v675_v18 = vld [vmem:[%s22602_s1 + $0x578] sm:$0xff] }
 0x2fa   : > { %v14621_v7 = vadd.f32 %v14620_v59, %v18173_v58  ;;  %6836 = vmatprep.mubr.bf16.mxu0 %v19314_v61  ;;  %v8755_v20 = vmax.f32 %v14617_v21, 0.0  ;;  %v13544_v59 = vcombine.low %v663_v49, %v667_v48  ;;  %v683_v49 = vld [vmem:[%s22602_s1 + $0x5b8] sm:$0xff] }
 0x2fb   : > { %7672 = vmatmul.mubr.bf16.gmra.mrb[100].mxu1 %v18987_v53  ;;  %v8762_v56 = vmax.f32 %v14619_v37, 0.0  ;;  %v671_v53 = vld [vmem:[%s22602_s1 + $0x558] sm:$0xff] }
 0x2fc   : > { %7681 = vmatprep.mubr.bf16.mxu1 %v18998_v47  ;;  %7827 = vmatpush1.bf16.msra.mxu1 %v13528_v40  ;;  %v8763_v31 = vmax.f32 %v14621_v7, 0.0  ;;  %v5457_v4 = vpop.f32.mrb[44].mxu0  ;;  %v13553_v7 = vcombine.high %v671_v53, %v675_v18  ;;  %v19348_v48 = vld [vmem:[%s17303_s14 + $0x43c] ss:$36 sps:$4 sm:$0xff]  }
 0x2fd   : > { %7828 = vmatprep.subr.bf16.mxu1 %v13537_v14  ;;  %v14622_v62 = vadd.f32 %v5457_v4, %v19204_v17  ;;  %v5459_v58 = vpop.f32.mrb[45].mxu0  ;;  %v19325_v47 = vpack.c.bf16 %v8762_v56, %v8754_v54  ;;  %v19336_v56 = vld [vmem:[%s17303_s14 + $0x3f0] ss:$36 sps:$4 sm:$0xff]  }
 0x2fe   : > { %v14624_v30 = vadd.f32 %v5459_v58, %v19210_v13  ;;  %v5461_v12 = vpop.f32.mrb[46].mxu0  ;;  %v19328_v1 = vpack.c.bf16 %v8763_v31, %v8755_v20  ;;  %v13552_v20 = vcombine.low %v671_v53, %v675_v18 }
 0x2ff   : > { %22722 = vst [vmem:[#allocation23_spill] sm:$0xff] %v19325_v47  ;;  %v14623_v11 = vadd.f32 %v14622_v62, %v18191_v26  ;;  %v14626_v40 = vadd.f32 %v5461_v12, %v19204_v17  ;;  %v5463_v21 = vpop.f32.mrb[47].mxu0  ;;  %v679_v26 = vld [vmem:[%s22602_s1 + $0x598] sm:$0xff] }
 0x300   : > { %22723 = vst [vmem:[#allocation24_spill] sm:$0xff] %v19328_v1  ;;  %7829 = vmatpush1.bf16.msra.mxu1 %v13536_v42  ;;  %v14625_v14 = vadd.f32 %v14624_v30, %v18196_v57  ;;  %v14628_v37 = vadd.f32 %v5463_v21, %v19210_v13  ;;  %v13561_v62 = vcombine.high %v679_v26, %v683_v49  ;;  %v691_v30 = vld [vmem:[%s22602_s1 + $0x5f8] sm:$0xff] }
 0x301   : > { %7830 = vmatprep.subr.bf16.mxu1 %v13545_v44  ;;  %v14627_v54 = vadd.f32 %v14626_v40, %v18198_v2  ;;  %6837 = vmatmul.mubr.bf16.gmra.mrb[120].mxu0 %v19336_v56  ;;  %v8770_v2 = vmax.f32 %v14623_v11, 0.0 }
 0x302   : > { %v14629_v57 = vadd.f32 %v14628_v37, %v18203_v33  ;;  %6846 = vmatprep.mubr.bf16.mxu0 %v19348_v48  ;;  %v8771_v31 = vmax.f32 %v14625_v14, 0.0  ;;  %v22726_v14 = vld [vmem:[#allocation2_spill] sm:$0xff] }
 0x303   : > { %7682 = vmatmul.mubr.bf16.gmra.mrb[104].mxu1 %v19021_v24  ;;  %v8778_v42 = vmax.f32 %v14627_v54, 0.0  ;;  %v687_v24 = vld [vmem:[%s22602_s1 + $0x5d8] sm:$0xff] }
 0x304   : > { %7691 = vmatprep.mubr.bf16.mxu1 %v19032_v15  ;;  %7831 = vmatpush1.bf16.msra.mxu1 %v13544_v59  ;;  %v8779_v4 = vmax.f32 %v14629_v57, 0.0  ;;  %v5467_v44 = vpop.f32.mrb[48].mxu0  ;;  %v13560_v59 = vcombine.low %v679_v26, %v683_v49  ;;  %v13569_v54 = vcombine.high %v687_v24, %v691_v30  ;;  %v22727_v57 = vld [vmem:[#allocation3_spill] sm:$0xff]  ;;  %v699_v26 = vld [vmem:[%s22602_s1 + $0x638] sm:$0xff]  ;;  %v22728_v49 = vld [vmem:[#allocation4_spill] sm:$0xff] }
 0x305   : > { %7832 = vmatprep.subr.bf16.mxu1 %v13553_v7  ;;  %v14630_v58 = vadd.f32 %v5467_v44, %v19204_v17  ;;  %v5469_v33 = vpop.f32.mrb[49].mxu0  ;;  %v19359_v15 = vpack.c.bf16 %v8778_v42, %v8770_v2  ;;  %v19370_v42 = vld [vmem:[%s17303_s14 + $0x438] ss:$36 sps:$4 sm:$0xff]  }
 0x306   : > { %v14632_v53 = vadd.f32 %v5469_v33, %v19210_v13  ;;  %v5471_v18 = vpop.f32.mrb[50].mxu0  ;;  %v19362_v12 = vpack.c.bf16 %v8779_v4, %v8771_v31  ;;  %v19382_v31 = vld [vmem:[%s17303_s14 + $0xc] ss:$36 sps:$4 sm:$0xff]  }
 0x307   : > { %22724 = vst [vmem:[#allocation25_spill] sm:$0xff] %v19359_v15  ;;  %v14631_v11 = vadd.f32 %v14630_v58, %v18216_v32  ;;  %v14634_v40 = vadd.f32 %v5471_v18, %v19204_v17  ;;  %v5473_v21 = vpop.f32.mrb[51].mxu0  ;;  %v695_v32 = vld [vmem:[%s22602_s1 + $0x618] sm:$0xff] }
 0x308   : > { %22725 = vst [vmem:[#allocation26_spill] sm:$0xff] %v19362_v12  ;;  %7833 = vmatpush1.bf16.msra.mxu1 %v13552_v20  ;;  %v14633_v37 = vadd.f32 %v14632_v53, %v22726_v14  ;;  %v14636_v7 = vadd.f32 %v5473_v21, %v19210_v13  ;;  %v13577_v18 = vcombine.high %v695_v32, %v699_v26 }
 0x309   : > { %7834 = vmatprep.subr.bf16.mxu1 %v13561_v62  ;;  %v14635_v2 = vadd.f32 %v14634_v40, %v22727_v57  ;;  %6847 = vmatmul.mubr.bf16.gmra.mrb[124].mxu0 %v19370_v42  ;;  %v8786_v4 = vmax.f32 %v14631_v11, 0.0  ;;  %v13568_v62 = vcombine.low %v687_v24, %v691_v30  ;;  %v707_v11 = vld [vmem:[%s22602_s1 + $0x678] sm:$0xff]  ;;  %v766_v30 = vld [vmem:[%s22602_s1 + $0x850] sm:$0xff] }
 0x30a   : > { %v14637_v20 = vadd.f32 %v14636_v7, %v22728_v49  ;;  %6889 = vmatprep.mubr.bf16.mxu0 %v19382_v31  ;;  %v8787_v58 = vmax.f32 %v14633_v37, 0.0  ;;  %v22731_v7 = vld [vmem:[#allocation5_spill] sm:$0xff]  ;;  %v13576_v49 = vcombine.low %v695_v32, %v699_v26 }
 0x30b   : > { %7692 = vmatmul.mubr.bf16.gmra.mrb[108].mxu1 %v19055_v6  ;;  %v8794_v44 = vmax.f32 %v14635_v2, 0.0  ;;  %v703_v6 = vld [vmem:[%s22602_s1 + $0x658] sm:$0xff] }
 0x30c   : > { %7701 = vmatprep.mubr.bf16.mxu1 %v19066_v27  ;;  %7835 = vmatpush1.bf16.msra.mxu1 %v13560_v59  ;;  %v8795_v33 = vmax.f32 %v14637_v20, 0.0  ;;  %v5477_v53 = vpop.f32.mrb[52].mxu0  ;;  %v770_v59 = vld [vmem:[%s22602_s1 + $0x870] sm:$0xff]  ;;  %v22732_v20 = vld [vmem:[#allocation6_spill] sm:$0xff]  ;;  %v715_v32 = vld [vmem:[%s22602_s1 + $0x6b8] sm:$0xff] }
 0x30d   : > { %7836 = vmatprep.subr.bf16.mxu1 %v13569_v54  ;;  %v14638_v40 = vadd.f32 %v5477_v53, %v19204_v17  ;;  %v5479_v21 = vpop.f32.mrb[53].mxu0  ;;  %v19393_v14 = vpack.c.bf16 %v8794_v44, %v8786_v4  ;;  %v13585_v53 = vcombine.high %v703_v6, %v707_v11  ;;  %v13647_v26 = vcombine.high %v766_v30, %v770_v59 }
 0x30e   : > { %v14640_v27 = vadd.f32 %v5479_v21, %v19210_v13  ;;  %v5481_v24 = vpop.f32.mrb[54].mxu0  ;;  %v19402_v37 = vpack.c.bf16 %v8795_v33, %v8787_v58  ;;  %v22733_v21 = vld [vmem:[#allocation7_spill] sm:$0xff]  ;;  %v711_v58 = vld [vmem:[%s22602_s1 + $0x698] sm:$0xff] }
 0x30f   : > { %22729 = vst [vmem:[#allocation2_spill] sm:$0xff] %v19393_v14  ;;  %v14639_v54 = vadd.f32 %v14638_v40, %v22731_v7  ;;  %v14642_v57 = vadd.f32 %v5481_v24, %v19204_v17  ;;  %v5483_v2 = vpop.f32.mrb[55].mxu0  ;;  %v19410_v14 = vld [vmem:[%s17303_s14 + $0x8] ss:$36 sps:$4 sm:$0xff]   ;;  %v774_v40 = vld [vmem:[%s22602_s1 + $0x890] sm:$0xff] }
 0x310   : > { %22730 = vst [vmem:[#allocation3_spill] sm:$0xff] %v19402_v37  ;;  %7837 = vmatpush1.bf16.msra.mxu1 %v13568_v62  ;;  %v14641_v4 = vadd.f32 %v14640_v27, %v22732_v20  ;;  %v14644_v44 = vadd.f32 %v5483_v2, %v19210_v13  ;;  %v22734_v62 = vld [vmem:[#allocation8_spill] sm:$0xff] }
 0x311   : > { %7838 = vmatprep.subr.bf16.mxu1 %v13577_v18  ;;  %v14643_v51 = vadd.f32 %v14642_v57, %v22733_v21  ;;  %6890 = vmatmul.mubr.bf16.vlgmr.msra.gmra.mrb[64].mxu0 %v19410_v14  ;;  %v19422_v18 = vld [vmem:[%s17303_s14 + $0x54] ss:$36 sps:$4 sm:$0xff]   ;;  %v8802_v24 = vmax.f32 %v14639_v54, 0.0  ;;  %v13584_v57 = vcombine.low %v703_v6, %v707_v11 }
 0x312   : > { %v14645_v33 = vadd.f32 %v14644_v44, %v22734_v62  ;;  %6899 = vmatprep.mubr.bf16.mxu0 %v19422_v18  ;;  %v778_v27 = vld [vmem:[%s22602_s1 + $0x8b0] sm:$0xff]  ;;  %v8803_v2 = vmax.f32 %v14641_v4, 0.0  ;;  %v13593_v44 = vcombine.high %v711_v58, %v715_v32  ;;  %v19435_v21 = vld [vmem:[%s22602_s1 + $0x6d8] sm:$0xff] }
 0x313   : > { %7702 = vmatmul.mubr.bf16.gmra.mrb[112].mxu1 %v19079_v3  ;;  %v8810_v7 = vmax.f32 %v14643_v51, 0.0  ;;  %v19440_v62 = vld [vmem:[%s22602_s1 + $0x6f8] sm:$0xff]  ;;  %v13646_v51 = vcombine.low %v766_v30, %v770_v59  ;;  %v13655_v54 = vcombine.high %v774_v40, %v778_v27  ;;  %v13654_v37 = vcombine.low %v774_v40, %v778_v27  ;;  %v790_v27 = vld [vmem:[%s22602_s1 + $0x910] sm:$0xff] }
 0x314   : > { %7711 = vmatprep.mubr.bf16.mxu1 %v19090_v23  ;;  %7839 = vmatpush1.bf16.msra.mxu1 %v13576_v49  ;;  %v8811_v3 = vmax.f32 %v14645_v33, 0.0  ;;  %v5487_v20 = vpop.f32.mrb[56].mxu0  ;;  %v22735_v23 = vcombine.low %v19157_v39, %v19162_v29  ;;  %v782_v33 = vld [vmem:[%s22602_s1 + $0x8d0] sm:$0xff]  ;;  %v22738_v30 = vld [vmem:[#allocation9_spill] sm:$0xff] }
 0x315   : > { %7840 = vmatprep.subr.bf16.mxu1 %v13585_v53  ;;  %v14646_v6 = vadd.f32 %v5487_v20, %v19204_v17  ;;  %v5489_v11 = vpop.f32.mrb[57].mxu0  ;;  %v19446_v49 = vpack.c.bf16 %v8810_v7, %v8802_v24  ;;  %v786_v39 = vld [vmem:[%s22602_s1 + $0x8f0] sm:$0xff]  ;;  %v13592_v7 = vcombine.low %v711_v58, %v715_v32  ;;  %v13601_v20 = vcombine.high %v19435_v21, %v19440_v62  ;;  %v727_v58 = vld [vmem:[%s22602_s1 + $0x718] sm:$0xff] }
 0x316   : > { %7051 = vmatpush1.bf16.msra.mxu0 %v22735_v23  ;;  %v14648_v4 = vadd.f32 %v5489_v11, %v19210_v13  ;;  %v5491_v53 = vpop.f32.mrb[58].mxu0  ;;  %v19455_v29 = vpack.c.bf16 %v8811_v3, %v8803_v2  ;;  %v22739_v23 = vld [vmem:[#allocation10_spill] sm:$0xff]  ;;  %v22740_v2 = vld [vmem:[#allocation11_spill] sm:$0xff]  ;;  %v731_v32 = vld [vmem:[%s22602_s1 + $0x738] sm:$0xff] }
 0x317   : > { %7052 = vmatprep.subr.bf16.mxu0 %v13647_v26  ;;  %22736 = vst [vmem:[#allocation4_spill] sm:$0xff] %v19446_v49  ;;  %v14647_v59 = vadd.f32 %v14646_v6, %v22738_v30  ;;  %v14650_v26 = vadd.f32 %v5491_v53, %v19204_v17  ;;  %v5493_v24 = vpop.f32.mrb[59].mxu0  ;;  %v22741_v6 = vld [vmem:[#allocation12_spill] sm:$0xff]  ;;  %v19477_v40 = vld [vmem:[%s17303_s14 + $0x9c] ss:$36 sps:$4 sm:$0xff]  }
 0x318   : > { %22737 = vst [vmem:[#allocation5_spill] sm:$0xff] %v19455_v29  ;;  %7841 = vmatpush1.bf16.msra.mxu1 %v13584_v57  ;;  %v14649_v11 = vadd.f32 %v14648_v4, %v22739_v23  ;;  %v14652_v49 = vadd.f32 %v5493_v24, %v19210_v13  ;;  %v19465_v29 = vld [vmem:[%s17303_s14 + $0x50] ss:$36 sps:$4 sm:$0xff]   ;;  %v13663_v57 = vcombine.high %v782_v33, %v786_v39  ;;  %v19492_v24 = vld [vmem:[%s22602_s1 + $0x758] sm:$0xff] }
 0x319   : > { %7842 = vmatprep.subr.bf16.mxu1 %v13593_v44  ;;  %v14651_v3 = vadd.f32 %v14650_v26, %v22740_v2  ;;  %6900 = vmatmul.mubr.bf16.gmra.mrb[68].mxu0 %v19465_v29  ;;  %v8818_v4 = vmax.f32 %v14647_v59, 0.0  ;;  %v13609_v26 = vcombine.high %v727_v58, %v731_v32  ;;  %v19497_v59 = vld [vmem:[%s22602_s1 + $0x778] sm:$0xff]  ;;  %v798_v2 = vld [vmem:[%s22602_s1 + $0x950] sm:$0xff] }
 0x31a   : > { %7053 = vmatpush1.bf16.msra.mxu0 %v13646_v51  ;;  %v14653_v44 = vadd.f32 %v14652_v49, %v22741_v6  ;;  %6909 = vmatprep.mubr.bf16.mxu0 %v19477_v40  ;;  %v794_v51 = vld [vmem:[%s22602_s1 + $0x930] sm:$0xff] }
 0x31b   : > { %7054 = vmatprep.subr.bf16.mxu0 %v13655_v54  ;;  %7712 = vmatmul.mubr.bf16.gmra.mrb[116].mxu1 %v19101_v36  ;;  %v8826_v53 = vmax.f32 %v14651_v3, 0.0  ;;  %v13600_v36 = vcombine.low %v19435_v21, %v19440_v62  ;;  %v8819_v54 = vmax.f32 %v14649_v11, 0.0  ;;  %v13671_v62 = vcombine.high %v790_v27, %v794_v51 }
 0x31c   : > { %7721 = vmatprep.mubr.bf16.mxu1 %v19112_v38  ;;  %7843 = vmatpush1.bf16.msra.mxu1 %v13592_v7  ;;  %v8827_v49 = vmax.f32 %v14653_v44, 0.0  ;;  %v5497_v30 = vpop.f32.mrb[60].mxu0  ;;  %v13662_v38 = vcombine.low %v782_v33, %v786_v39  ;;  %v22744_v39 = vld [vmem:[#allocation13_spill] sm:$0xff]  ;;  %v13608_v44 = vcombine.low %v727_v58, %v731_v32 }
 0x31d   : > { %7844 = vmatprep.subr.bf16.mxu1 %v13601_v20  ;;  %v14654_v7 = vadd.f32 %v5497_v30, %v19204_v17  ;;  %v5499_v21 = vpop.f32.mrb[61].mxu0  ;;  %v19500_v23 = vpack.c.bf16 %v8826_v53, %v8818_v4  ;;  %v13617_v4 = vcombine.high %v19492_v24, %v19497_v59  ;;  %v22745_v53 = vld [vmem:[#allocation14_spill] sm:$0xff]  ;;  %v743_v58 = vld [vmem:[%s22602_s1 + $0x798] sm:$0xff] }
 0x31e   : > { %7055 = vmatpush1.bf16.msra.mxu0 %v13654_v37  ;;  %v14656_v20 = vadd.f32 %v5499_v21, %v19210_v13  ;;  %v5501_v11 = vpop.f32.mrb[62].mxu0  ;;  %v802_v37 = vld [vmem:[%s22602_s1 + $0x970] sm:$0xff]  ;;  %v19509_v33 = vpack.c.bf16 %v8827_v49, %v8819_v54  ;;  %v22746_v54 = vld [vmem:[#allocation15_spill] sm:$0xff]  ;;  %v747_v32 = vld [vmem:[%s22602_s1 + $0x7b8] sm:$0xff] }
 0x31f   : > { %7056 = vmatprep.subr.bf16.mxu0 %v13663_v57  ;;  %22742 = vst [vmem:[#allocation6_spill] sm:$0xff] %v19500_v23  ;;  %v14655_v3 = vadd.f32 %v14654_v7, %v22744_v39  ;;  %v14658_v57 = vadd.f32 %v5501_v11, %v19204_v17  ;;  %v5503_v6 = vpop.f32.mrb[63].mxu0  ;;  %v13670_v23 = vcombine.low %v790_v27, %v794_v51  ;;  %v22747_v7 = vld [vmem:[#allocation16_spill] sm:$0xff]  ;;  %v19531_v27 = vld [vmem:[%s17303_s14 + $0xe4] ss:$36 sps:$4 sm:$0xff]  }
 0x320   : > { %22743 = vst [vmem:[#allocation7_spill] sm:$0xff] %v19509_v33  ;;  %7845 = vmatpush1.bf16.msra.mxu1 %v13600_v36  ;;  %v14657_v30 = vadd.f32 %v14656_v20, %v22745_v53  ;;  %v14660_v21 = vadd.f32 %v5503_v6, %v19210_v13  ;;  %v19519_v33 = vld [vmem:[%s17303_s14 + $0x98] ss:$36 sps:$4 sm:$0xff]   ;;  %v13679_v36 = vcombine.high %v798_v2, %v802_v37  ;;  %v806_v51 = vld [vmem:[%s22602_s1 + $0x990] sm:$0xff] }
 0x321   : > { %7846 = vmatprep.subr.bf16.mxu1 %v13609_v26  ;;  %v14659_v49 = vadd.f32 %v14658_v57, %v22746_v54  ;;  %6910 = vmatmul.mubr.bf16.gmra.mrb[72].mxu0 %v19519_v33  ;;  %v13625_v6 = vcombine.high %v743_v58, %v747_v32  ;;  %v13678_v53 = vcombine.low %v798_v2, %v802_v37  ;;  %v814_v2 = vld [vmem:[%s22602_s1 + $0x9d0] sm:$0xff] }
 0x322   : > { %7057 = vmatpush1.bf16.msra.mxu0 %v13662_v38  ;;  %v14661_v26 = vadd.f32 %v14660_v21, %v22747_v7  ;;  %6919 = vmatprep.mubr.bf16.mxu0 %v19531_v27  ;;  %v810_v38 = vld [vmem:[%s22602_s1 + $0x9b0] sm:$0xff]  ;;  %v8835_v11 = vmax.f32 %v14657_v30, 0.0 }
 0x323   : > { %7058 = vmatprep.subr.bf16.mxu0 %v13671_v62  ;;  %7722 = vmatmul.mubr.bf16.gmra.mrb[120].mxu1 %v19123_v43  ;;  %v8834_v62 = vmax.f32 %v14655_v3, 0.0  ;;  %v8842_v20 = vmax.f32 %v14659_v49, 0.0  ;;  %v13616_v43 = vcombine.low %v19492_v24, %v19497_v59  ;;  %v13687_v7 = vcombine.high %v806_v51, %v810_v38  ;;  %v755_v24 = vld [vmem:[%s22602_s1 + $0x7f8] sm:$0xff]  ;;  %v818_v37 = vld [vmem:[%s22602_s1 + $0x9f0] sm:$0xff] }
 0x324   : > { %7731 = vmatprep.mubr.bf16.mxu1 %v19134_v34  ;;  %7847 = vmatpush1.bf16.msra.mxu1 %v13608_v44  ;;  %v8843_v39 = vmax.f32 %v14661_v26, 0.0  ;;  %v5540_v57 = vpop.f32.mrb[0].mxu0  ;;  %v751_v34 = vld [vmem:[%s22602_s1 + $0x7d8] sm:$0xff]  ;;  %v13624_v49 = vcombine.low %v743_v58, %v747_v32  ;;  %v13686_v26 = vcombine.low %v806_v51, %v810_v38  ;;  %v822_v58 = vld [vmem:[%s22602_s1 + $0xa10] sm:$0xff] }
 0x325   : > { %7848 = vmatprep.subr.bf16.mxu1 %v13617_v4  ;;  %v14566_v21 = vadd.f32 %v5540_v57, %v19204_v17  ;;  %v5542_v54 = vpop.f32.mrb[1].mxu0  ;;  %v19550_v59 = vpack.c.bf16 %v8842_v20, %v8834_v62  ;;  %v13633_v62 = vcombine.high %v751_v34, %v755_v24  ;;  %v826_v32 = vld [vmem:[%s22602_s1 + $0xa30] sm:$0xff]  ;;  %v13632_v38 = vcombine.low %v751_v34, %v755_v24 }
 0x326   : > { %7059 = vmatpush1.bf16.msra.mxu0 %v13670_v23  ;;  %v14567_v3 = vadd.f32 %v5542_v54, %v19210_v13  ;;  %v5544_v23 = vpop.f32.mrb[2].mxu0  ;;  %v19559_v44 = vpack.c.bf16 %v8843_v39, %v8835_v11  ;;  %v19564_v54 = vld [vmem:[%s17303_s14 + $0xe0] ss:$36 sps:$4 sm:$0xff]   ;;  %v13695_v11 = vcombine.high %v814_v2, %v818_v37  ;;  %v830_v34 = vld [vmem:[%s22602_s1 + $0xa50] sm:$0xff] }
 0x327   : > { %7060 = vmatprep.subr.bf16.mxu0 %v13679_v36  ;;  %22748 = vst [vmem:[#allocation8_spill] sm:$0xff] %v19550_v59  ;;  %v14568_v4 = vadd.f32 %v5544_v23, %v19204_v17  ;;  %v5546_v30 = vpop.f32.mrb[3].mxu0  ;;  %v8594_v20 = vmax.f32 %v14566_v21, 0.0  ;;  %v834_v24 = vld [vmem:[%s22602_s1 + $0xa70] sm:$0xff] }
 0x328   : > { %22749 = vst [vmem:[#allocation9_spill] sm:$0xff] %v19559_v44  ;;  %7849 = vmatpush1.bf16.msra.mxu1 %v13616_v43  ;;  %v14569_v36 = vadd.f32 %v5546_v30, %v19210_v13  ;;  %v8595_v39 = vmax.f32 %v14567_v3, 0.0  ;;  %v19569_v43 = vld [vmem:[%s17303_s14 + $0x12c] ss:$36 sps:$4 sm:$0xff]  }
 0x329   : > { %7850 = vmatprep.subr.bf16.mxu1 %v13625_v6  ;;  %v8602_v57 = vmax.f32 %v14568_v4, 0.0  ;;  %6920 = vmatmul.mubr.bf16.gmra.mrb[76].mxu0 %v19564_v54  ;;  %v13703_v4 = vcombine.high %v822_v58, %v826_v32 }
 0x32a   : > { %7061 = vmatpush1.bf16.msra.mxu0 %v13678_v53  ;;  %v8603_v23 = vmax.f32 %v14569_v36, 0.0  ;;  %6929 = vmatprep.mubr.bf16.mxu0 %v19569_v43  ;;  %v13641_v53 = vcombine.high %v19282_v55, %v19287_v60  ;;  %v13702_v36 = vcombine.low %v822_v58, %v826_v32  ;;  %v838_v58 = vld [vmem:[%s22602_s1 + $0xa90] sm:$0xff] }
 0x32b   : > { %7062 = vmatprep.subr.bf16.mxu0 %v13687_v7  ;;  %7732 = vmatmul.mubr.bf16.gmra.mrb[124].mxu1 %v19145_v19  ;;  %v19578_v51 = vpack.c.bf16 %v8602_v57, %v8594_v20  ;;  %v13694_v19 = vcombine.low %v814_v2, %v818_v37  ;;  %v19596_v20 = vld [vmem:[%s17303_s14 + $0x128] ss:$36 sps:$4 sm:$0xff]   ;;  %v13711_v57 = vcombine.high %v830_v34, %v834_v24  ;;  %v842_v32 = vld [vmem:[%s22602_s1 + $0xab0] sm:$0xff] }
 0x32c   : > { %7741 = vmatprep.mubr.bf16.mxu1 %v19150_v22  ;;  %7851 = vmatpush1.bf16.msra.mxu1 %v13624_v49  ;;  %v5550_v6 = vpop.f32.mrb[4].mxu0  ;;  %v19583_v21 = vpack.c.bf16 %v8603_v23, %v8595_v39  ;;  %v19601_v23 = vld [vmem:[%s17303_s14 + $0x174] ss:$36 sps:$4 sm:$0xff]  }
 0x32d   : > { %7852 = vmatprep.subr.bf16.mxu1 %v13633_v62  ;;  %v14570_v7 = vadd.f32 %v5550_v6, %v19204_v17  ;;  %v5552_v3 = vpop.f32.mrb[5].mxu0 }
 0x32e   : > { %7063 = vmatpush1.bf16.msra.mxu0 %v13686_v26  ;;  %v14571_v30 = vadd.f32 %v5552_v3, %v19210_v13  ;;  %v5554_v22 = vpop.f32.mrb[6].mxu0  ;;  %v13719_v3 = vcombine.high %v838_v58, %v842_v32 }
 0x32f   : > { %7064 = vmatprep.subr.bf16.mxu0 %v13695_v11  ;;  %v14572_v2 = vadd.f32 %v5554_v22, %v19204_v17  ;;  %v5556_v37 = vpop.f32.mrb[7].mxu0  ;;  %v8610_v26 = vmax.f32 %v14570_v7, 0.0  ;;  %v850_v22 = vld [vmem:[%s22602_s1 + $0xaf0] sm:$0xff] }
 0x330   : > { %7853 = vmatpush1.bf16.msra.mxu1 %v13632_v38  ;;  %v14573_v49 = vadd.f32 %v5556_v37, %v19210_v13  ;;  %v8611_v11 = vmax.f32 %v14571_v30, 0.0  ;;  %v13718_v37 = vcombine.low %v838_v58, %v842_v32  ;;  %v854_v58 = vld [vmem:[%s22602_s1 + $0xb10] sm:$0xff] }
 0x331   : > { %8015 = vmatprep.subr.bf16.mxu1 %v13641_v53  ;;  %v8618_v62 = vmax.f32 %v14572_v2, 0.0  ;;  %6930 = vmatmul.mubr.bf16.gmra.mrb[80].mxu0 %v19596_v20  ;;  %v858_v32 = vld [vmem:[%s22602_s1 + $0xb30] sm:$0xff] }
 0x332   : > { %7065 = vmatpush1.bf16.msra.mxu0 %v13694_v19  ;;  %v8619_v39 = vmax.f32 %v14573_v49, 0.0  ;;  %6939 = vmatprep.mubr.bf16.mxu0 %v19601_v23  ;;  %v13710_v19 = vcombine.low %v830_v34, %v834_v24 }
 0x333   : > { %7066 = vmatprep.subr.bf16.mxu0 %v13703_v4  ;;  %7742 = vmatmul.mubr.bf16.gmra.mrb[128].mxu1 %v19167_v25  ;;  %v19611_v38 = vpack.c.bf16 %v8618_v62, %v8610_v26  ;;  %v19626_v26 = vld [vmem:[%s17303_s14 + $0x170] ss:$36 sps:$4 sm:$0xff]  }
 0x334   : > { %7751 = vmatprep.mubr.bf16.mxu1 %v19174_v28  ;;  %v5560_v6 = vpop.f32.mrb[8].mxu0  ;;  %v19613_v25 = vpack.c.bf16 %v8619_v39, %v8611_v11  ;;  %v846_v28 = vld [vmem:[%s22602_s1 + $0xad0] sm:$0xff]  ;;  %v19631_v39 = vld [vmem:[%s17303_s14 + $0x1bc] ss:$36 sps:$4 sm:$0xff]  }
 0x335   : > { %v14574_v53 = vadd.f32 %v5560_v6, %v19204_v17  ;;  %v5562_v7 = vpop.f32.mrb[9].mxu0  ;;  %v13727_v62 = vcombine.high %v846_v28, %v850_v22 }
 0x336   : > { %7067 = vmatpush1.bf16.msra.mxu0 %v13702_v36  ;;  %v14575_v4 = vadd.f32 %v5562_v7, %v19210_v13  ;;  %v5564_v30 = vpop.f32.mrb[10].mxu0 }
 0x337   : > { %7068 = vmatprep.subr.bf16.mxu0 %v13711_v57  ;;  %v14576_v34 = vadd.f32 %v5564_v30, %v19204_v17  ;;  %v5566_v24 = vpop.f32.mrb[11].mxu0  ;;  %v8626_v49 = vmax.f32 %v14574_v53, 0.0  ;;  %v13726_v53 = vcombine.low %v846_v28, %v850_v22  ;;  %v866_v28 = vld [vmem:[%s22602_s1 + $0xb70] sm:$0xff] }
 0x338   : > { %v14577_v2 = vadd.f32 %v5566_v24, %v19210_v13  ;;  %v8627_v57 = vmax.f32 %v14575_v4, 0.0  ;;  %v13735_v4 = vcombine.high %v854_v58, %v858_v32 }
 0x339   : > { %v8634_v36 = vmax.f32 %v14576_v34, 0.0  ;;  %6940 = vmatmul.mubr.bf16.gmra.mrb[84].mxu0 %v19626_v26 }
 0x33a   : > { %7069 = vmatpush1.bf16.msra.mxu0 %v13710_v19  ;;  %v8635_v11 = vmax.f32 %v14577_v2, 0.0  ;;  %6949 = vmatprep.mubr.bf16.mxu0 %v19631_v39 }
 0x33b   : > { %7070 = vmatprep.subr.bf16.mxu0 %v13719_v3  ;;  %7752 = vmatmul.mubr.bf16.gmra.mrb[132].mxu1 %v19179_v10  ;;  %v19641_v6 = vpack.c.bf16 %v8634_v36, %v8626_v49  ;;  %v13734_v36 = vcombine.low %v854_v58, %v858_v32  ;;  %v870_v58 = vld [vmem:[%s22602_s1 + $0xb90] sm:$0xff] }
 0x33c   : > { %7761 = vmatprep.mubr.bf16.mxu1 %v19186_v5  ;;  %v5570_v19 = vpop.f32.mrb[12].mxu0  ;;  %v19643_v10 = vpack.c.bf16 %v8635_v11, %v8627_v57  ;;  %v862_v5 = vld [vmem:[%s22602_s1 + $0xb50] sm:$0xff]  ;;  %v19658_v11 = vld [vmem:[%s17303_s14 + $0x1b8] ss:$36 sps:$4 sm:$0xff]  }
 0x33d   : > { %v14578_v7 = vadd.f32 %v5570_v19, %v19204_v17  ;;  %v5572_v3 = vpop.f32.mrb[13].mxu0  ;;  %v13743_v19 = vcombine.high %v862_v5, %v866_v28  ;;  %v874_v32 = vld [vmem:[%s22602_s1 + $0xbb0] sm:$0xff] }
 0x33e   : > { %7071 = vmatpush1.bf16.msra.mxu0 %v13718_v37  ;;  %v14579_v30 = vadd.f32 %v5572_v3, %v19210_v13  ;;  %v5574_v34 = vpop.f32.mrb[14].mxu0  ;;  %v13751_v44 = vcombine.high %v870_v58, %v874_v32 }
 0x33f   : > { %7072 = vmatprep.subr.bf16.mxu0 %v13727_v62  ;;  %v14580_v22 = vadd.f32 %v5574_v34, %v19204_v17  ;;  %v5576_v2 = vpop.f32.mrb[15].mxu0  ;;  %v8642_v62 = vmax.f32 %v14578_v7, 0.0  ;;  %v22750_v34 = vsub.s32 2, %v19182_v63 }
 0x340   : > { %v14581_v49 = vadd.f32 %v5576_v2, %v19210_v13  ;;  %v8643_v3 = vmax.f32 %v14579_v30, 0.0  ;;  %v19668_v2 = vld [vmem:[%s17303_s14 + $0x204] ss:$36 sps:$4 sm:$0xff]   ;;  %v13742_v30 = vcombine.low %v862_v5, %v866_v28 }
 0x341   : > { %v8650_v57 = vmax.f32 %v14580_v22, 0.0  ;;  %6950 = vmatmul.mubr.bf16.gmra.mrb[88].mxu0 %v19658_v11  ;;  %v19665_v37 = vrot.slane %v19194_v35, %v22750_v34 }
 0x342   : > { %7073 = vmatpush1.bf16.msra.mxu0 %v13726_v53  ;;  %v8651_v24 = vmax.f32 %v14581_v49, 0.0  ;;  %6959 = vmatprep.mubr.bf16.mxu0 %v19668_v2  ;;  %v22751_v53 = vsub.s32 3, %v19182_v63  ;;  %v19702_v63 = vld [vmem:[%s17303_s14 + $0x200] ss:$36 sps:$4 sm:$0xff]  }
 0x343   : > { %7074 = vmatprep.subr.bf16.mxu0 %v13735_v4  ;;  %7762 = vmatmul.mubr.bf16.gmra.mrb[136].mxu1 %v19198_v50  ;;  %v19683_v7 = vpack.c.bf16 %v8650_v57, %v8642_v62 }
 0x344   : > { %v19680_v50 = vrot.slane %v19194_v35, %v22751_v53  ;;  %7771 = vmatprep.mubr.bf16.mxu1 %v19213_v9  ;;  %v5580_v4 = vpop.f32.mrb[16].mxu0  ;;  %v19685_v22 = vpack.c.bf16 %v8651_v24, %v8643_v3  ;;  %v882_v24 = vld [vmem:[%s22602_s1 + $0xbf0] sm:$0xff] }
 0x345   : > { %v14582_v49 = vadd.f32 %v5580_v4, %v19204_v17  ;;  %v5582_v59 = vpop.f32.mrb[17].mxu0  ;;  %v13750_v4 = vcombine.low %v870_v58, %v874_v32 }
 0x346   : > { %7075 = vmatpush1.bf16.msra.mxu0 %v13734_v36  ;;  %v6505_v34 = vpop.f32.mrb[32].mxu1  ;;  %v14583_v35 = vadd.f32 %v5582_v59, %v19210_v13  ;;  %v5584_v9 = vpop.f32.mrb[18].mxu0  ;;  %v878_v36 = vld [vmem:[%s22602_s1 + $0xbd0] sm:$0xff] }
 0x347   : > { %7076 = vmatprep.subr.bf16.mxu0 %v13743_v19  ;;  %v14662_v15 = vadd.f32 %v6505_v34, %v19665_v37  ;;  %v6507_v53 = vpop.f32.mrb[33].mxu1  ;;  %v14584_v28 = vadd.f32 %v5584_v9, %v19204_v17  ;;  %v5586_v57 = vpop.f32.mrb[19].mxu0  ;;  %v8658_v34 = vmax.f32 %v14582_v49, 0.0 }
 0x348   : > { %v14663_v5 = vadd.f32 %v6507_v53, %v19680_v50  ;;  %v6509_v62 = vpop.f32.mrb[34].mxu1  ;;  %v14585_v59 = vadd.f32 %v5586_v57, %v19210_v13  ;;  %v13759_v53 = vcombine.high %v878_v36, %v882_v24  ;;  %v8659_v1 = vmax.f32 %v14583_v35, 0.0  ;;  %v19707_v57 = vld [vmem:[%s17303_s14 + $0x24c] ss:$36 sps:$4 sm:$0xff]  }
 0x349   : > { %v14664_v19 = vadd.f32 %v6509_v62, %v19665_v37  ;;  %v6511_v3 = vpop.f32.mrb[35].mxu1  ;;  %v8666_v12 = vmax.f32 %v14584_v28, 0.0  ;;  %6960 = vmatmul.mubr.bf16.gmra.mrb[92].mxu0 %v19702_v63  ;;  %v8596_v9 = vmax.f32 %v14662_v15, 0.0  ;;  %v13758_v15 = vcombine.low %v878_v36, %v882_v24 }
 0x34a   : > { %7077 = vmatpush1.bf16.msra.mxu0 %v13742_v30  ;;  %v14665_v47 = vadd.f32 %v6511_v3, %v19680_v50  ;;  %v8667_v62 = vmax.f32 %v14585_v59, 0.0  ;;  %6969 = vmatprep.mubr.bf16.mxu0 %v19707_v57  ;;  %v8597_v58 = vmax.f32 %v14663_v5, 0.0  ;;  %v22752_v30 = vld [vmem:[#allocation18_spill] sm:$0xff] }
 0x34b   : > { %7078 = vmatprep.subr.bf16.mxu0 %v13751_v44  ;;  %v8604_v41 = vmax.f32 %v14664_v19, 0.0  ;;  %7772 = vmatmul.mubr.bf16.gmra.mrb[140].mxu1 %v19225_v8  ;;  %v19711_v49 = vpack.c.bf16 %v8666_v12, %v8658_v34 }
 0x34c   : > { %v8605_v32 = vmax.f32 %v14665_v47, 0.0  ;;  %7781 = vmatprep.mubr.bf16.mxu1 %v22752_v30  ;;  %v5590_v44 = vpop.f32.mrb[20].mxu0  ;;  %v19715_v35 = vpack.c.bf16 %v8667_v62, %v8659_v1 }
 0x34d   : > { %22753 = vst [vmem:[#allocation10_spill] sm:$0xff] %v19711_v49  ;;  %v19713_v28 = vpack.c.bf16 %v8604_v41, %v8596_v9  ;;  %v14586_v8 = vadd.f32 %v5590_v44, %v19204_v17  ;;  %v5592_v3 = vpop.f32.mrb[21].mxu0 }
 0x34e   : > { %7079 = vmatpush1.bf16.msra.mxu0 %v13750_v4  ;;  %v19717_v19 = vpack.c.bf16 %v8605_v32, %v8597_v58  ;;  %v6515_v59 = vpop.f32.mrb[36].mxu1  ;;  %v14587_v5 = vadd.f32 %v5592_v3, %v19210_v13  ;;  %v5594_v41 = vpop.f32.mrb[22].mxu0  ;;  %v19727_v4 = vld [vmem:[%s22602_s1 + $0xc10] sm:$0xff]  ;;  %v19738_v3 = vld [vmem:[%s17303_s14 + $0x248] ss:$36 sps:$4 sm:$0xff]  }
 0x34f   : > { %22754 = vst [vmem:[#allocation11_spill] sm:$0xff] %v19713_v28  ;;  %7080 = vmatprep.subr.bf16.mxu0 %v13759_v53  ;;  %v14666_v47 = vadd.f32 %v6515_v59, %v19665_v37  ;;  %v6517_v12 = vpop.f32.mrb[37].mxu1  ;;  %v14588_v36 = vadd.f32 %v5594_v41, %v19204_v17  ;;  %v5596_v24 = vpop.f32.mrb[23].mxu0  ;;  %v19732_v53 = vld [vmem:[%s22602_s1 + $0xc30] sm:$0xff]  ;;  %v8674_v9 = vmax.f32 %v14586_v8, 0.0 }
 0x350   : > { %22755 = vst [vmem:[#allocation12_spill] sm:$0xff] %v19717_v19  ;;  %v14667_v34 = vadd.f32 %v6517_v12, %v19680_v50  ;;  %v6519_v1 = vpop.f32.mrb[38].mxu1  ;;  %v14589_v58 = vadd.f32 %v5596_v24, %v19210_v13  ;;  %v8675_v41 = vmax.f32 %v14587_v5, 0.0 }
 0x351   : > { %v14668_v62 = vadd.f32 %v6519_v1, %v19665_v37  ;;  %v6521_v32 = vpop.f32.mrb[39].mxu1  ;;  %v8612_v30 = vmax.f32 %v14666_v47, 0.0  ;;  %v8682_v44 = vmax.f32 %v14588_v36, 0.0  ;;  %6970 = vmatmul.mubr.bf16.gmra.mrb[96].mxu0 %v19738_v3  ;;  %v19745_v1 = vld [vmem:[%s17303_s14 + $0x294] ss:$36 sps:$4 sm:$0xff]  }
 0x352   : > { %7081 = vmatpush1.bf16.msra.mxu0 %v13758_v15  ;;  %v14669_v59 = vadd.f32 %v6521_v32, %v19680_v50  ;;  %v8683_v8 = vmax.f32 %v14589_v58, 0.0  ;;  %6979 = vmatprep.mubr.bf16.mxu0 %v19745_v1  ;;  %v13767_v15 = vcombine.high %v19727_v4, %v19732_v53  ;;  %v8613_v47 = vmax.f32 %v14667_v34, 0.0 }
 0x353   : > { %v8620_v28 = vmax.f32 %v14668_v62, 0.0  ;;  %7782 = vmatmul.mubr.bf16.gmra.mrb[144].mxu1 %v19253_v45  ;;  %v19751_v24 = vpack.c.bf16 %v8682_v44, %v8674_v9 }
 0x354   : > { %v8621_v36 = vmax.f32 %v14669_v59, 0.0  ;;  %7791 = vmatprep.mubr.bf16.mxu1 %v19265_v16  ;;  %v5600_v5 = vpop.f32.mrb[24].mxu0  ;;  %7243 = vmatprep.subr.bf16.mxu0 %v13767_v15  ;;  %v19755_v62 = vpack.c.bf16 %v8683_v8, %v8675_v41 }
 0x355   : > { %22756 = vst [vmem:[#allocation13_spill] sm:$0xff] %v19751_v24  ;;  %v19753_v32 = vpack.c.bf16 %v8620_v28, %v8612_v30  ;;  %v14590_v58 = vadd.f32 %v5600_v5, %v19204_v17  ;;  %v5602_v19 = vpop.f32.mrb[25].mxu0 }
 0x356   : > { %22758 = vst [vmem:[#allocation15_spill] sm:$0xff] %v19755_v62  ;;  %v19757_v45 = vpack.c.bf16 %v8621_v36, %v8613_v47  ;;  %v6525_v12 = vpop.f32.mrb[40].mxu1  ;;  %v14591_v59 = vadd.f32 %v5602_v19, %v19210_v13  ;;  %v5604_v9 = vpop.f32.mrb[26].mxu0 }
 0x357   : > { %22757 = vst [vmem:[#allocation14_spill] sm:$0xff] %v19753_v32  ;;  %v14670_v34 = vadd.f32 %v6525_v12, %v19665_v37  ;;  %v6527_v16 = vpop.f32.mrb[41].mxu1  ;;  %v14592_v30 = vadd.f32 %v5604_v9, %v19204_v17  ;;  %v5606_v41 = vpop.f32.mrb[27].mxu0  ;;  %v8690_v36 = vmax.f32 %v14590_v58, 0.0  ;;  %v19768_v32 = vld [vmem:[%s17303_s14 + $0x290] ss:$36 sps:$4 sm:$0xff]  }
 0x358   : > { %22759 = vst [vmem:[#allocation16_spill] sm:$0xff] %v19757_v45  ;;  %v14671_v28 = vadd.f32 %v6527_v16, %v19680_v50  ;;  %v6529_v44 = vpop.f32.mrb[42].mxu1  ;;  %v14593_v15 = vadd.f32 %v5606_v41, %v19210_v13  ;;  %v8691_v16 = vmax.f32 %v14591_v59, 0.0 }
 0x359   : > { %v14672_v8 = vadd.f32 %v6529_v44, %v19665_v37  ;;  %v6531_v47 = vpop.f32.mrb[43].mxu1  ;;  %v8698_v5 = vmax.f32 %v14592_v30, 0.0  ;;  %6980 = vmatmul.mubr.bf16.gmra.mrb[100].mxu0 %v19768_v32  ;;  %v8628_v19 = vmax.f32 %v14670_v34, 0.0 }
 0x35a   : > { %v14673_v12 = vadd.f32 %v6531_v47, %v19680_v50  ;;  %v8699_v9 = vmax.f32 %v14593_v15, 0.0  ;;  %6989 = vmatprep.mubr.bf16.mxu0 %v19773_v46  ;;  %v8629_v44 = vmax.f32 %v14671_v28, 0.0 }
 0x35b   : > { %v8636_v45 = vmax.f32 %v14672_v8, 0.0  ;;  %7792 = vmatmul.mubr.bf16.gmra.mrb[148].mxu1 %v19302_v0  ;;  %v19777_v58 = vpack.c.bf16 %v8698_v5, %v8690_v36 }
 0x35c   : > { %v8637_v41 = vmax.f32 %v14673_v12, 0.0  ;;  %7801 = vmatprep.mubr.bf16.mxu1 %v19314_v61  ;;  %v5610_v47 = vpop.f32.mrb[28].mxu0  ;;  %v19781_v52 = vpack.c.bf16 %v8699_v9, %v8691_v16 }
 0x35d   : > { %22760 = vst [vmem:[#allocation18_spill] sm:$0xff] %v19777_v58  ;;  %v19779_v30 = vpack.c.bf16 %v8636_v45, %v8628_v19  ;;  %v14594_v59 = vadd.f32 %v5610_v47, %v19204_v17  ;;  %v5612_v8 = vpop.f32.mrb[29].mxu0 }
 0x35e   : > { %22762 = vst [vmem:[#allocation28_spill] sm:$0xff] %v19781_v52  ;;  %v19783_v34 = vpack.c.bf16 %v8637_v41, %v8629_v44  ;;  %v6535_v0 = vpop.f32.mrb[44].mxu1  ;;  %v14595_v28 = vadd.f32 %v5612_v8, %v19210_v13  ;;  %v5614_v61 = vpop.f32.mrb[30].mxu0  ;;  %v22780_v52 = vcombine.low %v19727_v4, %v19732_v53  ;;  %v914_v4 = vld [vmem:[%s22602_s1 + $0xcf0] sm:$0xff] }
 0x35f   : > { %22761 = vst [vmem:[#allocation27_spill] sm:$0xff] %v19779_v30  ;;  %v14674_v15 = vadd.f32 %v6535_v0, %v19665_v37  ;;  %v6537_v12 = vpop.f32.mrb[45].mxu1  ;;  %v14596_v45 = vadd.f32 %v5614_v61, %v19204_v17  ;;  %v5616_v19 = vpop.f32.mrb[31].mxu0  ;;  %v8706_v41 = vmax.f32 %v14594_v59, 0.0  ;;  %v19794_v30 = vld [vmem:[%s17303_s14 + $0x2d8] ss:$36 sps:$4 sm:$0xff]  }
 0x360   : > { %22763 = vst [vmem:[#allocation29_spill] sm:$0xff] %v19783_v34  ;;  %v14675_v36 = vadd.f32 %v6537_v12, %v19680_v50  ;;  %v6539_v5 = vpop.f32.mrb[46].mxu1  ;;  %v14597_v9 = vadd.f32 %v5616_v19, %v19210_v13  ;;  %v8707_v12 = vmax.f32 %v14595_v28, 0.0  ;;  %v19799_v61 = vld [vmem:[%s17303_s14 + $0x324] ss:$36 sps:$4 sm:$0xff]  }
 0x361   : > { %v14676_v16 = vadd.f32 %v6539_v5, %v19665_v37  ;;  %v6541_v44 = vpop.f32.mrb[47].mxu1  ;;  %v8714_v47 = vmax.f32 %v14596_v45, 0.0  ;;  %6990 = vmatmul.mubr.bf16.gmra.mrb[104].mxu0 %v19794_v30  ;;  %v8644_v8 = vmax.f32 %v14674_v15, 0.0 }
 0x362   : > { %v14677_v0 = vadd.f32 %v6541_v44, %v19680_v50  ;;  %v8715_v17 = vmax.f32 %v14597_v9, 0.0  ;;  %6999 = vmatprep.mubr.bf16.mxu0 %v19799_v61  ;;  %v8645_v13 = vmax.f32 %v14675_v36, 0.0 }
 0x363   : > { %v8652_v34 = vmax.f32 %v14676_v16, 0.0  ;;  %7802 = vmatmul.mubr.bf16.gmra.mrb[152].mxu1 %v19336_v56  ;;  %v19802_v59 = vpack.c.bf16 %v8714_v47, %v8706_v41 }
 0x364   : > { %v8653_v45 = vmax.f32 %v14677_v0, 0.0  ;;  %7811 = vmatprep.mubr.bf16.mxu1 %v19348_v48  ;;  %v19807_v15 = vpack.c.bf16 %v8715_v17, %v8707_v12  ;;  %v19816_v48 = vld [vmem:[%s17303_s14 + $0x320] ss:$36 sps:$4 sm:$0xff]  }
 0x365   : > { %22764 = vst [vmem:[#allocation30_spill] sm:$0xff] %v19802_v59  ;;  %v19805_v5 = vpack.c.bf16 %v8652_v34, %v8644_v8  ;;  %v19821_v8 = vld [vmem:[%s17303_s14 + $0x36c] ss:$36 sps:$4 sm:$0xff]  }
 0x366   : > { %22766 = vst [vmem:[#allocation32_spill] sm:$0xff] %v19807_v15  ;;  %v19809_v28 = vpack.c.bf16 %v8653_v45, %v8645_v13  ;;  %v6545_v19 = vpop.f32.mrb[48].mxu1 }
 0x367   : > { %22765 = vst [vmem:[#allocation31_spill] sm:$0xff] %v19805_v5  ;;  %v14678_v56 = vadd.f32 %v6545_v19, %v19665_v37  ;;  %v6547_v16 = vpop.f32.mrb[49].mxu1 }
 0x368   : > { %22767 = vst [vmem:[#allocation33_spill] sm:$0xff] %v19809_v28  ;;  %v14679_v9 = vadd.f32 %v6547_v16, %v19680_v50  ;;  %v6549_v44 = vpop.f32.mrb[50].mxu1 }
 0x369   : > { %v14680_v36 = vadd.f32 %v6549_v44, %v19665_v37  ;;  %v6551_v41 = vpop.f32.mrb[51].mxu1  ;;  %7000 = vmatmul.mubr.bf16.gmra.mrb[108].mxu0 %v19816_v48  ;;  %v8660_v34 = vmax.f32 %v14678_v56, 0.0  ;;  %v767_v56 = vld [vmem:[%s22602_s1 + $0x858] sm:$0xff] }
 0x36a   : > { %v14681_v47 = vadd.f32 %v6551_v41, %v19680_v50  ;;  %7009 = vmatprep.mubr.bf16.mxu0 %v19821_v8  ;;  %v8661_v12 = vmax.f32 %v14679_v9, 0.0 }
 0x36b   : > { %v8668_v0 = vmax.f32 %v14680_v36, 0.0  ;;  %7812 = vmatmul.mubr.bf16.gmra.mrb[156].mxu1 %v19370_v42  ;;  %v771_v42 = vld [vmem:[%s22602_s1 + $0x878] sm:$0xff] }
 0x36c   : > { %v8669_v17 = vmax.f32 %v14681_v47, 0.0  ;;  %7854 = vmatprep.mubr.bf16.mxu1 %v19382_v31  ;;  %v13649_v47 = vcombine.high %v767_v56, %v771_v42 }
 0x36d   : > { %v19825_v13 = vpack.c.bf16 %v8668_v0, %v8660_v34  ;;  %v19840_v0 = vld [vmem:[%s17303_s14 + $0x368] ss:$36 sps:$4 sm:$0xff]  }
 0x36e   : > { %v19827_v45 = vpack.c.bf16 %v8669_v17, %v8661_v12  ;;  %v6555_v19 = vpop.f32.mrb[52].mxu1  ;;  %v775_v12 = vld [vmem:[%s22602_s1 + $0x898] sm:$0xff] }
 0x36f   : > { %22768 = vst [vmem:[#allocation34_spill] sm:$0xff] %v19825_v13  ;;  %v14682_v16 = vadd.f32 %v6555_v19, %v19665_v37  ;;  %v6557_v9 = vpop.f32.mrb[53].mxu1  ;;  %v779_v17 = vld [vmem:[%s22602_s1 + $0x8b8] sm:$0xff] }
 0x370   : > { %22769 = vst [vmem:[#allocation35_spill] sm:$0xff] %v19827_v45  ;;  %v14683_v44 = vadd.f32 %v6557_v9, %v19680_v50  ;;  %v6559_v31 = vpop.f32.mrb[54].mxu1  ;;  %v19862_v13 = vld [vmem:[%s22602_s1 + $0xc38] sm:$0xff]  ;;  %v13657_v59 = vcombine.high %v775_v12, %v779_v17 }
 0x371   : > { %v14684_v36 = vadd.f32 %v6559_v31, %v19665_v37  ;;  %v6561_v41 = vpop.f32.mrb[55].mxu1  ;;  %7010 = vmatmul.mubr.bf16.gmra.mrb[112].mxu0 %v19840_v0  ;;  %v8676_v19 = vmax.f32 %v14682_v16, 0.0  ;;  %v19851_v31 = vld [vmem:[%s17303_s14 + $0x3b4] ss:$36 sps:$4 sm:$0xff]   ;;  %v22770_v16 = vcombine.low %v19282_v55, %v19287_v60 }
 0x372   : > { %v14685_v34 = vadd.f32 %v6561_v41, %v19680_v50  ;;  %7019 = vmatprep.mubr.bf16.mxu0 %v19851_v31  ;;  %v19857_v41 = vld [vmem:[%s22602_s1 + $0xc18] sm:$0xff]  ;;  %v8677_v45 = vmax.f32 %v14683_v44, 0.0 }
 0x373   : > { %v8684_v9 = vmax.f32 %v14684_v36, 0.0  ;;  %7855 = vmatmul.mubr.bf16.vlgmr.msra.gmra.mrb[96].mxu1 %v19410_v14  ;;  %v13648_v14 = vcombine.low %v767_v56, %v771_v42  ;;  %v783_v44 = vld [vmem:[%s22602_s1 + $0x8d8] sm:$0xff] }
 0x374   : > { %v8685_v5 = vmax.f32 %v14685_v34, 0.0  ;;  %8016 = vmatpush1.bf16.msra.mxu1 %v22770_v16  ;;  %7864 = vmatprep.mubr.bf16.mxu1 %v19422_v18  ;;  %v787_v55 = vld [vmem:[%s22602_s1 + $0x8f8] sm:$0xff] }
 0x375   : > { %v19870_v28 = vpack.c.bf16 %v8684_v9, %v8676_v19  ;;  %8017 = vmatprep.subr.bf16.mxu1 %v13649_v47  ;;  %v13656_v47 = vcombine.low %v775_v12, %v779_v17  ;;  %v13665_v34 = vcombine.high %v783_v44, %v787_v55  ;;  %v19885_v9 = vld [vmem:[%s17303_s14 + $0x3b0] ss:$36 sps:$4 sm:$0xff]   ;;  %v795_v16 = vld [vmem:[%s22602_s1 + $0x938] sm:$0xff] }
 0x376   : > { %v19872_v15 = vpack.c.bf16 %v8685_v5, %v8677_v45  ;;  %v6565_v58 = vpop.f32.mrb[56].mxu1 }
 0x377   : > { %22771 = vst [vmem:[#allocation36_spill] sm:$0xff] %v19870_v28  ;;  %v14686_v60 = vadd.f32 %v6565_v58, %v19665_v37  ;;  %v6567_v18 = vpop.f32.mrb[57].mxu1  ;;  %v791_v58 = vld [vmem:[%s22602_s1 + $0x918] sm:$0xff] }
 0x378   : > { %22772 = vst [vmem:[#allocation37_spill] sm:$0xff] %v19872_v15  ;;  %v14687_v56 = vadd.f32 %v6567_v18, %v19680_v50  ;;  %v6569_v42 = vpop.f32.mrb[58].mxu1  ;;  %8018 = vmatpush1.bf16.msra.mxu1 %v13648_v14  ;;  %v13673_v36 = vcombine.high %v791_v58, %v795_v16 }
 0x379   : > { %v14688_v5 = vadd.f32 %v6569_v42, %v19665_v37  ;;  %v6571_v45 = vpop.f32.mrb[59].mxu1  ;;  %8019 = vmatprep.subr.bf16.mxu1 %v13657_v59  ;;  %7020 = vmatmul.mubr.bf16.gmra.mrb[116].mxu0 %v19885_v9  ;;  %v8692_v12 = vmax.f32 %v14686_v60, 0.0  ;;  %v19896_v59 = vld [vmem:[%s17303_s14 + $0x3fc] ss:$36 sps:$4 sm:$0xff]   ;;  %v13664_v42 = vcombine.low %v783_v44, %v787_v55 }
 0x37a   : > { %v14689_v19 = vadd.f32 %v6571_v45, %v19680_v50  ;;  %7029 = vmatprep.mubr.bf16.mxu0 %v19896_v59  ;;  %v8693_v14 = vmax.f32 %v14687_v56, 0.0  ;;  %v803_v56 = vld [vmem:[%s22602_s1 + $0x978] sm:$0xff] }
 0x37b   : > { %v8700_v17 = vmax.f32 %v14688_v5, 0.0  ;;  %7865 = vmatmul.mubr.bf16.gmra.mrb[100].mxu1 %v19465_v29  ;;  %v799_v29 = vld [vmem:[%s22602_s1 + $0x958] sm:$0xff]  ;;  %v13672_v5 = vcombine.low %v791_v58, %v795_v16 }
 0x37c   : > { %v8701_v18 = vmax.f32 %v14689_v19, 0.0  ;;  %7874 = vmatprep.mubr.bf16.mxu1 %v19477_v40  ;;  %8020 = vmatpush1.bf16.msra.mxu1 %v13656_v47 }
 0x37d   : > { %v19900_v45 = vpack.c.bf16 %v8700_v17, %v8692_v12  ;;  %8021 = vmatprep.subr.bf16.mxu1 %v13665_v34  ;;  %v13681_v12 = vcombine.high %v799_v29, %v803_v56 }
 0x37e   : > { %v19902_v28 = vpack.c.bf16 %v8701_v18, %v8693_v14  ;;  %v6575_v60 = vpop.f32.mrb[60].mxu1  ;;  %v19915_v14 = vld [vmem:[%s17303_s14 + $0x3f8] ss:$36 sps:$4 sm:$0xff]  }
 0x37f   : > { %22773 = vst [vmem:[#allocation38_spill] sm:$0xff] %v19900_v45  ;;  %v14690_v40 = vadd.f32 %v6575_v60, %v19665_v37  ;;  %v6577_v47 = vpop.f32.mrb[61].mxu1  ;;  %v807_v18 = vld [vmem:[%s22602_s1 + $0x998] sm:$0xff] }
 0x380   : > { %22774 = vst [vmem:[#allocation39_spill] sm:$0xff] %v19902_v28  ;;  %v14691_v44 = vadd.f32 %v6577_v47, %v19680_v50  ;;  %v6579_v55 = vpop.f32.mrb[62].mxu1  ;;  %8022 = vmatpush1.bf16.msra.mxu1 %v13664_v42  ;;  %v811_v42 = vld [vmem:[%s22602_s1 + $0x9b8] sm:$0xff] }
 0x381   : > { %v14692_v34 = vadd.f32 %v6579_v55, %v19665_v37  ;;  %v6581_v19 = vpop.f32.mrb[63].mxu1  ;;  %8023 = vmatprep.subr.bf16.mxu1 %v13673_v36  ;;  %7030 = vmatmul.mubr.bf16.gmra.mrb[120].mxu0 %v19915_v14  ;;  %v8708_v58 = vmax.f32 %v14690_v40, 0.0  ;;  %v19926_v36 = vld [vmem:[%s17303_s14 + $0x444] ss:$36 sps:$4 sm:$0xff]   ;;  %v13680_v55 = vcombine.low %v799_v29, %v803_v56  ;;  %v13689_v45 = vcombine.high %v807_v18, %v811_v42 }
 0x382   : > { %v14693_v17 = vadd.f32 %v6581_v19, %v19680_v50  ;;  %7039 = vmatprep.mubr.bf16.mxu0 %v19926_v36  ;;  %v8709_v60 = vmax.f32 %v14691_v44, 0.0  ;;  %v819_v44 = vld [vmem:[%s22602_s1 + $0x9f8] sm:$0xff] }
 0x383   : > { %v8716_v16 = vmax.f32 %v14692_v34, 0.0  ;;  %7875 = vmatmul.mubr.bf16.gmra.mrb[104].mxu1 %v19519_v33  ;;  %v815_v33 = vld [vmem:[%s22602_s1 + $0x9d8] sm:$0xff]  ;;  %v13688_v34 = vcombine.low %v807_v18, %v811_v42 }
 0x384   : > { %v8717_v47 = vmax.f32 %v14693_v17, 0.0  ;;  %7884 = vmatprep.mubr.bf16.mxu1 %v19531_v27  ;;  %8024 = vmatpush1.bf16.msra.mxu1 %v13672_v5 }
 0x385   : > { %v19930_v19 = vpack.c.bf16 %v8716_v16, %v8708_v58  ;;  %8025 = vmatprep.subr.bf16.mxu1 %v13681_v12  ;;  %v13697_v58 = vcombine.high %v815_v33, %v819_v44 }
 0x386   : > { %v19932_v28 = vpack.c.bf16 %v8717_v47, %v8709_v60  ;;  %v6585_v40 = vpop.f32.mrb[64].mxu1  ;;  %v19945_v60 = vld [vmem:[%s17303_s14 + $0x440] ss:$36 sps:$4 sm:$0xff]   ;;  %v823_v47 = vld [vmem:[%s22602_s1 + $0xa18] sm:$0xff] }
 0x387   : > { %22775 = vst [vmem:[#allocation40_spill] sm:$0xff] %v19930_v19  ;;  %v14694_v27 = vadd.f32 %v6585_v40, %v19665_v37  ;;  %v6587_v5 = vpop.f32.mrb[65].mxu1 }
 0x388   : > { %22776 = vst [vmem:[#allocation41_spill] sm:$0xff] %v19932_v28  ;;  %v14695_v29 = vadd.f32 %v6587_v5, %v19680_v50  ;;  %v6589_v56 = vpop.f32.mrb[66].mxu1  ;;  %8026 = vmatpush1.bf16.msra.mxu1 %v13680_v55  ;;  %v827_v55 = vld [vmem:[%s22602_s1 + $0xa38] sm:$0xff] }
 0x389   : > { %v14696_v12 = vadd.f32 %v6589_v56, %v19665_v37  ;;  %v6591_v17 = vpop.f32.mrb[67].mxu1  ;;  %8027 = vmatprep.subr.bf16.mxu1 %v13689_v45  ;;  %7040 = vmatmul.mubr.bf16.gmra.mrb[124].mxu0 %v19945_v60  ;;  %v8724_v18 = vmax.f32 %v14694_v27, 0.0  ;;  %v19956_v45 = vld [vmem:[%s17303_s14 + $0x14] ss:$36 sps:$4 sm:$0xff]   ;;  %v13696_v56 = vcombine.low %v815_v33, %v819_v44  ;;  %v13705_v19 = vcombine.high %v823_v47, %v827_v55 }
 0x38a   : > { %v14697_v16 = vadd.f32 %v6591_v17, %v19680_v50  ;;  %7082 = vmatprep.mubr.bf16.mxu0 %v19956_v45  ;;  %v8725_v40 = vmax.f32 %v14695_v29, 0.0  ;;  %v835_v29 = vld [vmem:[%s22602_s1 + $0xa78] sm:$0xff]  ;;  %v894_v33 = vld [vmem:[%s22602_s1 + $0xc50] sm:$0xff] }
 0x38b   : > { %v8732_v42 = vmax.f32 %v14696_v12, 0.0  ;;  %7885 = vmatmul.mubr.bf16.gmra.mrb[108].mxu1 %v19564_v54  ;;  %v831_v54 = vld [vmem:[%s22602_s1 + $0xa58] sm:$0xff]  ;;  %v898_v44 = vld [vmem:[%s22602_s1 + $0xc70] sm:$0xff] }
 0x38c   : > { %v8733_v5 = vmax.f32 %v14697_v16, 0.0  ;;  %7894 = vmatprep.mubr.bf16.mxu1 %v19569_v43  ;;  %8028 = vmatpush1.bf16.msra.mxu1 %v13688_v34  ;;  %v13704_v16 = vcombine.low %v823_v47, %v827_v55  ;;  %v13775_v47 = vcombine.high %v894_v33, %v898_v44  ;;  %v13774_v24 = vcombine.low %v894_v33, %v898_v44 }
 0x38d   : > { %v19960_v17 = vpack.c.bf16 %v8732_v42, %v8724_v18  ;;  %8029 = vmatprep.subr.bf16.mxu1 %v13697_v58 }
 0x38e   : > { %v19962_v28 = vpack.c.bf16 %v8733_v5, %v8725_v40  ;;  %v6595_v27 = vpop.f32.mrb[68].mxu1  ;;  %v13713_v40 = vcombine.high %v831_v54, %v835_v29 }
 0x38f   : > { %22777 = vst [vmem:[#allocation42_spill] sm:$0xff] %v19960_v17  ;;  %v14698_v43 = vadd.f32 %v6595_v27, %v19665_v37  ;;  %v6597_v34 = vpop.f32.mrb[69].mxu1  ;;  %v19981_v27 = vld [vmem:[%s17303_s14 + $0x10] ss:$36 sps:$4 sm:$0xff]   ;;  %v839_v17 = vld [vmem:[%s22602_s1 + $0xa98] sm:$0xff] }
 0x390   : > { %22778 = vst [vmem:[#allocation43_spill] sm:$0xff] %v19962_v28  ;;  %v14699_v12 = vadd.f32 %v6597_v34, %v19680_v50  ;;  %v6599_v58 = vpop.f32.mrb[70].mxu1  ;;  %8030 = vmatpush1.bf16.msra.mxu1 %v13696_v56  ;;  %v843_v56 = vld [vmem:[%s22602_s1 + $0xab8] sm:$0xff] }
 0x391   : > { %v14700_v18 = vadd.f32 %v6599_v58, %v19665_v37  ;;  %v6601_v42 = vpop.f32.mrb[71].mxu1  ;;  %8031 = vmatprep.subr.bf16.mxu1 %v13705_v19  ;;  %7083 = vmatmul.mubr.bf16.vlgmr.msra.gmra.mrb[64].mxu0 %v19981_v27  ;;  %v8740_v55 = vmax.f32 %v14698_v43, 0.0  ;;  %v19992_v19 = vld [vmem:[%s17303_s14 + $0x5c] ss:$36 sps:$4 sm:$0xff]   ;;  %v902_v58 = vld [vmem:[%s22602_s1 + $0xc90] sm:$0xff]  ;;  %v13712_v43 = vcombine.low %v831_v54, %v835_v29 }
 0x392   : > { %v14701_v5 = vadd.f32 %v6601_v42, %v19680_v50  ;;  %7092 = vmatprep.mubr.bf16.mxu0 %v19992_v19  ;;  %v906_v42 = vld [vmem:[%s22602_s1 + $0xcb0] sm:$0xff]  ;;  %v8741_v28 = vmax.f32 %v14699_v12, 0.0  ;;  %7244 = vmatpush1.bf16.msra.mxu0 %v22780_v52  ;;  %v847_v12 = vld [vmem:[%s22602_s1 + $0xad8] sm:$0xff] }
 0x393   : > { %v8748_v34 = vmax.f32 %v14700_v18, 0.0  ;;  %7895 = vmatmul.mubr.bf16.gmra.mrb[112].mxu1 %v19596_v20  ;;  %v13721_v20 = vcombine.high %v839_v17, %v843_v56  ;;  %7245 = vmatprep.subr.bf16.mxu0 %v13775_v47  ;;  %v13783_v54 = vcombine.high %v902_v58, %v906_v42  ;;  %v910_v52 = vld [vmem:[%s22602_s1 + $0xcd0] sm:$0xff]  ;;  %v20026_v47 = vld [vmem:[%s17303_s14 + $0x58] ss:$36 sps:$4 sm:$0xff]  }
 0x394   : > { %v8749_v15 = vmax.f32 %v14701_v5, 0.0  ;;  %7904 = vmatprep.mubr.bf16.mxu1 %v19601_v23  ;;  %8032 = vmatpush1.bf16.msra.mxu1 %v13704_v16  ;;  %v851_v23 = vld [vmem:[%s22602_s1 + $0xaf8] sm:$0xff] }
 0x395   : > { %v20002_v18 = vpack.c.bf16 %v8748_v34, %v8740_v55  ;;  %8033 = vmatprep.subr.bf16.mxu1 %v13713_v40  ;;  %v13782_v40 = vcombine.low %v902_v58, %v906_v42  ;;  %v855_v55 = vld [vmem:[%s22602_s1 + $0xb18] sm:$0xff]  ;;  %v918_v58 = vld [vmem:[%s22602_s1 + $0xd10] sm:$0xff] }
 0x396   : > { %v20007_v62 = vpack.c.bf16 %v8749_v15, %v8741_v28  ;;  %v6605_v49 = vpop.f32.mrb[72].mxu1  ;;  %v13720_v28 = vcombine.low %v839_v17, %v843_v56  ;;  %7246 = vmatpush1.bf16.msra.mxu0 %v13774_v24  ;;  %v859_v17 = vld [vmem:[%s22602_s1 + $0xb38] sm:$0xff]  ;;  %v13791_v56 = vcombine.high %v910_v52, %v914_v4  ;;  %v20037_v24 = vld [vmem:[%s17303_s14 + $0xa4] ss:$36 sps:$4 sm:$0xff]   ;;  %v922_v42 = vld [vmem:[%s22602_s1 + $0xd30] sm:$0xff] }
 0x397   : > { %22779 = vst [vmem:[#allocation44_spill] sm:$0xff] %v20002_v18  ;;  %v14702_v29 = vadd.f32 %v6605_v49, %v19665_v37  ;;  %v6607_v16 = vpop.f32.mrb[73].mxu1  ;;  %v13729_v49 = vcombine.high %v847_v12, %v851_v23  ;;  %7247 = vmatprep.subr.bf16.mxu0 %v13783_v54  ;;  %v13728_v54 = vcombine.low %v847_v12, %v851_v23  ;;  %v863_v18 = vld [vmem:[%s22602_s1 + $0xb58] sm:$0xff] }
 0x398   : > { %v14703_v53 = vadd.f32 %v6607_v16, %v19680_v50  ;;  %v6609_v15 = vpop.f32.mrb[74].mxu1  ;;  %8034 = vmatpush1.bf16.msra.mxu1 %v13712_v43 }
 0x399   : > { %v14704_v33 = vadd.f32 %v6609_v15, %v19665_v37  ;;  %v6611_v44 = vpop.f32.mrb[75].mxu1  ;;  %8035 = vmatprep.subr.bf16.mxu1 %v13721_v20  ;;  %7093 = vmatmul.mubr.bf16.gmra.mrb[68].mxu0 %v20026_v47  ;;  %v8756_v34 = vmax.f32 %v14702_v29, 0.0  ;;  %v13790_v15 = vcombine.low %v910_v52, %v914_v4  ;;  %v926_v52 = vld [vmem:[%s22602_s1 + $0xd50] sm:$0xff] }
 0x39a   : > { %v14705_v5 = vadd.f32 %v6611_v44, %v19680_v50  ;;  %7102 = vmatprep.mubr.bf16.mxu0 %v20037_v24  ;;  %v8757_v20 = vmax.f32 %v14703_v53, 0.0  ;;  %7248 = vmatpush1.bf16.msra.mxu0 %v13782_v40  ;;  %v867_v53 = vld [vmem:[%s22602_s1 + $0xb78] sm:$0xff]  ;;  %v930_v4 = vld [vmem:[%s22602_s1 + $0xd70] sm:$0xff]  ;;  %v13736_v40 = vcombine.low %v855_v55, %v859_v17 }
 0x39b   : > { %v8764_v43 = vmax.f32 %v14704_v33, 0.0  ;;  %7905 = vmatmul.mubr.bf16.gmra.mrb[116].mxu1 %v19626_v26  ;;  %v13737_v26 = vcombine.high %v855_v55, %v859_v17  ;;  %7249 = vmatprep.subr.bf16.mxu0 %v13791_v56  ;;  %v875_v55 = vld [vmem:[%s22602_s1 + $0xbb8] sm:$0xff]  ;;  %v13807_v17 = vcombine.high %v926_v52, %v930_v4 }
 0x39c   : > { %v8765_v16 = vmax.f32 %v14705_v5, 0.0  ;;  %7914 = vmatprep.mubr.bf16.mxu1 %v19631_v39  ;;  %8036 = vmatpush1.bf16.msra.mxu1 %v13720_v28  ;;  %v13799_v39 = vcombine.high %v918_v58, %v922_v42 }
 0x39d   : > { %v20047_v29 = vpack.c.bf16 %v8764_v43, %v8756_v34  ;;  %8037 = vmatprep.subr.bf16.mxu1 %v13729_v49  ;;  %v13745_v34 = vcombine.high %v863_v18, %v867_v53  ;;  %v13798_v43 = vcombine.low %v918_v58, %v922_v42  ;;  %v20079_v58 = vld [vmem:[%s17303_s14 + $0xec] ss:$36 sps:$4 sm:$0xff]  }
 0x39e   : > { %v20049_v33 = vpack.c.bf16 %v8765_v16, %v8757_v20  ;;  %v6615_v44 = vpop.f32.mrb[76].mxu1  ;;  %7250 = vmatpush1.bf16.msra.mxu0 %v13790_v15  ;;  %v20068_v16 = vld [vmem:[%s17303_s14 + $0xa0] ss:$36 sps:$4 sm:$0xff]   ;;  %v934_v42 = vld [vmem:[%s22602_s1 + $0xd90] sm:$0xff] }
 0x39f   : > { %22781 = vst [vmem:[#allocation45_spill] sm:$0xff] %v20047_v29  ;;  %v14706_v12 = vadd.f32 %v6615_v44, %v19665_v37  ;;  %v6617_v23 = vpop.f32.mrb[77].mxu1  ;;  %7251 = vmatprep.subr.bf16.mxu0 %v13799_v39  ;;  %v938_v15 = vld [vmem:[%s22602_s1 + $0xdb0] sm:$0xff] }
 0x3a0   : > { %22782 = vst [vmem:[#allocation46_spill] sm:$0xff] %v20049_v33  ;;  %v14707_v28 = vadd.f32 %v6617_v23, %v19680_v50  ;;  %v6619_v49 = vpop.f32.mrb[78].mxu1  ;;  %8038 = vmatpush1.bf16.msra.mxu1 %v13728_v54  ;;  %v871_v54 = vld [vmem:[%s22602_s1 + $0xb98] sm:$0xff]  ;;  %v13815_v33 = vcombine.high %v934_v42, %v938_v15 }
 0x3a1   : > { %v14708_v5 = vadd.f32 %v6619_v49, %v19665_v37  ;;  %v6621_v56 = vpop.f32.mrb[79].mxu1  ;;  %8039 = vmatprep.subr.bf16.mxu1 %v13737_v26  ;;  %7103 = vmatmul.mubr.bf16.gmra.mrb[72].mxu0 %v20068_v16  ;;  %v8772_v26 = vmax.f32 %v14706_v12, 0.0  ;;  %v13744_v12 = vcombine.low %v863_v18, %v867_v53 }
 0x3a2   : > { %v14709_v20 = vadd.f32 %v6621_v56, %v19680_v50  ;;  %7112 = vmatprep.mubr.bf16.mxu0 %v20079_v58  ;;  %v8773_v39 = vmax.f32 %v14707_v28, 0.0  ;;  %7252 = vmatpush1.bf16.msra.mxu0 %v13798_v43  ;;  %v879_v28 = vld [vmem:[%s22602_s1 + $0xbd8] sm:$0xff]  ;;  %v13752_v43 = vcombine.low %v871_v54, %v875_v55 }
 0x3a3   : > { %v8780_v44 = vmax.f32 %v14708_v5, 0.0  ;;  %7915 = vmatmul.mubr.bf16.gmra.mrb[120].mxu1 %v19658_v11  ;;  %v13753_v11 = vcombine.high %v871_v54, %v875_v55  ;;  %v13806_v5 = vcombine.low %v926_v52, %v930_v4  ;;  %7253 = vmatprep.subr.bf16.mxu0 %v13807_v17  ;;  %v942_v52 = vld [vmem:[%s22602_s1 + $0xdd0] sm:$0xff] }
 0x3a4   : > { %v8781_v23 = vmax.f32 %v14709_v20, 0.0  ;;  %7924 = vmatprep.mubr.bf16.mxu1 %v19668_v2  ;;  %8040 = vmatpush1.bf16.msra.mxu1 %v13736_v40  ;;  %v883_v2 = vld [vmem:[%s22602_s1 + $0xbf8] sm:$0xff]  ;;  %v946_v4 = vld [vmem:[%s22602_s1 + $0xdf0] sm:$0xff] }
 0x3a5   : > { %v20089_v49 = vpack.c.bf16 %v8780_v44, %v8772_v26  ;;  %8041 = vmatprep.subr.bf16.mxu1 %v13745_v34  ;;  %v13761_v26 = vcombine.high %v879_v28, %v883_v2  ;;  %v20115_v54 = vld [vmem:[%s17303_s14 + $0x134] ss:$36 sps:$4 sm:$0xff]  }
 0x3a6   : > { %v20091_v56 = vpack.c.bf16 %v8781_v23, %v8773_v39  ;;  %v6625_v29 = vpop.f32.mrb[80].mxu1  ;;  %7254 = vmatpush1.bf16.msra.mxu0 %v13806_v5  ;;  %v20110_v39 = vld [vmem:[%s17303_s14 + $0xe8] ss:$36 sps:$4 sm:$0xff]   ;;  %v13823_v23 = vcombine.high %v942_v52, %v946_v4  ;;  %v950_v55 = vld [vmem:[%s22602_s1 + $0xe10] sm:$0xff]  ;;  %v13769_v5 = vcombine.high %v19857_v41, %v19862_v13 }
 0x3a7   : > { %22783 = vst [vmem:[#allocation47_spill] sm:$0xff] %v20089_v49  ;;  %v14710_v18 = vadd.f32 %v6625_v29, %v19665_v37  ;;  %v6627_v53 = vpop.f32.mrb[81].mxu1  ;;  %v13814_v29 = vcombine.low %v934_v42, %v938_v15  ;;  %7255 = vmatprep.subr.bf16.mxu0 %v13815_v33  ;;  %v954_v42 = vld [vmem:[%s22602_s1 + $0xe30] sm:$0xff]  ;;  %v13760_v33 = vcombine.low %v879_v28, %v883_v2 }
 0x3a8   : > { %v14711_v40 = vadd.f32 %v6627_v53, %v19680_v50  ;;  %v6629_v34 = vpop.f32.mrb[82].mxu1  ;;  %8042 = vmatpush1.bf16.msra.mxu1 %v13744_v12 }
 0x3a9   : > { %v14712_v20 = vadd.f32 %v6629_v34, %v19665_v37  ;;  %v6631_v17 = vpop.f32.mrb[83].mxu1  ;;  %8043 = vmatprep.subr.bf16.mxu1 %v13753_v11  ;;  %7113 = vmatmul.mubr.bf16.gmra.mrb[76].mxu0 %v20110_v39  ;;  %v8788_v53 = vmax.f32 %v14710_v18, 0.0 }
 0x3aa   : > { %v14713_v44 = vadd.f32 %v6631_v17, %v19680_v50  ;;  %7122 = vmatprep.mubr.bf16.mxu0 %v20115_v54  ;;  %v8789_v15 = vmax.f32 %v14711_v40, 0.0  ;;  %7256 = vmatpush1.bf16.msra.mxu0 %v13814_v29 }
 0x3ab   : > { %v8796_v49 = vmax.f32 %v14712_v20, 0.0  ;;  %7925 = vmatmul.mubr.bf16.gmra.mrb[124].mxu1 %v19702_v63  ;;  %v13822_v63 = vcombine.low %v942_v52, %v946_v4  ;;  %7257 = vmatprep.subr.bf16.mxu0 %v13823_v23  ;;  %v13831_v20 = vcombine.high %v950_v55, %v954_v42 }
 0x3ac   : > { %v8797_v12 = vmax.f32 %v14713_v44, 0.0  ;;  %7934 = vmatprep.mubr.bf16.mxu1 %v19707_v57  ;;  %8044 = vmatpush1.bf16.msra.mxu1 %v13752_v43  ;;  %v958_v57 = vld [vmem:[%s22602_s1 + $0xe50] sm:$0xff]  ;;  %v13830_v43 = vcombine.low %v950_v55, %v954_v42 }
 0x3ad   : > { %v20125_v11 = vpack.c.bf16 %v8796_v49, %v8788_v53  ;;  %8045 = vmatprep.subr.bf16.mxu1 %v13761_v26  ;;  %v962_v49 = vld [vmem:[%s22602_s1 + $0xe70] sm:$0xff] }
 0x3ae   : > { %v20129_v18 = vpack.c.bf16 %v8797_v12, %v8789_v15  ;;  %v6635_v34 = vpop.f32.mrb[84].mxu1  ;;  %7258 = vmatpush1.bf16.msra.mxu0 %v13822_v63  ;;  %v20142_v26 = vld [vmem:[%s17303_s14 + $0x130] ss:$36 sps:$4 sm:$0xff]   ;;  %v13839_v44 = vcombine.high %v958_v57, %v962_v49  ;;  %v20147_v15 = vld [vmem:[%s17303_s14 + $0x17c] ss:$36 sps:$4 sm:$0xff]  }
 0x3af   : > { %v14714_v40 = vadd.f32 %v6635_v34, %v19665_v37  ;;  %v6637_v17 = vpop.f32.mrb[85].mxu1  ;;  %7259 = vmatprep.subr.bf16.mxu0 %v13831_v20  ;;  %v966_v55 = vld [vmem:[%s22602_s1 + $0xe90] sm:$0xff] }
 0x3b0   : > { %v14715_v28 = vadd.f32 %v6637_v17, %v19680_v50  ;;  %v6639_v2 = vpop.f32.mrb[86].mxu1  ;;  %8046 = vmatpush1.bf16.msra.mxu1 %v13760_v33  ;;  %v970_v42 = vld [vmem:[%s22602_s1 + $0xeb0] sm:$0xff] }
 0x3b1   : > { %v14716_v52 = vadd.f32 %v6639_v2, %v19665_v37  ;;  %v6641_v4 = vpop.f32.mrb[87].mxu1  ;;  %8208 = vmatprep.subr.bf16.mxu1 %v13769_v5  ;;  %7123 = vmatmul.mubr.bf16.gmra.mrb[80].mxu0 %v20142_v26  ;;  %v8804_v23 = vmax.f32 %v14714_v40, 0.0  ;;  %v13847_v20 = vcombine.high %v966_v55, %v970_v42 }
 0x3b2   : > { %v14717_v29 = vadd.f32 %v6641_v4, %v19680_v50  ;;  %7132 = vmatprep.mubr.bf16.mxu0 %v20147_v15  ;;  %v8805_v12 = vmax.f32 %v14715_v28, 0.0  ;;  %7260 = vmatpush1.bf16.msra.mxu0 %v13830_v43  ;;  %v974_v28 = vld [vmem:[%s22602_s1 + $0xed0] sm:$0xff]  ;;  %v13846_v4 = vcombine.low %v966_v55, %v970_v42 }
 0x3b3   : > { %v8812_v53 = vmax.f32 %v14716_v52, 0.0  ;;  %7935 = vmatmul.mubr.bf16.gmra.mrb[128].mxu1 %v19738_v3  ;;  %v13838_v3 = vcombine.low %v958_v57, %v962_v49  ;;  %7261 = vmatprep.subr.bf16.mxu0 %v13839_v44  ;;  %v982_v55 = vld [vmem:[%s22602_s1 + $0xf10] sm:$0xff] }
 0x3b4   : > { %v8813_v33 = vmax.f32 %v14717_v29, 0.0  ;;  %7944 = vmatprep.mubr.bf16.mxu1 %v19745_v1  ;;  %v978_v1 = vld [vmem:[%s22602_s1 + $0xef0] sm:$0xff]  ;;  %v20172_v29 = vld [vmem:[%s17303_s14 + $0x178] ss:$36 sps:$4 sm:$0xff]  }
 0x3b5   : > { %v20157_v63 = vpack.c.bf16 %v8812_v53, %v8804_v23  ;;  %v13855_v44 = vcombine.high %v974_v28, %v978_v1  ;;  %v986_v42 = vld [vmem:[%s22602_s1 + $0xf30] sm:$0xff] }
 0x3b6   : > { %v20159_v5 = vpack.c.bf16 %v8813_v33, %v8805_v12  ;;  %v6645_v34 = vpop.f32.mrb[88].mxu1  ;;  %7262 = vmatpush1.bf16.msra.mxu0 %v13838_v3  ;;  %v20177_v12 = vld [vmem:[%s17303_s14 + $0x1c4] ss:$36 sps:$4 sm:$0xff]  }
 0x3b7   : > { %v14718_v40 = vadd.f32 %v6645_v34, %v19665_v37  ;;  %v6647_v17 = vpop.f32.mrb[89].mxu1  ;;  %7263 = vmatprep.subr.bf16.mxu0 %v13847_v20 }
 0x3b8   : > { %v14719_v57 = vadd.f32 %v6647_v17, %v19680_v50  ;;  %v6649_v49 = vpop.f32.mrb[90].mxu1  ;;  %v13863_v17 = vcombine.high %v982_v55, %v986_v42 }
 0x3b9   : > { %v14720_v2 = vadd.f32 %v6649_v49, %v19665_v37  ;;  %v6651_v52 = vpop.f32.mrb[91].mxu1  ;;  %7133 = vmatmul.mubr.bf16.gmra.mrb[84].mxu0 %v20172_v29  ;;  %v8820_v23 = vmax.f32 %v14718_v40, 0.0 }
 0x3ba   : > { %v14721_v43 = vadd.f32 %v6651_v52, %v19680_v50  ;;  %7142 = vmatprep.mubr.bf16.mxu0 %v20177_v12  ;;  %v8821_v33 = vmax.f32 %v14719_v57, 0.0  ;;  %7264 = vmatpush1.bf16.msra.mxu0 %v13846_v4  ;;  %v990_v57 = vld [vmem:[%s22602_s1 + $0xf50] sm:$0xff] }
 0x3bb   : > { %v8828_v53 = vmax.f32 %v14720_v2, 0.0  ;;  %7945 = vmatmul.mubr.bf16.gmra.mrb[132].mxu1 %v19768_v32  ;;  %v13854_v32 = vcombine.low %v974_v28, %v978_v1  ;;  %7265 = vmatprep.subr.bf16.mxu0 %v13855_v44 }
 0x3bc   : > { %v8829_v3 = vmax.f32 %v14721_v43, 0.0  ;;  %7954 = vmatprep.mubr.bf16.mxu1 %v19773_v46  ;;  %v994_v46 = vld [vmem:[%s22602_s1 + $0xf70] sm:$0xff]  ;;  %v13862_v43 = vcombine.low %v982_v55, %v986_v42 }
 0x3bd   : > { %v20187_v34 = vpack.c.bf16 %v8828_v53, %v8820_v23  ;;  %v20202_v23 = vld [vmem:[%s17303_s14 + $0x1c0] ss:$36 sps:$4 sm:$0xff]   ;;  %v13871_v53 = vcombine.high %v990_v57, %v994_v46 }
 0x3be   : > { %v20189_v20 = vpack.c.bf16 %v8829_v3, %v8821_v33  ;;  %v6655_v40 = vpop.f32.mrb[92].mxu1  ;;  %7266 = vmatpush1.bf16.msra.mxu0 %v13854_v32 }
 0x3bf   : > { %v14722_v49 = vadd.f32 %v6655_v40, %v19665_v37  ;;  %v6657_v2 = vpop.f32.mrb[93].mxu1  ;;  %7267 = vmatprep.subr.bf16.mxu0 %v13863_v17  ;;  %v20207_v40 = vld [vmem:[%s17303_s14 + $0x20c] ss:$36 sps:$4 sm:$0xff]  }
 0x3c0   : > { %v14723_v28 = vadd.f32 %v6657_v2, %v19680_v50  ;;  %v6659_v1 = vpop.f32.mrb[94].mxu1  ;;  %v1006_v2 = vld [vmem:[%s22602_s1 + $0xfd0] sm:$0xff] }
 0x3c1   : > { %v14724_v52 = vadd.f32 %v6659_v1, %v19665_v37  ;;  %v6661_v4 = vpop.f32.mrb[95].mxu1  ;;  %7143 = vmatmul.mubr.bf16.gmra.mrb[88].mxu0 %v20202_v23  ;;  %v8836_v33 = vmax.f32 %v14722_v49, 0.0  ;;  %v998_v37 = vld [vmem:[%s22602_s1 + $0xf90] sm:$0xff]  ;;  %v20228_v1 = vld [vmem:[%s17303_s14 + $0x208] ss:$36 sps:$4 sm:$0xff]  }
 0x3c2   : > { %v14725_v44 = vadd.f32 %v6661_v4, %v19680_v50  ;;  %7152 = vmatprep.mubr.bf16.mxu0 %v20207_v40  ;;  %v1002_v50 = vld [vmem:[%s22602_s1 + $0xfb0] sm:$0xff]  ;;  %v8837_v55 = vmax.f32 %v14723_v28, 0.0  ;;  %7268 = vmatpush1.bf16.msra.mxu0 %v13862_v43  ;;  %v20253_v43 = vld [vmem:[%s17303_s14 + $0x2e4] ss:$36 sps:$4 sm:$0xff]  }
 0x3c3   : > { %v8844_v3 = vmax.f32 %v14724_v52, 0.0  ;;  %7955 = vmatmul.mubr.bf16.gmra.mrb[136].mxu1 %v19794_v30  ;;  %v13870_v30 = vcombine.low %v990_v57, %v994_v46  ;;  %7269 = vmatprep.subr.bf16.mxu0 %v13871_v53  ;;  %v13879_v49 = vcombine.high %v998_v37, %v1002_v50  ;;  %v1010_v28 = vld [vmem:[%s22602_s1 + $0xff0] sm:$0xff]  ;;  %v899_v53 = vld [vmem:[%s22602_s1 + $0xc78] sm:$0xff] }
 0x3c4   : > { %v8845_v42 = vmax.f32 %v14725_v44, 0.0  ;;  %7964 = vmatprep.mubr.bf16.mxu1 %v19799_v61  ;;  %v13878_v61 = vcombine.low %v998_v37, %v1002_v50  ;;  %v13887_v57 = vcombine.high %v1006_v2, %v1010_v28  ;;  %v20233_v46 = vld [vmem:[%s17303_s14 + $0x254] ss:$36 sps:$4 sm:$0xff]   ;;  %v13886_v52 = vcombine.low %v1006_v2, %v1010_v28  ;;  %v20307_v50 = vld [vmem:[%s17303_s14 + $0x3bc] ss:$36 sps:$4 sm:$0xff]  }
 0x3c5   : > { %v20217_v32 = vpack.c.bf16 %v8844_v3, %v8836_v33  ;;  %v20238_v4 = vld [vmem:[%s17303_s14 + $0x250] ss:$36 sps:$4 sm:$0xff]   ;;  %v895_v44 = vld [vmem:[%s22602_s1 + $0xc58] sm:$0xff] }
 0x3c6   : > { %v20219_v17 = vpack.c.bf16 %v8845_v42, %v8837_v55  ;;  %7270 = vmatpush1.bf16.msra.mxu0 %v13870_v30  ;;  %v13777_v33 = vcombine.high %v895_v44, %v899_v53  ;;  %v20296_v3 = vld [vmem:[%s17303_s14 + $0x370] ss:$36 sps:$4 sm:$0xff]   ;;  %v907_v37 = vld [vmem:[%s22602_s1 + $0xcb8] sm:$0xff]  ;;  %v22784_v30 = vcombine.low %v19857_v41, %v19862_v13 }
 0x3c7   : > { %7271 = vmatprep.subr.bf16.mxu0 %v13879_v49  ;;  %v20313_v55 = vld [vmem:[%s22602_s1 + $0x1018] sm:$0xff] }
 0x3c8   : > { %v20318_v42 = vld [vmem:[%s22602_s1 + $0x1038] sm:$0xff] }
 0x3c9   : > { %7153 = vmatmul.mubr.bf16.gmra.mrb[92].mxu0 %v20228_v1  ;;  %v911_v28 = vld [vmem:[%s22602_s1 + $0xcd8] sm:$0xff] }
 0x3ca   : > { %7162 = vmatprep.mubr.bf16.mxu0 %v20233_v46  ;;  %7272 = vmatpush1.bf16.msra.mxu0 %v13878_v61  ;;  %v915_v61 = vld [vmem:[%s22602_s1 + $0xcf8] sm:$0xff] }
 0x3cb   : > { %7965 = vmatmul.mubr.bf16.gmra.mrb[140].mxu1 %v19816_v48  ;;  %7273 = vmatprep.subr.bf16.mxu0 %v13887_v57  ;;  %v20243_v48 = vld [vmem:[%s17303_s14 + $0x29c] ss:$36 sps:$4 sm:$0xff]   ;;  %v13793_v41 = vcombine.high %v911_v28, %v915_v61 }
 0x3cc   : > { %7974 = vmatprep.mubr.bf16.mxu1 %v19821_v8  ;;  %v20248_v8 = vld [vmem:[%s17303_s14 + $0x298] ss:$36 sps:$4 sm:$0xff]  }
 0x3cd   : > { %v919_v57 = vld [vmem:[%s22602_s1 + $0xd18] sm:$0xff] }
 0x3ce   : > { %7274 = vmatpush1.bf16.msra.mxu0 %v13886_v52  ;;  %v923_v52 = vld [vmem:[%s22602_s1 + $0xd38] sm:$0xff] }
 0x3d1   : > { %7163 = vmatmul.mubr.bf16.gmra.mrb[96].mxu0 %v20238_v4 }
 0x3d2   : > { %7172 = vmatprep.mubr.bf16.mxu0 %v20243_v48 }
 0x3d3   : > { %7975 = vmatmul.mubr.bf16.gmra.mrb[144].mxu1 %v19840_v0  ;;  %v20258_v0 = vld [vmem:[%s17303_s14 + $0x2e0] ss:$36 sps:$4 sm:$0xff]  }
 0x3d4   : > { %7984 = vmatprep.mubr.bf16.mxu1 %v19851_v31  ;;  %v20263_v31 = vld [vmem:[%s17303_s14 + $0x32c] ss:$36 sps:$4 sm:$0xff]  }
 0x3d9   : > { %7173 = vmatmul.mubr.bf16.gmra.mrb[100].mxu0 %v20248_v8 }
 0x3da   : > { %7182 = vmatprep.mubr.bf16.mxu0 %v20253_v43 }
 0x3db   : > { %7985 = vmatmul.mubr.bf16.gmra.mrb[148].mxu1 %v19885_v9  ;;  %v20268_v9 = vld [vmem:[%s17303_s14 + $0x328] ss:$36 sps:$4 sm:$0xff]  }
 0x3dc   : > { %7994 = vmatprep.mubr.bf16.mxu1 %v19896_v59  ;;  %v20273_v59 = vld [vmem:[%s17303_s14 + $0x374] ss:$36 sps:$4 sm:$0xff]  }
 0x3e1   : > { %7183 = vmatmul.mubr.bf16.gmra.mrb[104].mxu0 %v20258_v0 }
 0x3e2   : > { %7192 = vmatprep.mubr.bf16.mxu0 %v20263_v31 }
 0x3e3   : > { %7995 = vmatmul.mubr.bf16.gmra.mrb[152].mxu1 %v19915_v14  ;;  %v20279_v14 = vld [vmem:[%s22602_s1 + $0x1010] sm:$0xff] }
 0x3e4   : > { %8004 = vmatprep.mubr.bf16.mxu1 %v19926_v36  ;;  %v20285_v36 = vld [vmem:[%s22602_s1 + $0x1030] sm:$0xff] }
 0x3e9   : > { %7193 = vmatmul.mubr.bf16.gmra.mrb[108].mxu0 %v20268_v9 }
 0x3ea   : > { %7202 = vmatprep.mubr.bf16.mxu0 %v20273_v59 }
 0x3eb   : > { %8005 = vmatmul.mubr.bf16.gmra.mrb[156].mxu1 %v19945_v60  ;;  %v13895_v60 = vcombine.high %v20279_v14, %v20285_v36 }
 0x3ec   : > { %8047 = vmatprep.mubr.bf16.mxu1 %v19956_v45  ;;  %v903_v45 = vld [vmem:[%s22602_s1 + $0xc98] sm:$0xff] }
 0x3ed   : > { %7436 = vmatprep.subr.bf16.mxu0 %v13895_v60  ;;  %v13785_v2 = vcombine.high %v903_v45, %v907_v37  ;;  %v13784_v13 = vcombine.low %v903_v45, %v907_v37  ;;  %v20344_v60 = vld [vmem:[%s17303_s14 + $0x404] ss:$36 sps:$4 sm:$0xff]   ;;  %v931_v45 = vld [vmem:[%s22602_s1 + $0xd78] sm:$0xff] }
 0x3f1   : > { %7203 = vmatmul.mubr.bf16.gmra.mrb[112].mxu0 %v20296_v3 }
 0x3f2   : > { %7212 = vmatprep.mubr.bf16.mxu0 %v20307_v50 }
 0x3f3   : > { %8048 = vmatmul.mubr.bf16.vlgmr.msra.gmra.mrb[96].mxu1 %v19981_v27  ;;  %v13776_v27 = vcombine.low %v895_v44, %v899_v53  ;;  %v13792_v44 = vcombine.low %v911_v28, %v915_v61  ;;  %v13801_v53 = vcombine.high %v919_v57, %v923_v52 }
 0x3f4   : > { %8209 = vmatpush1.bf16.msra.mxu1 %v22784_v30  ;;  %8057 = vmatprep.mubr.bf16.mxu1 %v19992_v19  ;;  %v20333_v19 = vld [vmem:[%s17303_s14 + $0x3b8] ss:$36 sps:$4 sm:$0xff]   ;;  %v20355_v30 = vld [vmem:[%s17303_s14 + $0x400] ss:$36 sps:$4 sm:$0xff]  }
 0x3f5   : > { %8210 = vmatprep.subr.bf16.mxu1 %v13777_v33  ;;  %v927_v33 = vld [vmem:[%s22602_s1 + $0xd58] sm:$0xff] }
 0x3f6   : > { %v13809_v37 = vcombine.high %v927_v33, %v931_v45  ;;  %v13808_v28 = vcombine.low %v927_v33, %v931_v45 }
 0x3f8   : > { %8211 = vmatpush1.bf16.msra.mxu1 %v13776_v27  ;;  %v939_v27 = vld [vmem:[%s22602_s1 + $0xdb8] sm:$0xff] }
 0x3f9   : > { %8212 = vmatprep.subr.bf16.mxu1 %v13785_v2  ;;  %7213 = vmatmul.mubr.bf16.gmra.mrb[116].mxu0 %v20333_v19  ;;  %v20366_v2 = vld [vmem:[%s17303_s14 + $0x44c] ss:$36 sps:$4 sm:$0xff]  }
 0x3fa   : > { %7222 = vmatprep.mubr.bf16.mxu0 %v20344_v60 }
 0x3fb   : > { %8058 = vmatmul.mubr.bf16.gmra.mrb[100].mxu1 %v20026_v47  ;;  %v13800_v47 = vcombine.low %v919_v57, %v923_v52  ;;  %v20377_v52 = vld [vmem:[%s17303_s14 + $0x448] ss:$36 sps:$4 sm:$0xff]  }
 0x3fc   : > { %8067 = vmatprep.mubr.bf16.mxu1 %v20037_v24  ;;  %8213 = vmatpush1.bf16.msra.mxu1 %v13784_v13  ;;  %v935_v24 = vld [vmem:[%s22602_s1 + $0xd98] sm:$0xff] }
 0x3fd   : > { %8214 = vmatprep.subr.bf16.mxu1 %v13793_v41  ;;  %v13817_v61 = vcombine.high %v935_v24, %v939_v27  ;;  %v943_v13 = vld [vmem:[%s22602_s1 + $0xdd8] sm:$0xff] }
 0x3fe   : > { %v947_v41 = vld [vmem:[%s22602_s1 + $0xdf8] sm:$0xff] }
 0x3ff   : > { %v13825_v57 = vcombine.high %v943_v13, %v947_v41  ;;  %v13824_v33 = vcombine.low %v943_v13, %v947_v41  ;;  %v967_v13 = vld [vmem:[%s22602_s1 + $0xe98] sm:$0xff] }
 0x400   : > { %8215 = vmatpush1.bf16.msra.mxu1 %v13792_v44  ;;  %v955_v44 = vld [vmem:[%s22602_s1 + $0xe38] sm:$0xff] }
 0x401   : > { %8216 = vmatprep.subr.bf16.mxu1 %v13801_v53  ;;  %7223 = vmatmul.mubr.bf16.gmra.mrb[120].mxu0 %v20355_v30  ;;  %v20388_v53 = vld [vmem:[%s17303_s14 + $0x1c] ss:$36 sps:$4 sm:$0xff]  }
 0x402   : > { %7232 = vmatprep.mubr.bf16.mxu0 %v20366_v2  ;;  %v971_v41 = vld [vmem:[%s22602_s1 + $0xeb8] sm:$0xff] }
 0x403   : > { %8068 = vmatmul.mubr.bf16.gmra.mrb[104].mxu1 %v20068_v16  ;;  %v13816_v16 = vcombine.low %v935_v24, %v939_v27 }
 0x404   : > { %8077 = vmatprep.mubr.bf16.mxu1 %v20079_v58  ;;  %8217 = vmatpush1.bf16.msra.mxu1 %v13800_v47  ;;  %v951_v58 = vld [vmem:[%s22602_s1 + $0xe18] sm:$0xff] }
 0x405   : > { %8218 = vmatprep.subr.bf16.mxu1 %v13809_v37  ;;  %v13833_v45 = vcombine.high %v951_v58, %v955_v44  ;;  %v959_v47 = vld [vmem:[%s22602_s1 + $0xe58] sm:$0xff]  ;;  %v1022_v37 = vld [vmem:[%s22602_s1 + $0x1050] sm:$0xff]  ;;  %v13832_v24 = vcombine.low %v951_v58, %v955_v44  ;;  %v13849_v44 = vcombine.high %v967_v13, %v971_v41 }
 0x408   : > { %8219 = vmatpush1.bf16.msra.mxu1 %v13808_v28  ;;  %v13894_v28 = vcombine.low %v20279_v14, %v20285_v36  ;;  %v1030_v14 = vld [vmem:[%s22602_s1 + $0x1090] sm:$0xff] }
 0x409   : > { %8220 = vmatprep.subr.bf16.mxu1 %v13817_v61  ;;  %7233 = vmatmul.mubr.bf16.gmra.mrb[124].mxu0 %v20377_v52  ;;  %v20407_v61 = vld [vmem:[%s17303_s14 + $0x18] ss:$36 sps:$4 sm:$0xff]   ;;  %v1034_v36 = vld [vmem:[%s22602_s1 + $0x10b0] sm:$0xff] }
 0x40a   : > { %7275 = vmatprep.mubr.bf16.mxu0 %v20388_v53  ;;  %v13911_v49 = vcombine.high %v1030_v14, %v1034_v36 }
 0x40b   : > { %8078 = vmatmul.mubr.bf16.gmra.mrb[108].mxu1 %v20110_v39  ;;  %v963_v39 = vld [vmem:[%s22602_s1 + $0xe78] sm:$0xff] }
 0x40c   : > { %8087 = vmatprep.mubr.bf16.mxu1 %v20115_v54  ;;  %8221 = vmatpush1.bf16.msra.mxu1 %v13816_v16  ;;  %v1026_v54 = vld [vmem:[%s22602_s1 + $0x1070] sm:$0xff]  ;;  %v13841_v27 = vcombine.high %v959_v47, %v963_v39  ;;  %v13840_v58 = vcombine.low %v959_v47, %v963_v39  ;;  %v13848_v39 = vcombine.low %v967_v13, %v971_v41 }
 0x40d   : > { %8222 = vmatprep.subr.bf16.mxu1 %v13825_v57  ;;  %v13903_v16 = vcombine.high %v1022_v37, %v1026_v54  ;;  %v20418_v57 = vld [vmem:[%s17303_s14 + $0x64] ss:$36 sps:$4 sm:$0xff]   ;;  %v1042_v47 = vld [vmem:[%s22602_s1 + $0x10f0] sm:$0xff] }
 0x40e   : > { %v20452_v13 = vld [vmem:[%s17303_s14 + $0xac] ss:$36 sps:$4 sm:$0xff]  }
 0x40f   : > { %v1046_v41 = vld [vmem:[%s22602_s1 + $0x1110] sm:$0xff] }
 0x410   : > { %8223 = vmatpush1.bf16.msra.mxu1 %v13824_v33  ;;  %v975_v33 = vld [vmem:[%s22602_s1 + $0xed8] sm:$0xff] }
 0x411   : > { %8224 = vmatprep.subr.bf16.mxu1 %v13833_v45  ;;  %7276 = vmatmul.mubr.bf16.vlgmr.msra.gmra.mrb[64].mxu0 %v20407_v61  ;;  %v979_v45 = vld [vmem:[%s22602_s1 + $0xef8] sm:$0xff] }
 0x412   : > { %7285 = vmatprep.mubr.bf16.mxu0 %v20418_v57  ;;  %7437 = vmatpush1.bf16.msra.mxu0 %v13894_v28  ;;  %v987_v28 = vld [vmem:[%s22602_s1 + $0xf38] sm:$0xff] }
 0x413   : > { %8088 = vmatmul.mubr.bf16.gmra.mrb[112].mxu1 %v20142_v26  ;;  %v13902_v26 = vcombine.low %v1022_v37, %v1026_v54  ;;  %7438 = vmatprep.subr.bf16.mxu0 %v13903_v16  ;;  %v13857_v37 = vcombine.high %v975_v33, %v979_v45  ;;  %v13910_v54 = vcombine.low %v1030_v14, %v1034_v36  ;;  %v1050_v14 = vld [vmem:[%s22602_s1 + $0x1130] sm:$0xff] }
 0x414   : > { %8097 = vmatprep.mubr.bf16.mxu1 %v20147_v15  ;;  %8225 = vmatpush1.bf16.msra.mxu1 %v13832_v24  ;;  %v1038_v15 = vld [vmem:[%s22602_s1 + $0x10d0] sm:$0xff]  ;;  %v20441_v24 = vld [vmem:[%s17303_s14 + $0x60] ss:$36 sps:$4 sm:$0xff]   ;;  %v13856_v36 = vcombine.low %v975_v33, %v979_v45 }
 0x415   : > { %8226 = vmatprep.subr.bf16.mxu1 %v13841_v27  ;;  %v983_v27 = vld [vmem:[%s22602_s1 + $0xf18] sm:$0xff]  ;;  %v13919_v16 = vcombine.high %v1038_v15, %v1042_v47  ;;  %v1058_v33 = vld [vmem:[%s22602_s1 + $0x1170] sm:$0xff] }
 0x416   : > { %7439 = vmatpush1.bf16.msra.mxu0 %v13902_v26  ;;  %v13927_v26 = vcombine.high %v1046_v41, %v1050_v14  ;;  %v13864_v45 = vcombine.low %v983_v27, %v987_v28 }
 0x417   : > { %7440 = vmatprep.subr.bf16.mxu0 %v13911_v49  ;;  %v13865_v49 = vcombine.high %v983_v27, %v987_v28  ;;  %v20486_v27 = vld [vmem:[%s17303_s14 + $0xf4] ss:$36 sps:$4 sm:$0xff]  }
 0x418   : > { %8227 = vmatpush1.bf16.msra.mxu1 %v13840_v58  ;;  %v991_v58 = vld [vmem:[%s22602_s1 + $0xf58] sm:$0xff]  ;;  %v1062_v28 = vld [vmem:[%s22602_s1 + $0x1190] sm:$0xff] }
 0x419   : > { %8228 = vmatprep.subr.bf16.mxu1 %v13849_v44  ;;  %7286 = vmatmul.mubr.bf16.gmra.mrb[68].mxu0 %v20441_v24  ;;  %v995_v44 = vld [vmem:[%s22602_s1 + $0xf78] sm:$0xff] }
 0x41a   : > { %7295 = vmatprep.mubr.bf16.mxu0 %v20452_v13  ;;  %7441 = vmatpush1.bf16.msra.mxu0 %v13910_v54  ;;  %v1003_v54 = vld [vmem:[%s22602_s1 + $0xfb8] sm:$0xff] }
 0x41b   : > { %8098 = vmatmul.mubr.bf16.gmra.mrb[116].mxu1 %v20172_v29  ;;  %v13918_v29 = vcombine.low %v1038_v15, %v1042_v47  ;;  %7442 = vmatprep.subr.bf16.mxu0 %v13919_v16  ;;  %v13873_v15 = vcombine.high %v991_v58, %v995_v44  ;;  %v13926_v47 = vcombine.low %v1046_v41, %v1050_v14  ;;  %v1066_v41 = vld [vmem:[%s22602_s1 + $0x11b0] sm:$0xff] }
 0x41c   : > { %8107 = vmatprep.mubr.bf16.mxu1 %v20177_v12  ;;  %8229 = vmatpush1.bf16.msra.mxu1 %v13848_v39  ;;  %v1054_v12 = vld [vmem:[%s22602_s1 + $0x1150] sm:$0xff]  ;;  %v20475_v39 = vld [vmem:[%s17303_s14 + $0xa8] ss:$36 sps:$4 sm:$0xff]   ;;  %v13872_v14 = vcombine.low %v991_v58, %v995_v44 }
 0x41d   : > { %8230 = vmatprep.subr.bf16.mxu1 %v13857_v37  ;;  %v999_v37 = vld [vmem:[%s22602_s1 + $0xf98] sm:$0xff]  ;;  %v13935_v16 = vcombine.high %v1054_v12, %v1058_v33  ;;  %v1074_v58 = vld [vmem:[%s22602_s1 + $0x11f0] sm:$0xff] }
 0x41e   : > { %7443 = vmatpush1.bf16.msra.mxu0 %v13918_v29  ;;  %v1011_v29 = vld [vmem:[%s22602_s1 + $0xff8] sm:$0xff]  ;;  %v13880_v44 = vcombine.low %v999_v37, %v1003_v54 }
 0x41f   : > { %7444 = vmatprep.subr.bf16.mxu0 %v13927_v26  ;;  %v13943_v26 = vcombine.high %v1062_v28, %v1066_v41 }
 0x420   : > { %8231 = vmatpush1.bf16.msra.mxu1 %v13856_v36  ;;  %v13881_v36 = vcombine.high %v999_v37, %v1003_v54  ;;  %v13897_v54 = vcombine.high %v20313_v55, %v20318_v42 }
 0x421   : > { %8232 = vmatprep.subr.bf16.mxu1 %v13865_v49  ;;  %7296 = vmatmul.mubr.bf16.gmra.mrb[72].mxu0 %v20475_v39  ;;  %v1007_v49 = vld [vmem:[%s22602_s1 + $0xfd8] sm:$0xff] }
 0x422   : > { %7305 = vmatprep.mubr.bf16.mxu0 %v20486_v27  ;;  %7445 = vmatpush1.bf16.msra.mxu0 %v13926_v47  ;;  %v20514_v47 = vld [vmem:[%s17303_s14 + $0x13c] ss:$36 sps:$4 sm:$0xff]   ;;  %v13888_v37 = vcombine.low %v1007_v49, %v1011_v29 }
 0x423   : > { %8108 = vmatmul.mubr.bf16.gmra.mrb[120].mxu1 %v20202_v23  ;;  %v13934_v23 = vcombine.low %v1054_v12, %v1058_v33  ;;  %7446 = vmatprep.subr.bf16.mxu0 %v13935_v16  ;;  %v13889_v12 = vcombine.high %v1007_v49, %v1011_v29  ;;  %v13942_v33 = vcombine.low %v1062_v28, %v1066_v41  ;;  %v20531_v28 = vld [vmem:[%s17303_s14 + $0x180] ss:$36 sps:$4 sm:$0xff]   ;;  %v20536_v41 = vld [vmem:[%s17303_s14 + $0x1cc] ss:$36 sps:$4 sm:$0xff]  }
 0x424   : > { %8117 = vmatprep.mubr.bf16.mxu1 %v20207_v40  ;;  %8233 = vmatpush1.bf16.msra.mxu1 %v13864_v45  ;;  %v1070_v40 = vld [vmem:[%s22602_s1 + $0x11d0] sm:$0xff]  ;;  %v20621_v49 = vld [vmem:[%s17303_s14 + $0x3c4] ss:$36 sps:$4 sm:$0xff]   ;;  %v22785_v29 = vcombine.low %v20313_v55, %v20318_v42  ;;  %v1047_v42 = vld [vmem:[%s22602_s1 + $0x1118] sm:$0xff] }
 0x425   : > { %8234 = vmatprep.subr.bf16.mxu1 %v13873_v15  ;;  %v20509_v45 = vld [vmem:[%s17303_s14 + $0xf0] ss:$36 sps:$4 sm:$0xff]   ;;  %v13951_v15 = vcombine.high %v1070_v40, %v1074_v58  ;;  %v13950_v16 = vcombine.low %v1070_v40, %v1074_v58  ;;  %v1039_v58 = vld [vmem:[%s22602_s1 + $0x10d8] sm:$0xff]  ;;  %v20635_v55 = vld [vmem:[%s17303_s14 + $0x3c0] ss:$36 sps:$4 sm:$0xff]  }
 0x426   : > { %7447 = vmatpush1.bf16.msra.mxu0 %v13934_v23  ;;  %v20610_v23 = vld [vmem:[%s17303_s14 + $0x378] ss:$36 sps:$4 sm:$0xff]  }
 0x427   : > { %7448 = vmatprep.subr.bf16.mxu0 %v13943_v26 }
 0x428   : > { %8235 = vmatpush1.bf16.msra.mxu1 %v13872_v14  ;;  %v20564_v14 = vld [vmem:[%s17303_s14 + $0x258] ss:$36 sps:$4 sm:$0xff]  }
 0x429   : > { %8236 = vmatprep.subr.bf16.mxu1 %v13881_v36  ;;  %7306 = vmatmul.mubr.bf16.gmra.mrb[76].mxu0 %v20509_v45 }
 0x42a   : > { %7315 = vmatprep.mubr.bf16.mxu0 %v20514_v47  ;;  %7449 = vmatpush1.bf16.msra.mxu0 %v13942_v33  ;;  %v20646_v33 = vld [vmem:[%s17303_s14 + $0x40c] ss:$36 sps:$4 sm:$0xff]  }
 0x42b   : > { %8118 = vmatmul.mubr.bf16.gmra.mrb[124].mxu1 %v20228_v1  ;;  %7450 = vmatprep.subr.bf16.mxu0 %v13951_v15  ;;  %v20521_v1 = vld [vmem:[%s17303_s14 + $0x138] ss:$36 sps:$4 sm:$0xff]  }
 0x42c   : > { %8127 = vmatprep.mubr.bf16.mxu1 %v20233_v46  ;;  %8237 = vmatpush1.bf16.msra.mxu1 %v13880_v44  ;;  %v20526_v46 = vld [vmem:[%s17303_s14 + $0x184] ss:$36 sps:$4 sm:$0xff]  }
 0x42d   : > { %8238 = vmatprep.subr.bf16.mxu1 %v13889_v12 }
 0x42e   : > { %7451 = vmatpush1.bf16.msra.mxu0 %v13950_v16  ;;  %v1059_v16 = vld [vmem:[%s22602_s1 + $0x1178] sm:$0xff] }
 0x430   : > { %8239 = vmatpush1.bf16.msra.mxu1 %v13888_v37 }
 0x431   : > { %8401 = vmatprep.subr.bf16.mxu1 %v13897_v54  ;;  %7316 = vmatmul.mubr.bf16.gmra.mrb[80].mxu0 %v20521_v1  ;;  %v1055_v54 = vld [vmem:[%s22602_s1 + $0x1158] sm:$0xff] }
 0x432   : > { %7325 = vmatprep.mubr.bf16.mxu0 %v20526_v46 }
 0x433   : > { %8128 = vmatmul.mubr.bf16.gmra.mrb[128].mxu1 %v20238_v4  ;;  %v20541_v4 = vld [vmem:[%s17303_s14 + $0x1c8] ss:$36 sps:$4 sm:$0xff]  }
 0x434   : > { %8137 = vmatprep.mubr.bf16.mxu1 %v20243_v48  ;;  %v20546_v48 = vld [vmem:[%s17303_s14 + $0x214] ss:$36 sps:$4 sm:$0xff]  }
 0x439   : > { %7326 = vmatmul.mubr.bf16.gmra.mrb[84].mxu0 %v20531_v28 }
 0x43a   : > { %7335 = vmatprep.mubr.bf16.mxu0 %v20536_v41 }
 0x43b   : > { %8138 = vmatmul.mubr.bf16.gmra.mrb[132].mxu1 %v20248_v8  ;;  %v20551_v8 = vld [vmem:[%s17303_s14 + $0x210] ss:$36 sps:$4 sm:$0xff]  }
 0x43c   : > { %8147 = vmatprep.mubr.bf16.mxu1 %v20253_v43  ;;  %v20556_v43 = vld [vmem:[%s17303_s14 + $0x25c] ss:$36 sps:$4 sm:$0xff]  }
 0x441   : > { %7336 = vmatmul.mubr.bf16.gmra.mrb[88].mxu0 %v20541_v4 }
 0x442   : > { %7345 = vmatprep.mubr.bf16.mxu0 %v20546_v48 }
 0x443   : > { %8148 = vmatmul.mubr.bf16.gmra.mrb[136].mxu1 %v20258_v0  ;;  %v16578_v0 = vld [vmem:[%s22604_s3 + $0x4] ss:$16 sps:$4 sm:$0xff]  }
 0x444   : > { %8157 = vmatprep.mubr.bf16.mxu1 %v20263_v31  ;;  %v20569_v31 = vld [vmem:[%s17303_s14 + $0x2a4] ss:$36 sps:$4 sm:$0xff]   ;;  %10536 = vmatprep.subr.bf16.mxu0 %v16578_v0  ;;  %v13937_v0 = vcombine.high %v1055_v54, %v1059_v16 }
 0x449   : > { %7346 = vmatmul.mubr.bf16.gmra.mrb[92].mxu0 %v20551_v8 }
 0x44a   : > { %7355 = vmatprep.mubr.bf16.mxu0 %v20556_v43 }
 0x44b   : > { %8158 = vmatmul.mubr.bf16.gmra.mrb[140].mxu1 %v20268_v9  ;;  %v20574_v9 = vld [vmem:[%s17303_s14 + $0x2a0] ss:$36 sps:$4 sm:$0xff]  }
 0x44c   : > { %8167 = vmatprep.mubr.bf16.mxu1 %v20273_v59  ;;  %v20579_v59 = vld [vmem:[%s17303_s14 + $0x2ec] ss:$36 sps:$4 sm:$0xff]  }
 0x451   : > { %7356 = vmatmul.mubr.bf16.gmra.mrb[96].mxu0 %v20564_v14 }
 0x452   : > { %7365 = vmatprep.mubr.bf16.mxu0 %v20569_v31 }
 0x453   : > { %8168 = vmatmul.mubr.bf16.gmra.mrb[144].mxu1 %v20296_v3  ;;  %v20584_v3 = vld [vmem:[%s17303_s14 + $0x2e8] ss:$36 sps:$4 sm:$0xff]  }
 0x454   : > { %8177 = vmatprep.mubr.bf16.mxu1 %v20307_v50  ;;  %v20589_v50 = vld [vmem:[%s17303_s14 + $0x334] ss:$36 sps:$4 sm:$0xff]  }
 0x459   : > { %7366 = vmatmul.mubr.bf16.gmra.mrb[100].mxu0 %v20574_v9 }
 0x45a   : > { %7375 = vmatprep.mubr.bf16.mxu0 %v20579_v59 }
 0x45b   : > { %8178 = vmatmul.mubr.bf16.gmra.mrb[148].mxu1 %v20333_v19  ;;  %v20594_v19 = vld [vmem:[%s17303_s14 + $0x330] ss:$36 sps:$4 sm:$0xff]  }
 0x45c   : > { %8187 = vmatprep.mubr.bf16.mxu1 %v20344_v60  ;;  %v20599_v60 = vld [vmem:[%s17303_s14 + $0x37c] ss:$36 sps:$4 sm:$0xff]  }
 0x461   : > { %7376 = vmatmul.mubr.bf16.gmra.mrb[104].mxu0 %v20584_v3 }
 0x462   : > { %7385 = vmatprep.mubr.bf16.mxu0 %v20589_v50 }
 0x463   : > { %8188 = vmatmul.mubr.bf16.gmra.mrb[152].mxu1 %v20355_v30  ;;  %v1023_v30 = vld [vmem:[%s22602_s1 + $0x1058] sm:$0xff] }
 0x464   : > { %8197 = vmatprep.mubr.bf16.mxu1 %v20366_v2  ;;  %v1027_v2 = vld [vmem:[%s22602_s1 + $0x1078] sm:$0xff] }
 0x465   : > { %v13905_v36 = vcombine.high %v1023_v30, %v1027_v2  ;;  %v13904_v26 = vcombine.low %v1023_v30, %v1027_v2  ;;  %v20657_v30 = vld [vmem:[%s17303_s14 + $0x408] ss:$36 sps:$4 sm:$0xff]   ;;  %v1067_v2 = vld [vmem:[%s22602_s1 + $0x11b8] sm:$0xff] }
 0x469   : > { %7386 = vmatmul.mubr.bf16.gmra.mrb[108].mxu0 %v20594_v19 }
 0x46a   : > { %7395 = vmatprep.mubr.bf16.mxu0 %v20599_v60 }
 0x46b   : > { %8198 = vmatmul.mubr.bf16.gmra.mrb[156].mxu1 %v20377_v52  ;;  %v1031_v52 = vld [vmem:[%s22602_s1 + $0x1098] sm:$0xff] }
 0x46c   : > { %8240 = vmatprep.mubr.bf16.mxu1 %v20388_v53  ;;  %v1035_v53 = vld [vmem:[%s22602_s1 + $0x10b8] sm:$0xff] }
 0x46d   : > { %v13913_v40 = vcombine.high %v1031_v52, %v1035_v53  ;;  %v13912_v44 = vcombine.low %v1031_v52, %v1035_v53  ;;  %v13936_v52 = vcombine.low %v1055_v54, %v1059_v16  ;;  %v16590_v54 = vld [vmem:[%s22604_s3 + $0x84] ss:$16 sps:$4 sm:$0xff]   ;;  %v16588_v16 = vld [vmem:[%s22604_s3 + $0x80] ss:$16 sps:$4 sm:$0xff]  }
 0x471   : > { %7396 = vmatmul.mubr.bf16.gmra.mrb[112].mxu0 %v20610_v23 }
 0x472   : > { %7405 = vmatprep.mubr.bf16.mxu0 %v20621_v49 }
 0x473   : > { %8241 = vmatmul.mubr.bf16.vlgmr.msra.gmra.mrb[96].mxu1 %v20407_v61  ;;  %v1043_v61 = vld [vmem:[%s22602_s1 + $0x10f8] sm:$0xff] }
 0x474   : > { %8402 = vmatpush1.bf16.msra.mxu1 %v22785_v29  ;;  %8250 = vmatprep.mubr.bf16.mxu1 %v20418_v57  ;;  %v13921_v12 = vcombine.high %v1039_v58, %v1043_v61  ;;  %v1051_v57 = vld [vmem:[%s22602_s1 + $0x1138] sm:$0xff]  ;;  %v13920_v15 = vcombine.low %v1039_v58, %v1043_v61  ;;  %v20679_v58 = vld [vmem:[%s17303_s14 + $0x450] ss:$36 sps:$4 sm:$0xff]  }
 0x475   : > { %8403 = vmatprep.subr.bf16.mxu1 %v13905_v36  ;;  %v13929_v37 = vcombine.high %v1047_v42, %v1051_v57  ;;  %v20668_v36 = vld [vmem:[%s17303_s14 + $0x454] ss:$36 sps:$4 sm:$0xff]  }
 0x476   : > { %v1071_v29 = vld [vmem:[%s22602_s1 + $0x11d8] sm:$0xff] }
 0x478   : > { %8404 = vmatpush1.bf16.msra.mxu1 %v13904_v26  ;;  %v1075_v26 = vld [vmem:[%s22602_s1 + $0x11f8] sm:$0xff] }
 0x479   : > { %8405 = vmatprep.subr.bf16.mxu1 %v13913_v40  ;;  %7406 = vmatmul.mubr.bf16.gmra.mrb[116].mxu0 %v20635_v55  ;;  %v13953_v40 = vcombine.high %v1071_v29, %v1075_v26  ;;  %v13952_v61 = vcombine.low %v1071_v29, %v1075_v26  ;;  %v16606_v29 = vld [vmem:[%s22604_s3 + $0x120] ss:$16 sps:$4 sm:$0xff]   ;;  %v16611_v26 = vld [vmem:[%s22604_s3 + $0x144] ss:$16 sps:$4 sm:$0xff]  }
 0x47a   : > { %7415 = vmatprep.mubr.bf16.mxu0 %v20646_v33 }
 0x47b   : > { %8251 = vmatmul.mubr.bf16.gmra.mrb[100].mxu1 %v20441_v24  ;;  %v13928_v24 = vcombine.low %v1047_v42, %v1051_v57  ;;  %v20695_v42 = vld [vmem:[%s17303_s14 + $0x20] ss:$36 sps:$4 sm:$0xff]  }
 0x47c   : > { %8260 = vmatprep.mubr.bf16.mxu1 %v20452_v13  ;;  %8406 = vmatpush1.bf16.msra.mxu1 %v13912_v44  ;;  %v1063_v13 = vld [vmem:[%s22602_s1 + $0x1198] sm:$0xff]  ;;  %v16584_v57 = vld [vmem:[%s22604_s3 + $0x44] ss:$16 sps:$4 sm:$0xff]  }
 0x47d   : > { %8407 = vmatprep.subr.bf16.mxu1 %v13921_v12  ;;  %v13945_v53 = vcombine.high %v1063_v13, %v1067_v2  ;;  %v16605_v44 = vld [vmem:[%s22604_s3 + $0xc] ss:$16 sps:$4 sm:$0xff]   ;;  %v16576_v12 = vld [vmem:[%s22604_s3] ss:$16 sps:$4 sm:$0xff]  }
 0x480   : > { %8408 = vmatpush1.bf16.msra.mxu1 %v13920_v15  ;;  %v16582_v15 = vld [vmem:[%s22604_s3 + $0x40] ss:$16 sps:$4 sm:$0xff]  }
 0x481   : > { %8409 = vmatprep.subr.bf16.mxu1 %v13929_v37  ;;  %7416 = vmatmul.mubr.bf16.gmra.mrb[120].mxu0 %v20657_v30  ;;  %v16585_v37 = vld [vmem:[%s22604_s3 + $0x60] ss:$16 sps:$4 sm:$0xff]  }
 0x482   : > { %7425 = vmatprep.mubr.bf16.mxu0 %v20668_v36 }
 0x483   : > { %8261 = vmatmul.mubr.bf16.gmra.mrb[104].mxu1 %v20475_v39  ;;  %v13944_v39 = vcombine.low %v1063_v13, %v1067_v2  ;;  %v16594_v13 = vld [vmem:[%s22604_s3 + $0xc0] ss:$16 sps:$4 sm:$0xff]  }
 0x484   : > { %8270 = vmatprep.mubr.bf16.mxu1 %v20486_v27  ;;  %8410 = vmatpush1.bf16.msra.mxu1 %v13928_v24  ;;  %v22786_v27 = vmov 0   ;;  %v16591_v24 = vld [vmem:[%s22604_s3 + $0xa0] ss:$16 sps:$4 sm:$0xff]  }
 0x485   : > { %8411 = vmatprep.subr.bf16.mxu1 %v13937_v0  ;;  %v16596_v0 = vld [vmem:[%s22604_s3 + $0xc4] ss:$16 sps:$4 sm:$0xff]   ;;  %v16597_v2 = vld [vmem:[%s22604_s3 + $0xe0] ss:$16 sps:$4 sm:$0xff]  }
 0x488   : > { %8412 = vmatpush1.bf16.msra.mxu1 %v13936_v52  ;;  %v16602_v52 = vld [vmem:[%s22604_s3 + $0x104] ss:$16 sps:$4 sm:$0xff]  }
 0x489   : > { %8413 = vmatprep.subr.bf16.mxu1 %v13945_v53  ;;  %7426 = vmatmul.mubr.bf16.gmra.mrb[124].mxu0 %v20679_v58  ;;  %v16600_v53 = vld [vmem:[%s22604_s3 + $0x100] ss:$16 sps:$4 sm:$0xff]  }
 0x48a   : > { %7468 = vmatprep.mubr.bf16.mxu0 %v22786_v27 }
 0x48b   : > { %8271 = vmatmul.mubr.bf16.gmra.mrb[108].mxu1 %v20509_v45  ;;  %v16581_v45 = vld [vmem:[%s22604_s3 + $0x24] ss:$16 sps:$4 sm:$0xff]  }
 0x48c   : > { %8280 = vmatprep.mubr.bf16.mxu1 %v20514_v47  ;;  %8414 = vmatpush1.bf16.msra.mxu1 %v13944_v39  ;;  %v16579_v47 = vld [vmem:[%s22604_s3 + $0x20] ss:$16 sps:$4 sm:$0xff]  }
 0x48d   : > { %8415 = vmatprep.subr.bf16.mxu1 %v13953_v40  ;;  %v16609_v39 = vld [vmem:[%s22604_s3 + $0x140] ss:$16 sps:$4 sm:$0xff]  }
 0x48e   : > { %v16615_v40 = vld [vmem:[%s22604_s3 + $0x160] ss:$16 sps:$4 sm:$0xff]  }
 0x490   : > { %8416 = vmatpush1.bf16.msra.mxu1 %v13952_v61  ;;  %v16620_v61 = vld [vmem:[%s22604_s3 + $0x184] ss:$16 sps:$4 sm:$0xff]  }
 0x491   : > { %11308 = vmatprep.subr.bf16.mxu1 %v16605_v44  ;;  %7469 = vmatmul.mubr.bf16.vlgmr.msra.gmra.mrb[64].mxu0 %v20695_v42  ;;  %v16618_v44 = vld [vmem:[%s22604_s3 + $0x180] ss:$16 sps:$4 sm:$0xff]  }
 0x492   : > { %7478 = vmatprep.mubr.bf16.mxu0 %v22786_v27  ;;  %10537 = vmatpush1.bf16.msra.mxu0 %v16576_v12  ;;  %v16624_v12 = vld [vmem:[%s22604_s3 + $0x1a0] ss:$16 sps:$4 sm:$0xff]  }
 0x493   : > { %8281 = vmatmul.mubr.bf16.gmra.mrb[112].mxu1 %v20521_v1  ;;  %10538 = vmatprep.subr.bf16.mxu0 %v16581_v45  ;;  %v16587_v1 = vld [vmem:[%s22604_s3 + $0x64] ss:$16 sps:$4 sm:$0xff]  }
 0x494   : > { %8290 = vmatprep.mubr.bf16.mxu1 %v20526_v46  ;;  %v20714_v46 = vld [vmem:[%s17303_s14 + $0x68] ss:$36 sps:$4 sm:$0xff]   ;;  %v16629_v45 = vld [vmem:[%s22604_s3 + $0x1c4] ss:$16 sps:$4 sm:$0xff]  }
 0x496   : > { %10539 = vmatpush1.bf16.msra.mxu0 %v16579_v47  ;;  %v20828_v47 = vld [vmem:[%s17303_s14 + $0x218] ss:$36 sps:$4 sm:$0xff]  }
 0x497   : > { %10540 = vmatprep.subr.bf16.mxu0 %v16584_v57  ;;  %v16633_v57 = vld [vmem:[%s22604_s3 + $0x1e0] ss:$16 sps:$4 sm:$0xff]  }
 0x499   : > { %7479 = vmatmul.mubr.bf16.gmra.mrb[68].mxu0 %v20714_v46 }
 0x49a   : > { %7488 = vmatprep.mubr.bf16.mxu0 %v22786_v27  ;;  %10541 = vmatpush1.bf16.msra.mxu0 %v16582_v15  ;;  %v16662_v15 = vld [vmem:[%s22604_s3 + $0x204] ss:$16 sps:$4 sm:$0xff]  }
 0x49b   : > { %8291 = vmatmul.mubr.bf16.gmra.mrb[116].mxu1 %v20531_v28  ;;  %10542 = vmatprep.subr.bf16.mxu0 %v16587_v1  ;;  %v16593_v28 = vld [vmem:[%s22604_s3 + $0xa4] ss:$16 sps:$4 sm:$0xff]  }
 0x49c   : > { %8300 = vmatprep.mubr.bf16.mxu1 %v20536_v41  ;;  %v20733_v41 = vld [vmem:[%s17303_s14 + $0xb0] ss:$36 sps:$4 sm:$0xff]   ;;  %v20841_v1 = vld [vmem:[%s17303_s14 + $0x260] ss:$36 sps:$4 sm:$0xff]  }
 0x49e   : > { %10543 = vmatpush1.bf16.msra.mxu0 %v16585_v37  ;;  %v20894_v37 = vld [vmem:[%s17303_s14 + $0x3c8] ss:$36 sps:$4 sm:$0xff]  }
 0x49f   : > { %10544 = vmatprep.subr.bf16.mxu0 %v16590_v54  ;;  %v16630_v54 = vld [vmem:[%s22604_s3 + $0x68] ss:$16 sps:$4 sm:$0xff]  }
 0x4a1   : > { %7489 = vmatmul.mubr.bf16.gmra.mrb[72].mxu0 %v20733_v41 }
 0x4a2   : > { %7498 = vmatprep.mubr.bf16.mxu0 %v22786_v27  ;;  %10545 = vmatpush1.bf16.msra.mxu0 %v16588_v16  ;;  %v16638_v16 = vld [vmem:[%s22604_s3 + $0x8c] ss:$16 sps:$4 sm:$0xff]  }
 0x4a3   : > { %8301 = vmatmul.mubr.bf16.gmra.mrb[120].mxu1 %v20541_v4  ;;  %10546 = vmatprep.subr.bf16.mxu0 %v16593_v28  ;;  %v16599_v4 = vld [vmem:[%s22604_s3 + $0xe4] ss:$16 sps:$4 sm:$0xff]   ;;  %v16636_v28 = vld [vmem:[%s22604_s3 + $0x88] ss:$16 sps:$4 sm:$0xff]  }
 0x4a4   : > { %8310 = vmatprep.mubr.bf16.mxu1 %v20546_v48  ;;  %v20752_v48 = vld [vmem:[%s17303_s14 + $0xf8] ss:$36 sps:$4 sm:$0xff]  }
 0x4a6   : > { %10547 = vmatpush1.bf16.msra.mxu0 %v16591_v24  ;;  %v20913_v24 = vld [vmem:[%s17303_s14 + $0x410] ss:$36 sps:$4 sm:$0xff]  }
 0x4a7   : > { %10548 = vmatprep.subr.bf16.mxu0 %v16596_v0  ;;  %v16639_v0 = vld [vmem:[%s22604_s3 + $0xa8] ss:$16 sps:$4 sm:$0xff]  }
 0x4a9   : > { %7499 = vmatmul.mubr.bf16.gmra.mrb[76].mxu0 %v20752_v48 }
 0x4aa   : > { %7508 = vmatprep.mubr.bf16.mxu0 %v22786_v27  ;;  %10549 = vmatpush1.bf16.msra.mxu0 %v16594_v13  ;;  %v16644_v13 = vld [vmem:[%s22604_s3 + $0xcc] ss:$16 sps:$4 sm:$0xff]  }
 0x4ab   : > { %8311 = vmatmul.mubr.bf16.gmra.mrb[124].mxu1 %v20551_v8  ;;  %10550 = vmatprep.subr.bf16.mxu0 %v16599_v4  ;;  %v16608_v8 = vld [vmem:[%s22604_s3 + $0x124] ss:$16 sps:$4 sm:$0xff]   ;;  %v16642_v4 = vld [vmem:[%s22604_s3 + $0xc8] ss:$16 sps:$4 sm:$0xff]  }
 0x4ac   : > { %8320 = vmatprep.mubr.bf16.mxu1 %v20556_v43  ;;  %v20771_v43 = vld [vmem:[%s17303_s14 + $0x140] ss:$36 sps:$4 sm:$0xff]  }
 0x4ae   : > { %10551 = vmatpush1.bf16.msra.mxu0 %v16597_v2  ;;  %v20932_v2 = vld [vmem:[%s17303_s14 + $0x458] ss:$36 sps:$4 sm:$0xff]  }
 0x4af   : > { %10552 = vmatprep.subr.bf16.mxu0 %v16602_v52  ;;  %v16645_v52 = vld [vmem:[%s22604_s3 + $0xe8] ss:$16 sps:$4 sm:$0xff]  }
 0x4b1   : > { %7509 = vmatmul.mubr.bf16.gmra.mrb[80].mxu0 %v20771_v43 }
 0x4b2   : > { %7518 = vmatprep.mubr.bf16.mxu0 %v22786_v27  ;;  %10553 = vmatpush1.bf16.msra.mxu0 %v16600_v53  ;;  %v16650_v53 = vld [vmem:[%s22604_s3 + $0x10c] ss:$16 sps:$4 sm:$0xff]  }
 0x4b3   : > { %8321 = vmatmul.mubr.bf16.gmra.mrb[128].mxu1 %v20564_v14  ;;  %10554 = vmatprep.subr.bf16.mxu0 %v16608_v8  ;;  %v16617_v14 = vld [vmem:[%s22604_s3 + $0x164] ss:$16 sps:$4 sm:$0xff]   ;;  %v16648_v8 = vld [vmem:[%s22604_s3 + $0x108] ss:$16 sps:$4 sm:$0xff]  }
 0x4b4   : > { %8330 = vmatprep.mubr.bf16.mxu1 %v20569_v31  ;;  %v20790_v31 = vld [vmem:[%s17303_s14 + $0x188] ss:$36 sps:$4 sm:$0xff]  }
 0x4b6   : > { %10555 = vmatpush1.bf16.msra.mxu0 %v16606_v29  ;;  %v16660_v29 = vld [vmem:[%s22604_s3 + $0x200] ss:$16 sps:$4 sm:$0xff]  }
 0x4b7   : > { %10556 = vmatprep.subr.bf16.mxu0 %v16611_v26  ;;  %v16668_v26 = vld [vmem:[%s22604_s3 + $0x224] ss:$16 sps:$4 sm:$0xff]  }
 0x4b9   : > { %7519 = vmatmul.mubr.bf16.gmra.mrb[84].mxu0 %v20790_v31 }
 0x4ba   : > { %7528 = vmatprep.mubr.bf16.mxu0 %v22786_v27  ;;  %10557 = vmatpush1.bf16.msra.mxu0 %v16609_v39  ;;  %v16651_v39 = vld [vmem:[%s22604_s3 + $0x128] ss:$16 sps:$4 sm:$0xff]  }
 0x4bb   : > { %8331 = vmatmul.mubr.bf16.gmra.mrb[132].mxu1 %v20574_v9  ;;  %10558 = vmatprep.subr.bf16.mxu0 %v16617_v14  ;;  %v16626_v9 = vld [vmem:[%s22604_s3 + $0x1a4] ss:$16 sps:$4 sm:$0xff]   ;;  %v16656_v14 = vld [vmem:[%s22604_s3 + $0x14c] ss:$16 sps:$4 sm:$0xff]  }
 0x4bc   : > { %8340 = vmatprep.mubr.bf16.mxu1 %v20579_v59  ;;  %v20809_v59 = vld [vmem:[%s17303_s14 + $0x1d0] ss:$36 sps:$4 sm:$0xff]  }
 0x4be   : > { %10559 = vmatpush1.bf16.msra.mxu0 %v16615_v40  ;;  %v16666_v40 = vld [vmem:[%s22604_s3 + $0x220] ss:$16 sps:$4 sm:$0xff]  }
 0x4bf   : > { %10560 = vmatprep.subr.bf16.mxu0 %v16620_v61  ;;  %v16654_v61 = vld [vmem:[%s22604_s3 + $0x148] ss:$16 sps:$4 sm:$0xff]  }
 0x4c1   : > { %7529 = vmatmul.mubr.bf16.gmra.mrb[88].mxu0 %v20809_v59 }
 0x4c2   : > { %7538 = vmatprep.mubr.bf16.mxu0 %v22786_v27  ;;  %10561 = vmatpush1.bf16.msra.mxu0 %v16618_v44  ;;  %v16659_v44 = vld [vmem:[%s22604_s3 + $0x16c] ss:$16 sps:$4 sm:$0xff]  }
 0x4c3   : > { %8341 = vmatmul.mubr.bf16.gmra.mrb[136].mxu1 %v20584_v3  ;;  %10562 = vmatprep.subr.bf16.mxu0 %v16626_v9  ;;  %v16627_v3 = vld [vmem:[%s22604_s3 + $0x1c0] ss:$16 sps:$4 sm:$0xff]  }
 0x4c4   : > { %8350 = vmatprep.mubr.bf16.mxu1 %v20589_v50  ;;  %v16635_v50 = vld [vmem:[%s22604_s3 + $0x1e4] ss:$16 sps:$4 sm:$0xff]   ;;  %v16669_v9 = vld [vmem:[%s22604_s3 + $0x240] ss:$16 sps:$4 sm:$0xff]  }
 0x4c6   : > { %10563 = vmatpush1.bf16.msra.mxu0 %v16624_v12  ;;  %v16677_v12 = vld [vmem:[%s22604_s3 + $0x264] ss:$16 sps:$4 sm:$0xff]  }
 0x4c7   : > { %10564 = vmatprep.subr.bf16.mxu0 %v16629_v45  ;;  %v16657_v45 = vld [vmem:[%s22604_s3 + $0x168] ss:$16 sps:$4 sm:$0xff]  }
 0x4c9   : > { %7539 = vmatmul.mubr.bf16.gmra.mrb[92].mxu0 %v20828_v47 }
 0x4ca   : > { %7548 = vmatprep.mubr.bf16.mxu0 %v22786_v27  ;;  %10565 = vmatpush1.bf16.msra.mxu0 %v16627_v3  ;;  %v16665_v3 = vld [vmem:[%s22604_s3 + $0x18c] ss:$16 sps:$4 sm:$0xff]  }
 0x4cb   : > { %8351 = vmatmul.mubr.bf16.gmra.mrb[140].mxu1 %v20594_v19  ;;  %10566 = vmatprep.subr.bf16.mxu0 %v16635_v50  ;;  %v20848_v19 = vld [vmem:[%s17303_s14 + $0x2a8] ss:$36 sps:$4 sm:$0xff]   ;;  %v16675_v50 = vld [vmem:[%s22604_s3 + $0x260] ss:$16 sps:$4 sm:$0xff]  }
 0x4cc   : > { %8360 = vmatprep.mubr.bf16.mxu1 %v20599_v60  ;;  %v20855_v60 = vld [vmem:[%s17303_s14 + $0x2f0] ss:$36 sps:$4 sm:$0xff]  }
 0x4ce   : > { %10567 = vmatpush1.bf16.msra.mxu0 %v16633_v57  ;;  %v16663_v57 = vld [vmem:[%s22604_s3 + $0x188] ss:$16 sps:$4 sm:$0xff]  }
 0x4cf   : > { %10729 = vmatprep.subr.bf16.mxu0 %v16662_v15  ;;  %v16674_v15 = vld [vmem:[%s22604_s3 + $0x1ac] ss:$16 sps:$4 sm:$0xff]  }
 0x4d1   : > { %7549 = vmatmul.mubr.bf16.gmra.mrb[96].mxu0 %v20841_v1 }
 0x4d2   : > { %7558 = vmatprep.mubr.bf16.mxu0 %v22786_v27 }
 0x4d3   : > { %8361 = vmatmul.mubr.bf16.gmra.mrb[144].mxu1 %v20610_v23  ;;  %v20862_v23 = vld [vmem:[%s17303_s14 + $0x338] ss:$36 sps:$4 sm:$0xff]  }
 0x4d4   : > { %8370 = vmatprep.mubr.bf16.mxu1 %v20621_v49  ;;  %v16603_v49 = vld [vmem:[%s22604_s3 + $0x8] ss:$16 sps:$4 sm:$0xff]  }
 0x4d9   : > { %7559 = vmatmul.mubr.bf16.gmra.mrb[100].mxu0 %v20848_v19 }
 0x4da   : > { %7568 = vmatprep.mubr.bf16.mxu0 %v22786_v27 }
 0x4db   : > { %8371 = vmatmul.mubr.bf16.gmra.mrb[148].mxu1 %v20635_v55  ;;  %v16614_v55 = vld [vmem:[%s22604_s3 + $0x2c] ss:$16 sps:$4 sm:$0xff]  }
 0x4dc   : > { %8380 = vmatprep.mubr.bf16.mxu1 %v20646_v33  ;;  %v20875_v33 = vld [vmem:[%s17303_s14 + $0x380] ss:$36 sps:$4 sm:$0xff]  }
 0x4e1   : > { %7569 = vmatmul.mubr.bf16.gmra.mrb[104].mxu0 %v20855_v60 }
 0x4e2   : > { %7578 = vmatprep.mubr.bf16.mxu0 %v22786_v27 }
 0x4e3   : > { %8381 = vmatmul.mubr.bf16.gmra.mrb[152].mxu1 %v20657_v30  ;;  %v16612_v30 = vld [vmem:[%s22604_s3 + $0x28] ss:$16 sps:$4 sm:$0xff]  }
 0x4e4   : > { %8390 = vmatprep.mubr.bf16.mxu1 %v20668_v36  ;;  %v16623_v36 = vld [vmem:[%s22604_s3 + $0x4c] ss:$16 sps:$4 sm:$0xff]  }
 0x4e9   : > { %7579 = vmatmul.mubr.bf16.gmra.mrb[108].mxu0 %v20862_v23 }
 0x4ea   : > { %7588 = vmatprep.mubr.bf16.mxu0 %v22786_v27 }
 0x4eb   : > { %8391 = vmatmul.mubr.bf16.gmra.mrb[156].mxu1 %v20679_v58  ;;  %v16621_v58 = vld [vmem:[%s22604_s3 + $0x48] ss:$16 sps:$4 sm:$0xff]  }
 0x4ec   : > { %8433 = vmatprep.mubr.bf16.mxu1 %v22786_v27 }
 0x4f1   : > { %7589 = vmatmul.mubr.bf16.gmra.mrb[112].mxu0 %v20875_v33 }
 0x4f2   : > { %7598 = vmatprep.mubr.bf16.mxu0 %v22786_v27 }
 0x4f3   : > { %8434 = vmatmul.mubr.bf16.vlgmr.msra.gmra.mrb[96].mxu1 %v20695_v42  ;;  %v16632_v42 = vld [vmem:[%s22604_s3 + $0x6c] ss:$16 sps:$4 sm:$0xff]  }
 0x4f4   : > { %11309 = vmatpush1.bf16.msra.mxu1 %v16603_v49  ;;  %8443 = vmatprep.mubr.bf16.mxu1 %v22786_v27  ;;  %v16678_v49 = vld [vmem:[%s22604_s3 + $0x280] ss:$16 sps:$4 sm:$0xff]  }
 0x4f5   : > { %11310 = vmatprep.subr.bf16.mxu1 %v16614_v55  ;;  %v16686_v55 = vld [vmem:[%s22604_s3 + $0x2a4] ss:$16 sps:$4 sm:$0xff]  }
 0x4f8   : > { %11311 = vmatpush1.bf16.msra.mxu1 %v16612_v30  ;;  %v16672_v30 = vld [vmem:[%s22604_s3 + $0x1a8] ss:$16 sps:$4 sm:$0xff]  }
 0x4f9   : > { %11312 = vmatprep.subr.bf16.mxu1 %v16623_v36  ;;  %7599 = vmatmul.mubr.bf16.gmra.mrb[116].mxu0 %v20894_v37  ;;  %v16683_v36 = vld [vmem:[%s22604_s3 + $0x1cc] ss:$16 sps:$4 sm:$0xff]  }
 0x4fa   : > { %7608 = vmatprep.mubr.bf16.mxu0 %v22786_v27 }
 0x4fb   : > { %8444 = vmatmul.mubr.bf16.gmra.mrb[100].mxu1 %v20714_v46  ;;  %v16641_v46 = vld [vmem:[%s22604_s3 + $0xac] ss:$16 sps:$4 sm:$0xff]  }
 0x4fc   : > { %8453 = vmatprep.mubr.bf16.mxu1 %v22786_v27  ;;  %11313 = vmatpush1.bf16.msra.mxu1 %v16621_v58  ;;  %v16684_v58 = vld [vmem:[%s22604_s3 + $0x2a0] ss:$16 sps:$4 sm:$0xff]  }
 0x4fd   : > { %11314 = vmatprep.subr.bf16.mxu1 %v16632_v42  ;;  %v16681_v42 = vld [vmem:[%s22604_s3 + $0x1c8] ss:$16 sps:$4 sm:$0xff]  }
 0x500   : > { %11315 = vmatpush1.bf16.msra.mxu1 %v16630_v54  ;;  %v16687_v54 = vld [vmem:[%s22604_s3 + $0x2c0] ss:$16 sps:$4 sm:$0xff]  }
 0x501   : > { %11316 = vmatprep.subr.bf16.mxu1 %v16638_v16  ;;  %7609 = vmatmul.mubr.bf16.gmra.mrb[120].mxu0 %v20913_v24  ;;  %v16692_v16 = vld [vmem:[%s22604_s3 + $0x1ec] ss:$16 sps:$4 sm:$0xff]  }
 0x502   : > { %7618 = vmatprep.mubr.bf16.mxu0 %v22786_v27 }
 0x503   : > { %8454 = vmatmul.mubr.bf16.gmra.mrb[104].mxu1 %v20733_v41  ;;  %v16647_v41 = vld [vmem:[%s22604_s3 + $0xec] ss:$16 sps:$4 sm:$0xff]  }
 0x504   : > { %8463 = vmatprep.mubr.bf16.mxu1 %v22786_v27  ;;  %11317 = vmatpush1.bf16.msra.mxu1 %v16636_v28  ;;  %v16695_v28 = vld [vmem:[%s22604_s3 + $0x2e4] ss:$16 sps:$4 sm:$0xff]  }
 0x505   : > { %11318 = vmatprep.subr.bf16.mxu1 %v16641_v46  ;;  %v16690_v46 = vld [vmem:[%s22604_s3 + $0x1e8] ss:$16 sps:$4 sm:$0xff]  }
 0x508   : > { %11319 = vmatpush1.bf16.msra.mxu1 %v16639_v0  ;;  %v16693_v0 = vld [vmem:[%s22604_s3 + $0x2e0] ss:$16 sps:$4 sm:$0xff]  }
 0x509   : > { %11320 = vmatprep.subr.bf16.mxu1 %v16644_v13  ;;  %7619 = vmatmul.mubr.bf16.gmra.mrb[124].mxu0 %v20932_v2  ;;  %v16701_v13 = vld [vmem:[%s22604_s3 + $0x20c] ss:$16 sps:$4 sm:$0xff]  }
 0x50a   : > { %10568 = vmatprep.mubr.bf16.mxu0 %v19583_v21 }
 0x50b   : > { %8464 = vmatmul.mubr.bf16.gmra.mrb[108].mxu1 %v20752_v48  ;;  %v16653_v48 = vld [vmem:[%s22604_s3 + $0x12c] ss:$16 sps:$4 sm:$0xff]  }
 0x50c   : > { %8473 = vmatprep.mubr.bf16.mxu1 %v22786_v27  ;;  %11321 = vmatpush1.bf16.msra.mxu1 %v16642_v4  ;;  %v16696_v4 = vld [vmem:[%s22604_s3 + $0x300] ss:$16 sps:$4 sm:$0xff]  }
 0x50d   : > { %11322 = vmatprep.subr.bf16.mxu1 %v16647_v41  ;;  %v22787_v41 = vld [vmem:[#allocation10_spill] sm:$0xff] }
 0x510   : > { %11323 = vmatpush1.bf16.msra.mxu1 %v16645_v52  ;;  %v16704_v52 = vld [vmem:[%s22604_s3 + $0x324] ss:$16 sps:$4 sm:$0xff]  }
 0x511   : > { %11324 = vmatprep.subr.bf16.mxu1 %v16650_v53  ;;  %10569 = vmatmul.mubr.bf16.vlgmr.msra.gmra.mrb[128].mxu0 %v19578_v51  ;;  %v22788_v53 = vld [vmem:[#allocation15_spill] sm:$0xff] }
 0x512   : > { %10578 = vmatprep.mubr.bf16.mxu0 %v19613_v25  ;;  %10730 = vmatpush1.bf16.msra.mxu0 %v16660_v29  ;;  %v16705_v29 = vld [vmem:[%s22604_s3 + $0x340] ss:$16 sps:$4 sm:$0xff]  }
 0x513   : > { %8474 = vmatmul.mubr.bf16.gmra.mrb[112].mxu1 %v20771_v43  ;;  %10731 = vmatprep.subr.bf16.mxu0 %v16668_v26  ;;  %v16671_v43 = vld [vmem:[%s22604_s3 + $0x244] ss:$16 sps:$4 sm:$0xff]  }
 0x514   : > { %8483 = vmatprep.mubr.bf16.mxu1 %v22786_v27  ;;  %11325 = vmatpush1.bf16.msra.mxu1 %v16648_v8  ;;  %v16702_v8 = vld [vmem:[%s22604_s3 + $0x320] ss:$16 sps:$4 sm:$0xff]   ;;  %v16713_v26 = vld [vmem:[%s22604_s3 + $0x364] ss:$16 sps:$4 sm:$0xff]  }
 0x515   : > { %11326 = vmatprep.subr.bf16.mxu1 %v16653_v48  ;;  %v16707_v48 = vld [vmem:[%s22604_s3 + $0x344] ss:$16 sps:$4 sm:$0xff]  }
 0x516   : > { %10732 = vmatpush1.bf16.msra.mxu0 %v16666_v40  ;;  %v16716_v40 = vld [vmem:[%s22604_s3 + $0x384] ss:$16 sps:$4 sm:$0xff]  }
 0x517   : > { %10733 = vmatprep.subr.bf16.mxu0 %v16671_v43  ;;  %v16714_v43 = vld [vmem:[%s22604_s3 + $0x380] ss:$16 sps:$4 sm:$0xff]  }
 0x518   : > { %11327 = vmatpush1.bf16.msra.mxu1 %v16651_v39  ;;  %v22790_v39 = vld [vmem:[#allocation28_spill] sm:$0xff] }
 0x519   : > { %11328 = vmatprep.subr.bf16.mxu1 %v16656_v14  ;;  %10579 = vmatmul.mubr.bf16.gmra.mrb[132].mxu0 %v19611_v38  ;;  %v16711_v14 = vld [vmem:[%s22604_s3 + $0x360] ss:$16 sps:$4 sm:$0xff]  }
 0x51a   : > { %10588 = vmatprep.mubr.bf16.mxu0 %v19643_v10  ;;  %10734 = vmatpush1.bf16.msra.mxu0 %v16669_v9  ;;  %v16720_v9 = vld [vmem:[%s22604_s3 + $0x3a0] ss:$16 sps:$4 sm:$0xff]  }
 0x51b   : > { %8484 = vmatmul.mubr.bf16.gmra.mrb[116].mxu1 %v20790_v31  ;;  %10735 = vmatprep.subr.bf16.mxu0 %v16677_v12  ;;  %v16680_v31 = vld [vmem:[%s22604_s3 + $0x284] ss:$16 sps:$4 sm:$0xff]  }
 0x51c   : > { %8493 = vmatprep.mubr.bf16.mxu1 %v22786_v27  ;;  %11329 = vmatpush1.bf16.msra.mxu1 %v16654_v61  ;;  %v16722_v61 = vld [vmem:[%s22604_s3 + $0x3a4] ss:$16 sps:$4 sm:$0xff]  }
 0x51d   : > { %11330 = vmatprep.subr.bf16.mxu1 %v16659_v44  ;;  %v22792_v44 = vld [vmem:[#allocation32_spill] sm:$0xff] }
 0x51e   : > { %10736 = vmatpush1.bf16.msra.mxu0 %v16675_v50  ;;  %v16725_v12 = vld [vmem:[%s22604_s3 + $0x3c4] ss:$16 sps:$4 sm:$0xff]   ;;  %v22794_v50 = vld [vmem:[#allocation19_spill] sm:$0xff] }
 0x51f   : > { %10737 = vmatprep.subr.bf16.mxu0 %v16680_v31  ;;  %v16729_v31 = vld [vmem:[%s22604_s3 + $0x3e0] ss:$16 sps:$4 sm:$0xff]  }
 0x520   : > { %11331 = vmatpush1.bf16.msra.mxu1 %v16657_v45  ;;  %v16723_v45 = vld [vmem:[%s22604_s3 + $0x3c0] ss:$16 sps:$4 sm:$0xff]  }
 0x521   : > { %11332 = vmatprep.subr.bf16.mxu1 %v16665_v3  ;;  %10589 = vmatmul.mubr.bf16.gmra.mrb[136].mxu0 %v19641_v6  ;;  %v16731_v3 = vld [vmem:[%s22604_s3 + $0x3e4] ss:$16 sps:$4 sm:$0xff]  }
 0x522   : > { %10598 = vmatprep.mubr.bf16.mxu0 %v19685_v22  ;;  %10738 = vmatpush1.bf16.msra.mxu0 %v16678_v49  ;;  %v22797_v49 = vld [vmem:[#allocation21_spill] sm:$0xff] }
 0x523   : > { %8494 = vmatmul.mubr.bf16.gmra.mrb[120].mxu1 %v20809_v59  ;;  %10739 = vmatprep.subr.bf16.mxu0 %v16686_v55  ;;  %v16689_v59 = vld [vmem:[%s22604_s3 + $0x2c4] ss:$16 sps:$4 sm:$0xff]  }
 0x524   : > { %8503 = vmatprep.mubr.bf16.mxu1 %v22786_v27  ;;  %11333 = vmatpush1.bf16.msra.mxu1 %v16663_v57  ;;  %v16758_v57 = vld [vmem:[%s22604_s3 + $0x404] ss:$16 sps:$4 sm:$0xff]  }
 0x525   : > { %11334 = vmatprep.subr.bf16.mxu1 %v16674_v15  ;;  %v22795_v15 = vld [vmem:[#allocation20_spill] sm:$0xff] }
 0x526   : > { %10740 = vmatpush1.bf16.msra.mxu0 %v16684_v58  ;;  %v22798_v55 = vld [vmem:[#allocation24_spill] sm:$0xff] }
 0x527   : > { %10741 = vmatprep.subr.bf16.mxu0 %v16689_v59  ;;  %v22800_v59 = vld [vmem:[#allocation23_spill] sm:$0xff] }
 0x528   : > { %11335 = vmatpush1.bf16.msra.mxu1 %v16672_v30  ;;  %v22799_v30 = vld [vmem:[#allocation17_spill] sm:$0xff] }
 0x529   : > { %11336 = vmatprep.subr.bf16.mxu1 %v16683_v36  ;;  %10599 = vmatmul.mubr.bf16.gmra.mrb[140].mxu0 %v19683_v7  ;;  %v1096_v36 = vsub.s32 4, %v22799_v30  ;;  %v1100_v58 = vsub.s32 5, %v22799_v30 }
 0x52a   : > { %10608 = vmatprep.mubr.bf16.mxu0 %v19715_v35  ;;  %10742 = vmatpush1.bf16.msra.mxu0 %v16687_v54 }
 0x52b   : > { %8504 = vmatmul.mubr.bf16.gmra.mrb[124].mxu1 %v20828_v47  ;;  %10743 = vmatprep.subr.bf16.mxu0 %v16695_v28  ;;  %v16698_v47 = vld [vmem:[%s22604_s3 + $0x304] ss:$16 sps:$4 sm:$0xff]  }
 0x52c   : > { %8513 = vmatprep.mubr.bf16.mxu1 %v22786_v27  ;;  %11337 = vmatpush1.bf16.msra.mxu1 %v16681_v42 }
 0x52d   : > { %11338 = vmatprep.subr.bf16.mxu1 %v16692_v16 }
 0x52e   : > { %10744 = vmatpush1.bf16.msra.mxu0 %v16693_v0 }
 0x52f   : > { %10745 = vmatprep.subr.bf16.mxu0 %v16698_v47 }
 0x530   : > { %11339 = vmatpush1.bf16.msra.mxu1 %v16690_v46 }
 0x531   : > { %11501 = vmatprep.subr.bf16.mxu1 %v16701_v13  ;;  %10609 = vmatmul.mubr.bf16.gmra.mrb[144].mxu0 %v22787_v41 }
 0x532   : > { %10618 = vmatprep.mubr.bf16.mxu0 %v22788_v53  ;;  %10746 = vmatpush1.bf16.msra.mxu0 %v16696_v4 }
 0x533   : > { %8514 = vmatmul.mubr.bf16.gmra.mrb[128].mxu1 %v20841_v1  ;;  %10747 = vmatprep.subr.bf16.mxu0 %v16704_v52  ;;  %v22789_v1 = vld [vmem:[#allocation13_spill] sm:$0xff] }
 0x534   : > { %8523 = vmatprep.mubr.bf16.mxu1 %v22786_v27 }
 0x536   : > { %10748 = vmatpush1.bf16.msra.mxu0 %v16702_v8 }
 0x537   : > { %10749 = vmatprep.subr.bf16.mxu0 %v16707_v48  ;;  %v22802_v48 = vld [vmem:[#allocation25_spill] sm:$0xff] }
 0x539   : > { %10619 = vmatmul.mubr.bf16.gmra.mrb[148].mxu0 %v22789_v1 }
 0x53a   : > { %10628 = vmatprep.mubr.bf16.mxu0 %v22790_v39  ;;  %10750 = vmatpush1.bf16.msra.mxu0 %v16705_v29 }
 0x53b   : > { %8524 = vmatmul.mubr.bf16.gmra.mrb[132].mxu1 %v20848_v19  ;;  %10751 = vmatprep.subr.bf16.mxu0 %v16713_v26  ;;  %v22791_v19 = vld [vmem:[#allocation18_spill] sm:$0xff] }
 0x53c   : > { %8533 = vmatprep.mubr.bf16.mxu1 %v22786_v27 }
 0x53e   : > { %10752 = vmatpush1.bf16.msra.mxu0 %v16711_v14 }
 0x53f   : > { %10753 = vmatprep.subr.bf16.mxu0 %v16716_v40 }
 0x541   : > { %10629 = vmatmul.mubr.bf16.gmra.mrb[152].mxu0 %v22791_v19 }
 0x542   : > { %10638 = vmatprep.mubr.bf16.mxu0 %v22792_v44  ;;  %10754 = vmatpush1.bf16.msra.mxu0 %v16714_v43 }
 0x543   : > { %8534 = vmatmul.mubr.bf16.gmra.mrb[136].mxu1 %v20855_v60  ;;  %10755 = vmatprep.subr.bf16.mxu0 %v16722_v61  ;;  %v22793_v60 = vld [vmem:[#allocation30_spill] sm:$0xff] }
 0x544   : > { %8543 = vmatprep.mubr.bf16.mxu1 %v22786_v27 }
 0x546   : > { %10756 = vmatpush1.bf16.msra.mxu0 %v16720_v9 }
 0x547   : > { %10757 = vmatprep.subr.bf16.mxu0 %v16725_v12 }
 0x549   : > { %10639 = vmatmul.mubr.bf16.gmra.mrb[156].mxu0 %v22793_v60 }
 0x54a   : > { %10648 = vmatprep.mubr.bf16.mxu0 %v22794_v50  ;;  %10758 = vmatpush1.bf16.msra.mxu0 %v16723_v45 }
 0x54b   : > { %8544 = vmatmul.mubr.bf16.gmra.mrb[140].mxu1 %v20862_v23  ;;  %10759 = vmatprep.subr.bf16.mxu0 %v16731_v3  ;;  %v22796_v23 = vld [vmem:[#allocation22_spill] sm:$0xff] }
 0x54c   : > { %8553 = vmatprep.mubr.bf16.mxu1 %v22786_v27 }
 0x54e   : > { %10760 = vmatpush1.bf16.msra.mxu0 %v16729_v31 }
 0x54f   : > { %10922 = vmatprep.subr.bf16.mxu0 %v16758_v57 }
 0x551   : > { %10649 = vmatmul.mubr.bf16.gmra.mrb[160].mxu0 %v22795_v15 }
 0x552   : > { %10658 = vmatprep.mubr.bf16.mxu0 %v22796_v23 }
 0x553   : > { %8554 = vmatmul.mubr.bf16.gmra.mrb[144].mxu1 %v20875_v33  ;;  %v21134_v33 = vld [vmem:[%s22603_s2] sm:$0xff] }
 0x554   : > { %8563 = vmatprep.mubr.bf16.mxu1 %v22786_v27  ;;  %v21137_v42 = vrot.slane %v21134_v33, %v1096_v36  ;;  %v21142_v54 = vrot.slane %v21134_v33, %v1100_v58 }
 0x559   : > { %10659 = vmatmul.mubr.bf16.gmra.mrb[164].mxu0 %v22797_v49 }
 0x55a   : > { %10668 = vmatprep.mubr.bf16.mxu0 %v22798_v55 }
 0x55b   : > { %8564 = vmatmul.mubr.bf16.gmra.mrb[148].mxu1 %v20894_v37  ;;  %v22801_v37 = vld [vmem:[#allocation26_spill] sm:$0xff] }
 0x55c   : > { %8573 = vmatprep.mubr.bf16.mxu1 %v22786_v27 }
 0x561   : > { %10669 = vmatmul.mubr.bf16.gmra.mrb[168].mxu0 %v22800_v59 }
 0x562   : > { %10678 = vmatprep.mubr.bf16.mxu0 %v22801_v37 }
 0x563   : > { %8574 = vmatmul.mubr.bf16.gmra.mrb[152].mxu1 %v20913_v24 }
 0x564   : > { %8583 = vmatprep.mubr.bf16.mxu1 %v22786_v27  ;;  %v7470_v16 = vpop.f32.mrb[64].mxu0  ;;  %v22803_v27 = vld [vmem:[#allocation3_spill] sm:$0xff] }
 0x565   : > { %v14726_v28 = vadd.f32 %v7470_v16, %v21137_v42  ;;  %v7472_v46 = vpop.f32.mrb[65].mxu0  ;;  %v22804_v16 = vld [vmem:[#allocation2_spill] sm:$0xff] }
 0x566   : > { %v14727_v0 = vadd.f32 %v7472_v46, %v21142_v54  ;;  %v7474_v13 = vpop.f32.mrb[66].mxu0 }
 0x567   : > { %v14728_v47 = vadd.f32 %v7474_v13, %v21137_v42  ;;  %v7476_v4 = vpop.f32.mrb[67].mxu0  ;;  %v8598_v24 = vmax.f32 %v14726_v28, 0.0 }
 0x568   : > { %v14729_v52 = vadd.f32 %v7476_v4, %v21142_v54  ;;  %v8599_v29 = vmax.f32 %v14727_v0, 0.0  ;;  %v22805_v0 = vld [vmem:[#allocation5_spill] sm:$0xff] }
 0x569   : > { %v8606_v8 = vmax.f32 %v14728_v47, 0.0  ;;  %10679 = vmatmul.mubr.bf16.gmra.mrb[172].mxu0 %v22802_v48  ;;  %v16708_v47 = vld [vmem:[%s22604_s3 + $0x228] ss:$16 sps:$4 sm:$0xff]  }
 0x56a   : > { %v8607_v26 = vmax.f32 %v14729_v52, 0.0  ;;  %10688 = vmatprep.mubr.bf16.mxu0 %v22803_v27 }
 0x56b   : > { %8584 = vmatmul.mubr.bf16.gmra.mrb[156].mxu1 %v20932_v2  ;;  %v21152_v14 = vpack.c.bf16 %v8606_v8, %v8598_v24  ;;  %v16699_v2 = vld [vmem:[%s22604_s3 + $0x208] ss:$16 sps:$4 sm:$0xff]   ;;  %v16719_v24 = vld [vmem:[%s22604_s3 + $0x24c] ss:$16 sps:$4 sm:$0xff]  }
 0x56c   : > { %11340 = vmatprep.mubr.bf16.mxu1 %v19583_v21  ;;  %v21155_v40 = vpack.c.bf16 %v8607_v26, %v8599_v29  ;;  %v7480_v43 = vpop.f32.mrb[68].mxu0  ;;  %v16710_v21 = vld [vmem:[%s22604_s3 + $0x22c] ss:$16 sps:$4 sm:$0xff]  }
 0x56d   : > { %v14730_v61 = vadd.f32 %v7480_v43, %v21137_v42  ;;  %v7482_v9 = vpop.f32.mrb[69].mxu0 }
 0x56e   : > { %v14731_v12 = vadd.f32 %v7482_v9, %v21142_v54  ;;  %v7484_v45 = vpop.f32.mrb[70].mxu0 }
 0x56f   : > { %v14732_v3 = vadd.f32 %v7484_v45, %v21137_v42  ;;  %v7486_v31 = vpop.f32.mrb[71].mxu0  ;;  %v8614_v36 = vmax.f32 %v14730_v61, 0.0  ;;  %v16717_v61 = vld [vmem:[%s22604_s3 + $0x248] ss:$16 sps:$4 sm:$0xff]  }
 0x570   : > { %v14733_v57 = vadd.f32 %v7486_v31, %v21142_v54  ;;  %v8615_v28 = vmax.f32 %v14731_v12, 0.0  ;;  %v16728_v12 = vld [vmem:[%s22604_s3 + $0x26c] ss:$16 sps:$4 sm:$0xff]   ;;  %v22806_v31 = vld [vmem:[#allocation4_spill] sm:$0xff] }
 0x571   : > { %v8622_v58 = vmax.f32 %v14732_v3, 0.0  ;;  %10689 = vmatmul.mubr.bf16.gmra.mrb[176].mxu0 %v22804_v16 }
 0x572   : > { %v8623_v46 = vmax.f32 %v14733_v57, 0.0  ;;  %10698 = vmatprep.mubr.bf16.mxu0 %v22805_v0 }
 0x573   : > { %11341 = vmatmul.mubr.bf16.vlgmr.msra.gmra.mrb[160].mxu1 %v19578_v51  ;;  %v21170_v13 = vpack.c.bf16 %v8622_v58, %v8614_v36  ;;  %v16726_v58 = vld [vmem:[%s22604_s3 + $0x268] ss:$16 sps:$4 sm:$0xff]  }
 0x574   : > { %11350 = vmatprep.mubr.bf16.mxu1 %v19613_v25  ;;  %11502 = vmatpush1.bf16.msra.mxu1 %v16699_v2  ;;  %v21176_v4 = vpack.c.bf16 %v8623_v46, %v8615_v28  ;;  %v7490_v52 = vpop.f32.mrb[72].mxu0 }
 0x575   : > { %11503 = vmatprep.subr.bf16.mxu1 %v16710_v21  ;;  %v14734_v51 = vadd.f32 %v7490_v52, %v21137_v42  ;;  %v7492_v8 = vpop.f32.mrb[73].mxu0  ;;  %v22807_v21 = vld [vmem:[#allocation7_spill] sm:$0xff] }
 0x576   : > { %v14735_v29 = vadd.f32 %v7492_v8, %v21142_v54  ;;  %v7494_v26 = vpop.f32.mrb[74].mxu0 }
 0x577   : > { %v14736_v25 = vadd.f32 %v7494_v26, %v21137_v42  ;;  %v7496_v43 = vpop.f32.mrb[75].mxu0  ;;  %v8630_v45 = vmax.f32 %v14734_v51, 0.0 }
 0x578   : > { %11504 = vmatpush1.bf16.msra.mxu1 %v16708_v47  ;;  %v14737_v9 = vadd.f32 %v7496_v43, %v21142_v54  ;;  %v8631_v2 = vmax.f32 %v14735_v29, 0.0  ;;  %v16734_v47 = vld [vmem:[%s22604_s3 + $0x28c] ss:$16 sps:$4 sm:$0xff]   ;;  %v16732_v29 = vld [vmem:[%s22604_s3 + $0x288] ss:$16 sps:$4 sm:$0xff]  }
 0x579   : > { %11505 = vmatprep.subr.bf16.mxu1 %v16719_v24  ;;  %v8638_v3 = vmax.f32 %v14736_v25, 0.0  ;;  %10699 = vmatmul.mubr.bf16.gmra.mrb[180].mxu0 %v22806_v31  ;;  %v16737_v25 = vld [vmem:[%s22604_s3 + $0x2ac] ss:$16 sps:$4 sm:$0xff]  }
 0x57a   : > { %v8639_v57 = vmax.f32 %v14737_v9, 0.0  ;;  %10708 = vmatprep.mubr.bf16.mxu0 %v22807_v21  ;;  %v22808_v9 = vld [vmem:[#allocation6_spill] sm:$0xff] }
 0x57b   : > { %11351 = vmatmul.mubr.bf16.gmra.mrb[164].mxu1 %v19611_v38  ;;  %v21194_v36 = vpack.c.bf16 %v8638_v3, %v8630_v45  ;;  %v22809_v3 = vld [vmem:[#allocation9_spill] sm:$0xff] }
 0x57c   : > { %11360 = vmatprep.mubr.bf16.mxu1 %v19643_v10  ;;  %11506 = vmatpush1.bf16.msra.mxu1 %v16717_v61  ;;  %v21200_v28 = vpack.c.bf16 %v8639_v57, %v8631_v2  ;;  %v7500_v46 = vpop.f32.mrb[76].mxu0  ;;  %v16735_v57 = vld [vmem:[%s22604_s3 + $0x2a8] ss:$16 sps:$4 sm:$0xff]  }
 0x57d   : > { %11507 = vmatprep.subr.bf16.mxu1 %v16728_v12  ;;  %v14738_v38 = vadd.f32 %v7500_v46, %v21137_v42  ;;  %v7502_v52 = vpop.f32.mrb[77].mxu0 }
 0x57e   : > { %v14739_v24 = vadd.f32 %v7502_v52, %v21142_v54  ;;  %v7504_v51 = vpop.f32.mrb[78].mxu0 }
 0x57f   : > { %v14740_v10 = vadd.f32 %v7504_v51, %v21137_v42  ;;  %v7506_v8 = vpop.f32.mrb[79].mxu0  ;;  %v8646_v43 = vmax.f32 %v14738_v38, 0.0 }
 0x580   : > { %11508 = vmatpush1.bf16.msra.mxu1 %v16726_v58  ;;  %v14741_v26 = vadd.f32 %v7506_v8, %v21142_v54  ;;  %v8647_v12 = vmax.f32 %v14739_v24, 0.0 }
 0x581   : > { %11509 = vmatprep.subr.bf16.mxu1 %v16734_v47  ;;  %v8654_v61 = vmax.f32 %v14740_v10, 0.0  ;;  %10709 = vmatmul.mubr.bf16.gmra.mrb[184].mxu0 %v22808_v9  ;;  %v16740_v47 = vld [vmem:[%s22604_s3 + $0x2cc] ss:$16 sps:$4 sm:$0xff]   ;;  %v16738_v10 = vld [vmem:[%s22604_s3 + $0x2c8] ss:$16 sps:$4 sm:$0xff]  }
 0x582   : > { %v8655_v45 = vmax.f32 %v14741_v26, 0.0  ;;  %10718 = vmatprep.mubr.bf16.mxu0 %v22809_v3 }
 0x583   : > { %11361 = vmatmul.mubr.bf16.gmra.mrb[168].mxu1 %v19641_v6  ;;  %v21218_v2 = vpack.c.bf16 %v8654_v61, %v8646_v43  ;;  %v22812_v43 = vld [vmem:[#allocation8_spill] sm:$0xff] }
 0x584   : > { %11370 = vmatprep.mubr.bf16.mxu1 %v19685_v22  ;;  %11510 = vmatpush1.bf16.msra.mxu1 %v16732_v29  ;;  %v21224_v58 = vpack.c.bf16 %v8655_v45, %v8647_v12  ;;  %v7510_v46 = vpop.f32.mrb[80].mxu0  ;;  %v16743_v29 = vld [vmem:[%s22604_s3 + $0x2ec] ss:$16 sps:$4 sm:$0xff]   ;;  %v22813_v45 = vld [vmem:[#allocation12_spill] sm:$0xff] }
 0x585   : > { %22810 = vst [vmem:[#allocation10_spill] sm:$0xff] %v21218_v2  ;;  %11511 = vmatprep.subr.bf16.mxu1 %v16737_v25  ;;  %v14742_v6 = vadd.f32 %v7510_v46, %v21137_v42  ;;  %v7512_v38 = vpop.f32.mrb[81].mxu0  ;;  %v16741_v46 = vld [vmem:[%s22604_s3 + $0x2e8] ss:$16 sps:$4 sm:$0xff]   ;;  %v22844_v2 = vld [vmem:[#allocation40_spill] sm:$0xff] }
 0x586   : > { %22811 = vst [vmem:[#allocation15_spill] sm:$0xff] %v21224_v58  ;;  %v14743_v52 = vadd.f32 %v7512_v38, %v21142_v54  ;;  %v7514_v24 = vpop.f32.mrb[82].mxu0  ;;  %v16746_v38 = vld [vmem:[%s22604_s3 + $0x30c] ss:$16 sps:$4 sm:$0xff]  }
 0x587   : > { %v14744_v22 = vadd.f32 %v7514_v24, %v21137_v42  ;;  %v7516_v51 = vpop.f32.mrb[83].mxu0  ;;  %v8662_v26 = vmax.f32 %v14742_v6, 0.0 }
 0x588   : > { %11512 = vmatpush1.bf16.msra.mxu1 %v16735_v57  ;;  %v14745_v8 = vadd.f32 %v7516_v51, %v21142_v54  ;;  %v8663_v61 = vmax.f32 %v14743_v52, 0.0 }
 0x589   : > { %11513 = vmatprep.subr.bf16.mxu1 %v16740_v47  ;;  %v8670_v25 = vmax.f32 %v14744_v22, 0.0  ;;  %10719 = vmatmul.mubr.bf16.gmra.mrb[188].mxu0 %v22812_v43 }
 0x58a   : > { %v8671_v12 = vmax.f32 %v14745_v8, 0.0  ;;  %10761 = vmatprep.mubr.bf16.mxu0 %v22813_v45 }
 0x58b   : > { %11371 = vmatmul.mubr.bf16.gmra.mrb[172].mxu1 %v19683_v7  ;;  %v21242_v57 = vpack.c.bf16 %v8670_v25, %v8662_v26  ;;  %v16756_v26 = vld [vmem:[%s22604_s3 + $0x400] ss:$16 sps:$4 sm:$0xff]  }
 0x58c   : > { %11380 = vmatprep.mubr.bf16.mxu1 %v19715_v35  ;;  %11514 = vmatpush1.bf16.msra.mxu1 %v16738_v10  ;;  %v21248_v47 = vpack.c.bf16 %v8671_v12, %v8663_v61  ;;  %v7520_v6 = vpop.f32.mrb[84].mxu0  ;;  %v16744_v10 = vld [vmem:[%s22604_s3 + $0x308] ss:$16 sps:$4 sm:$0xff]  }
 0x58d   : > { %22814 = vst [vmem:[#allocation13_spill] sm:$0xff] %v21242_v57  ;;  %11515 = vmatprep.subr.bf16.mxu1 %v16743_v29  ;;  %v14746_v7 = vadd.f32 %v7520_v6, %v21137_v42  ;;  %v7522_v52 = vpop.f32.mrb[85].mxu0  ;;  %v16749_v29 = vld [vmem:[%s22604_s3 + $0x32c] ss:$16 sps:$4 sm:$0xff]  }
 0x58e   : > { %22815 = vst [vmem:[#allocation28_spill] sm:$0xff] %v21248_v47  ;;  %v14747_v24 = vadd.f32 %v7522_v52, %v21142_v54  ;;  %v7524_v22 = vpop.f32.mrb[86].mxu0  ;;  %v22816_v12 = vld [vmem:[#allocation11_spill] sm:$0xff] }
 0x58f   : > { %v14748_v35 = vadd.f32 %v7524_v22, %v21137_v42  ;;  %v7526_v51 = vpop.f32.mrb[87].mxu0  ;;  %v8678_v25 = vmax.f32 %v14746_v7, 0.0  ;;  %v16747_v7 = vld [vmem:[%s22604_s3 + $0x328] ss:$16 sps:$4 sm:$0xff]  }
 0x590   : > { %11516 = vmatpush1.bf16.msra.mxu1 %v16741_v46  ;;  %v14749_v8 = vadd.f32 %v7526_v51, %v21142_v54  ;;  %v16764_v46 = vld [vmem:[%s22604_s3 + $0x424] ss:$16 sps:$4 sm:$0xff]   ;;  %v8679_v6 = vmax.f32 %v14747_v24, 0.0  ;;  %v16752_v24 = vld [vmem:[%s22604_s3 + $0x34c] ss:$16 sps:$4 sm:$0xff]  }
 0x591   : > { %11517 = vmatprep.subr.bf16.mxu1 %v16746_v38  ;;  %v8686_v61 = vmax.f32 %v14748_v35, 0.0  ;;  %10762 = vmatmul.mubr.bf16.vlgmr.msra.gmra.mrb[128].mxu0 %v22816_v12  ;;  %v22817_v38 = vld [vmem:[#allocation16_spill] sm:$0xff] }
 0x592   : > { %v8687_v52 = vmax.f32 %v14749_v8, 0.0  ;;  %10771 = vmatprep.mubr.bf16.mxu0 %v22817_v38  ;;  %10923 = vmatpush1.bf16.msra.mxu0 %v16756_v26  ;;  %v16767_v8 = vld [vmem:[%s22604_s3 + $0x444] ss:$16 sps:$4 sm:$0xff]   ;;  %v16750_v26 = vld [vmem:[%s22604_s3 + $0x348] ss:$16 sps:$4 sm:$0xff]  }
 0x593   : > { %11381 = vmatmul.mubr.bf16.gmra.mrb[176].mxu1 %v22787_v41  ;;  %v21272_v22 = vpack.c.bf16 %v8686_v61, %v8678_v25  ;;  %v16762_v41 = vld [vmem:[%s22604_s3 + $0x420] ss:$16 sps:$4 sm:$0xff]   ;;  %10924 = vmatprep.subr.bf16.mxu0 %v16764_v46  ;;  %v16755_v46 = vld [vmem:[%s22604_s3 + $0x36c] ss:$16 sps:$4 sm:$0xff]  }
 0x594   : > { %11390 = vmatprep.mubr.bf16.mxu1 %v22788_v53  ;;  %11518 = vmatpush1.bf16.msra.mxu1 %v16744_v10  ;;  %v21278_v35 = vpack.c.bf16 %v8687_v52, %v8679_v6  ;;  %v7530_v51 = vpop.f32.mrb[88].mxu0 }
 0x595   : > { %22818 = vst [vmem:[#allocation18_spill] sm:$0xff] %v21272_v22  ;;  %11519 = vmatprep.subr.bf16.mxu1 %v16749_v29  ;;  %v14750_v53 = vadd.f32 %v7530_v51, %v21137_v42  ;;  %v7532_v10 = vpop.f32.mrb[89].mxu0  ;;  %v16765_v51 = vld [vmem:[%s22604_s3 + $0x440] ss:$16 sps:$4 sm:$0xff]  }
 0x596   : > { %22819 = vst [vmem:[#allocation32_spill] sm:$0xff] %v21278_v35  ;;  %v14751_v25 = vadd.f32 %v7532_v10, %v21142_v54  ;;  %v7534_v29 = vpop.f32.mrb[90].mxu0  ;;  %10925 = vmatpush1.bf16.msra.mxu0 %v16762_v41  ;;  %v22820_v22 = vld [vmem:[#allocation14_spill] sm:$0xff]  ;;  %v22821_v35 = vld [vmem:[#allocation29_spill] sm:$0xff] }
 0x597   : > { %v14752_v61 = vadd.f32 %v7534_v29, %v21137_v42  ;;  %v7536_v6 = vpop.f32.mrb[91].mxu0  ;;  %v8694_v10 = vmax.f32 %v14750_v53, 0.0  ;;  %10926 = vmatprep.subr.bf16.mxu0 %v16767_v8  ;;  %v16753_v53 = vld [vmem:[%s22604_s3 + $0x368] ss:$16 sps:$4 sm:$0xff]  }
 0x598   : > { %11520 = vmatpush1.bf16.msra.mxu1 %v16747_v7  ;;  %v14753_v52 = vadd.f32 %v7536_v6, %v21142_v54  ;;  %v16773_v7 = vld [vmem:[%s22604_s3 + $0x464] ss:$16 sps:$4 sm:$0xff]   ;;  %v8695_v6 = vmax.f32 %v14751_v25, 0.0  ;;  %v16761_v25 = vld [vmem:[%s22604_s3 + $0x38c] ss:$16 sps:$4 sm:$0xff]  }
 0x599   : > { %11521 = vmatprep.subr.bf16.mxu1 %v16752_v24  ;;  %v8702_v29 = vmax.f32 %v14752_v61, 0.0  ;;  %10772 = vmatmul.mubr.bf16.gmra.mrb[132].mxu0 %v22820_v22 }
 0x59a   : > { %v8703_v24 = vmax.f32 %v14753_v52, 0.0  ;;  %10781 = vmatprep.mubr.bf16.mxu0 %v22821_v35  ;;  %10927 = vmatpush1.bf16.msra.mxu0 %v16765_v51  ;;  %v16776_v52 = vld [vmem:[%s22604_s3 + $0x484] ss:$16 sps:$4 sm:$0xff]   ;;  %v16759_v51 = vld [vmem:[%s22604_s3 + $0x388] ss:$16 sps:$4 sm:$0xff]  }
 0x59b   : > { %11391 = vmatmul.mubr.bf16.gmra.mrb[180].mxu1 %v22789_v1  ;;  %v21308_v41 = vpack.c.bf16 %v8702_v29, %v8694_v10  ;;  %v16771_v1 = vld [vmem:[%s22604_s3 + $0x460] ss:$16 sps:$4 sm:$0xff]   ;;  %10928 = vmatprep.subr.bf16.mxu0 %v16773_v7  ;;  %v16770_v7 = vld [vmem:[%s22604_s3 + $0x3ac] ss:$16 sps:$4 sm:$0xff]  }
 0x59c   : > { %11400 = vmatprep.mubr.bf16.mxu1 %v22790_v39  ;;  %11522 = vmatpush1.bf16.msra.mxu1 %v16750_v26  ;;  %v21314_v8 = vpack.c.bf16 %v8703_v24, %v8695_v6  ;;  %v7540_v61 = vpop.f32.mrb[92].mxu0 }
 0x59d   : > { %22822 = vst [vmem:[#allocation30_spill] sm:$0xff] %v21308_v41  ;;  %11523 = vmatprep.subr.bf16.mxu1 %v16755_v46  ;;  %v14754_v39 = vadd.f32 %v7540_v61, %v21137_v42  ;;  %v7542_v26 = vpop.f32.mrb[93].mxu0  ;;  %v16774_v61 = vld [vmem:[%s22604_s3 + $0x480] ss:$16 sps:$4 sm:$0xff]   ;;  %v22824_v41 = vld [vmem:[#allocation27_spill] sm:$0xff] }
 0x59e   : > { %22823 = vst [vmem:[#allocation19_spill] sm:$0xff] %v21314_v8  ;;  %v14755_v10 = vadd.f32 %v7542_v26, %v21142_v54  ;;  %v7544_v46 = vpop.f32.mrb[94].mxu0  ;;  %10929 = vmatpush1.bf16.msra.mxu0 %v16771_v1  ;;  %v22825_v8 = vld [vmem:[#allocation33_spill] sm:$0xff] }
 0x59f   : > { %v14756_v29 = vadd.f32 %v7544_v46, %v21137_v42  ;;  %v7546_v6 = vpop.f32.mrb[95].mxu0  ;;  %v8710_v26 = vmax.f32 %v14754_v39, 0.0  ;;  %10930 = vmatprep.subr.bf16.mxu0 %v16776_v52  ;;  %v16768_v39 = vld [vmem:[%s22604_s3 + $0x3a8] ss:$16 sps:$4 sm:$0xff]  }
 0x5a0   : > { %11524 = vmatpush1.bf16.msra.mxu1 %v16753_v53  ;;  %v14757_v24 = vadd.f32 %v7546_v6, %v21142_v54  ;;  %v16782_v53 = vld [vmem:[%s22604_s3 + $0x4a4] ss:$16 sps:$4 sm:$0xff]   ;;  %v8711_v6 = vmax.f32 %v14755_v10, 0.0  ;;  %v16779_v10 = vld [vmem:[%s22604_s3 + $0x3cc] ss:$16 sps:$4 sm:$0xff]  }
 0x5a1   : > { %11525 = vmatprep.subr.bf16.mxu1 %v16761_v25  ;;  %v8718_v46 = vmax.f32 %v14756_v29, 0.0  ;;  %10782 = vmatmul.mubr.bf16.gmra.mrb[136].mxu0 %v22824_v41 }
 0x5a2   : > { %v8719_v25 = vmax.f32 %v14757_v24, 0.0  ;;  %10791 = vmatprep.mubr.bf16.mxu0 %v22825_v8  ;;  %10931 = vmatpush1.bf16.msra.mxu0 %v16774_v61  ;;  %v16785_v24 = vld [vmem:[%s22604_s3 + $0x4c4] ss:$16 sps:$4 sm:$0xff]   ;;  %v16777_v61 = vld [vmem:[%s22604_s3 + $0x3c8] ss:$16 sps:$4 sm:$0xff]  }
 0x5a3   : > { %11401 = vmatmul.mubr.bf16.gmra.mrb[184].mxu1 %v22791_v19  ;;  %v21344_v1 = vpack.c.bf16 %v8718_v46, %v8710_v26  ;;  %v16780_v19 = vld [vmem:[%s22604_s3 + $0x4a0] ss:$16 sps:$4 sm:$0xff]   ;;  %10932 = vmatprep.subr.bf16.mxu0 %v16782_v53 }
 0x5a4   : > { %11410 = vmatprep.mubr.bf16.mxu1 %v22792_v44  ;;  %11526 = vmatpush1.bf16.msra.mxu1 %v16759_v51  ;;  %v21350_v52 = vpack.c.bf16 %v8719_v25, %v8711_v6  ;;  %v7550_v29 = vpop.f32.mrb[96].mxu0  ;;  %v16783_v53 = vld [vmem:[%s22604_s3 + $0x4c0] ss:$16 sps:$4 sm:$0xff]  }
 0x5a5   : > { %22826 = vst [vmem:[#allocation20_spill] sm:$0xff] %v21344_v1  ;;  %11527 = vmatprep.subr.bf16.mxu1 %v16770_v7  ;;  %v14758_v44 = vadd.f32 %v7550_v29, %v21137_v42  ;;  %v7552_v51 = vpop.f32.mrb[97].mxu0  ;;  %v16788_v29 = vld [vmem:[%s22604_s3 + $0x3ec] ss:$16 sps:$4 sm:$0xff]  }
 0x5a6   : > { %22827 = vst [vmem:[#allocation22_spill] sm:$0xff] %v21350_v52  ;;  %v14759_v26 = vadd.f32 %v7552_v51, %v21142_v54  ;;  %v7554_v7 = vpop.f32.mrb[98].mxu0  ;;  %10933 = vmatpush1.bf16.msra.mxu0 %v16780_v19  ;;  %v22828_v1 = vld [vmem:[#allocation31_spill] sm:$0xff] }
 0x5a7   : > { %v14760_v46 = vadd.f32 %v7554_v7, %v21137_v42  ;;  %v7556_v6 = vpop.f32.mrb[99].mxu0  ;;  %v8726_v51 = vmax.f32 %v14758_v44, 0.0  ;;  %10934 = vmatprep.subr.bf16.mxu0 %v16785_v24  ;;  %v22829_v19 = vld [vmem:[#allocation35_spill] sm:$0xff] }
 0x5a8   : > { %11528 = vmatpush1.bf16.msra.mxu1 %v16768_v39  ;;  %v14761_v25 = vadd.f32 %v7556_v6, %v21142_v54  ;;  %v16791_v39 = vld [vmem:[%s22604_s3 + $0x4e4] ss:$16 sps:$4 sm:$0xff]   ;;  %v8727_v6 = vmax.f32 %v14759_v26, 0.0  ;;  %v16786_v44 = vld [vmem:[%s22604_s3 + $0x3e8] ss:$16 sps:$4 sm:$0xff]  }
 0x5a9   : > { %11529 = vmatprep.subr.bf16.mxu1 %v16779_v10  ;;  %v8734_v7 = vmax.f32 %v14760_v46, 0.0  ;;  %10792 = vmatmul.mubr.bf16.gmra.mrb[140].mxu0 %v22828_v1  ;;  %v16797_v26 = vld [vmem:[%s22604_s3 + $0x40c] ss:$16 sps:$4 sm:$0xff]  }
 0x5aa   : > { %v8735_v10 = vmax.f32 %v14761_v25, 0.0  ;;  %10801 = vmatprep.mubr.bf16.mxu0 %v22829_v19  ;;  %10935 = vmatpush1.bf16.msra.mxu0 %v16783_v53  ;;  %v16794_v25 = vld [vmem:[%s22604_s3 + $0x504] ss:$16 sps:$4 sm:$0xff]  }
 0x5ab   : > { %11411 = vmatmul.mubr.bf16.gmra.mrb[188].mxu1 %v22793_v60  ;;  %v21380_v52 = vpack.c.bf16 %v8734_v7, %v8726_v51  ;;  %v16789_v60 = vld [vmem:[%s22604_s3 + $0x4e0] ss:$16 sps:$4 sm:$0xff]   ;;  %10936 = vmatprep.subr.bf16.mxu0 %v16791_v39 }
 0x5ac   : > { %11420 = vmatprep.mubr.bf16.mxu1 %v22794_v50  ;;  %11530 = vmatpush1.bf16.msra.mxu1 %v16777_v61  ;;  %v21386_v24 = vpack.c.bf16 %v8735_v10, %v8727_v6  ;;  %v7560_v46 = vpop.f32.mrb[100].mxu0  ;;  %v16792_v10 = vld [vmem:[%s22604_s3 + $0x500] ss:$16 sps:$4 sm:$0xff]  }
 0x5ad   : > { %22830 = vst [vmem:[#allocation21_spill] sm:$0xff] %v21380_v52  ;;  %11531 = vmatprep.subr.bf16.mxu1 %v16788_v29  ;;  %v14762_v50 = vadd.f32 %v7560_v46, %v21137_v42  ;;  %v7562_v61 = vpop.f32.mrb[101].mxu0  ;;  %v22832_v52 = vld [vmem:[#allocation34_spill] sm:$0xff] }
 0x5ae   : > { %22831 = vst [vmem:[#allocation24_spill] sm:$0xff] %v21386_v24  ;;  %v14763_v51 = vadd.f32 %v7562_v61, %v21142_v54  ;;  %v7564_v29 = vpop.f32.mrb[102].mxu0  ;;  %10937 = vmatpush1.bf16.msra.mxu0 %v16789_v60  ;;  %v16800_v61 = vld [vmem:[%s22604_s3 + $0x524] ss:$16 sps:$4 sm:$0xff]  }
 0x5af   : > { %v14764_v53 = vadd.f32 %v7564_v29, %v21137_v42  ;;  %v7566_v7 = vpop.f32.mrb[103].mxu0  ;;  %v8742_v39 = vmax.f32 %v14762_v50, 0.0  ;;  %10938 = vmatprep.subr.bf16.mxu0 %v16794_v25  ;;  %v16798_v25 = vld [vmem:[%s22604_s3 + $0x520] ss:$16 sps:$4 sm:$0xff]  }
 0x5b0   : > { %11532 = vmatpush1.bf16.msra.mxu1 %v16786_v44  ;;  %v14765_v6 = vadd.f32 %v7566_v7, %v21142_v54  ;;  %v8743_v29 = vmax.f32 %v14763_v51, 0.0  ;;  %v22833_v44 = vld [vmem:[#allocation37_spill] sm:$0xff] }
 0x5b1   : > { %11694 = vmatprep.subr.bf16.mxu1 %v16797_v26  ;;  %v8750_v46 = vmax.f32 %v14764_v53, 0.0  ;;  %10802 = vmatmul.mubr.bf16.gmra.mrb[144].mxu0 %v22832_v52 }
 0x5b2   : > { %v8751_v24 = vmax.f32 %v14765_v6, 0.0  ;;  %10811 = vmatprep.mubr.bf16.mxu0 %v22833_v44  ;;  %10939 = vmatpush1.bf16.msra.mxu0 %v16792_v10 }
 0x5b3   : > { %11421 = vmatmul.mubr.bf16.gmra.mrb[192].mxu1 %v22795_v15  ;;  %v21410_v60 = vpack.c.bf16 %v8750_v46, %v8742_v39  ;;  %10940 = vmatprep.subr.bf16.mxu0 %v16800_v61  ;;  %v16803_v15 = vld [vmem:[%s22604_s3 + $0x544] ss:$16 sps:$4 sm:$0xff]   ;;  %v16801_v39 = vld [vmem:[%s22604_s3 + $0x540] ss:$16 sps:$4 sm:$0xff]  }
 0x5b4   : > { %11430 = vmatprep.mubr.bf16.mxu1 %v22796_v23  ;;  %v21413_v26 = vpack.c.bf16 %v8751_v24, %v8743_v29  ;;  %v7570_v50 = vpop.f32.mrb[104].mxu0  ;;  %v22836_v61 = vld [vmem:[#allocation36_spill] sm:$0xff] }
 0x5b5   : > { %22834 = vst [vmem:[#allocation23_spill] sm:$0xff] %v21410_v60  ;;  %v14766_v53 = vadd.f32 %v7570_v50, %v21137_v42  ;;  %v7572_v51 = vpop.f32.mrb[105].mxu0  ;;  %v16809_v50 = vld [vmem:[%s22604_s3 + $0x564] ss:$16 sps:$4 sm:$0xff]  }
 0x5b6   : > { %22835 = vst [vmem:[#allocation26_spill] sm:$0xff] %v21413_v26  ;;  %v14767_v7 = vadd.f32 %v7572_v51, %v21142_v54  ;;  %v7574_v6 = vpop.f32.mrb[106].mxu0  ;;  %10941 = vmatpush1.bf16.msra.mxu0 %v16798_v25 }
 0x5b7   : > { %v14768_v23 = vadd.f32 %v7574_v6, %v21137_v42  ;;  %v7576_v24 = vpop.f32.mrb[107].mxu0  ;;  %v8758_v46 = vmax.f32 %v14766_v53, 0.0  ;;  %10942 = vmatprep.subr.bf16.mxu0 %v16803_v15  ;;  %v22837_v6 = vld [vmem:[#allocation39_spill] sm:$0xff]  ;;  %v16807_v15 = vld [vmem:[%s22604_s3 + $0x560] ss:$16 sps:$4 sm:$0xff]  }
 0x5b8   : > { %v14769_v10 = vadd.f32 %v7576_v24, %v21142_v54  ;;  %v8759_v51 = vmax.f32 %v14767_v7, 0.0 }
 0x5b9   : > { %v8766_v29 = vmax.f32 %v14768_v23, 0.0  ;;  %10812 = vmatmul.mubr.bf16.gmra.mrb[148].mxu0 %v22836_v61 }
 0x5ba   : > { %v8767_v60 = vmax.f32 %v14769_v10, 0.0  ;;  %10821 = vmatprep.mubr.bf16.mxu0 %v22837_v6  ;;  %10943 = vmatpush1.bf16.msra.mxu0 %v16801_v39 }
 0x5bb   : > { %11431 = vmatmul.mubr.bf16.gmra.mrb[196].mxu1 %v22797_v49  ;;  %v21434_v25 = vpack.c.bf16 %v8766_v29, %v8758_v46  ;;  %10944 = vmatprep.subr.bf16.mxu0 %v16809_v50  ;;  %v16812_v49 = vld [vmem:[%s22604_s3 + $0x584] ss:$16 sps:$4 sm:$0xff]   ;;  %v1108_v29 = vsub.s32 7, %v22799_v30  ;;  %v16810_v50 = vld [vmem:[%s22604_s3 + $0x580] ss:$16 sps:$4 sm:$0xff]  }
 0x5bc   : > { %11440 = vmatprep.mubr.bf16.mxu1 %v22798_v55  ;;  %v21437_v24 = vpack.c.bf16 %v8767_v60, %v8759_v51  ;;  %v7580_v53 = vpop.f32.mrb[108].mxu0  ;;  %v1104_v55 = vsub.s32 6, %v22799_v30  ;;  %v22841_v30 = vld [vmem:[#allocation41_spill] sm:$0xff] }
 0x5bd   : > { %22838 = vst [vmem:[#allocation25_spill] sm:$0xff] %v21434_v25  ;;  %v14770_v23 = vadd.f32 %v7580_v53, %v21137_v42  ;;  %v7582_v7 = vpop.f32.mrb[109].mxu0 }
 0x5be   : > { %22839 = vst [vmem:[#allocation3_spill] sm:$0xff] %v21437_v24  ;;  %v14771_v10 = vadd.f32 %v7582_v7, %v21142_v54  ;;  %v7584_v46 = vpop.f32.mrb[110].mxu0  ;;  %10945 = vmatpush1.bf16.msra.mxu0 %v16807_v15  ;;  %v22840_v24 = vld [vmem:[#allocation38_spill] sm:$0xff]  ;;  %v21461_v15 = vrot.slane %v21134_v33, %v1104_v55 }
 0x5bf   : > { %v14772_v60 = vadd.f32 %v7584_v46, %v21137_v42  ;;  %v7586_v39 = vpop.f32.mrb[111].mxu0  ;;  %v8774_v53 = vmax.f32 %v14770_v23, 0.0  ;;  %10946 = vmatprep.subr.bf16.mxu0 %v16812_v49  ;;  %v16818_v7 = vld [vmem:[%s22604_s3 + $0x5a4] ss:$16 sps:$4 sm:$0xff]   ;;  %v21467_v23 = vrot.slane %v21134_v33, %v1108_v29 }
 0x5c0   : > { %v14773_v51 = vadd.f32 %v7586_v39, %v21142_v54  ;;  %v8775_v46 = vmax.f32 %v14771_v10, 0.0 }
 0x5c1   : > { %v8782_v25 = vmax.f32 %v14772_v60, 0.0  ;;  %10822 = vmatmul.mubr.bf16.gmra.mrb[152].mxu0 %v22840_v24 }
 0x5c2   : > { %v8783_v26 = vmax.f32 %v14773_v51, 0.0  ;;  %10831 = vmatprep.mubr.bf16.mxu0 %v22841_v30  ;;  %10947 = vmatpush1.bf16.msra.mxu0 %v16810_v50 }
 0x5c3   : > { %11441 = vmatmul.mubr.bf16.gmra.mrb[200].mxu1 %v22800_v59  ;;  %v21463_v39 = vpack.c.bf16 %v8782_v25, %v8774_v53  ;;  %v16816_v59 = vld [vmem:[%s22604_s3 + $0x5a0] ss:$16 sps:$4 sm:$0xff]   ;;  %10948 = vmatprep.subr.bf16.mxu0 %v16818_v7 }
 0x5c4   : > { %11450 = vmatprep.mubr.bf16.mxu1 %v22801_v37  ;;  %v21469_v49 = vpack.c.bf16 %v8783_v26, %v8775_v46  ;;  %v7590_v60 = vpop.f32.mrb[112].mxu0  ;;  %v16821_v37 = vld [vmem:[%s22604_s3 + $0x5c4] ss:$16 sps:$4 sm:$0xff]  }
 0x5c5   : > { %22842 = vst [vmem:[#allocation2_spill] sm:$0xff] %v21463_v39  ;;  %v14774_v10 = vadd.f32 %v7590_v60, %v21137_v42  ;;  %v7592_v55 = vpop.f32.mrb[113].mxu0 }
 0x5c6   : > { %22843 = vst [vmem:[#allocation5_spill] sm:$0xff] %v21469_v49  ;;  %v8435_v51 = vpop.f32.mrb[96].mxu1  ;;  %v14775_v26 = vadd.f32 %v7592_v55, %v21142_v54  ;;  %v7594_v29 = vpop.f32.mrb[114].mxu0  ;;  %10949 = vmatpush1.bf16.msra.mxu0 %v16816_v59  ;;  %v22845_v59 = vld [vmem:[#allocation43_spill] sm:$0xff] }
 0x5c7   : > { %v14790_v33 = vadd.f32 %v8435_v51, %v21461_v15  ;;  %v8437_v25 = vpop.f32.mrb[97].mxu1  ;;  %v14776_v53 = vadd.f32 %v7594_v29, %v21137_v42  ;;  %v7596_v39 = vpop.f32.mrb[115].mxu0  ;;  %v16819_v51 = vld [vmem:[%s22604_s3 + $0x5c0] ss:$16 sps:$4 sm:$0xff]   ;;  %v8790_v57 = vmax.f32 %v14774_v10, 0.0  ;;  %10950 = vmatprep.subr.bf16.mxu0 %v16821_v37 }
 0x5c8   : > { %v14791_v50 = vadd.f32 %v8437_v25, %v21467_v23  ;;  %v8439_v46 = vpop.f32.mrb[98].mxu1  ;;  %v14777_v7 = vadd.f32 %v7596_v39, %v21142_v54  ;;  %v16827_v25 = vld [vmem:[%s22604_s3 + $0x5e4] ss:$16 sps:$4 sm:$0xff]  }
 0x5c9   : > { %v14792_v60 = vadd.f32 %v8439_v46, %v21461_v15  ;;  %v8441_v49 = vpop.f32.mrb[99].mxu1  ;;  %v8798_v55 = vmax.f32 %v14776_v53, 0.0  ;;  %10832 = vmatmul.mubr.bf16.gmra.mrb[156].mxu0 %v22844_v2  ;;  %v8600_v29 = vmax.f32 %v14790_v33, 0.0  ;;  %v8791_v46 = vmax.f32 %v14775_v26, 0.0  ;;  %v16825_v33 = vld [vmem:[%s22604_s3 + $0x5e0] ss:$16 sps:$4 sm:$0xff]  }
 0x5ca   : > { %v14793_v47 = vadd.f32 %v8441_v49, %v21467_v23  ;;  %v8799_v30 = vmax.f32 %v14777_v7, 0.0  ;;  %10841 = vmatprep.mubr.bf16.mxu0 %v22845_v59  ;;  %v8601_v58 = vmax.f32 %v14791_v50, 0.0  ;;  %10951 = vmatpush1.bf16.msra.mxu0 %v16819_v51 }
 0x5cb   : > { %v8608_v39 = vmax.f32 %v14792_v60, 0.0  ;;  %11451 = vmatmul.mubr.bf16.gmra.mrb[204].mxu1 %v22802_v48  ;;  %v21494_v10 = vpack.c.bf16 %v8798_v55, %v8790_v57  ;;  %10952 = vmatprep.subr.bf16.mxu0 %v16827_v25  ;;  %v16854_v25 = vld [vmem:[%s22604_s3 + $0x604] ss:$16 sps:$4 sm:$0xff]  }
 0x5cc   : > { %v8609_v53 = vmax.f32 %v14793_v47, 0.0  ;;  %11460 = vmatprep.mubr.bf16.mxu1 %v22803_v27  ;;  %v21499_v37 = vpack.c.bf16 %v8799_v30, %v8791_v46  ;;  %v7600_v2 = vpop.f32.mrb[116].mxu0 }
 0x5cd   : > { %v21497_v49 = vpack.c.bf16 %v8608_v39, %v8600_v29  ;;  %v14778_v48 = vadd.f32 %v7600_v2, %v21137_v42  ;;  %v7602_v57 = vpop.f32.mrb[117].mxu0 }
 0x5ce   : > { %v21504_v26 = vpack.c.bf16 %v8609_v53, %v8601_v58  ;;  %v8445_v50 = vpop.f32.mrb[100].mxu1  ;;  %v14779_v27 = vadd.f32 %v7602_v57, %v21142_v54  ;;  %v7604_v30 = vpop.f32.mrb[118].mxu0  ;;  %10953 = vmatpush1.bf16.msra.mxu0 %v16825_v33  ;;  %v22848_v57 = vld [vmem:[#allocation42_spill] sm:$0xff] }
 0x5cf   : > { %22846 = vst [vmem:[#allocation4_spill] sm:$0xff] %v21497_v49  ;;  %v14794_v47 = vadd.f32 %v8445_v50, %v21461_v15  ;;  %v8447_v60 = vpop.f32.mrb[101].mxu1  ;;  %v14780_v51 = vadd.f32 %v7604_v30, %v21137_v42  ;;  %v7606_v29 = vpop.f32.mrb[119].mxu0  ;;  %v8806_v39 = vmax.f32 %v14778_v48, 0.0  ;;  %11115 = vmatprep.subr.bf16.mxu0 %v16854_v25 }
 0x5d0   : > { %22847 = vst [vmem:[#allocation7_spill] sm:$0xff] %v21504_v26  ;;  %v14795_v7 = vadd.f32 %v8447_v60, %v21467_v23  ;;  %v8449_v55 = vpop.f32.mrb[102].mxu1  ;;  %v14781_v46 = vadd.f32 %v7606_v29, %v21142_v54  ;;  %v8807_v30 = vmax.f32 %v14779_v27, 0.0 }
 0x5d1   : > { %v14796_v58 = vadd.f32 %v8449_v55, %v21461_v15  ;;  %v8451_v2 = vpop.f32.mrb[103].mxu1  ;;  %v8814_v53 = vmax.f32 %v14780_v51, 0.0  ;;  %10842 = vmatmul.mubr.bf16.gmra.mrb[160].mxu0 %v22848_v57  ;;  %v8616_v60 = vmax.f32 %v14794_v47, 0.0 }
 0x5d2   : > { %v14797_v50 = vadd.f32 %v8451_v2, %v21467_v23  ;;  %v8815_v26 = vmax.f32 %v14781_v46, 0.0  ;;  %10851 = vmatprep.mubr.bf16.mxu0 %v20007_v62  ;;  %v8617_v55 = vmax.f32 %v14795_v7, 0.0 }
 0x5d3   : > { %v8624_v49 = vmax.f32 %v14796_v58, 0.0  ;;  %11461 = vmatmul.mubr.bf16.gmra.mrb[208].mxu1 %v22804_v16  ;;  %v21520_v33 = vpack.c.bf16 %v8814_v53, %v8806_v39 }
 0x5d4   : > { %v8625_v29 = vmax.f32 %v14797_v50, 0.0  ;;  %11470 = vmatprep.mubr.bf16.mxu1 %v22805_v0  ;;  %v21525_v51 = vpack.c.bf16 %v8815_v26, %v8807_v30  ;;  %v7610_v2 = vpop.f32.mrb[120].mxu0 }
 0x5d5   : > { %22849 = vst [vmem:[#allocation6_spill] sm:$0xff] %v21520_v33  ;;  %v21523_v48 = vpack.c.bf16 %v8624_v49, %v8616_v60  ;;  %v14782_v27 = vadd.f32 %v7610_v2, %v21137_v42  ;;  %v7612_v16 = vpop.f32.mrb[121].mxu0 }
 0x5d6   : > { %22851 = vst [vmem:[#allocation8_spill] sm:$0xff] %v21525_v51  ;;  %v21527_v47 = vpack.c.bf16 %v8625_v29, %v8617_v55  ;;  %v8455_v58 = vpop.f32.mrb[104].mxu1  ;;  %v14783_v7 = vadd.f32 %v7612_v16, %v21142_v54  ;;  %v7614_v53 = vpop.f32.mrb[122].mxu0 }
 0x5d7   : > { %22850 = vst [vmem:[#allocation9_spill] sm:$0xff] %v21523_v48  ;;  %v14798_v46 = vadd.f32 %v8455_v58, %v21461_v15  ;;  %v8457_v39 = vpop.f32.mrb[105].mxu1  ;;  %v14784_v49 = vadd.f32 %v7614_v53, %v21137_v42  ;;  %v7616_v26 = vpop.f32.mrb[123].mxu0  ;;  %v8822_v55 = vmax.f32 %v14782_v27, 0.0  ;;  %v22853_v58 = vld [vmem:[#allocation44_spill] sm:$0xff] }
 0x5d8   : > { %22852 = vst [vmem:[#allocation12_spill] sm:$0xff] %v21527_v47  ;;  %v14799_v0 = vadd.f32 %v8457_v39, %v21467_v23  ;;  %v8459_v25 = vpop.f32.mrb[106].mxu1  ;;  %v14785_v60 = vadd.f32 %v7616_v26, %v21142_v54  ;;  %v8823_v48 = vmax.f32 %v14783_v7, 0.0  ;;  %v22854_v39 = vld [vmem:[#allocation46_spill] sm:$0xff] }
 0x5d9   : > { %v14800_v50 = vadd.f32 %v8459_v25, %v21461_v15  ;;  %v8461_v30 = vpop.f32.mrb[107].mxu1  ;;  %v8830_v29 = vmax.f32 %v14784_v49, 0.0  ;;  %10852 = vmatmul.mubr.bf16.gmra.mrb[164].mxu0 %v22853_v58  ;;  %v8632_v16 = vmax.f32 %v14798_v46, 0.0 }
 0x5da   : > { %v14801_v2 = vadd.f32 %v8461_v30, %v21467_v23  ;;  %v8831_v33 = vmax.f32 %v14785_v60, 0.0  ;;  %10861 = vmatprep.mubr.bf16.mxu0 %v22854_v39  ;;  %v8633_v53 = vmax.f32 %v14799_v0, 0.0 }
 0x5db   : > { %v8640_v47 = vmax.f32 %v14800_v50, 0.0  ;;  %11471 = vmatmul.mubr.bf16.gmra.mrb[212].mxu1 %v22806_v31  ;;  %v21540_v51 = vpack.c.bf16 %v8830_v29, %v8822_v55 }
 0x5dc   : > { %v8641_v25 = vmax.f32 %v14801_v2, 0.0  ;;  %11480 = vmatprep.mubr.bf16.mxu1 %v22807_v21  ;;  %v21545_v49 = vpack.c.bf16 %v8831_v33, %v8823_v48  ;;  %v7620_v26 = vpop.f32.mrb[124].mxu0 }
 0x5dd   : > { %22855 = vst [vmem:[#allocation11_spill] sm:$0xff] %v21540_v51  ;;  %v21543_v27 = vpack.c.bf16 %v8640_v47, %v8632_v16  ;;  %v14786_v46 = vadd.f32 %v7620_v26, %v21137_v42  ;;  %v7622_v50 = vpop.f32.mrb[125].mxu0 }
 0x5de   : > { %v21547_v30 = vpack.c.bf16 %v8641_v25, %v8633_v53  ;;  %v8465_v7 = vpop.f32.mrb[108].mxu1  ;;  %v14787_v0 = vadd.f32 %v7622_v50, %v21142_v54  ;;  %v7624_v55 = vpop.f32.mrb[126].mxu0 }
 0x5df   : > { %22856 = vst [vmem:[#allocation16_spill] sm:$0xff] %v21543_v27  ;;  %v14802_v31 = vadd.f32 %v8465_v7, %v21461_v15  ;;  %v8467_v60 = vpop.f32.mrb[109].mxu1  ;;  %v14788_v21 = vadd.f32 %v7624_v55, %v21137_v42  ;;  %v7626_v33 = vpop.f32.mrb[127].mxu0  ;;  %v8838_v53 = vmax.f32 %v14786_v46, 0.0  ;;  %v22858_v7 = vld [vmem:[#allocation45_spill] sm:$0xff] }
 0x5e0   : > { %22857 = vst [vmem:[#allocation14_spill] sm:$0xff] %v21547_v30  ;;  %v14803_v29 = vadd.f32 %v8467_v60, %v21467_v23  ;;  %v8469_v47 = vpop.f32.mrb[110].mxu1  ;;  %v14789_v2 = vadd.f32 %v7626_v33, %v21142_v54  ;;  %v8839_v27 = vmax.f32 %v14787_v0, 0.0 }
 0x5e1   : > { %v14804_v48 = vadd.f32 %v8469_v47, %v21461_v15  ;;  %v8471_v16 = vpop.f32.mrb[111].mxu1  ;;  %v8846_v25 = vmax.f32 %v14788_v21, 0.0  ;;  %10862 = vmatmul.mubr.bf16.gmra.mrb[168].mxu0 %v22858_v7  ;;  %v8648_v50 = vmax.f32 %v14802_v31, 0.0 }
 0x5e2   : > { %v14805_v26 = vadd.f32 %v8471_v16, %v21467_v23  ;;  %v8847_v51 = vmax.f32 %v14789_v2, 0.0  ;;  %10871 = vmatprep.mubr.bf16.mxu0 %v20091_v56  ;;  %v8649_v42 = vmax.f32 %v14803_v29, 0.0  ;;  %v22859_v16 = vld [vmem:[#allocation47_spill] sm:$0xff] }
 0x5e3   : > { %v8656_v30 = vmax.f32 %v14804_v48, 0.0  ;;  %11481 = vmatmul.mubr.bf16.gmra.mrb[216].mxu1 %v22808_v9  ;;  %v21560_v60 = vpack.c.bf16 %v8846_v25, %v8838_v53 }
 0x5e4   : > { %v8657_v55 = vmax.f32 %v14805_v26, 0.0  ;;  %11490 = vmatprep.mubr.bf16.mxu1 %v22809_v3  ;;  %v21565_v46 = vpack.c.bf16 %v8847_v51, %v8839_v27 }
 0x5e5   : > { %v21563_v54 = vpack.c.bf16 %v8656_v30, %v8648_v50 }
 0x5e6   : > { %v21567_v21 = vpack.c.bf16 %v8657_v55, %v8649_v42  ;;  %v8475_v31 = vpop.f32.mrb[112].mxu1 }
 0x5e7   : > { %v14806_v0 = vadd.f32 %v8475_v31, %v21461_v15  ;;  %v8477_v47 = vpop.f32.mrb[113].mxu1 }
 0x5e8   : > { %v14807_v9 = vadd.f32 %v8477_v47, %v21467_v23  ;;  %v8479_v33 = vpop.f32.mrb[114].mxu1 }
 0x5e9   : > { %v14808_v29 = vadd.f32 %v8479_v33, %v21461_v15  ;;  %v8481_v48 = vpop.f32.mrb[115].mxu1  ;;  %10872 = vmatmul.mubr.bf16.gmra.mrb[172].mxu0 %v22859_v16  ;;  %v8664_v3 = vmax.f32 %v14806_v0, 0.0 }
 0x5ea   : > { %v14809_v2 = vadd.f32 %v8481_v48, %v21467_v23  ;;  %10881 = vmatprep.mubr.bf16.mxu0 %v20129_v18  ;;  %v8665_v51 = vmax.f32 %v14807_v9, 0.0 }
 0x5eb   : > { %v8672_v30 = vmax.f32 %v14808_v29, 0.0  ;;  %11491 = vmatmul.mubr.bf16.gmra.mrb[220].mxu1 %v22812_v43  ;;  %v16795_v43 = vld [vmem:[%s22604_s3 + $0x408] ss:$16 sps:$4 sm:$0xff]  }
 0x5ec   : > { %v8673_v27 = vmax.f32 %v14809_v2, 0.0  ;;  %11533 = vmatprep.mubr.bf16.mxu1 %v22813_v45  ;;  %v16806_v45 = vld [vmem:[%s22604_s3 + $0x42c] ss:$16 sps:$4 sm:$0xff]  }
 0x5ed   : > { %v21577_v53 = vpack.c.bf16 %v8672_v30, %v8664_v3  ;;  %v16804_v3 = vld [vmem:[%s22604_s3 + $0x428] ss:$16 sps:$4 sm:$0xff]  }
 0x5ee   : > { %v21579_v25 = vpack.c.bf16 %v8673_v27, %v8665_v51  ;;  %v8485_v26 = vpop.f32.mrb[116].mxu1  ;;  %v16815_v51 = vld [vmem:[%s22604_s3 + $0x44c] ss:$16 sps:$4 sm:$0xff]  }
 0x5ef   : > { %v14810_v50 = vadd.f32 %v8485_v26, %v21461_v15  ;;  %v8487_v42 = vpop.f32.mrb[117].mxu1 }
 0x5f0   : > { %v14811_v55 = vadd.f32 %v8487_v42, %v21467_v23  ;;  %v8489_v31 = vpop.f32.mrb[118].mxu1 }
 0x5f1   : > { %v14812_v0 = vadd.f32 %v8489_v31, %v21461_v15  ;;  %v8491_v47 = vpop.f32.mrb[119].mxu1  ;;  %10882 = vmatmul.mubr.bf16.gmra.mrb[176].mxu0 %v20125_v11  ;;  %v8680_v33 = vmax.f32 %v14810_v50, 0.0 }
 0x5f2   : > { %v14813_v9 = vadd.f32 %v8491_v47, %v21467_v23  ;;  %10891 = vmatprep.mubr.bf16.mxu0 %v20159_v5  ;;  %v8681_v48 = vmax.f32 %v14811_v55, 0.0  ;;  %v16813_v55 = vld [vmem:[%s22604_s3 + $0x448] ss:$16 sps:$4 sm:$0xff]  }
 0x5f3   : > { %v8688_v29 = vmax.f32 %v14812_v0, 0.0  ;;  %11534 = vmatmul.mubr.bf16.vlgmr.msra.gmra.mrb[160].mxu1 %v22816_v12  ;;  %v16824_v0 = vld [vmem:[%s22604_s3 + $0x46c] ss:$16 sps:$4 sm:$0xff]  }
 0x5f4   : > { %v8689_v2 = vmax.f32 %v14813_v9, 0.0  ;;  %11543 = vmatprep.mubr.bf16.mxu1 %v22817_v38  ;;  %11695 = vmatpush1.bf16.msra.mxu1 %v16795_v43 }
 0x5f5   : > { %v21598_v30 = vpack.c.bf16 %v8688_v29, %v8680_v33  ;;  %11696 = vmatprep.subr.bf16.mxu1 %v16806_v45 }
 0x5f6   : > { %v21603_v27 = vpack.c.bf16 %v8689_v2, %v8681_v48  ;;  %v8495_v12 = vpop.f32.mrb[120].mxu1  ;;  %v16822_v48 = vld [vmem:[%s22604_s3 + $0x468] ss:$16 sps:$4 sm:$0xff]  }
 0x5f7   : > { %v14814_v26 = vadd.f32 %v8495_v12, %v21461_v15  ;;  %v8497_v50 = vpop.f32.mrb[121].mxu1 }
 0x5f8   : > { %v14815_v38 = vadd.f32 %v8497_v50, %v21467_v23  ;;  %v8499_v42 = vpop.f32.mrb[122].mxu1  ;;  %11697 = vmatpush1.bf16.msra.mxu1 %v16804_v3  ;;  %v16830_v3 = vld [vmem:[%s22604_s3 + $0x48c] ss:$16 sps:$4 sm:$0xff]  }
 0x5f9   : > { %v14816_v31 = vadd.f32 %v8499_v42, %v21461_v15  ;;  %v8501_v43 = vpop.f32.mrb[123].mxu1  ;;  %11698 = vmatprep.subr.bf16.mxu1 %v16815_v51  ;;  %10892 = vmatmul.mubr.bf16.gmra.mrb[180].mxu0 %v20157_v63  ;;  %v8696_v45 = vmax.f32 %v14814_v26, 0.0 }
 0x5fa   : > { %v14817_v47 = vadd.f32 %v8501_v43, %v21467_v23  ;;  %10901 = vmatprep.mubr.bf16.mxu0 %v20189_v20  ;;  %v8697_v33 = vmax.f32 %v14815_v38, 0.0  ;;  %v16828_v38 = vld [vmem:[%s22604_s3 + $0x488] ss:$16 sps:$4 sm:$0xff]  }
 0x5fb   : > { %v8704_v9 = vmax.f32 %v14816_v31, 0.0  ;;  %11544 = vmatmul.mubr.bf16.gmra.mrb[164].mxu1 %v22820_v22  ;;  %v16833_v31 = vld [vmem:[%s22604_s3 + $0x4ac] ss:$16 sps:$4 sm:$0xff]  }
 0x5fc   : > { %v8705_v29 = vmax.f32 %v14817_v47, 0.0  ;;  %11553 = vmatprep.mubr.bf16.mxu1 %v22821_v35  ;;  %11699 = vmatpush1.bf16.msra.mxu1 %v16813_v55 }
 0x5fd   : > { %v21622_v2 = vpack.c.bf16 %v8704_v9, %v8696_v45  ;;  %11700 = vmatprep.subr.bf16.mxu1 %v16824_v0 }
 0x5fe   : > { %v21627_v51 = vpack.c.bf16 %v8705_v29, %v8697_v33  ;;  %v8505_v22 = vpop.f32.mrb[124].mxu1  ;;  %v16831_v33 = vld [vmem:[%s22604_s3 + $0x4a8] ss:$16 sps:$4 sm:$0xff]  }
 0x5ff   : > { %v14818_v12 = vadd.f32 %v8505_v22, %v21461_v15  ;;  %v8507_v26 = vpop.f32.mrb[125].mxu1 }
 0x600   : > { %v14819_v35 = vadd.f32 %v8507_v26, %v21467_v23  ;;  %v8509_v50 = vpop.f32.mrb[126].mxu1  ;;  %11701 = vmatpush1.bf16.msra.mxu1 %v16822_v48  ;;  %v16836_v48 = vld [vmem:[%s22604_s3 + $0x4cc] ss:$16 sps:$4 sm:$0xff]  }
 0x601   : > { %v14820_v42 = vadd.f32 %v8509_v50, %v21461_v15  ;;  %v8511_v55 = vpop.f32.mrb[127].mxu1  ;;  %11702 = vmatprep.subr.bf16.mxu1 %v16830_v3  ;;  %10902 = vmatmul.mubr.bf16.gmra.mrb[184].mxu0 %v20187_v34  ;;  %v8712_v0 = vmax.f32 %v14818_v12, 0.0 }
 0x602   : > { %v14821_v43 = vadd.f32 %v8511_v55, %v21467_v23  ;;  %10911 = vmatprep.mubr.bf16.mxu0 %v20219_v17  ;;  %v8713_v45 = vmax.f32 %v14819_v35, 0.0  ;;  %v16834_v35 = vld [vmem:[%s22604_s3 + $0x4c8] ss:$16 sps:$4 sm:$0xff]  }
 0x603   : > { %v8720_v47 = vmax.f32 %v14820_v42, 0.0  ;;  %11554 = vmatmul.mubr.bf16.gmra.mrb[168].mxu1 %v22824_v41  ;;  %v16839_v42 = vld [vmem:[%s22604_s3 + $0x4ec] ss:$16 sps:$4 sm:$0xff]  }
 0x604   : > { %v8721_v9 = vmax.f32 %v14821_v43, 0.0  ;;  %11563 = vmatprep.mubr.bf16.mxu1 %v22825_v8  ;;  %11703 = vmatpush1.bf16.msra.mxu1 %v16828_v38 }
 0x605   : > { %v21646_v29 = vpack.c.bf16 %v8720_v47, %v8712_v0  ;;  %11704 = vmatprep.subr.bf16.mxu1 %v16833_v31 }
 0x606   : > { %v21651_v3 = vpack.c.bf16 %v8721_v9, %v8713_v45  ;;  %v8515_v41 = vpop.f32.mrb[128].mxu1  ;;  %v16837_v45 = vld [vmem:[%s22604_s3 + $0x4e8] ss:$16 sps:$4 sm:$0xff]  }
 0x607   : > { %v14822_v22 = vadd.f32 %v8515_v41, %v21461_v15  ;;  %v8517_v12 = vpop.f32.mrb[129].mxu1 }
 0x608   : > { %v14823_v8 = vadd.f32 %v8517_v12, %v21467_v23  ;;  %v8519_v26 = vpop.f32.mrb[130].mxu1  ;;  %11705 = vmatpush1.bf16.msra.mxu1 %v16831_v33  ;;  %v16842_v33 = vld [vmem:[%s22604_s3 + $0x50c] ss:$16 sps:$4 sm:$0xff]  }
 0x609   : > { %v14824_v50 = vadd.f32 %v8519_v26, %v21461_v15  ;;  %v8521_v38 = vpop.f32.mrb[131].mxu1  ;;  %11706 = vmatprep.subr.bf16.mxu1 %v16836_v48  ;;  %10912 = vmatmul.mubr.bf16.gmra.mrb[188].mxu0 %v20217_v32  ;;  %v8728_v31 = vmax.f32 %v14822_v22, 0.0 }
 0x60a   : > { %v14825_v55 = vadd.f32 %v8521_v38, %v21467_v23  ;;  %10954 = vmatprep.mubr.bf16.mxu0 %v21155_v40  ;;  %v8729_v0 = vmax.f32 %v14823_v8, 0.0  ;;  %v16840_v8 = vld [vmem:[%s22604_s3 + $0x508] ss:$16 sps:$4 sm:$0xff]   ;;  %v16852_v38 = vld [vmem:[%s22604_s3 + $0x600] ss:$16 sps:$4 sm:$0xff]  }
 0x60b   : > { %v8736_v43 = vmax.f32 %v14824_v50, 0.0  ;;  %11564 = vmatmul.mubr.bf16.gmra.mrb[172].mxu1 %v22828_v1  ;;  %v16845_v50 = vld [vmem:[%s22604_s3 + $0x52c] ss:$16 sps:$4 sm:$0xff]  }
 0x60c   : > { %v8737_v47 = vmax.f32 %v14825_v55, 0.0  ;;  %11573 = vmatprep.mubr.bf16.mxu1 %v22829_v19  ;;  %11707 = vmatpush1.bf16.msra.mxu1 %v16834_v35  ;;  %v16860_v55 = vld [vmem:[%s22604_s3 + $0x624] ss:$16 sps:$4 sm:$0xff]  }
 0x60d   : > { %v21670_v9 = vpack.c.bf16 %v8736_v43, %v8728_v31  ;;  %11708 = vmatprep.subr.bf16.mxu1 %v16839_v42 }
 0x60e   : > { %v21675_v48 = vpack.c.bf16 %v8737_v47, %v8729_v0  ;;  %v8525_v1 = vpop.f32.mrb[132].mxu1 }
 0x60f   : > { %v14826_v41 = vadd.f32 %v8525_v1, %v21461_v15  ;;  %v8527_v22 = vpop.f32.mrb[133].mxu1  ;;  %v16848_v1 = vld [vmem:[%s22604_s3 + $0x54c] ss:$16 sps:$4 sm:$0xff]  }
 0x610   : > { %v14827_v19 = vadd.f32 %v8527_v22, %v21467_v23  ;;  %v8529_v12 = vpop.f32.mrb[134].mxu1  ;;  %11709 = vmatpush1.bf16.msra.mxu1 %v16837_v45  ;;  %v16843_v45 = vld [vmem:[%s22604_s3 + $0x528] ss:$16 sps:$4 sm:$0xff]   ;;  %v16863_v22 = vld [vmem:[%s22604_s3 + $0x644] ss:$16 sps:$4 sm:$0xff]  }
 0x611   : > { %v14828_v26 = vadd.f32 %v8529_v12, %v21461_v15  ;;  %v8531_v35 = vpop.f32.mrb[135].mxu1  ;;  %11710 = vmatprep.subr.bf16.mxu1 %v16842_v33  ;;  %10955 = vmatmul.mubr.bf16.vlgmr.msra.gmra.mrb[128].mxu0 %v21152_v14  ;;  %v8744_v31 = vmax.f32 %v14826_v41, 0.0 }
 0x612   : > { %v14829_v42 = vadd.f32 %v8531_v35, %v21467_v23  ;;  %10964 = vmatprep.mubr.bf16.mxu0 %v21176_v4  ;;  %v8745_v0 = vmax.f32 %v14827_v19, 0.0  ;;  %11116 = vmatpush1.bf16.msra.mxu0 %v16852_v38  ;;  %v16846_v35 = vld [vmem:[%s22604_s3 + $0x548] ss:$16 sps:$4 sm:$0xff]  }
 0x613   : > { %v8752_v43 = vmax.f32 %v14828_v26, 0.0  ;;  %11574 = vmatmul.mubr.bf16.gmra.mrb[176].mxu1 %v22832_v52  ;;  %v16858_v52 = vld [vmem:[%s22604_s3 + $0x620] ss:$16 sps:$4 sm:$0xff]   ;;  %11117 = vmatprep.subr.bf16.mxu0 %v16860_v55 }
 0x614   : > { %v8753_v47 = vmax.f32 %v14829_v42, 0.0  ;;  %11583 = vmatprep.mubr.bf16.mxu1 %v22833_v44  ;;  %11711 = vmatpush1.bf16.msra.mxu1 %v16840_v8  ;;  %v16851_v42 = vld [vmem:[%s22604_s3 + $0x56c] ss:$16 sps:$4 sm:$0xff]   ;;  %v16861_v55 = vld [vmem:[%s22604_s3 + $0x640] ss:$16 sps:$4 sm:$0xff]  }
 0x615   : > { %v21700_v33 = vpack.c.bf16 %v8752_v43, %v8744_v31  ;;  %11712 = vmatprep.subr.bf16.mxu1 %v16845_v50  ;;  %v16869_v43 = vld [vmem:[%s22604_s3 + $0x664] ss:$16 sps:$4 sm:$0xff]  }
 0x616   : > { %v21708_v41 = vpack.c.bf16 %v8753_v47, %v8745_v0  ;;  %v8535_v44 = vpop.f32.mrb[136].mxu1  ;;  %11118 = vmatpush1.bf16.msra.mxu0 %v16858_v52  ;;  %v16849_v52 = vld [vmem:[%s22604_s3 + $0x568] ss:$16 sps:$4 sm:$0xff]  }
 0x617   : > { %v14830_v19 = vadd.f32 %v8535_v44, %v21461_v15  ;;  %v8537_v12 = vpop.f32.mrb[137].mxu1  ;;  %11119 = vmatprep.subr.bf16.mxu0 %v16863_v22  ;;  %v16857_v22 = vld [vmem:[%s22604_s3 + $0x58c] ss:$16 sps:$4 sm:$0xff]  }
 0x618   : > { %v14831_v8 = vadd.f32 %v8537_v12, %v21467_v23  ;;  %v8539_v26 = vpop.f32.mrb[138].mxu1  ;;  %11713 = vmatpush1.bf16.msra.mxu1 %v16843_v45  ;;  %v16872_v12 = vld [vmem:[%s22604_s3 + $0x684] ss:$16 sps:$4 sm:$0xff]  }
 0x619   : > { %v14832_v50 = vadd.f32 %v8539_v26, %v21461_v15  ;;  %v8541_v38 = vpop.f32.mrb[139].mxu1  ;;  %11714 = vmatprep.subr.bf16.mxu1 %v16848_v1  ;;  %10965 = vmatmul.mubr.bf16.gmra.mrb[132].mxu0 %v21170_v13  ;;  %v8760_v0 = vmax.f32 %v14830_v19, 0.0 }
 0x61a   : > { %v14833_v31 = vadd.f32 %v8541_v38, %v21467_v23  ;;  %10974 = vmatprep.mubr.bf16.mxu0 %v21200_v28  ;;  %v8761_v45 = vmax.f32 %v14831_v8, 0.0  ;;  %11120 = vmatpush1.bf16.msra.mxu0 %v16861_v55  ;;  %v16855_v38 = vld [vmem:[%s22604_s3 + $0x588] ss:$16 sps:$4 sm:$0xff]  }
 0x61b   : > { %v8768_v47 = vmax.f32 %v14832_v50, 0.0  ;;  %11584 = vmatmul.mubr.bf16.gmra.mrb[180].mxu1 %v22836_v61  ;;  %v16867_v61 = vld [vmem:[%s22604_s3 + $0x660] ss:$16 sps:$4 sm:$0xff]   ;;  %11121 = vmatprep.subr.bf16.mxu0 %v16869_v43 }
 0x61c   : > { %v8769_v1 = vmax.f32 %v14833_v31, 0.0  ;;  %11593 = vmatprep.mubr.bf16.mxu1 %v22837_v6  ;;  %11715 = vmatpush1.bf16.msra.mxu1 %v16846_v35  ;;  %v16866_v31 = vld [vmem:[%s22604_s3 + $0x5ac] ss:$16 sps:$4 sm:$0xff]   ;;  %v16870_v43 = vld [vmem:[%s22604_s3 + $0x680] ss:$16 sps:$4 sm:$0xff]  }
 0x61d   : > { %v21736_v44 = vpack.c.bf16 %v8768_v47, %v8760_v0  ;;  %11716 = vmatprep.subr.bf16.mxu1 %v16851_v42  ;;  %v16878_v47 = vld [vmem:[%s22604_s3 + $0x6a4] ss:$16 sps:$4 sm:$0xff]  }
 0x61e   : > { %v21744_v19 = vpack.c.bf16 %v8769_v1, %v8761_v45  ;;  %v8545_v6 = vpop.f32.mrb[140].mxu1  ;;  %11122 = vmatpush1.bf16.msra.mxu0 %v16867_v61 }
 0x61f   : > { %v14834_v8 = vadd.f32 %v8545_v6, %v21461_v15  ;;  %v8547_v26 = vpop.f32.mrb[141].mxu1  ;;  %11123 = vmatprep.subr.bf16.mxu0 %v16872_v12  ;;  %v22861_v6 = vld [vmem:[#allocation41_spill] sm:$0xff] }
 0x620   : > { %v14835_v35 = vadd.f32 %v8547_v26, %v21467_v23  ;;  %v8549_v50 = vpop.f32.mrb[142].mxu1  ;;  %11717 = vmatpush1.bf16.msra.mxu1 %v16849_v52  ;;  %v22860_v52 = vld [vmem:[#allocation15_spill] sm:$0xff] }
 0x621   : > { %v14836_v42 = vadd.f32 %v8549_v50, %v21461_v15  ;;  %v8551_v55 = vpop.f32.mrb[143].mxu1  ;;  %11718 = vmatprep.subr.bf16.mxu1 %v16857_v22  ;;  %10975 = vmatmul.mubr.bf16.gmra.mrb[136].mxu0 %v21194_v36  ;;  %v8776_v45 = vmax.f32 %v14834_v8, 0.0  ;;  %v16864_v26 = vld [vmem:[%s22604_s3 + $0x5a8] ss:$16 sps:$4 sm:$0xff]   ;;  %v16875_v8 = vld [vmem:[%s22604_s3 + $0x5cc] ss:$16 sps:$4 sm:$0xff]  }
 0x622   : > { %v14837_v0 = vadd.f32 %v8551_v55, %v21467_v23  ;;  %10984 = vmatprep.mubr.bf16.mxu0 %v22860_v52  ;;  %v8777_v22 = vmax.f32 %v14835_v35, 0.0  ;;  %11124 = vmatpush1.bf16.msra.mxu0 %v16870_v43  ;;  %v16873_v43 = vld [vmem:[%s22604_s3 + $0x5c8] ss:$16 sps:$4 sm:$0xff]  }
 0x623   : > { %v8784_v1 = vmax.f32 %v14836_v42, 0.0  ;;  %11594 = vmatmul.mubr.bf16.gmra.mrb[184].mxu1 %v22840_v24  ;;  %v16876_v24 = vld [vmem:[%s22604_s3 + $0x6a0] ss:$16 sps:$4 sm:$0xff]   ;;  %11125 = vmatprep.subr.bf16.mxu0 %v16878_v47 }
 0x624   : > { %v8785_v61 = vmax.f32 %v14837_v0, 0.0  ;;  %11603 = vmatprep.mubr.bf16.mxu1 %v22861_v6  ;;  %11719 = vmatpush1.bf16.msra.mxu1 %v16855_v38  ;;  %v16881_v38 = vld [vmem:[%s22604_s3 + $0x6c4] ss:$16 sps:$4 sm:$0xff]   ;;  %v16879_v47 = vld [vmem:[%s22604_s3 + $0x6c0] ss:$16 sps:$4 sm:$0xff]  }
 0x625   : > { %v21772_v12 = vpack.c.bf16 %v8784_v1, %v8776_v45  ;;  %11720 = vmatprep.subr.bf16.mxu1 %v16866_v31  ;;  %v22863_v6 = vld [vmem:[#allocation10_spill] sm:$0xff] }
 0x626   : > { %v21780_v35 = vpack.c.bf16 %v8785_v61, %v8777_v22  ;;  %v8555_v50 = vpop.f32.mrb[144].mxu1  ;;  %11126 = vmatpush1.bf16.msra.mxu0 %v16876_v24  ;;  %v16884_v22 = vld [vmem:[%s22604_s3 + $0x5ec] ss:$16 sps:$4 sm:$0xff]   ;;  %v22864_v24 = vld [vmem:[#allocation40_spill] sm:$0xff] }
 0x627   : > { %22862 = vst [vmem:[#allocation29_spill] sm:$0xff] %v21772_v12  ;;  %v14838_v42 = vadd.f32 %v8555_v50, %v21461_v15  ;;  %v8557_v55 = vpop.f32.mrb[145].mxu1  ;;  %11127 = vmatprep.subr.bf16.mxu0 %v16881_v38 }
 0x628   : > { %v14839_v31 = vadd.f32 %v8557_v55, %v21467_v23  ;;  %v8559_v0 = vpop.f32.mrb[146].mxu1  ;;  %11721 = vmatpush1.bf16.msra.mxu1 %v16864_v26  ;;  %v16887_v26 = vld [vmem:[%s22604_s3 + $0x6e4] ss:$16 sps:$4 sm:$0xff]  }
 0x629   : > { %v14840_v45 = vadd.f32 %v8559_v0, %v21461_v15  ;;  %v8561_v1 = vpop.f32.mrb[147].mxu1  ;;  %11722 = vmatprep.subr.bf16.mxu1 %v16875_v8  ;;  %10985 = vmatmul.mubr.bf16.gmra.mrb[140].mxu0 %v22863_v6  ;;  %v8792_v50 = vmax.f32 %v14838_v42, 0.0  ;;  %v22865_v55 = vld [vmem:[#allocation28_spill] sm:$0xff] }
 0x62a   : > { %v14841_v61 = vadd.f32 %v8561_v1, %v21467_v23  ;;  %10994 = vmatprep.mubr.bf16.mxu0 %v22865_v55  ;;  %v8793_v0 = vmax.f32 %v14839_v31, 0.0  ;;  %v16882_v1 = vld [vmem:[%s22604_s3 + $0x5e8] ss:$16 sps:$4 sm:$0xff]   ;;  %11128 = vmatpush1.bf16.msra.mxu0 %v16879_v47  ;;  %v16885_v42 = vld [vmem:[%s22604_s3 + $0x6e0] ss:$16 sps:$4 sm:$0xff]  }
 0x62b   : > { %v8800_v8 = vmax.f32 %v14840_v45, 0.0  ;;  %11604 = vmatmul.mubr.bf16.gmra.mrb[188].mxu1 %v22864_v24  ;;  %v16893_v31 = vld [vmem:[%s22604_s3 + $0x60c] ss:$16 sps:$4 sm:$0xff]   ;;  %11129 = vmatprep.subr.bf16.mxu0 %v16887_v26 }
 0x62c   : > { %v8801_v12 = vmax.f32 %v14841_v61, 0.0  ;;  %11613 = vmatprep.mubr.bf16.mxu1 %v22845_v59  ;;  %11723 = vmatpush1.bf16.msra.mxu1 %v16873_v43  ;;  %v16890_v43 = vld [vmem:[%s22604_s3 + $0x704] ss:$16 sps:$4 sm:$0xff]  }
 0x62d   : > { %v21808_v38 = vpack.c.bf16 %v8800_v8, %v8792_v50  ;;  %11724 = vmatprep.subr.bf16.mxu1 %v16884_v22 }
 0x62e   : > { %v21816_v45 = vpack.c.bf16 %v8801_v12, %v8793_v0  ;;  %v8565_v59 = vpop.f32.mrb[148].mxu1  ;;  %11130 = vmatpush1.bf16.msra.mxu0 %v16885_v42  ;;  %v16888_v12 = vld [vmem:[%s22604_s3 + $0x700] ss:$16 sps:$4 sm:$0xff]   ;;  %v22868_v0 = vld [vmem:[#allocation13_spill] sm:$0xff] }
 0x62f   : > { %22866 = vst [vmem:[#allocation27_spill] sm:$0xff] %v21808_v38  ;;  %v14842_v61 = vadd.f32 %v8565_v59, %v21461_v15  ;;  %v8567_v22 = vpop.f32.mrb[149].mxu1  ;;  %11131 = vmatprep.subr.bf16.mxu0 %v16890_v43  ;;  %v16896_v59 = vld [vmem:[%s22604_s3 + $0x724] ss:$16 sps:$4 sm:$0xff]   ;;  %v16894_v43 = vld [vmem:[%s22604_s3 + $0x720] ss:$16 sps:$4 sm:$0xff]  }
 0x630   : > { %22867 = vst [vmem:[#allocation33_spill] sm:$0xff] %v21816_v45  ;;  %v14843_v47 = vadd.f32 %v8567_v22, %v21467_v23  ;;  %v8569_v50 = vpop.f32.mrb[150].mxu1  ;;  %11725 = vmatpush1.bf16.msra.mxu1 %v16882_v1 }
 0x631   : > { %v14844_v8 = vadd.f32 %v8569_v50, %v21461_v15  ;;  %v8571_v24 = vpop.f32.mrb[151].mxu1  ;;  %11887 = vmatprep.subr.bf16.mxu1 %v16893_v31  ;;  %10995 = vmatmul.mubr.bf16.gmra.mrb[144].mxu0 %v22868_v0  ;;  %v8808_v22 = vmax.f32 %v14842_v61, 0.0  ;;  %v22869_v50 = vld [vmem:[#allocation32_spill] sm:$0xff] }
 0x632   : > { %v14845_v26 = vadd.f32 %v8571_v24, %v21467_v23  ;;  %11004 = vmatprep.mubr.bf16.mxu0 %v22869_v50  ;;  %v8809_v42 = vmax.f32 %v14843_v47, 0.0  ;;  %11132 = vmatpush1.bf16.msra.mxu0 %v16888_v12 }
 0x633   : > { %v8816_v1 = vmax.f32 %v14844_v8, 0.0  ;;  %11614 = vmatmul.mubr.bf16.gmra.mrb[192].mxu1 %v22848_v57  ;;  %11133 = vmatprep.subr.bf16.mxu0 %v16896_v59  ;;  %v16899_v57 = vld [vmem:[%s22604_s3 + $0x744] ss:$16 sps:$4 sm:$0xff]  }
 0x634   : > { %v8817_v38 = vmax.f32 %v14845_v26, 0.0  ;;  %11623 = vmatprep.mubr.bf16.mxu1 %v20007_v62 }
 0x635   : > { %v21835_v31 = vpack.c.bf16 %v8816_v1, %v8808_v22  ;;  %v22872_v22 = vld [vmem:[#allocation18_spill] sm:$0xff] }
 0x636   : > { %v21840_v24 = vpack.c.bf16 %v8817_v38, %v8809_v42  ;;  %v8575_v45 = vpop.f32.mrb[152].mxu1  ;;  %11134 = vmatpush1.bf16.msra.mxu0 %v16894_v43  ;;  %v16897_v38 = vld [vmem:[%s22604_s3 + $0x740] ss:$16 sps:$4 sm:$0xff]  }
 0x637   : > { %22870 = vst [vmem:[#allocation31_spill] sm:$0xff] %v21835_v31  ;;  %v14846_v61 = vadd.f32 %v8575_v45, %v21461_v15  ;;  %v8577_v47 = vpop.f32.mrb[153].mxu1  ;;  %11135 = vmatprep.subr.bf16.mxu0 %v16899_v57  ;;  %v16905_v45 = vld [vmem:[%s22604_s3 + $0x764] ss:$16 sps:$4 sm:$0xff]   ;;  %v16903_v57 = vld [vmem:[%s22604_s3 + $0x760] ss:$16 sps:$4 sm:$0xff]  }
 0x638   : > { %22871 = vst [vmem:[#allocation35_spill] sm:$0xff] %v21840_v24  ;;  %v14847_v62 = vadd.f32 %v8577_v47, %v21467_v23  ;;  %v8579_v8 = vpop.f32.mrb[154].mxu1  ;;  %v22873_v47 = vld [vmem:[#allocation19_spill] sm:$0xff] }
 0x639   : > { %v14848_v12 = vadd.f32 %v8579_v8, %v21461_v15  ;;  %v8581_v26 = vpop.f32.mrb[155].mxu1  ;;  %11005 = vmatmul.mubr.bf16.gmra.mrb[148].mxu0 %v22872_v22  ;;  %v8824_v1 = vmax.f32 %v14846_v61, 0.0 }
 0x63a   : > { %v14849_v59 = vadd.f32 %v8581_v26, %v21467_v23  ;;  %11014 = vmatprep.mubr.bf16.mxu0 %v22873_v47  ;;  %v8825_v43 = vmax.f32 %v14847_v62, 0.0  ;;  %11136 = vmatpush1.bf16.msra.mxu0 %v16897_v38 }
 0x63b   : > { %v8832_v42 = vmax.f32 %v14848_v12, 0.0  ;;  %11624 = vmatmul.mubr.bf16.gmra.mrb[196].mxu1 %v22853_v58  ;;  %11137 = vmatprep.subr.bf16.mxu0 %v16905_v45  ;;  %v16908_v58 = vld [vmem:[%s22604_s3 + $0x784] ss:$16 sps:$4 sm:$0xff]  }
 0x63c   : > { %v8833_v8 = vmax.f32 %v14849_v59, 0.0  ;;  %11633 = vmatprep.mubr.bf16.mxu1 %v22854_v39 }
 0x63d   : > { %v21859_v31 = vpack.c.bf16 %v8832_v42, %v8824_v1  ;;  %v16906_v1 = vld [vmem:[%s22604_s3 + $0x780] ss:$16 sps:$4 sm:$0xff]  }
 0x63e   : > { %v21864_v26 = vpack.c.bf16 %v8833_v8, %v8825_v43  ;;  %v8585_v24 = vpop.f32.mrb[156].mxu1  ;;  %11138 = vmatpush1.bf16.msra.mxu0 %v16903_v57  ;;  %v22874_v42 = vld [vmem:[#allocation30_spill] sm:$0xff] }
 0x63f   : > { %v14850_v61 = vadd.f32 %v8585_v24, %v21461_v15  ;;  %v8587_v62 = vpop.f32.mrb[157].mxu1  ;;  %11139 = vmatprep.subr.bf16.mxu0 %v16908_v58  ;;  %v16914_v24 = vld [vmem:[%s22604_s3 + $0x7a4] ss:$16 sps:$4 sm:$0xff]  }
 0x640   : > { %v14851_v39 = vadd.f32 %v8587_v62, %v21467_v23  ;;  %v8589_v12 = vpop.f32.mrb[158].mxu1 }
 0x641   : > { %v14852_v38 = vadd.f32 %v8589_v12, %v21461_v15  ;;  %v8591_v59 = vpop.f32.mrb[159].mxu1  ;;  %11015 = vmatmul.mubr.bf16.gmra.mrb[152].mxu0 %v22874_v42  ;;  %v8840_v43 = vmax.f32 %v14850_v61, 0.0  ;;  %v22875_v15 = vld [vmem:[#allocation22_spill] sm:$0xff] }
 0x642   : > { %v14853_v45 = vadd.f32 %v8591_v59, %v21467_v23  ;;  %11024 = vmatprep.mubr.bf16.mxu0 %v22875_v15  ;;  %v8841_v57 = vmax.f32 %v14851_v39, 0.0  ;;  %11140 = vmatpush1.bf16.msra.mxu0 %v16906_v1  ;;  %v16912_v23 = vld [vmem:[%s22604_s3 + $0x7a0] ss:$16 sps:$4 sm:$0xff]   ;;  %v16923_v39 = vld [vmem:[%s22604_s3 + $0x7e4] ss:$16 sps:$4 sm:$0xff]   ;;  %v22878_v1 = vld [vmem:[#allocation21_spill] sm:$0xff] }
 0x643   : > { %v8848_v8 = vmax.f32 %v14852_v38, 0.0  ;;  %11634 = vmatmul.mubr.bf16.gmra.mrb[200].mxu1 %v22858_v7  ;;  %11141 = vmatprep.subr.bf16.mxu0 %v16914_v24  ;;  %v16917_v7 = vld [vmem:[%s22604_s3 + $0x7c4] ss:$16 sps:$4 sm:$0xff]   ;;  %v16915_v61 = vld [vmem:[%s22604_s3 + $0x7c0] ss:$16 sps:$4 sm:$0xff]   ;;  %v22882_v24 = vld [vmem:[#allocation25_spill] sm:$0xff] }
 0x644   : > { %v8849_v62 = vmax.f32 %v14853_v45, 0.0  ;;  %11643 = vmatprep.mubr.bf16.mxu1 %v20091_v56  ;;  %v22876_v56 = vld [vmem:[#allocation20_spill] sm:$0xff]  ;;  %v22879_v45 = vld [vmem:[#allocation26_spill] sm:$0xff] }
 0x645   : > { %v21883_v12 = vpack.c.bf16 %v8848_v8, %v8840_v43  ;;  %v22877_v38 = vld [vmem:[#allocation24_spill] sm:$0xff]  ;;  %v22883_v43 = vld [vmem:[#allocation5_spill] sm:$0xff] }
 0x646   : > { %v21888_v58 = vpack.c.bf16 %v8849_v62, %v8841_v57  ;;  %11142 = vmatpush1.bf16.msra.mxu0 %v16912_v23  ;;  %v16921_v59 = vld [vmem:[%s22604_s3 + $0x7e0] ss:$16 sps:$4 sm:$0xff]   ;;  %v16926_v8 = vld [vmem:[%s22604_s3 + $0x68c] ss:$16 sps:$4 sm:$0xff]   ;;  %v16924_v57 = vld [vmem:[%s22604_s3 + $0x688] ss:$16 sps:$4 sm:$0xff]  }
 0x647   : > { %11143 = vmatprep.subr.bf16.mxu0 %v16917_v7  ;;  %v16927_v62 = vld [vmem:[%s22604_s3 + $0x6a8] ss:$16 sps:$4 sm:$0xff]   ;;  %v16932_v23 = vld [vmem:[%s22604_s3 + $0x6cc] ss:$16 sps:$4 sm:$0xff]  }
 0x648   : > { %v16930_v7 = vld [vmem:[%s22604_s3 + $0x6c8] ss:$16 sps:$4 sm:$0xff]  }
 0x649   : > { %11025 = vmatmul.mubr.bf16.gmra.mrb[156].mxu0 %v22876_v56 }
 0x64a   : > { %11034 = vmatprep.mubr.bf16.mxu0 %v22877_v38  ;;  %11144 = vmatpush1.bf16.msra.mxu0 %v16915_v61  ;;  %v16933_v61 = vld [vmem:[%s22604_s3 + $0x6e8] ss:$16 sps:$4 sm:$0xff]  }
 0x64b   : > { %11644 = vmatmul.mubr.bf16.gmra.mrb[204].mxu1 %v22859_v16  ;;  %11145 = vmatprep.subr.bf16.mxu0 %v16923_v39  ;;  %v22880_v16 = vld [vmem:[#allocation23_spill] sm:$0xff] }
 0x64c   : > { %11653 = vmatprep.mubr.bf16.mxu1 %v20129_v18  ;;  %v22881_v18 = vld [vmem:[#allocation3_spill] sm:$0xff] }
 0x64d   : > { %v16938_v39 = vld [vmem:[%s22604_s3 + $0x70c] ss:$16 sps:$4 sm:$0xff]  }
 0x64e   : > { %11146 = vmatpush1.bf16.msra.mxu0 %v16921_v59  ;;  %v16936_v59 = vld [vmem:[%s22604_s3 + $0x708] ss:$16 sps:$4 sm:$0xff]  }
 0x651   : > { %11035 = vmatmul.mubr.bf16.gmra.mrb[160].mxu0 %v22878_v1 }
 0x652   : > { %11044 = vmatprep.mubr.bf16.mxu0 %v22879_v45 }
 0x653   : > { %11654 = vmatmul.mubr.bf16.gmra.mrb[208].mxu1 %v20125_v11  ;;  %v22884_v11 = vld [vmem:[#allocation2_spill] sm:$0xff] }
 0x654   : > { %11663 = vmatprep.mubr.bf16.mxu1 %v20159_v5  ;;  %v16902_v5 = vld [vmem:[%s22604_s3 + $0x62c] ss:$16 sps:$4 sm:$0xff]  }
 0x659   : > { %11045 = vmatmul.mubr.bf16.gmra.mrb[164].mxu0 %v22880_v16 }
 0x65a   : > { %11054 = vmatprep.mubr.bf16.mxu0 %v22881_v18 }
 0x65b   : > { %11664 = vmatmul.mubr.bf16.gmra.mrb[212].mxu1 %v20157_v63  ;;  %v16891_v63 = vld [vmem:[%s22604_s3 + $0x608] ss:$16 sps:$4 sm:$0xff]  }
 0x65c   : > { %11673 = vmatprep.mubr.bf16.mxu1 %v20189_v20  ;;  %v16900_v20 = vld [vmem:[%s22604_s3 + $0x628] ss:$16 sps:$4 sm:$0xff]  }
 0x661   : > { %11055 = vmatmul.mubr.bf16.gmra.mrb[168].mxu0 %v22882_v24 }
 0x662   : > { %11064 = vmatprep.mubr.bf16.mxu0 %v22883_v43 }
 0x663   : > { %11674 = vmatmul.mubr.bf16.gmra.mrb[216].mxu1 %v20187_v34  ;;  %v22885_v34 = vld [vmem:[#allocation8_spill] sm:$0xff] }
 0x664   : > { %11683 = vmatprep.mubr.bf16.mxu1 %v20219_v17  ;;  %v16909_v17 = vld [vmem:[%s22604_s3 + $0x648] ss:$16 sps:$4 sm:$0xff]  }
 0x669   : > { %11065 = vmatmul.mubr.bf16.gmra.mrb[172].mxu0 %v22884_v11 }
 0x66a   : > { %11074 = vmatprep.mubr.bf16.mxu0 %v21499_v37 }
 0x66b   : > { %11684 = vmatmul.mubr.bf16.gmra.mrb[220].mxu1 %v20217_v32  ;;  %v16911_v32 = vld [vmem:[%s22604_s3 + $0x64c] ss:$16 sps:$4 sm:$0xff]  }
 0x66c   : > { %11726 = vmatprep.mubr.bf16.mxu1 %v21155_v40  ;;  %v22886_v40 = vld [vmem:[#allocation6_spill] sm:$0xff] }
 0x671   : > { %11075 = vmatmul.mubr.bf16.gmra.mrb[176].mxu0 %v21494_v10 }
 0x672   : > { %11084 = vmatprep.mubr.bf16.mxu0 %v22885_v34 }
 0x673   : > { %11727 = vmatmul.mubr.bf16.vlgmr.msra.gmra.mrb[160].mxu1 %v21152_v14  ;;  %v16920_v14 = vld [vmem:[%s22604_s3 + $0x66c] ss:$16 sps:$4 sm:$0xff]  }
 0x674   : > { %11736 = vmatprep.mubr.bf16.mxu1 %v21176_v4  ;;  %11888 = vmatpush1.bf16.msra.mxu1 %v16891_v63  ;;  %v16918_v4 = vld [vmem:[%s22604_s3 + $0x668] ss:$16 sps:$4 sm:$0xff]   ;;  %v22890_v63 = vld [vmem:[#allocation12_spill] sm:$0xff] }
 0x675   : > { %11889 = vmatprep.subr.bf16.mxu1 %v16902_v5  ;;  %v16939_v5 = vld [vmem:[%s22604_s3 + $0x728] ss:$16 sps:$4 sm:$0xff]  }
 0x678   : > { %11890 = vmatpush1.bf16.msra.mxu1 %v16900_v20  ;;  %v16944_v20 = vld [vmem:[%s22604_s3 + $0x74c] ss:$16 sps:$4 sm:$0xff]  }
 0x679   : > { %11891 = vmatprep.subr.bf16.mxu1 %v16911_v32  ;;  %11085 = vmatmul.mubr.bf16.gmra.mrb[180].mxu0 %v22886_v40  ;;  %v16942_v32 = vld [vmem:[%s22604_s3 + $0x748] ss:$16 sps:$4 sm:$0xff]  }
 0x67a   : > { %11094 = vmatprep.mubr.bf16.mxu0 %v21545_v49 }
 0x67b   : > { %11737 = vmatmul.mubr.bf16.gmra.mrb[164].mxu1 %v21170_v13  ;;  %v16929_v13 = vld [vmem:[%s22604_s3 + $0x6ac] ss:$16 sps:$4 sm:$0xff]  }
 0x67c   : > { %11746 = vmatprep.mubr.bf16.mxu1 %v21200_v28  ;;  %11892 = vmatpush1.bf16.msra.mxu1 %v16909_v17  ;;  %v22887_v28 = vld [vmem:[#allocation11_spill] sm:$0xff]  ;;  %v22892_v17 = vld [vmem:[#allocation14_spill] sm:$0xff] }
 0x67d   : > { %11893 = vmatprep.subr.bf16.mxu1 %v16920_v14  ;;  %v16945_v14 = vld [vmem:[%s22604_s3 + $0x768] ss:$16 sps:$4 sm:$0xff]  }
 0x680   : > { %11894 = vmatpush1.bf16.msra.mxu1 %v16918_v4  ;;  %v16950_v4 = vld [vmem:[%s22604_s3 + $0x78c] ss:$16 sps:$4 sm:$0xff]  }
 0x681   : > { %11895 = vmatprep.subr.bf16.mxu1 %v16926_v8  ;;  %11095 = vmatmul.mubr.bf16.gmra.mrb[184].mxu0 %v22887_v28  ;;  %v16948_v8 = vld [vmem:[%s22604_s3 + $0x788] ss:$16 sps:$4 sm:$0xff]  }
 0x682   : > { %11104 = vmatprep.mubr.bf16.mxu0 %v21565_v46 }
 0x683   : > { %11747 = vmatmul.mubr.bf16.gmra.mrb[168].mxu1 %v21194_v36  ;;  %v16935_v36 = vld [vmem:[%s22604_s3 + $0x6ec] ss:$16 sps:$4 sm:$0xff]  }
 0x684   : > { %11756 = vmatprep.mubr.bf16.mxu1 %v22860_v52  ;;  %11896 = vmatpush1.bf16.msra.mxu1 %v16924_v57  ;;  %v22888_v52 = vld [vmem:[#allocation7_spill] sm:$0xff] }
 0x685   : > { %11897 = vmatprep.subr.bf16.mxu1 %v16929_v13  ;;  %v16951_v57 = vld [vmem:[%s22604_s3 + $0x7a8] ss:$16 sps:$4 sm:$0xff]   ;;  %v16956_v13 = vld [vmem:[%s22604_s3 + $0x7cc] ss:$16 sps:$4 sm:$0xff]  }
 0x688   : > { %11898 = vmatpush1.bf16.msra.mxu1 %v16927_v62  ;;  %v16954_v62 = vld [vmem:[%s22604_s3 + $0x7c8] ss:$16 sps:$4 sm:$0xff]  }
 0x689   : > { %11899 = vmatprep.subr.bf16.mxu1 %v16932_v23  ;;  %11105 = vmatmul.mubr.bf16.gmra.mrb[188].mxu0 %v21560_v60  ;;  %v22894_v23 = vld [vmem:[#allocation29_spill] sm:$0xff] }
 0x68a   : > { %11147 = vmatprep.mubr.bf16.mxu0 %v22888_v52 }
 0x68b   : > { %11757 = vmatmul.mubr.bf16.gmra.mrb[172].mxu1 %v22863_v6  ;;  %v16941_v6 = vld [vmem:[%s22604_s3 + $0x72c] ss:$16 sps:$4 sm:$0xff]  }
 0x68c   : > { %11766 = vmatprep.mubr.bf16.mxu1 %v22865_v55  ;;  %11900 = vmatpush1.bf16.msra.mxu1 %v16930_v7  ;;  %v22889_v55 = vld [vmem:[#allocation4_spill] sm:$0xff]  ;;  %v16978_v7 = vld [vmem:[%s22606_s5 + $0x78] sm:$0xff]  }
 0x68d   : > { %11901 = vmatprep.subr.bf16.mxu1 %v16935_v36  ;;  %v16979_v36 = vld [vmem:[%s22606_s5 + $0x38] sm:$0xff]  }
 0x690   : > { %11902 = vmatpush1.bf16.msra.mxu1 %v16933_v61  ;;  %v16963_v61 = vld [vmem:[%s22606_s5 + $0x80] sm:$0xff]  }
 0x691   : > { %11903 = vmatprep.subr.bf16.mxu1 %v16938_v39  ;;  %11148 = vmatmul.mubr.bf16.vlgmr.msra.gmra.mrb[128].mxu0 %v22889_v55  ;;  %v22896_v39 = vld [vmem:[#allocation27_spill] sm:$0xff] }
 0x692   : > { %11157 = vmatprep.mubr.bf16.mxu0 %v22890_v63 }
 0x693   : > { %11767 = vmatmul.mubr.bf16.gmra.mrb[176].mxu1 %v22868_v0  ;;  %v16947_v0 = vld [vmem:[%s22604_s3 + $0x76c] ss:$16 sps:$4 sm:$0xff]  }
 0x694   : > { %11776 = vmatprep.mubr.bf16.mxu1 %v22869_v50  ;;  %11904 = vmatpush1.bf16.msra.mxu1 %v16936_v59  ;;  %v22891_v50 = vld [vmem:[#allocation9_spill] sm:$0xff]  ;;  %v16973_v59 = vld [vmem:[%s22606_s5 + $0x88] sm:$0xff]  }
 0x695   : > { %11905 = vmatprep.subr.bf16.mxu1 %v16941_v6  ;;  %v16980_v6 = vld [vmem:[%s22606_s5 + $0xd0] sm:$0xff]  }
 0x698   : > { %11906 = vmatpush1.bf16.msra.mxu1 %v16939_v5  ;;  %v16981_v5 = vld [vmem:[%s22606_s5 + $0x90] sm:$0xff]  }
 0x699   : > { %11907 = vmatprep.subr.bf16.mxu1 %v16944_v20  ;;  %11158 = vmatmul.mubr.bf16.gmra.mrb[132].mxu0 %v22891_v50  ;;  %v16983_v20 = vld [vmem:[%s22606_s5 + $0x98] sm:$0xff]  }
 0x69a   : > { %11167 = vmatprep.mubr.bf16.mxu0 %v22892_v17 }
 0x69b   : > { %11777 = vmatmul.mubr.bf16.gmra.mrb[180].mxu1 %v22872_v22  ;;  %v16953_v22 = vld [vmem:[%s22604_s3 + $0x7ac] ss:$16 sps:$4 sm:$0xff]  }
 0x69c   : > { %11786 = vmatprep.mubr.bf16.mxu1 %v22873_v47  ;;  %11908 = vmatpush1.bf16.msra.mxu1 %v16942_v32  ;;  %v22893_v47 = vld [vmem:[#allocation16_spill] sm:$0xff]  ;;  %v16985_v32 = vld [vmem:[%s22606_s5 + $0xa0] sm:$0xff]  }
 0x69d   : > { %11909 = vmatprep.subr.bf16.mxu1 %v16947_v0 }
 0x6a0   : > { %11910 = vmatpush1.bf16.msra.mxu1 %v16945_v14 }
 0x6a1   : > { %11911 = vmatprep.subr.bf16.mxu1 %v16950_v4  ;;  %11168 = vmatmul.mubr.bf16.gmra.mrb[136].mxu0 %v22893_v47 }
 0x6a2   : > { %11177 = vmatprep.mubr.bf16.mxu0 %v21567_v21 }
 0x6a3   : > { %11787 = vmatmul.mubr.bf16.gmra.mrb[184].mxu1 %v22874_v42  ;;  %v16959_v42 = vld [vmem:[%s22604_s3 + $0x7ec] ss:$16 sps:$4 sm:$0xff]  }
 0x6a4   : > { %11796 = vmatprep.mubr.bf16.mxu1 %v22875_v15  ;;  %11912 = vmatpush1.bf16.msra.mxu1 %v16948_v8  ;;  %v16957_v15 = vld [vmem:[%s22604_s3 + $0x7e8] ss:$16 sps:$4 sm:$0xff]  }
 0x6a5   : > { %11913 = vmatprep.subr.bf16.mxu1 %v16953_v22 }
 0x6a8   : > { %11914 = vmatpush1.bf16.msra.mxu1 %v16951_v57 }
 0x6a9   : > { %11915 = vmatprep.subr.bf16.mxu1 %v16956_v13  ;;  %11178 = vmatmul.mubr.bf16.gmra.mrb[140].mxu0 %v21563_v54 }
 0x6aa   : > { %11187 = vmatprep.mubr.bf16.mxu0 %v21579_v25 }
 0x6ab   : > { %11797 = vmatmul.mubr.bf16.gmra.mrb[188].mxu1 %v22876_v56  ;;  %v16960_v56 = vld [vmem:[%s22606_s5 + $0x40] sm:$0xff]  }
 0x6ac   : > { %11806 = vmatprep.mubr.bf16.mxu1 %v22877_v38  ;;  %11916 = vmatpush1.bf16.msra.mxu1 %v16954_v62  ;;  %v16961_v38 = vld [vmem:[%s22606_s5] sm:$0xff]  }
 0x6ad   : > { %11917 = vmatprep.subr.bf16.mxu1 %v16959_v42  ;;  %14254 = vmatprep.subr.bf16.mxu0 %v16960_v56 }
 0x6ae   : > { %14255 = vmatpush3.bf16.msra.mxu0 %v16961_v38 }
 0x6b0   : > { %11918 = vmatpush1.bf16.msra.mxu1 %v16957_v15 }
 0x6b1   : > { %11188 = vmatmul.mubr.bf16.gmra.mrb[144].mxu0 %v21577_v53 }
 0x6b2   : > { %11197 = vmatprep.mubr.bf16.mxu0 %v21603_v27 }
 0x6b3   : > { %11807 = vmatmul.mubr.bf16.gmra.mrb[192].mxu1 %v22878_v1  ;;  %v16962_v1 = vld [vmem:[%s22606_s5 + $0xc0] sm:$0xff]  }
 0x6b4   : > { %11816 = vmatprep.mubr.bf16.mxu1 %v22879_v45  ;;  %14366 = vmatprep.subr.bf16.mxu1 %v16962_v1  ;;  %v16965_v45 = vld [vmem:[%s22606_s5 + $0x8] sm:$0xff]  }
 0x6b9   : > { %11198 = vmatmul.mubr.bf16.gmra.mrb[148].mxu0 %v21598_v30 }
 0x6ba   : > { %11207 = vmatprep.mubr.bf16.mxu0 %v21627_v51 }
 0x6bb   : > { %11817 = vmatmul.mubr.bf16.gmra.mrb[196].mxu1 %v22880_v16  ;;  %v16966_v16 = vld [vmem:[%s22606_s5 + $0x50] sm:$0xff]  }
 0x6bc   : > { %11826 = vmatprep.mubr.bf16.mxu1 %v22881_v18  ;;  %v16968_v18 = vld [vmem:[%s22606_s5 + $0x58] sm:$0xff]  }
 0x6c1   : > { %11208 = vmatmul.mubr.bf16.gmra.mrb[152].mxu0 %v21622_v2 }
 0x6c2   : > { %11217 = vmatprep.mubr.bf16.mxu0 %v21651_v3 }
 0x6c3   : > { %11827 = vmatmul.mubr.bf16.gmra.mrb[200].mxu1 %v22882_v24  ;;  %v16969_v24 = vld [vmem:[%s22606_s5 + $0x18] sm:$0xff]  }
 0x6c4   : > { %11836 = vmatprep.mubr.bf16.mxu1 %v22883_v43  ;;  %v16970_v43 = vld [vmem:[%s22606_s5 + $0x60] sm:$0xff]  }
 0x6c9   : > { %11218 = vmatmul.mubr.bf16.gmra.mrb[156].mxu0 %v21646_v29 }
 0x6ca   : > { %11227 = vmatprep.mubr.bf16.mxu0 %v21675_v48 }
 0x6cb   : > { %11837 = vmatmul.mubr.bf16.gmra.mrb[204].mxu1 %v22884_v11  ;;  %v16972_v11 = vld [vmem:[%s22606_s5 + $0x20] sm:$0xff]  }
 0x6cc   : > { %11846 = vmatprep.mubr.bf16.mxu1 %v21499_v37  ;;  %v16964_v37 = vld [vmem:[%s22606_s5 + $0x48] sm:$0xff]  }
 0x6cd   : > { %14256 = vmatprep.subr.bf16.mxu0 %v16964_v37 }
 0x6ce   : > { %14257 = vmatpush3.bf16.msra.mxu0 %v16965_v45 }
 0x6cf   : > { %14258 = vmatprep.subr.bf16.mxu0 %v16966_v16 }
 0x6d1   : > { %11228 = vmatmul.mubr.bf16.gmra.mrb[160].mxu0 %v21670_v9 }
 0x6d2   : > { %11237 = vmatprep.mubr.bf16.mxu0 %v21708_v41 }
 0x6d3   : > { %11847 = vmatmul.mubr.bf16.gmra.mrb[208].mxu1 %v21494_v10  ;;  %v16967_v10 = vld [vmem:[%s22606_s5 + $0x10] sm:$0xff]  }
 0x6d4   : > { %11856 = vmatprep.mubr.bf16.mxu1 %v22885_v34  ;;  %14259 = vmatpush3.bf16.msra.mxu0 %v16967_v10  ;;  %v16975_v34 = vld [vmem:[%s22606_s5 + $0x28] sm:$0xff]  }
 0x6d5   : > { %14260 = vmatprep.subr.bf16.mxu0 %v16968_v18 }
 0x6d8   : > { %14261 = vmatpush3.bf16.msra.mxu0 %v16969_v24 }
 0x6d9   : > { %11238 = vmatmul.mubr.bf16.gmra.mrb[164].mxu0 %v21700_v33  ;;  %14262 = vmatprep.subr.bf16.mxu0 %v16970_v43 }
 0x6da   : > { %11247 = vmatprep.mubr.bf16.mxu0 %v21744_v19 }
 0x6db   : > { %11857 = vmatmul.mubr.bf16.gmra.mrb[212].mxu1 %v22886_v40  ;;  %v16976_v40 = vld [vmem:[%s22606_s5 + $0x70] sm:$0xff]  }
 0x6dc   : > { %11866 = vmatprep.mubr.bf16.mxu1 %v21545_v49  ;;  %v16974_v49 = vld [vmem:[%s22606_s5 + $0x68] sm:$0xff]   ;;  %14263 = vmatpush3.bf16.msra.mxu0 %v16972_v11 }
 0x6dd   : > { %14264 = vmatprep.subr.bf16.mxu0 %v16974_v49 }
 0x6e0   : > { %14265 = vmatpush3.bf16.msra.mxu0 %v16975_v34 }
 0x6e1   : > { %11248 = vmatmul.mubr.bf16.gmra.mrb[168].mxu0 %v21736_v44  ;;  %14266 = vmatprep.subr.bf16.mxu0 %v16976_v40 }
 0x6e2   : > { %11257 = vmatprep.mubr.bf16.mxu0 %v21780_v35 }
 0x6e3   : > { %11867 = vmatmul.mubr.bf16.gmra.mrb[216].mxu1 %v22887_v28  ;;  %v16977_v28 = vld [vmem:[%s22606_s5 + $0x30] sm:$0xff]  }
 0x6e4   : > { %11876 = vmatprep.mubr.bf16.mxu1 %v21565_v46  ;;  %v22895_v46 = vld [vmem:[#allocation33_spill] sm:$0xff]  ;;  %14267 = vmatpush3.bf16.msra.mxu0 %v16977_v28 }
 0x6e5   : > { %14268 = vmatprep.subr.bf16.mxu0 %v16978_v7 }
 0x6e8   : > { %14269 = vmatpush3.bf16.msra.mxu0 %v16979_v36 }
 0x6e9   : > { %11258 = vmatmul.mubr.bf16.gmra.mrb[172].mxu0 %v22894_v23 }
 0x6ea   : > { %11267 = vmatprep.mubr.bf16.mxu0 %v22895_v46 }
 0x6eb   : > { %11877 = vmatmul.mubr.bf16.gmra.mrb[220].mxu1 %v21560_v60  ;;  %v16971_v60 = vld [vmem:[%s22606_s5 + $0xc8] sm:$0xff]  }
 0x6ec   : > { %11919 = vmatprep.mubr.bf16.mxu1 %v22888_v52  ;;  %v22897_v52 = vld [vmem:[#allocation35_spill] sm:$0xff] }
 0x6f1   : > { %11268 = vmatmul.mubr.bf16.gmra.mrb[176].mxu0 %v22896_v39 }
 0x6f2   : > { %11277 = vmatprep.mubr.bf16.mxu0 %v22897_v52 }
 0x6f3   : > { %11920 = vmatmul.mubr.bf16.vlgmr.msra.gmra.mrb[160].mxu1 %v22889_v55  ;;  %v22898_v55 = vld [vmem:[#allocation31_spill] sm:$0xff] }
 0x6f4   : > { %11929 = vmatprep.mubr.bf16.mxu1 %v22890_v63  ;;  %14367 = vmatpush3.bf16.msra.mxu1 %v16963_v61  ;;  %v16982_v63 = vld [vmem:[%s22606_s5 + $0xd8] sm:$0xff]  }
 0x6f5   : > { %14368 = vmatprep.subr.bf16.mxu1 %v16971_v60 }
 0x6f8   : > { %14369 = vmatpush3.bf16.msra.mxu1 %v16973_v59 }
 0x6f9   : > { %14370 = vmatprep.subr.bf16.mxu1 %v16980_v6  ;;  %11278 = vmatmul.mubr.bf16.gmra.mrb[180].mxu0 %v22898_v55 }
 0x6fa   : > { %11287 = vmatprep.mubr.bf16.mxu0 %v21864_v26 }
 0x6fb   : > { %11930 = vmatmul.mubr.bf16.gmra.mrb[164].mxu1 %v22891_v50 }
 0x6fc   : > { %11939 = vmatprep.mubr.bf16.mxu1 %v22892_v17  ;;  %14371 = vmatpush3.bf16.msra.mxu1 %v16981_v5 }
 0x6fd   : > { %14372 = vmatprep.subr.bf16.mxu1 %v16982_v63 }
 0x700   : > { %14373 = vmatpush3.bf16.msra.mxu1 %v16983_v20 }
 0x701   : > { %11288 = vmatmul.mubr.bf16.gmra.mrb[184].mxu0 %v21859_v31 }
 0x702   : > { %11297 = vmatprep.mubr.bf16.mxu0 %v21888_v58 }
 0x703   : > { %11940 = vmatmul.mubr.bf16.gmra.mrb[168].mxu1 %v22893_v47 }
 0x704   : > { %11949 = vmatprep.mubr.bf16.mxu1 %v21567_v21  ;;  %v16984_v21 = vld [vmem:[%s22606_s5 + $0xe0] sm:$0xff]  }
 0x705   : > { %14374 = vmatprep.subr.bf16.mxu1 %v16984_v21 }
 0x706   : > { %14375 = vmatpush3.bf16.msra.mxu1 %v16985_v32 }
 0x709   : > { %11298 = vmatmul.mubr.bf16.gmra.mrb[188].mxu0 %v21883_v12 }
 0x70b   : > { %11950 = vmatmul.mubr.bf16.gmra.mrb[172].mxu1 %v21563_v54  ;;  %v16986_v54 = vld [vmem:[%s22606_s5 + $0xe8] sm:$0xff]  }
 0x70c   : > { %11959 = vmatprep.mubr.bf16.mxu1 %v21579_v25  ;;  %14376 = vmatprep.subr.bf16.mxu1 %v16986_v54  ;;  %v16988_v25 = vld [vmem:[%s22606_s5 + $0xf0] sm:$0xff]  }
 0x713   : > { %11960 = vmatmul.mubr.bf16.gmra.mrb[176].mxu1 %v21577_v53  ;;  %v16987_v53 = vld [vmem:[%s22606_s5 + $0xa8] sm:$0xff]  }
 0x714   : > { %11969 = vmatprep.mubr.bf16.mxu1 %v21603_v27  ;;  %14377 = vmatpush3.bf16.msra.mxu1 %v16987_v53  ;;  %v16990_v27 = vld [vmem:[%s22606_s5 + $0xf8] sm:$0xff]  }
 0x715   : > { %14378 = vmatprep.subr.bf16.mxu1 %v16988_v25 }
 0x71b   : > { %11970 = vmatmul.mubr.bf16.gmra.mrb[180].mxu1 %v21598_v30  ;;  %v16989_v30 = vld [vmem:[%s22606_s5 + $0xb0] sm:$0xff]  }
 0x71c   : > { %11979 = vmatprep.mubr.bf16.mxu1 %v21627_v51  ;;  %14379 = vmatpush3.bf16.msra.mxu1 %v16989_v30  ;;  %v22213_v51 = vld [vmem:[%s22605_s4] sm:$0xf] }
 0x71d   : > { %14380 = vmatprep.subr.bf16.mxu1 %v16990_v27 }
 0x723   : > { %11980 = vmatmul.mubr.bf16.gmra.mrb[184].mxu1 %v21622_v2  ;;  %v16991_v2 = vld [vmem:[%s22606_s5 + $0xb8] sm:$0xff]  }
 0x724   : > { %11989 = vmatprep.mubr.bf16.mxu1 %v21651_v3  ;;  %14381 = vmatpush3.bf16.msra.mxu1 %v16991_v2 }
 0x72b   : > { %11990 = vmatmul.mubr.bf16.gmra.mrb[188].mxu1 %v21646_v29  ;;  %v22899_v29 = vld [vmem:[#allocation17_spill] sm:$0xff] }
 0x72c   : > { %11999 = vmatprep.mubr.bf16.mxu1 %v21675_v48  ;;  %v22900_v3 = vsub.s32 0, %v22899_v29  ;;  %v22901_v48 = vsub.s32 1, %v22899_v29 }
 0x733   : > { %12000 = vmatmul.mubr.bf16.gmra.mrb[192].mxu1 %v21670_v9  ;;  %v22218_v9 = vrot.slane %v22213_v51, %v22900_v3 }
 0x734   : > { %12009 = vmatprep.mubr.bf16.mxu1 %v21708_v41 }
 0x73b   : > { %12010 = vmatmul.mubr.bf16.gmra.mrb[196].mxu1 %v21700_v33  ;;  %v22224_v33 = vrot.slane %v22213_v51, %v22901_v48 }
 0x73c   : > { %12019 = vmatprep.mubr.bf16.mxu1 %v21744_v19 }
 0x743   : > { %12020 = vmatmul.mubr.bf16.gmra.mrb[200].mxu1 %v21736_v44 }
 0x744   : > { %12029 = vmatprep.mubr.bf16.mxu1 %v21780_v35 }
 0x74b   : > { %12030 = vmatmul.mubr.bf16.gmra.mrb[204].mxu1 %v22894_v23 }
 0x74c   : > { %12039 = vmatprep.mubr.bf16.mxu1 %v22895_v46 }
 0x753   : > { %12040 = vmatmul.mubr.bf16.gmra.mrb[208].mxu1 %v22896_v39 }
 0x754   : > { %12049 = vmatprep.mubr.bf16.mxu1 %v22897_v52 }
 0x75b   : > { %12050 = vmatmul.mubr.bf16.gmra.mrb[212].mxu1 %v22898_v55 }
 0x75c   : > { %12059 = vmatprep.mubr.bf16.mxu1 %v21864_v26 }
 0x763   : > { %12060 = vmatmul.mubr.bf16.gmra.mrb[216].mxu1 %v21859_v31 }
 0x764   : > { %12069 = vmatprep.mubr.bf16.mxu1 %v21888_v58  ;;  %v11149_v41 = vpop.f32.mrb[128].mxu0 }
 0x765   : > { %v14854_v44 = vadd.f32 %v11149_v41, %v22218_v9  ;;  %v11151_v19 = vpop.f32.mrb[129].mxu0 }
 0x766   : > { %v14855_v35 = vadd.f32 %v11151_v19, %v22224_v33  ;;  %v11153_v26 = vpop.f32.mrb[130].mxu0 }
 0x767   : > { %v14856_v0 = vadd.f32 %v11153_v26, %v22218_v9  ;;  %v11155_v50 = vpop.f32.mrb[131].mxu0  ;;  %v12080_v31 = vmax.f32 %v14854_v44, 0.0 }
 0x768   : > { %v14857_v17 = vadd.f32 %v11155_v50, %v22224_v33  ;;  %v12081_v4 = vmax.f32 %v14855_v35, 0.0 }
 0x769   : > { %v12084_v14 = vmax.f32 %v14856_v0, 0.0 }
 0x76a   : > { %v12085_v8 = vmax.f32 %v14857_v17, 0.0 }
 0x76b   : > { %12070 = vmatmul.mubr.bf16.gmra.mrb[220].mxu1 %v21883_v12  ;;  %v12208_v22 = vpack.c.bf16 %v12084_v14, %v12080_v31 }
 0x76c   : > { %v12209_v58 = vpack.c.bf16 %v12085_v8, %v12081_v4  ;;  %v11159_v47 = vpop.f32.mrb[132].mxu0 }
 0x76d   : > { %v14858_v57 = vadd.f32 %v11159_v47, %v22218_v9  ;;  %v11161_v13 = vpop.f32.mrb[133].mxu0 }
 0x76e   : > { %v14859_v62 = vadd.f32 %v11161_v13, %v22224_v33  ;;  %v11163_v42 = vpop.f32.mrb[134].mxu0  ;;  %12567 = vmatprep.mubr.bf16.mxu0 %v12209_v58 }
 0x76f   : > { %v14860_v15 = vadd.f32 %v11163_v42, %v22218_v9  ;;  %v11165_v56 = vpop.f32.mrb[135].mxu0  ;;  %12568 = vmatmul.mubr.bf16.vlgmr.msra.gmra.mrb[192].mxu0 %v12208_v22  ;;  %v12088_v1 = vmax.f32 %v14858_v57, 0.0 }
 0x770   : > { %v14861_v38 = vadd.f32 %v11165_v56, %v22224_v33  ;;  %v12089_v45 = vmax.f32 %v14859_v62, 0.0 }
 0x771   : > { %v12092_v37 = vmax.f32 %v14860_v15, 0.0 }
 0x772   : > { %v12093_v12 = vmax.f32 %v14861_v38, 0.0 }
 0x773   : > { %v12212_v16 = vpack.c.bf16 %v12092_v37, %v12088_v1 }
 0x774   : > { %v12213_v10 = vpack.c.bf16 %v12093_v12, %v12089_v45  ;;  %v11169_v18 = vpop.f32.mrb[136].mxu0 }
 0x775   : > { %v14862_v24 = vadd.f32 %v11169_v18, %v22218_v9  ;;  %v11171_v43 = vpop.f32.mrb[137].mxu0 }
 0x776   : > { %v14863_v11 = vadd.f32 %v11171_v43, %v22224_v33  ;;  %v11173_v49 = vpop.f32.mrb[138].mxu0  ;;  %12575 = vmatprep.mubr.bf16.mxu0 %v12213_v10 }
 0x777   : > { %v14864_v34 = vadd.f32 %v11173_v49, %v22218_v9  ;;  %v11175_v40 = vpop.f32.mrb[139].mxu0  ;;  %12576 = vmatmul.mubr.bf16.gmra.mrb[196].mxu0 %v12212_v16  ;;  %v12096_v23 = vmax.f32 %v14862_v24, 0.0 }
 0x778   : > { %v14865_v28 = vadd.f32 %v11175_v40, %v22224_v33  ;;  %v12097_v7 = vmax.f32 %v14863_v11, 0.0 }
 0x779   : > { %v12100_v46 = vmax.f32 %v14864_v34, 0.0 }
 0x77a   : > { %v12101_v36 = vmax.f32 %v14865_v28, 0.0 }
 0x77b   : > { %v12216_v61 = vpack.c.bf16 %v12100_v46, %v12096_v23 }
 0x77c   : > { %v12217_v60 = vpack.c.bf16 %v12101_v36, %v12097_v7  ;;  %v11179_v39 = vpop.f32.mrb[140].mxu0 }
 0x77d   : > { %v14866_v52 = vadd.f32 %v11179_v39, %v22218_v9  ;;  %v11181_v59 = vpop.f32.mrb[141].mxu0 }
 0x77e   : > { %v14867_v6 = vadd.f32 %v11181_v59, %v22224_v33  ;;  %v11183_v5 = vpop.f32.mrb[142].mxu0  ;;  %12583 = vmatprep.mubr.bf16.mxu0 %v12217_v60 }
 0x77f   : > { %v14868_v55 = vadd.f32 %v11183_v5, %v22218_v9  ;;  %v11185_v63 = vpop.f32.mrb[143].mxu0  ;;  %12584 = vmatmul.mubr.bf16.gmra.mrb[200].mxu0 %v12216_v61  ;;  %v12104_v21 = vmax.f32 %v14866_v52, 0.0 }
 0x780   : > { %v14869_v20 = vadd.f32 %v11185_v63, %v22224_v33  ;;  %v12105_v54 = vmax.f32 %v14867_v6, 0.0 }
 0x781   : > { %v12108_v32 = vmax.f32 %v14868_v55, 0.0 }
 0x782   : > { %v12109_v53 = vmax.f32 %v14869_v20, 0.0 }
 0x783   : > { %v12220_v25 = vpack.c.bf16 %v12108_v32, %v12104_v21 }
 0x784   : > { %v12221_v30 = vpack.c.bf16 %v12109_v53, %v12105_v54  ;;  %v11189_v27 = vpop.f32.mrb[144].mxu0 }
 0x785   : > { %v14870_v2 = vadd.f32 %v11189_v27, %v22218_v9  ;;  %v11191_v3 = vpop.f32.mrb[145].mxu0 }
 0x786   : > { %v14871_v48 = vadd.f32 %v11191_v3, %v22224_v33  ;;  %v11193_v41 = vpop.f32.mrb[146].mxu0  ;;  %12591 = vmatprep.mubr.bf16.mxu0 %v12221_v30 }
 0x787   : > { %v14872_v44 = vadd.f32 %v11193_v41, %v22218_v9  ;;  %v11195_v19 = vpop.f32.mrb[147].mxu0  ;;  %12592 = vmatmul.mubr.bf16.gmra.mrb[204].mxu0 %v12220_v25  ;;  %v12112_v26 = vmax.f32 %v14870_v2, 0.0 }
 0x788   : > { %v14873_v35 = vadd.f32 %v11195_v19, %v22224_v33  ;;  %v12113_v50 = vmax.f32 %v14871_v48, 0.0 }
 0x789   : > { %v12116_v0 = vmax.f32 %v14872_v44, 0.0 }
 0x78a   : > { %v12117_v17 = vmax.f32 %v14873_v35, 0.0 }
 0x78b   : > { %v12224_v31 = vpack.c.bf16 %v12116_v0, %v12112_v26 }
 0x78c   : > { %v12225_v14 = vpack.c.bf16 %v12117_v17, %v12113_v50  ;;  %v11199_v4 = vpop.f32.mrb[148].mxu0 }
 0x78d   : > { %v14874_v8 = vadd.f32 %v11199_v4, %v22218_v9  ;;  %v11201_v22 = vpop.f32.mrb[149].mxu0 }
 0x78e   : > { %v14875_v58 = vadd.f32 %v11201_v22, %v22224_v33  ;;  %v11203_v47 = vpop.f32.mrb[150].mxu0  ;;  %12599 = vmatprep.mubr.bf16.mxu0 %v12225_v14 }
 0x78f   : > { %v14876_v57 = vadd.f32 %v11203_v47, %v22218_v9  ;;  %v11205_v13 = vpop.f32.mrb[151].mxu0  ;;  %12600 = vmatmul.mubr.bf16.gmra.mrb[208].mxu0 %v12224_v31  ;;  %v12120_v42 = vmax.f32 %v14874_v8, 0.0 }
 0x790   : > { %v14877_v62 = vadd.f32 %v11205_v13, %v22224_v33  ;;  %v12121_v56 = vmax.f32 %v14875_v58, 0.0 }
 0x791   : > { %v12124_v15 = vmax.f32 %v14876_v57, 0.0 }
 0x792   : > { %v12125_v38 = vmax.f32 %v14877_v62, 0.0 }
 0x793   : > { %v12228_v1 = vpack.c.bf16 %v12124_v15, %v12120_v42 }
 0x794   : > { %v12229_v37 = vpack.c.bf16 %v12125_v38, %v12121_v56  ;;  %v11209_v45 = vpop.f32.mrb[152].mxu0 }
 0x795   : > { %v14878_v12 = vadd.f32 %v11209_v45, %v22218_v9  ;;  %v11211_v16 = vpop.f32.mrb[153].mxu0 }
 0x796   : > { %v14879_v10 = vadd.f32 %v11211_v16, %v22224_v33  ;;  %v11213_v18 = vpop.f32.mrb[154].mxu0  ;;  %12607 = vmatprep.mubr.bf16.mxu0 %v12229_v37 }
 0x797   : > { %v14880_v24 = vadd.f32 %v11213_v18, %v22218_v9  ;;  %v11215_v43 = vpop.f32.mrb[155].mxu0  ;;  %12608 = vmatmul.mubr.bf16.gmra.mrb[212].mxu0 %v12228_v1  ;;  %v12128_v49 = vmax.f32 %v14878_v12, 0.0 }
 0x798   : > { %v14881_v11 = vadd.f32 %v11215_v43, %v22224_v33  ;;  %v12129_v40 = vmax.f32 %v14879_v10, 0.0 }
 0x799   : > { %v12132_v34 = vmax.f32 %v14880_v24, 0.0 }
 0x79a   : > { %v12133_v28 = vmax.f32 %v14881_v11, 0.0 }
 0x79b   : > { %v12232_v23 = vpack.c.bf16 %v12132_v34, %v12128_v49 }
 0x79c   : > { %v12233_v46 = vpack.c.bf16 %v12133_v28, %v12129_v40  ;;  %v11219_v7 = vpop.f32.mrb[156].mxu0 }
 0x79d   : > { %v14882_v36 = vadd.f32 %v11219_v7, %v22218_v9  ;;  %v11221_v61 = vpop.f32.mrb[157].mxu0 }
 0x79e   : > { %v14883_v60 = vadd.f32 %v11221_v61, %v22224_v33  ;;  %v11223_v39 = vpop.f32.mrb[158].mxu0  ;;  %12615 = vmatprep.mubr.bf16.mxu0 %v12233_v46 }
 0x79f   : > { %v14884_v52 = vadd.f32 %v11223_v39, %v22218_v9  ;;  %v11225_v59 = vpop.f32.mrb[159].mxu0  ;;  %12616 = vmatmul.mubr.bf16.gmra.mrb[216].mxu0 %v12232_v23  ;;  %v12136_v5 = vmax.f32 %v14882_v36, 0.0 }
 0x7a0   : > { %v14885_v6 = vadd.f32 %v11225_v59, %v22224_v33  ;;  %v12137_v63 = vmax.f32 %v14883_v60, 0.0 }
 0x7a1   : > { %v12140_v55 = vmax.f32 %v14884_v52, 0.0 }
 0x7a2   : > { %v12141_v20 = vmax.f32 %v14885_v6, 0.0 }
 0x7a3   : > { %v12236_v21 = vpack.c.bf16 %v12140_v55, %v12136_v5  ;;  %v22902_v5 = vsub.s32 2, %v22899_v29 }
 0x7a4   : > { %v12237_v32 = vpack.c.bf16 %v12141_v20, %v12137_v63  ;;  %v11229_v54 = vpop.f32.mrb[160].mxu0  ;;  %v22903_v20 = vsub.s32 3, %v22899_v29 }
 0x7a5   : > { %v14886_v53 = vadd.f32 %v11229_v54, %v22218_v9  ;;  %v11231_v25 = vpop.f32.mrb[161].mxu0  ;;  %v22279_v55 = vrot.slane %v22213_v51, %v22902_v5 }
 0x7a6   : > { %v14887_v30 = vadd.f32 %v11231_v25, %v22224_v33  ;;  %v11233_v27 = vpop.f32.mrb[162].mxu0  ;;  %12623 = vmatprep.mubr.bf16.mxu0 %v12237_v32 }
 0x7a7   : > { %v14888_v2 = vadd.f32 %v11233_v27, %v22218_v9  ;;  %v11235_v3 = vpop.f32.mrb[163].mxu0  ;;  %12624 = vmatmul.mubr.bf16.gmra.mrb[220].mxu0 %v12236_v21  ;;  %v12144_v41 = vmax.f32 %v14886_v53, 0.0  ;;  %v22284_v21 = vrot.slane %v22213_v51, %v22903_v20 }
 0x7a8   : > { %v14889_v48 = vadd.f32 %v11235_v3, %v22224_v33  ;;  %v12145_v19 = vmax.f32 %v14887_v30, 0.0 }
 0x7a9   : > { %v12148_v44 = vmax.f32 %v14888_v2, 0.0 }
 0x7aa   : > { %v12149_v35 = vmax.f32 %v14889_v48, 0.0 }
 0x7ab   : > { %v12240_v26 = vpack.c.bf16 %v12148_v44, %v12144_v41 }
 0x7ac   : > { %v12241_v0 = vpack.c.bf16 %v12149_v35, %v12145_v19  ;;  %v11239_v50 = vpop.f32.mrb[164].mxu0 }
 0x7ad   : > { %v14890_v17 = vadd.f32 %v11239_v50, %v22218_v9  ;;  %v11241_v31 = vpop.f32.mrb[165].mxu0 }
 0x7ae   : > { %v14891_v14 = vadd.f32 %v11241_v31, %v22224_v33  ;;  %v11243_v4 = vpop.f32.mrb[166].mxu0  ;;  %12631 = vmatprep.mubr.bf16.mxu0 %v12241_v0 }
 0x7af   : > { %v14892_v8 = vadd.f32 %v11243_v4, %v22218_v9  ;;  %v11245_v22 = vpop.f32.mrb[167].mxu0  ;;  %12632 = vmatmul.mubr.bf16.gmra.mrb[224].mxu0 %v12240_v26  ;;  %v12152_v47 = vmax.f32 %v14890_v17, 0.0 }
 0x7b0   : > { %v14893_v58 = vadd.f32 %v11245_v22, %v22224_v33  ;;  %v12153_v13 = vmax.f32 %v14891_v14, 0.0 }
 0x7b1   : > { %v12156_v57 = vmax.f32 %v14892_v8, 0.0 }
 0x7b2   : > { %v12157_v62 = vmax.f32 %v14893_v58, 0.0 }
 0x7b3   : > { %v12244_v42 = vpack.c.bf16 %v12156_v57, %v12152_v47 }
 0x7b4   : > { %v12245_v15 = vpack.c.bf16 %v12157_v62, %v12153_v13  ;;  %v11249_v56 = vpop.f32.mrb[168].mxu0 }
 0x7b5   : > { %v14894_v38 = vadd.f32 %v11249_v56, %v22218_v9  ;;  %v11251_v1 = vpop.f32.mrb[169].mxu0 }
 0x7b6   : > { %v14895_v37 = vadd.f32 %v11251_v1, %v22224_v33  ;;  %v11253_v45 = vpop.f32.mrb[170].mxu0  ;;  %12639 = vmatprep.mubr.bf16.mxu0 %v12245_v15 }
 0x7b7   : > { %v14896_v12 = vadd.f32 %v11253_v45, %v22218_v9  ;;  %v11255_v16 = vpop.f32.mrb[171].mxu0  ;;  %12640 = vmatmul.mubr.bf16.gmra.mrb[228].mxu0 %v12244_v42  ;;  %v12160_v18 = vmax.f32 %v14894_v38, 0.0 }
 0x7b8   : > { %v14897_v10 = vadd.f32 %v11255_v16, %v22224_v33  ;;  %v12161_v43 = vmax.f32 %v14895_v37, 0.0 }
 0x7b9   : > { %v12164_v24 = vmax.f32 %v14896_v12, 0.0 }
 0x7ba   : > { %v12165_v11 = vmax.f32 %v14897_v10, 0.0 }
 0x7bb   : > { %v12248_v49 = vpack.c.bf16 %v12164_v24, %v12160_v18 }
 0x7bc   : > { %v12249_v34 = vpack.c.bf16 %v12165_v11, %v12161_v43  ;;  %v11259_v40 = vpop.f32.mrb[172].mxu0 }
 0x7bd   : > { %v14898_v28 = vadd.f32 %v11259_v40, %v22218_v9  ;;  %v11261_v23 = vpop.f32.mrb[173].mxu0 }
 0x7be   : > { %v14899_v46 = vadd.f32 %v11261_v23, %v22224_v33  ;;  %v11263_v7 = vpop.f32.mrb[174].mxu0  ;;  %12647 = vmatprep.mubr.bf16.mxu0 %v12249_v34 }
 0x7bf   : > { %v14900_v36 = vadd.f32 %v11263_v7, %v22218_v9  ;;  %v11265_v61 = vpop.f32.mrb[175].mxu0  ;;  %12648 = vmatmul.mubr.bf16.gmra.mrb[232].mxu0 %v12248_v49  ;;  %v12168_v39 = vmax.f32 %v14898_v28, 0.0 }
 0x7c0   : > { %v14901_v60 = vadd.f32 %v11265_v61, %v22224_v33  ;;  %v12169_v59 = vmax.f32 %v14899_v46, 0.0 }
 0x7c1   : > { %v12172_v52 = vmax.f32 %v14900_v36, 0.0 }
 0x7c2   : > { %v12173_v6 = vmax.f32 %v14901_v60, 0.0 }
 0x7c3   : > { %v12252_v63 = vpack.c.bf16 %v12172_v52, %v12168_v39 }
 0x7c4   : > { %v12253_v32 = vpack.c.bf16 %v12173_v6, %v12169_v59  ;;  %v11269_v54 = vpop.f32.mrb[176].mxu0 }
 0x7c5   : > { %v14902_v53 = vadd.f32 %v11269_v54, %v22218_v9  ;;  %v11271_v30 = vpop.f32.mrb[177].mxu0 }
 0x7c6   : > { %v11921_v25 = vpop.f32.mrb[160].mxu1  ;;  %v14903_v2 = vadd.f32 %v11271_v30, %v22224_v33  ;;  %v11273_v48 = vpop.f32.mrb[178].mxu0  ;;  %12655 = vmatprep.mubr.bf16.mxu0 %v12253_v32 }
 0x7c7   : > { %v14918_v27 = vadd.f32 %v11921_v25, %v22279_v55  ;;  %v11923_v3 = vpop.f32.mrb[161].mxu1  ;;  %v14904_v29 = vadd.f32 %v11273_v48, %v22218_v9  ;;  %v11275_v51 = vpop.f32.mrb[179].mxu0  ;;  %12656 = vmatmul.mubr.bf16.gmra.mrb[236].mxu0 %v12252_v63  ;;  %v12176_v0 = vmax.f32 %v14902_v53, 0.0 }
 0x7c8   : > { %v14919_v41 = vadd.f32 %v11923_v3, %v22284_v21  ;;  %v11925_v44 = vpop.f32.mrb[162].mxu1  ;;  %v14905_v35 = vadd.f32 %v11275_v51, %v22224_v33  ;;  %v12177_v14 = vmax.f32 %v14903_v2, 0.0 }
 0x7c9   : > { %v14920_v19 = vadd.f32 %v11925_v44, %v22279_v55  ;;  %v11927_v26 = vpop.f32.mrb[163].mxu1  ;;  %v12180_v50 = vmax.f32 %v14904_v29, 0.0  ;;  %v12082_v31 = vmax.f32 %v14918_v27, 0.0 }
 0x7ca   : > { %v14921_v17 = vadd.f32 %v11927_v26, %v22284_v21  ;;  %v12181_v8 = vmax.f32 %v14905_v35, 0.0  ;;  %v12083_v22 = vmax.f32 %v14919_v41, 0.0 }
 0x7cb   : > { %v12086_v4 = vmax.f32 %v14920_v19, 0.0  ;;  %v12256_v58 = vpack.c.bf16 %v12180_v50, %v12176_v0 }
 0x7cc   : > { %v12087_v47 = vmax.f32 %v14921_v17, 0.0  ;;  %v12257_v13 = vpack.c.bf16 %v12181_v8, %v12177_v14  ;;  %v11279_v62 = vpop.f32.mrb[180].mxu0 }
 0x7cd   : > { %v12210_v57 = vpack.c.bf16 %v12086_v4, %v12082_v31  ;;  %v14906_v15 = vadd.f32 %v11279_v62, %v22218_v9  ;;  %v11281_v38 = vpop.f32.mrb[181].mxu0 }
 0x7ce   : > { %v12211_v42 = vpack.c.bf16 %v12087_v47, %v12083_v22  ;;  %v11931_v56 = vpop.f32.mrb[164].mxu1  ;;  %v14907_v37 = vadd.f32 %v11281_v38, %v22224_v33  ;;  %v11283_v12 = vpop.f32.mrb[182].mxu0  ;;  %12663 = vmatprep.mubr.bf16.mxu0 %v12257_v13 }
 0x7cf   : > { %v14922_v1 = vadd.f32 %v11931_v56, %v22279_v55  ;;  %v11933_v45 = vpop.f32.mrb[165].mxu1  ;;  %v14908_v10 = vadd.f32 %v11283_v12, %v22218_v9  ;;  %v11285_v24 = vpop.f32.mrb[183].mxu0  ;;  %12664 = vmatmul.mubr.bf16.gmra.mrb[240].mxu0 %v12256_v58  ;;  %v12184_v34 = vmax.f32 %v14906_v15, 0.0 }
 0x7d0   : > { %v14923_v16 = vadd.f32 %v11933_v45, %v22284_v21  ;;  %v11935_v18 = vpop.f32.mrb[166].mxu1  ;;  %12728 = vmatprep.mubr.bf16.mxu1 %v12211_v42  ;;  %v14909_v11 = vadd.f32 %v11285_v24, %v22224_v33  ;;  %v12185_v46 = vmax.f32 %v14907_v37, 0.0 }
 0x7d1   : > { %v14924_v43 = vadd.f32 %v11935_v18, %v22279_v55  ;;  %v11937_v49 = vpop.f32.mrb[167].mxu1  ;;  %12729 = vmatmul.mubr.bf16.vlgmr.msra.gmra.mrb[224].mxu1 %v12210_v57  ;;  %v12188_v40 = vmax.f32 %v14908_v10, 0.0  ;;  %v12090_v23 = vmax.f32 %v14922_v1, 0.0 }
 0x7d2   : > { %v14925_v28 = vadd.f32 %v11937_v49, %v22284_v21  ;;  %v12189_v36 = vmax.f32 %v14909_v11, 0.0  ;;  %v12091_v61 = vmax.f32 %v14923_v16, 0.0 }
 0x7d3   : > { %v12094_v7 = vmax.f32 %v14924_v43, 0.0  ;;  %v12260_v60 = vpack.c.bf16 %v12188_v40, %v12184_v34 }
 0x7d4   : > { %v12095_v39 = vmax.f32 %v14925_v28, 0.0  ;;  %v12261_v59 = vpack.c.bf16 %v12189_v36, %v12185_v46  ;;  %v11289_v6 = vpop.f32.mrb[184].mxu0 }
 0x7d5   : > { %v12214_v52 = vpack.c.bf16 %v12094_v7, %v12090_v23  ;;  %v14910_v63 = vadd.f32 %v11289_v6, %v22218_v9  ;;  %v11291_v32 = vpop.f32.mrb[185].mxu0 }
 0x7d6   : > { %v12215_v5 = vpack.c.bf16 %v12095_v39, %v12091_v61  ;;  %v11941_v20 = vpop.f32.mrb[168].mxu1  ;;  %v14911_v53 = vadd.f32 %v11291_v32, %v22224_v33  ;;  %v11293_v30 = vpop.f32.mrb[186].mxu0  ;;  %12671 = vmatprep.mubr.bf16.mxu0 %v12261_v59 }
 0x7d7   : > { %v14926_v54 = vadd.f32 %v11941_v20, %v22279_v55  ;;  %v11943_v25 = vpop.f32.mrb[169].mxu1  ;;  %v14912_v2 = vadd.f32 %v11293_v30, %v22218_v9  ;;  %v11295_v48 = vpop.f32.mrb[187].mxu0  ;;  %12672 = vmatmul.mubr.bf16.gmra.mrb[244].mxu0 %v12260_v60  ;;  %v12192_v51 = vmax.f32 %v14910_v63, 0.0 }
 0x7d8   : > { %v14927_v27 = vadd.f32 %v11943_v25, %v22284_v21  ;;  %v11945_v3 = vpop.f32.mrb[170].mxu1  ;;  %12736 = vmatprep.mubr.bf16.mxu1 %v12215_v5  ;;  %v14913_v29 = vadd.f32 %v11295_v48, %v22224_v33  ;;  %v12193_v0 = vmax.f32 %v14911_v53, 0.0 }
 0x7d9   : > { %v14928_v41 = vadd.f32 %v11945_v3, %v22279_v55  ;;  %v11947_v44 = vpop.f32.mrb[171].mxu1  ;;  %12737 = vmatmul.mubr.bf16.gmra.mrb[228].mxu1 %v12214_v52  ;;  %v12196_v19 = vmax.f32 %v14912_v2, 0.0  ;;  %v12098_v26 = vmax.f32 %v14926_v54, 0.0 }
 0x7da   : > { %v14929_v35 = vadd.f32 %v11947_v44, %v22284_v21  ;;  %v12197_v17 = vmax.f32 %v14913_v29, 0.0  ;;  %v12099_v31 = vmax.f32 %v14927_v27, 0.0 }
 0x7db   : > { %v12102_v50 = vmax.f32 %v14928_v41, 0.0  ;;  %v12264_v14 = vpack.c.bf16 %v12196_v19, %v12192_v51  ;;  %v16992_v51 = vld [vmem:[%s22608_s7] sm:$0xff]  }
 0x7dc   : > { %v12103_v4 = vmax.f32 %v14929_v35, 0.0  ;;  %v12265_v22 = vpack.c.bf16 %v12197_v17, %v12193_v0  ;;  %v11299_v58 = vpop.f32.mrb[188].mxu0  ;;  %14502 = vmatprep.subr.bf16.mxu0 %v16992_v51 }
 0x7dd   : > { %v12218_v8 = vpack.c.bf16 %v12102_v50, %v12098_v26  ;;  %v14914_v57 = vadd.f32 %v11299_v58, %v22218_v9  ;;  %v11301_v62 = vpop.f32.mrb[189].mxu0  ;;  %14503 = vmatpush3.bf16.msra.mxu0 %v16992_v51 }
 0x7de   : > { %v12219_v47 = vpack.c.bf16 %v12103_v4, %v12099_v31  ;;  %v11951_v13 = vpop.f32.mrb[172].mxu1  ;;  %v14915_v15 = vadd.f32 %v11301_v62, %v22224_v33  ;;  %v11303_v38 = vpop.f32.mrb[190].mxu0  ;;  %12679 = vmatprep.mubr.bf16.mxu0 %v12265_v22 }
 0x7df   : > { %v14930_v42 = vadd.f32 %v11951_v13, %v22279_v55  ;;  %v11953_v56 = vpop.f32.mrb[173].mxu1  ;;  %v14916_v37 = vadd.f32 %v11303_v38, %v22218_v9  ;;  %v11305_v12 = vpop.f32.mrb[191].mxu0  ;;  %12680 = vmatmul.mubr.bf16.gmra.mrb[248].mxu0 %v12264_v14  ;;  %v12200_v24 = vmax.f32 %v14914_v57, 0.0 }
 0x7e0   : > { %v14931_v1 = vadd.f32 %v11953_v56, %v22284_v21  ;;  %v11955_v45 = vpop.f32.mrb[174].mxu1  ;;  %12744 = vmatprep.mubr.bf16.mxu1 %v12219_v47  ;;  %v14917_v10 = vadd.f32 %v11305_v12, %v22224_v33  ;;  %v12201_v34 = vmax.f32 %v14915_v15, 0.0 }
 0x7e1   : > { %v14932_v16 = vadd.f32 %v11955_v45, %v22279_v55  ;;  %v11957_v18 = vpop.f32.mrb[175].mxu1  ;;  %12745 = vmatmul.mubr.bf16.gmra.mrb[232].mxu1 %v12218_v8  ;;  %v12204_v43 = vmax.f32 %v14916_v37, 0.0  ;;  %v12106_v49 = vmax.f32 %v14930_v42, 0.0 }
 0x7e2   : > { %v14933_v11 = vadd.f32 %v11957_v18, %v22284_v21  ;;  %v12205_v28 = vmax.f32 %v14917_v10, 0.0  ;;  %v12107_v23 = vmax.f32 %v14931_v1, 0.0 }
 0x7e3   : > { %v12110_v40 = vmax.f32 %v14932_v16, 0.0  ;;  %v12268_v9 = vpack.c.bf16 %v12204_v43, %v12200_v24  ;;  %v16993_v43 = vld [vmem:[%s22608_s7 + $0x8] sm:$0xff]  }
 0x7e4   : > { %v12111_v46 = vmax.f32 %v14933_v11, 0.0  ;;  %v12269_v36 = vpack.c.bf16 %v12205_v28, %v12201_v34  ;;  %14504 = vmatprep.subr.bf16.mxu0 %v16993_v43 }
 0x7e5   : > { %v12222_v7 = vpack.c.bf16 %v12110_v40, %v12106_v49  ;;  %14505 = vmatpush3.bf16.msra.mxu0 %v16993_v43 }
 0x7e6   : > { %v12223_v61 = vpack.c.bf16 %v12111_v46, %v12107_v23  ;;  %v11961_v60 = vpop.f32.mrb[176].mxu1  ;;  %12687 = vmatprep.mubr.bf16.mxu0 %v12269_v36 }
 0x7e7   : > { %v14934_v39 = vadd.f32 %v11961_v60, %v22279_v55  ;;  %v11963_v33 = vpop.f32.mrb[177].mxu1  ;;  %12688 = vmatmul.mubr.bf16.gmra.mrb[252].mxu0 %v12268_v9 }
 0x7e8   : > { %v14935_v52 = vadd.f32 %v11963_v33, %v22284_v21  ;;  %v11965_v59 = vpop.f32.mrb[178].mxu1  ;;  %12752 = vmatprep.mubr.bf16.mxu1 %v12223_v61 }
 0x7e9   : > { %v14936_v6 = vadd.f32 %v11965_v59, %v22279_v55  ;;  %v11967_v5 = vpop.f32.mrb[179].mxu1  ;;  %12753 = vmatmul.mubr.bf16.gmra.mrb[236].mxu1 %v12222_v7  ;;  %v12114_v20 = vmax.f32 %v14934_v39, 0.0 }
 0x7ea   : > { %v14937_v63 = vadd.f32 %v11967_v5, %v22284_v21  ;;  %v12115_v54 = vmax.f32 %v14935_v52, 0.0 }
 0x7eb   : > { %v12118_v32 = vmax.f32 %v14936_v6, 0.0 }
 0x7ec   : > { %v12119_v53 = vmax.f32 %v14937_v63, 0.0 }
 0x7ed   : > { %v12226_v25 = vpack.c.bf16 %v12118_v32, %v12114_v20 }
 0x7ee   : > { %v12227_v30 = vpack.c.bf16 %v12119_v53, %v12115_v54  ;;  %v11971_v27 = vpop.f32.mrb[180].mxu1 }
 0x7ef   : > { %v14938_v2 = vadd.f32 %v11971_v27, %v22279_v55  ;;  %v11973_v3 = vpop.f32.mrb[181].mxu1 }
 0x7f0   : > { %v14939_v48 = vadd.f32 %v11973_v3, %v22284_v21  ;;  %v11975_v41 = vpop.f32.mrb[182].mxu1  ;;  %12760 = vmatprep.mubr.bf16.mxu1 %v12227_v30 }
 0x7f1   : > { %v14940_v29 = vadd.f32 %v11975_v41, %v22279_v55  ;;  %v11977_v44 = vpop.f32.mrb[183].mxu1  ;;  %12761 = vmatmul.mubr.bf16.gmra.mrb[240].mxu1 %v12226_v25  ;;  %v12122_v35 = vmax.f32 %v14938_v2, 0.0 }
 0x7f2   : > { %v14941_v19 = vadd.f32 %v11977_v44, %v22284_v21  ;;  %v12123_v0 = vmax.f32 %v14939_v48, 0.0  ;;  %v16994_v48 = vld [vmem:[%s22608_s7 + $0x10] sm:$0xff]  }
 0x7f3   : > { %v12126_v26 = vmax.f32 %v14940_v29, 0.0  ;;  %14506 = vmatprep.subr.bf16.mxu0 %v16994_v48 }
 0x7f4   : > { %v12127_v50 = vmax.f32 %v14941_v19, 0.0  ;;  %14507 = vmatpush3.bf16.msra.mxu0 %v16994_v48  ;;  %v16999_v48 = vld [vmem:[%s22608_s7 + $0x38] sm:$0xff]  }
 0x7f5   : > { %v12230_v17 = vpack.c.bf16 %v12126_v26, %v12122_v35 }
 0x7f6   : > { %v12231_v31 = vpack.c.bf16 %v12127_v50, %v12123_v0  ;;  %v11981_v14 = vpop.f32.mrb[184].mxu1 }
 0x7f7   : > { %v14942_v4 = vadd.f32 %v11981_v14, %v22279_v55  ;;  %v11983_v8 = vpop.f32.mrb[185].mxu1 }
 0x7f8   : > { %v14943_v22 = vadd.f32 %v11983_v8, %v22284_v21  ;;  %v11985_v58 = vpop.f32.mrb[186].mxu1  ;;  %12768 = vmatprep.mubr.bf16.mxu1 %v12231_v31 }
 0x7f9   : > { %v14944_v47 = vadd.f32 %v11985_v58, %v22279_v55  ;;  %v11987_v57 = vpop.f32.mrb[187].mxu1  ;;  %12769 = vmatmul.mubr.bf16.gmra.mrb[244].mxu1 %v12230_v17  ;;  %v12130_v62 = vmax.f32 %v14942_v4, 0.0 }
 0x7fa   : > { %v14945_v13 = vadd.f32 %v11987_v57, %v22284_v21  ;;  %v12131_v15 = vmax.f32 %v14943_v22, 0.0 }
 0x7fb   : > { %v12134_v42 = vmax.f32 %v14944_v47, 0.0 }
 0x7fc   : > { %v12135_v56 = vmax.f32 %v14945_v13, 0.0 }
 0x7fd   : > { %v12234_v38 = vpack.c.bf16 %v12134_v42, %v12130_v62 }
 0x7fe   : > { %v12235_v1 = vpack.c.bf16 %v12135_v56, %v12131_v15  ;;  %v11991_v37 = vpop.f32.mrb[188].mxu1 }
 0x7ff   : > { %v14946_v45 = vadd.f32 %v11991_v37, %v22279_v55  ;;  %v11993_v12 = vpop.f32.mrb[189].mxu1 }
 0x800   : > { %v14947_v16 = vadd.f32 %v11993_v12, %v22284_v21  ;;  %v11995_v10 = vpop.f32.mrb[190].mxu1  ;;  %12776 = vmatprep.mubr.bf16.mxu1 %v12235_v1 }
 0x801   : > { %v14948_v18 = vadd.f32 %v11995_v10, %v22279_v55  ;;  %v11997_v24 = vpop.f32.mrb[191].mxu1  ;;  %12777 = vmatmul.mubr.bf16.gmra.mrb[248].mxu1 %v12234_v38  ;;  %v12138_v49 = vmax.f32 %v14946_v45, 0.0 }
 0x802   : > { %v14949_v11 = vadd.f32 %v11997_v24, %v22284_v21  ;;  %v12139_v40 = vmax.f32 %v14947_v16, 0.0  ;;  %v16995_v16 = vld [vmem:[%s22608_s7 + $0x18] sm:$0xff]  }
 0x803   : > { %v12142_v34 = vmax.f32 %v14948_v18, 0.0  ;;  %14508 = vmatprep.subr.bf16.mxu0 %v16995_v16 }
 0x804   : > { %v12143_v28 = vmax.f32 %v14949_v11, 0.0  ;;  %14509 = vmatpush3.bf16.msra.mxu0 %v16995_v16 }
 0x805   : > { %v12238_v23 = vpack.c.bf16 %v12142_v34, %v12138_v49 }
 0x806   : > { %v12239_v9 = vpack.c.bf16 %v12143_v28, %v12139_v40  ;;  %v12001_v46 = vpop.f32.mrb[192].mxu1  ;;  %v16996_v28 = vld [vmem:[%s22608_s7 + $0x20] sm:$0xff]  }
 0x807   : > { %v14950_v7 = vadd.f32 %v12001_v46, %v22279_v55  ;;  %v12003_v36 = vpop.f32.mrb[193].mxu1  ;;  %14510 = vmatprep.subr.bf16.mxu0 %v16996_v28 }
 0x808   : > { %v14951_v61 = vadd.f32 %v12003_v36, %v22284_v21  ;;  %v12005_v60 = vpop.f32.mrb[194].mxu1  ;;  %12784 = vmatprep.mubr.bf16.mxu1 %v12239_v9  ;;  %14511 = vmatpush3.bf16.msra.mxu0 %v16996_v28 }
 0x809   : > { %v14952_v39 = vadd.f32 %v12005_v60, %v22279_v55  ;;  %v12007_v33 = vpop.f32.mrb[195].mxu1  ;;  %12785 = vmatmul.mubr.bf16.gmra.mrb[252].mxu1 %v12238_v23  ;;  %v12146_v59 = vmax.f32 %v14950_v7, 0.0 }
 0x80a   : > { %v14953_v52 = vadd.f32 %v12007_v33, %v22284_v21  ;;  %v12147_v5 = vmax.f32 %v14951_v61, 0.0 }
 0x80b   : > { %v12150_v6 = vmax.f32 %v14952_v39, 0.0  ;;  %v16997_v39 = vld [vmem:[%s22608_s7 + $0x28] sm:$0xff]  }
 0x80c   : > { %v12151_v63 = vmax.f32 %v14953_v52, 0.0  ;;  %14512 = vmatprep.subr.bf16.mxu0 %v16997_v39 }
 0x80d   : > { %v12242_v20 = vpack.c.bf16 %v12150_v6, %v12146_v59  ;;  %14513 = vmatpush3.bf16.msra.mxu0 %v16997_v39 }
 0x80e   : > { %v12243_v32 = vpack.c.bf16 %v12151_v63, %v12147_v5  ;;  %v12011_v54 = vpop.f32.mrb[196].mxu1 }
 0x80f   : > { %v14954_v53 = vadd.f32 %v12011_v54, %v22279_v55  ;;  %v12013_v25 = vpop.f32.mrb[197].mxu1 }
 0x810   : > { %v14955_v30 = vadd.f32 %v12013_v25, %v22284_v21  ;;  %v12015_v27 = vpop.f32.mrb[198].mxu1  ;;  %12792 = vmatprep.mubr.bf16.mxu1 %v12243_v32  ;;  %v16998_v32 = vld [vmem:[%s22608_s7 + $0x30] sm:$0xff]  }
 0x811   : > { %v14956_v2 = vadd.f32 %v12015_v27, %v22279_v55  ;;  %v12017_v3 = vpop.f32.mrb[199].mxu1  ;;  %12793 = vmatmul.mubr.bf16.gmra.mrb[0].mxu1 %v12242_v20  ;;  %v12154_v29 = vmax.f32 %v14954_v53, 0.0  ;;  %14514 = vmatprep.subr.bf16.mxu0 %v16998_v32 }
 0x812   : > { %v14957_v41 = vadd.f32 %v12017_v3, %v22284_v21  ;;  %v12155_v51 = vmax.f32 %v14955_v30, 0.0  ;;  %14515 = vmatpush3.bf16.msra.mxu0 %v16998_v32 }
 0x813   : > { %v12158_v44 = vmax.f32 %v14956_v2, 0.0  ;;  %14516 = vmatprep.subr.bf16.mxu0 %v16999_v48 }
 0x814   : > { %v12159_v19 = vmax.f32 %v14957_v41, 0.0 }
 0x815   : > { %v12246_v35 = vpack.c.bf16 %v12158_v44, %v12154_v29 }
 0x816   : > { %v12247_v26 = vpack.c.bf16 %v12159_v19, %v12155_v51  ;;  %v12021_v0 = vpop.f32.mrb[200].mxu1  ;;  %14517 = vmatpush3.bf16.msra.mxu0 %v16999_v48 }
 0x817   : > { %v14958_v50 = vadd.f32 %v12021_v0, %v22279_v55  ;;  %v12023_v17 = vpop.f32.mrb[201].mxu1 }
 0x818   : > { %v14959_v31 = vadd.f32 %v12023_v17, %v22284_v21  ;;  %v12025_v14 = vpop.f32.mrb[202].mxu1  ;;  %12800 = vmatprep.mubr.bf16.mxu1 %v12247_v26 }
 0x819   : > { %v14960_v4 = vadd.f32 %v12025_v14, %v22279_v55  ;;  %v12027_v8 = vpop.f32.mrb[203].mxu1  ;;  %12801 = vmatmul.mubr.bf16.gmra.mrb[4].mxu1 %v12246_v35  ;;  %v12162_v58 = vmax.f32 %v14958_v50, 0.0 }
 0x81a   : > { %v14961_v22 = vadd.f32 %v12027_v8, %v22284_v21  ;;  %v12163_v57 = vmax.f32 %v14959_v31, 0.0 }
 0x81b   : > { %v12166_v47 = vmax.f32 %v14960_v4, 0.0 }
 0x81c   : > { %v12167_v13 = vmax.f32 %v14961_v22, 0.0 }
 0x81d   : > { %v12250_v62 = vpack.c.bf16 %v12166_v47, %v12162_v58 }
 0x81e   : > { %v12251_v42 = vpack.c.bf16 %v12167_v13, %v12163_v57  ;;  %v12031_v15 = vpop.f32.mrb[204].mxu1 }
 0x81f   : > { %v14962_v56 = vadd.f32 %v12031_v15, %v22279_v55  ;;  %v12033_v38 = vpop.f32.mrb[205].mxu1 }
 0x820   : > { %v14963_v1 = vadd.f32 %v12033_v38, %v22284_v21  ;;  %v12035_v37 = vpop.f32.mrb[206].mxu1  ;;  %12808 = vmatprep.mubr.bf16.mxu1 %v12251_v42 }
 0x821   : > { %v14964_v45 = vadd.f32 %v12035_v37, %v22279_v55  ;;  %v12037_v12 = vpop.f32.mrb[207].mxu1  ;;  %12809 = vmatmul.mubr.bf16.gmra.mrb[8].mxu1 %v12250_v62  ;;  %v12170_v18 = vmax.f32 %v14962_v56, 0.0 }
 0x822   : > { %v14965_v10 = vadd.f32 %v12037_v12, %v22284_v21  ;;  %v12171_v43 = vmax.f32 %v14963_v1, 0.0 }
 0x823   : > { %v12174_v24 = vmax.f32 %v14964_v45, 0.0 }
 0x824   : > { %v12175_v11 = vmax.f32 %v14965_v10, 0.0 }
 0x825   : > { %v12254_v49 = vpack.c.bf16 %v12174_v24, %v12170_v18 }
 0x826   : > { %v12255_v34 = vpack.c.bf16 %v12175_v11, %v12171_v43  ;;  %v12041_v40 = vpop.f32.mrb[208].mxu1 }
 0x827   : > { %v14966_v23 = vadd.f32 %v12041_v40, %v22279_v55  ;;  %v12043_v9 = vpop.f32.mrb[209].mxu1 }
 0x828   : > { %v14967_v46 = vadd.f32 %v12043_v9, %v22284_v21  ;;  %v12045_v7 = vpop.f32.mrb[210].mxu1  ;;  %12816 = vmatprep.mubr.bf16.mxu1 %v12255_v34 }
 0x829   : > { %v14968_v36 = vadd.f32 %v12045_v7, %v22279_v55  ;;  %v12047_v61 = vpop.f32.mrb[211].mxu1  ;;  %12817 = vmatmul.mubr.bf16.gmra.mrb[12].mxu1 %v12254_v49  ;;  %v12178_v33 = vmax.f32 %v14966_v23, 0.0 }
 0x82a   : > { %v14969_v60 = vadd.f32 %v12047_v61, %v22284_v21  ;;  %v12179_v59 = vmax.f32 %v14967_v46, 0.0 }
 0x82b   : > { %v12182_v52 = vmax.f32 %v14968_v36, 0.0 }
 0x82c   : > { %v12183_v6 = vmax.f32 %v14969_v60, 0.0 }
 0x82d   : > { %v12258_v5 = vpack.c.bf16 %v12182_v52, %v12178_v33 }
 0x82e   : > { %v12259_v63 = vpack.c.bf16 %v12183_v6, %v12179_v59  ;;  %v12051_v20 = vpop.f32.mrb[212].mxu1 }
 0x82f   : > { %v14970_v54 = vadd.f32 %v12051_v20, %v22279_v55  ;;  %v12053_v53 = vpop.f32.mrb[213].mxu1 }
 0x830   : > { %v14971_v25 = vadd.f32 %v12053_v53, %v22284_v21  ;;  %v12055_v30 = vpop.f32.mrb[214].mxu1  ;;  %12824 = vmatprep.mubr.bf16.mxu1 %v12259_v63 }
 0x831   : > { %v14972_v27 = vadd.f32 %v12055_v30, %v22279_v55  ;;  %v12057_v2 = vpop.f32.mrb[215].mxu1  ;;  %12825 = vmatmul.mubr.bf16.gmra.mrb[16].mxu1 %v12258_v5  ;;  %v12186_v41 = vmax.f32 %v14970_v54, 0.0 }
 0x832   : > { %v14973_v3 = vadd.f32 %v12057_v2, %v22284_v21  ;;  %v12187_v44 = vmax.f32 %v14971_v25, 0.0 }
 0x833   : > { %v12190_v29 = vmax.f32 %v14972_v27, 0.0 }
 0x834   : > { %v12191_v51 = vmax.f32 %v14973_v3, 0.0 }
 0x835   : > { %v12262_v19 = vpack.c.bf16 %v12190_v29, %v12186_v41 }
 0x836   : > { %v12263_v35 = vpack.c.bf16 %v12191_v51, %v12187_v44  ;;  %v12061_v26 = vpop.f32.mrb[216].mxu1 }
 0x837   : > { %v14974_v0 = vadd.f32 %v12061_v26, %v22279_v55  ;;  %v12063_v50 = vpop.f32.mrb[217].mxu1 }
 0x838   : > { %v14975_v17 = vadd.f32 %v12063_v50, %v22284_v21  ;;  %v12065_v31 = vpop.f32.mrb[218].mxu1  ;;  %12832 = vmatprep.mubr.bf16.mxu1 %v12263_v35 }
 0x839   : > { %v14976_v14 = vadd.f32 %v12065_v31, %v22279_v55  ;;  %v12067_v4 = vpop.f32.mrb[219].mxu1  ;;  %12833 = vmatmul.mubr.bf16.gmra.mrb[20].mxu1 %v12262_v19  ;;  %v12194_v22 = vmax.f32 %v14974_v0, 0.0 }
 0x83a   : > { %v14977_v8 = vadd.f32 %v12067_v4, %v22284_v21  ;;  %v12195_v47 = vmax.f32 %v14975_v17, 0.0 }
 0x83b   : > { %v12198_v58 = vmax.f32 %v14976_v14, 0.0 }
 0x83c   : > { %v12199_v57 = vmax.f32 %v14977_v8, 0.0 }
 0x83d   : > { %v12266_v13 = vpack.c.bf16 %v12198_v58, %v12194_v22 }
 0x83e   : > { %v12267_v62 = vpack.c.bf16 %v12199_v57, %v12195_v47  ;;  %v12071_v42 = vpop.f32.mrb[220].mxu1 }
 0x83f   : > { %v14978_v15 = vadd.f32 %v12071_v42, %v22279_v55  ;;  %v12073_v56 = vpop.f32.mrb[221].mxu1 }
 0x840   : > { %v14979_v38 = vadd.f32 %v12073_v56, %v22284_v21  ;;  %v12075_v1 = vpop.f32.mrb[222].mxu1  ;;  %12840 = vmatprep.mubr.bf16.mxu1 %v12267_v62 }
 0x841   : > { %v14980_v37 = vadd.f32 %v12075_v1, %v22279_v55  ;;  %v12077_v45 = vpop.f32.mrb[223].mxu1  ;;  %12841 = vmatmul.mubr.bf16.gmra.mrb[24].mxu1 %v12266_v13  ;;  %v12202_v16 = vmax.f32 %v14978_v15, 0.0 }
 0x842   : > { %v14981_v12 = vadd.f32 %v12077_v45, %v22284_v21  ;;  %v14270_v18 = vpop.f32.mrb[192].mxu0  ;;  %v12203_v24 = vmax.f32 %v14979_v38, 0.0 }
 0x843   : > { %v12206_v10 = vmax.f32 %v14980_v37, 0.0  ;;  %v14271_v11 = vpop.f32.mrb[193].mxu0 }
 0x844   : > { %v12207_v43 = vmax.f32 %v14981_v12, 0.0  ;;  %v22390_v34 = vadd.f32 %v14271_v11, %v14270_v18  ;;  %v14273_v40 = vpop.f32.mrb[194].mxu0 }
 0x845   : > { %v12270_v49 = vpack.c.bf16 %v12206_v10, %v12202_v16  ;;  %v14274_v23 = vpop.f32.mrb[195].mxu0 }
 0x846   : > { %v12271_v28 = vpack.c.bf16 %v12207_v43, %v12203_v24  ;;  %v22392_v9 = vadd.f32 %v14274_v23, %v14273_v40 }
 0x848   : > { %12848 = vmatprep.mubr.bf16.mxu1 %v12271_v28 }
 0x849   : > { %12849 = vmatmul.mubr.bf16.gmra.mrb[28].mxu1 %v12270_v49 }
 0x84a   : > { %v14276_v55 = vpop.f32.mrb[196].mxu0 }
 0x84b   : > { %v14277_v46 = vpop.f32.mrb[197].mxu0 }
 0x84c   : > { %v22394_v7 = vadd.f32 %v14277_v46, %v14276_v55  ;;  %v14279_v21 = vpop.f32.mrb[198].mxu0 }
 0x84d   : > { %v14280_v36 = vpop.f32.mrb[199].mxu0 }
 0x84e   : > { %v22396_v61 = vadd.f32 %v14280_v36, %v14279_v21 }
 0x852   : > { %v14282_v60 = vpop.f32.mrb[200].mxu0 }
 0x853   : > { %v14283_v39 = vpop.f32.mrb[201].mxu0 }
 0x854   : > { %v22398_v33 = vadd.f32 %v14283_v39, %v14282_v60  ;;  %v14285_v52 = vpop.f32.mrb[202].mxu0  ;;  %v22441_v60 = vld [vmem:[%s22607_s6] ss:$0 sm:$0xff] }
 0x855   : > { %v14286_v59 = vpop.f32.mrb[203].mxu0 }
 0x856   : > { %v22400_v6 = vadd.f32 %v14286_v59, %v14285_v52 }
 0x85a   : > { %v14288_v5 = vpop.f32.mrb[204].mxu0 }
 0x85b   : > { %v14289_v63 = vpop.f32.mrb[205].mxu0 }
 0x85c   : > { %v22402_v20 = vadd.f32 %v14289_v63, %v14288_v5  ;;  %v14291_v32 = vpop.f32.mrb[206].mxu0 }
 0x85d   : > { %v14292_v54 = vpop.f32.mrb[207].mxu0 }
 0x85e   : > { %v22404_v53 = vadd.f32 %v14292_v54, %v14291_v32  ;;  %v12570_v54 = vadd.f32 %v22390_v34, %v22441_v60 }
 0x862   : > { %v14294_v25 = vpop.f32.mrb[208].mxu0 }
 0x863   : > { %v14295_v30 = vpop.f32.mrb[209].mxu0 }
 0x864   : > { %v22406_v27 = vadd.f32 %v14295_v30, %v14294_v25  ;;  %v14297_v2 = vpop.f32.mrb[210].mxu0 }
 0x865   : > { %v14298_v3 = vpop.f32.mrb[211].mxu0 }
 0x866   : > { %v22408_v48 = vadd.f32 %v14298_v3, %v14297_v2 }
 0x86a   : > { %v14300_v41 = vpop.f32.mrb[212].mxu0 }
 0x86b   : > { %v14301_v29 = vpop.f32.mrb[213].mxu0 }
 0x86c   : > { %v22410_v44 = vadd.f32 %v14301_v29, %v14300_v41  ;;  %v14303_v51 = vpop.f32.mrb[214].mxu0  ;;  %v12573_v29 = vadd.f32 %v22392_v9, %v22441_v60 }
 0x86d   : > { %v14304_v19 = vpop.f32.mrb[215].mxu0 }
 0x86e   : > { %v22412_v35 = vadd.f32 %v14304_v19, %v14303_v51 }
 0x872   : > { %v14306_v26 = vpop.f32.mrb[216].mxu0 }
 0x873   : > { %v14307_v0 = vpop.f32.mrb[217].mxu0 }
 0x874   : > { %v22414_v50 = vadd.f32 %v14307_v0, %v14306_v26  ;;  %v14309_v17 = vpop.f32.mrb[218].mxu0 }
 0x875   : > { %v14310_v31 = vpop.f32.mrb[219].mxu0 }
 0x876   : > { %v22416_v14 = vadd.f32 %v14310_v31, %v14309_v17 }
 0x87a   : > { %v14312_v4 = vpop.f32.mrb[220].mxu0 }
 0x87b   : > { %v14313_v8 = vpop.f32.mrb[221].mxu0 }
 0x87c   : > { %v22418_v22 = vadd.f32 %v14313_v8, %v14312_v4  ;;  %v14315_v58 = vpop.f32.mrb[222].mxu0 }
 0x87d   : > { %v14316_v47 = vpop.f32.mrb[223].mxu0 }
 0x87e   : > { %v22420_v57 = vadd.f32 %v14316_v47, %v14315_v58 }
 0x882   : > { %v14318_v13 = vpop.f32.mrb[224].mxu0 }
 0x883   : > { %v14319_v62 = vpop.f32.mrb[225].mxu0 }
 0x884   : > { %v22422_v42 = vadd.f32 %v14319_v62, %v14318_v13  ;;  %v14321_v15 = vpop.f32.mrb[226].mxu0  ;;  %v12578_v13 = vadd.f32 %v22394_v7, %v22441_v60 }
 0x885   : > { %v14322_v56 = vpop.f32.mrb[227].mxu0 }
 0x886   : > { %v22424_v38 = vadd.f32 %v14322_v56, %v14321_v15 }
 0x88a   : > { %v14324_v1 = vpop.f32.mrb[228].mxu0 }
 0x88b   : > { %v14325_v37 = vpop.f32.mrb[229].mxu0 }
 0x88c   : > { %v22426_v45 = vadd.f32 %v14325_v37, %v14324_v1  ;;  %v14327_v12 = vpop.f32.mrb[230].mxu0 }
 0x88d   : > { %v14328_v16 = vpop.f32.mrb[231].mxu0 }
 0x88e   : > { %v22428_v10 = vadd.f32 %v14328_v16, %v14327_v12  ;;  %v12581_v12 = vadd.f32 %v22396_v61, %v22441_v60 }
 0x892   : > { %v14330_v18 = vpop.f32.mrb[232].mxu0 }
 0x893   : > { %v14331_v24 = vpop.f32.mrb[233].mxu0 }
 0x894   : > { %v22430_v43 = vadd.f32 %v14331_v24, %v14330_v18  ;;  %v14333_v11 = vpop.f32.mrb[234].mxu0 }
 0x895   : > { %v14334_v49 = vpop.f32.mrb[235].mxu0 }
 0x896   : > { %v22432_v40 = vadd.f32 %v14334_v49, %v14333_v11 }
 0x89a   : > { %v14336_v28 = vpop.f32.mrb[236].mxu0 }
 0x89b   : > { %v14337_v23 = vpop.f32.mrb[237].mxu0 }
 0x89c   : > { %v22434_v55 = vadd.f32 %v14337_v23, %v14336_v28  ;;  %v14339_v46 = vpop.f32.mrb[238].mxu0 }
 0x89d   : > { %v14340_v21 = vpop.f32.mrb[239].mxu0 }
 0x89e   : > { %v22436_v36 = vadd.f32 %v14340_v21, %v14339_v46 }
 0x8a2   : > { %v14342_v39 = vpop.f32.mrb[240].mxu0 }
 0x8a3   : > { %v14343_v59 = vpop.f32.mrb[241].mxu0 }
 0x8a4   : > { %v14382_v52 = vpop.f32.mrb[224].mxu1  ;;  %v22443_v5 = vadd.f32 %v14343_v59, %v14342_v39  ;;  %v14345_v32 = vpop.f32.mrb[242].mxu0 }
 0x8a5   : > { %v14383_v63 = vpop.f32.mrb[225].mxu1  ;;  %v14346_v2 = vpop.f32.mrb[243].mxu0 }
 0x8a6   : > { %v14384_v25 = vadd.f32 %v14383_v63, %v14382_v52  ;;  %v14385_v30 = vpop.f32.mrb[226].mxu1  ;;  %v22447_v3 = vadd.f32 %v14346_v2, %v14345_v32  ;;  %v12586_v52 = vadd.f32 %v22398_v33, %v22441_v60 }
 0x8a7   : > { %v14386_v41 = vpop.f32.mrb[227].mxu1 }
 0x8a8   : > { %v12731_v51 = vadd.f32 %v14384_v25, %v12570_v54  ;;  %v14387_v19 = vadd.f32 %v14386_v41, %v14385_v30  ;;  %v12589_v30 = vadd.f32 %v22400_v6, %v22441_v60 }
 0x8aa   : > { %v12734_v26 = vadd.f32 %v14387_v19, %v12573_v29  ;;  %v14348_v0 = vpop.f32.mrb[244].mxu0  ;;  %v12857_v17 = vmax.f32 %v12731_v51, 0.0 }
 0x8ab   : > { %v14349_v8 = vpop.f32.mrb[245].mxu0 }
 0x8ac   : > { %v12858_v31 = vmax.f32 %v12734_v26, 0.0  ;;  %v14388_v4 = vpop.f32.mrb[228].mxu1  ;;  %v22451_v58 = vadd.f32 %v14349_v8, %v14348_v0  ;;  %v14351_v47 = vpop.f32.mrb[246].mxu0  ;;  %v12594_v8 = vadd.f32 %v22402_v20, %v22441_v60  ;;  %v12602_v20 = vadd.f32 %v22406_v27, %v22441_v60 }
 0x8ad   : > { %v14389_v34 = vpop.f32.mrb[229].mxu1  ;;  %v14352_v56 = vpop.f32.mrb[247].mxu0 }
 0x8ae   : > { %v14390_v62 = vadd.f32 %v14389_v34, %v14388_v4  ;;  %v14391_v15 = vpop.f32.mrb[230].mxu1  ;;  %v12889_v1 = vpack.c.bf16 %v12858_v31, %v12857_v17  ;;  %v22455_v9 = vadd.f32 %v14352_v56, %v14351_v47  ;;  %v12597_v56 = vadd.f32 %v22404_v53, %v22441_v60 }
 0x8af   : > { %v14392_v37 = vpop.f32.mrb[231].mxu1 }
 0x8b0   : > { %v12739_v16 = vadd.f32 %v14390_v62, %v12578_v13  ;;  %v14393_v18 = vadd.f32 %v14392_v37, %v14391_v15  ;;  %14518 = vmatprep.mubr.bf16.mxu0 %v12889_v1 }
 0x8b2   : > { %v12742_v24 = vadd.f32 %v14393_v18, %v12581_v12  ;;  %v14354_v11 = vpop.f32.mrb[248].mxu0  ;;  %v12859_v49 = vmax.f32 %v12739_v16, 0.0 }
 0x8b3   : > { %v14355_v46 = vpop.f32.mrb[249].mxu0 }
 0x8b4   : > { %v12860_v28 = vmax.f32 %v12742_v24, 0.0  ;;  %v14394_v23 = vpop.f32.mrb[232].mxu1  ;;  %v22459_v7 = vadd.f32 %v14355_v46, %v14354_v11  ;;  %v14357_v39 = vpop.f32.mrb[250].mxu0 }
 0x8b5   : > { %v14395_v21 = vpop.f32.mrb[233].mxu1  ;;  %v14358_v61 = vpop.f32.mrb[251].mxu0 }
 0x8b6   : > { %v12890_v59 = vpack.c.bf16 %v12860_v28, %v12859_v49  ;;  %v14396_v63 = vadd.f32 %v14395_v21, %v14394_v23  ;;  %v14397_v32 = vpop.f32.mrb[234].mxu1  ;;  %v22463_v54 = vadd.f32 %v14358_v61, %v14357_v39  ;;  %v12605_v21 = vadd.f32 %v22408_v48, %v22441_v60 }
 0x8b7   : > { %v14398_v25 = vpop.f32.mrb[235].mxu1 }
 0x8b8   : > { %v12747_v2 = vadd.f32 %v14396_v63, %v12586_v52  ;;  %v14399_v41 = vadd.f32 %v14398_v25, %v14397_v32  ;;  %14519 = vmatmul.mubr.bf16.vlgmr.msra.gmra.mrb[0].mxu0 %v12890_v59  ;;  %v12610_v25 = vadd.f32 %v22410_v44, %v22441_v60 }
 0x8ba   : > { %v12750_v29 = vadd.f32 %v14399_v41, %v12589_v30  ;;  %v14360_v51 = vpop.f32.mrb[252].mxu0  ;;  %v12861_v19 = vmax.f32 %v12747_v2, 0.0 }
 0x8bb   : > { %v14361_v17 = vpop.f32.mrb[253].mxu0 }
 0x8bc   : > { %v12862_v26 = vmax.f32 %v12750_v29, 0.0  ;;  %v14400_v0 = vpop.f32.mrb[236].mxu1  ;;  %v22467_v33 = vadd.f32 %v14361_v17, %v14360_v51  ;;  %v14363_v4 = vpop.f32.mrb[254].mxu0  ;;  %v12613_v29 = vadd.f32 %v22412_v35, %v22441_v60 }
 0x8bd   : > { %v14401_v31 = vpop.f32.mrb[237].mxu1  ;;  %v14364_v13 = vpop.f32.mrb[255].mxu0 }
 0x8be   : > { %v14402_v34 = vadd.f32 %v14401_v31, %v14400_v0  ;;  %v14403_v47 = vpop.f32.mrb[238].mxu1  ;;  %v12891_v6 = vpack.c.bf16 %v12862_v26, %v12861_v19  ;;  %v22471_v62 = vadd.f32 %v14364_v13, %v14363_v4  ;;  %v12618_v4 = vadd.f32 %v22414_v50, %v22441_v60 }
 0x8bf   : > { %v14404_v15 = vpop.f32.mrb[239].mxu1  ;;  %v12621_v13 = vadd.f32 %v22416_v14, %v22441_v60 }
 0x8c0   : > { %v12755_v1 = vadd.f32 %v14402_v34, %v12594_v8  ;;  %v14405_v37 = vadd.f32 %v14404_v15, %v14403_v47  ;;  %14522 = vmatprep.mubr.bf16.mxu0 %v12891_v6 }
 0x8c2   : > { %v12758_v12 = vadd.f32 %v14405_v37, %v12597_v56  ;;  %v12863_v16 = vmax.f32 %v12755_v1, 0.0 }
 0x8c4   : > { %v12864_v18 = vmax.f32 %v12758_v12, 0.0  ;;  %v14406_v24 = vpop.f32.mrb[240].mxu1 }
 0x8c5   : > { %v14407_v11 = vpop.f32.mrb[241].mxu1 }
 0x8c6   : > { %v12892_v49 = vpack.c.bf16 %v12864_v18, %v12863_v16  ;;  %v14408_v28 = vadd.f32 %v14407_v11, %v14406_v24  ;;  %v14409_v23 = vpop.f32.mrb[242].mxu1  ;;  %v12626_v16 = vadd.f32 %v22418_v22, %v22441_v60 }
 0x8c7   : > { %v14410_v46 = vpop.f32.mrb[243].mxu1 }
 0x8c8   : > { %v12763_v39 = vadd.f32 %v14408_v28, %v12602_v20  ;;  %v14411_v53 = vadd.f32 %v14410_v46, %v14409_v23  ;;  %14523 = vmatmul.mubr.bf16.gmra.mrb[4].mxu0 %v12892_v49  ;;  %v12629_v20 = vadd.f32 %v22420_v57, %v22441_v60 }
 0x8ca   : > { %v12766_v52 = vadd.f32 %v14411_v53, %v12605_v21  ;;  %v12865_v59 = vmax.f32 %v12763_v39, 0.0  ;;  %v12634_v53 = vadd.f32 %v22422_v42, %v22441_v60 }
 0x8cc   : > { %v12866_v63 = vmax.f32 %v12766_v52, 0.0  ;;  %v14412_v32 = vpop.f32.mrb[244].mxu1 }
 0x8cd   : > { %v14413_v61 = vpop.f32.mrb[245].mxu1 }
 0x8ce   : > { %v14414_v30 = vadd.f32 %v14413_v61, %v14412_v32  ;;  %v14415_v27 = vpop.f32.mrb[246].mxu1  ;;  %v12893_v2 = vpack.c.bf16 %v12866_v63, %v12865_v59  ;;  %v12637_v32 = vadd.f32 %v22424_v38, %v22441_v60 }
 0x8cf   : > { %v14416_v41 = vpop.f32.mrb[247].mxu1 }
 0x8d0   : > { %v12771_v51 = vadd.f32 %v14414_v30, %v12610_v25  ;;  %v14417_v48 = vadd.f32 %v14416_v41, %v14415_v27  ;;  %14526 = vmatprep.mubr.bf16.mxu0 %v12893_v2 }
 0x8d2   : > { %v12774_v19 = vadd.f32 %v14417_v48, %v12613_v29  ;;  %v12867_v26 = vmax.f32 %v12771_v51, 0.0  ;;  %v12642_v29 = vadd.f32 %v22426_v45, %v22441_v60 }
 0x8d4   : > { %v12868_v0 = vmax.f32 %v12774_v19, 0.0  ;;  %v14418_v17 = vpop.f32.mrb[248].mxu1 }
 0x8d5   : > { %v14419_v31 = vpop.f32.mrb[249].mxu1 }
 0x8d6   : > { %v12894_v8 = vpack.c.bf16 %v12868_v0, %v12867_v26  ;;  %v14420_v44 = vadd.f32 %v14419_v31, %v14418_v17  ;;  %v14421_v34 = vpop.f32.mrb[250].mxu1  ;;  %v12645_v26 = vadd.f32 %v22428_v10, %v22441_v60 }
 0x8d7   : > { %v14422_v47 = vpop.f32.mrb[251].mxu1 }
 0x8d8   : > { %v12779_v6 = vadd.f32 %v14420_v44, %v12618_v4  ;;  %v14423_v35 = vadd.f32 %v14422_v47, %v14421_v34  ;;  %14527 = vmatmul.mubr.bf16.gmra.mrb[8].mxu0 %v12894_v8  ;;  %v12650_v34 = vadd.f32 %v22430_v43, %v22441_v60 }
 0x8da   : > { %v12782_v15 = vadd.f32 %v14423_v35, %v12621_v13  ;;  %v12869_v56 = vmax.f32 %v12779_v6, 0.0  ;;  %v12653_v35 = vadd.f32 %v22432_v40, %v22441_v60 }
 0x8dc   : > { %v12870_v1 = vmax.f32 %v12782_v15, 0.0  ;;  %v14424_v37 = vpop.f32.mrb[252].mxu1 }
 0x8dd   : > { %v14425_v12 = vpop.f32.mrb[253].mxu1 }
 0x8de   : > { %v14426_v18 = vadd.f32 %v14425_v12, %v14424_v37  ;;  %v14427_v50 = vpop.f32.mrb[254].mxu1  ;;  %v12895_v24 = vpack.c.bf16 %v12870_v1, %v12869_v56 }
 0x8df   : > { %v14428_v11 = vpop.f32.mrb[255].mxu1 }
 0x8e0   : > { %v12787_v49 = vadd.f32 %v14426_v18, %v12626_v16  ;;  %v14429_v14 = vadd.f32 %v14428_v11, %v14427_v50  ;;  %14530 = vmatprep.mubr.bf16.mxu0 %v12895_v24  ;;  %v12658_v18 = vadd.f32 %v22434_v55, %v22441_v60 }
 0x8e2   : > { %v12790_v28 = vadd.f32 %v14429_v14, %v12629_v20  ;;  %v12871_v23 = vmax.f32 %v12787_v49, 0.0  ;;  %v12661_v20 = vadd.f32 %v22436_v36, %v22441_v60 }
 0x8e4   : > { %v12872_v46 = vmax.f32 %v12790_v28, 0.0  ;;  %v14430_v21 = vpop.f32.mrb[0].mxu1 }
 0x8e5   : > { %v14431_v39 = vpop.f32.mrb[1].mxu1 }
 0x8e6   : > { %v12896_v52 = vpack.c.bf16 %v12872_v46, %v12871_v23  ;;  %v14432_v22 = vadd.f32 %v14431_v39, %v14430_v21  ;;  %v14433_v59 = vpop.f32.mrb[2].mxu1  ;;  %v12666_v39 = vadd.f32 %v22443_v5, %v22441_v60 }
 0x8e7   : > { %v14434_v63 = vpop.f32.mrb[3].mxu1 }
 0x8e8   : > { %v12795_v61 = vadd.f32 %v14432_v22, %v12634_v53  ;;  %v14435_v57 = vadd.f32 %v14434_v63, %v14433_v59  ;;  %14531 = vmatmul.mubr.bf16.gmra.mrb[12].mxu0 %v12896_v52  ;;  %v12669_v59 = vadd.f32 %v22447_v3, %v22441_v60 }
 0x8ea   : > { %v12798_v25 = vadd.f32 %v14435_v57, %v12637_v32  ;;  %v12873_v30 = vmax.f32 %v12795_v61, 0.0 }
 0x8ec   : > { %v12874_v27 = vmax.f32 %v12798_v25, 0.0  ;;  %v14436_v2 = vpop.f32.mrb[4].mxu1 }
 0x8ed   : > { %v14437_v41 = vpop.f32.mrb[5].mxu1 }
 0x8ee   : > { %v14438_v51 = vadd.f32 %v14437_v41, %v14436_v2  ;;  %v14439_v42 = vpop.f32.mrb[6].mxu1  ;;  %v12897_v48 = vpack.c.bf16 %v12874_v27, %v12873_v30  ;;  %v12674_v27 = vadd.f32 %v22451_v58, %v22441_v60 }
 0x8ef   : > { %v14440_v19 = vpop.f32.mrb[7].mxu1 }
 0x8f0   : > { %v12803_v0 = vadd.f32 %v14438_v51, %v12642_v29  ;;  %v14441_v38 = vadd.f32 %v14440_v19, %v14439_v42  ;;  %14534 = vmatprep.mubr.bf16.mxu0 %v12897_v48  ;;  %v12677_v51 = vadd.f32 %v22455_v9, %v22441_v60 }
 0x8f2   : > { %v12806_v17 = vadd.f32 %v14441_v38, %v12645_v26  ;;  %v12875_v31 = vmax.f32 %v12803_v0, 0.0 }
 0x8f4   : > { %v12876_v4 = vmax.f32 %v12806_v17, 0.0  ;;  %v14442_v8 = vpop.f32.mrb[8].mxu1  ;;  %v12682_v17 = vadd.f32 %v22459_v7, %v22441_v60 }
 0x8f5   : > { %v14443_v44 = vpop.f32.mrb[9].mxu1 }
 0x8f6   : > { %v12898_v47 = vpack.c.bf16 %v12876_v4, %v12875_v31  ;;  %v14444_v45 = vadd.f32 %v14443_v44, %v14442_v8  ;;  %v14445_v13 = vpop.f32.mrb[10].mxu1  ;;  %v12685_v44 = vadd.f32 %v22463_v54, %v22441_v60 }
 0x8f7   : > { %v14446_v6 = vpop.f32.mrb[11].mxu1 }
 0x8f8   : > { %v12811_v15 = vadd.f32 %v14444_v45, %v12650_v34  ;;  %v14447_v10 = vadd.f32 %v14446_v6, %v14445_v13  ;;  %14535 = vmatmul.mubr.bf16.gmra.mrb[16].mxu0 %v12898_v47 }
 0x8fa   : > { %v12814_v56 = vadd.f32 %v14447_v10, %v12653_v35  ;;  %v12877_v1 = vmax.f32 %v12811_v15, 0.0  ;;  %v12690_v15 = vadd.f32 %v22467_v33, %v22441_v60  ;;  %v22527_v33 = vld [vmem:[%s22609_s8] ss:$0 sm:$0xff] }
 0x8fc   : > { %v12878_v37 = vmax.f32 %v12814_v56, 0.0  ;;  %v14448_v12 = vpop.f32.mrb[12].mxu1 }
 0x8fd   : > { %v14449_v16 = vpop.f32.mrb[13].mxu1 }
 0x8fe   : > { %v14450_v50 = vadd.f32 %v14449_v16, %v14448_v12  ;;  %v14451_v43 = vpop.f32.mrb[14].mxu1  ;;  %v12899_v24 = vpack.c.bf16 %v12878_v37, %v12877_v1  ;;  %v12693_v37 = vadd.f32 %v22471_v62, %v22441_v60 }
 0x8ff   : > { %v14452_v11 = vpop.f32.mrb[15].mxu1 }
 0x900   : > { %v12819_v49 = vadd.f32 %v14450_v50, %v12658_v18  ;;  %v14453_v40 = vadd.f32 %v14452_v11, %v14451_v43  ;;  %14538 = vmatprep.mubr.bf16.mxu0 %v12899_v24 }
 0x902   : > { %v12822_v14 = vadd.f32 %v14453_v40, %v12661_v20  ;;  %v12879_v28 = vmax.f32 %v12819_v49, 0.0 }
 0x904   : > { %v12880_v23 = vmax.f32 %v12822_v14, 0.0  ;;  %v14454_v46 = vpop.f32.mrb[16].mxu1 }
 0x905   : > { %v14455_v21 = vpop.f32.mrb[17].mxu1 }
 0x906   : > { %v12900_v53 = vpack.c.bf16 %v12880_v23, %v12879_v28  ;;  %v14456_v55 = vadd.f32 %v14455_v21, %v14454_v46  ;;  %v14457_v52 = vpop.f32.mrb[18].mxu1 }
 0x907   : > { %v14458_v22 = vpop.f32.mrb[19].mxu1 }
 0x908   : > { %v12827_v63 = vadd.f32 %v14456_v55, %v12666_v39  ;;  %v14459_v36 = vadd.f32 %v14458_v22, %v14457_v52  ;;  %14539 = vmatmul.mubr.bf16.gmra.mrb[20].mxu0 %v12900_v53 }
 0x90a   : > { %v12830_v32 = vadd.f32 %v14459_v36, %v12669_v59  ;;  %v12881_v61 = vmax.f32 %v12827_v63, 0.0 }
 0x90c   : > { %v12882_v57 = vmax.f32 %v12830_v32, 0.0  ;;  %v14460_v25 = vpop.f32.mrb[20].mxu1 }
 0x90d   : > { %v14461_v30 = vpop.f32.mrb[21].mxu1 }
 0x90e   : > { %v14462_v2 = vadd.f32 %v14461_v30, %v14460_v25  ;;  %v14463_v5 = vpop.f32.mrb[22].mxu1  ;;  %v12901_v41 = vpack.c.bf16 %v12882_v57, %v12881_v61 }
 0x90f   : > { %v14464_v29 = vpop.f32.mrb[23].mxu1 }
 0x910   : > { %v12835_v42 = vadd.f32 %v14462_v2, %v12674_v27  ;;  %v14465_v3 = vadd.f32 %v14464_v29, %v14463_v5  ;;  %14542 = vmatprep.mubr.bf16.mxu0 %v12901_v41 }
 0x912   : > { %v12838_v48 = vadd.f32 %v14465_v3, %v12677_v51  ;;  %v12883_v19 = vmax.f32 %v12835_v42, 0.0 }
 0x914   : > { %v12884_v26 = vmax.f32 %v12838_v48, 0.0  ;;  %v14466_v0 = vpop.f32.mrb[24].mxu1 }
 0x915   : > { %v14467_v38 = vpop.f32.mrb[25].mxu1 }
 0x916   : > { %v12902_v31 = vpack.c.bf16 %v12884_v26, %v12883_v19  ;;  %v14468_v58 = vadd.f32 %v14467_v38, %v14466_v0  ;;  %v14469_v4 = vpop.f32.mrb[26].mxu1 }
 0x917   : > { %v14470_v8 = vpop.f32.mrb[27].mxu1 }
 0x918   : > { %v12843_v34 = vadd.f32 %v14468_v58, %v12682_v17  ;;  %v14471_v9 = vadd.f32 %v14470_v8, %v14469_v4  ;;  %14543 = vmatmul.mubr.bf16.gmra.mrb[24].mxu0 %v12902_v31 }
 0x91a   : > { %v12846_v47 = vadd.f32 %v14471_v9, %v12685_v44  ;;  %v12885_v45 = vmax.f32 %v12843_v34, 0.0 }
 0x91c   : > { %v12886_v13 = vmax.f32 %v12846_v47, 0.0  ;;  %v14472_v6 = vpop.f32.mrb[28].mxu1 }
 0x91d   : > { %v14473_v35 = vpop.f32.mrb[29].mxu1 }
 0x91e   : > { %v14474_v7 = vadd.f32 %v14473_v35, %v14472_v6  ;;  %v14475_v10 = vpop.f32.mrb[30].mxu1  ;;  %v12903_v56 = vpack.c.bf16 %v12886_v13, %v12885_v45 }
 0x91f   : > { %v14476_v1 = vpop.f32.mrb[31].mxu1 }
 0x920   : > { %v12851_v54 = vadd.f32 %v14474_v7, %v12690_v15  ;;  %v14477_v12 = vadd.f32 %v14476_v1, %v14475_v10  ;;  %14546 = vmatprep.mubr.bf16.mxu0 %v12903_v56 }
 0x922   : > { %v12854_v16 = vadd.f32 %v14477_v12, %v12693_v37  ;;  %v12887_v18 = vmax.f32 %v12851_v54, 0.0 }
 0x924   : > { %v12888_v50 = vmax.f32 %v12854_v16, 0.0 }
 0x926   : > { %v12904_v43 = vpack.c.bf16 %v12888_v50, %v12887_v18 }
 0x928   : > { %14547 = vmatmul.mubr.bf16.gmra.mrb[32].mxu0 %v12904_v43 }
 0x98b   : > { %v14520_v60 = vpop.f32.mrb[0].mxu0 }
 0x98c   : > { %v13019_v62 = vadd.f32 %v14520_v60, %v22527_v33  ;;  %v13010_v24 = vpop.f32.mrb[1].mxu0 }
 0x98d   : > { %v13011_v11 = vadd.f32 %v22527_v33, %v13010_v24  ;;  %v14521_v20 = vpop.f32.mrb[2].mxu0 }
 0x98e   : > { %13139 = vst [vmem:[%s22532_s15 + $0x10] sm:$0xff] %v13019_v62  ;;  %v13022_v49 = vadd.f32 %v14521_v20, %v22527_v33  ;;  %v13013_v40 = vpop.f32.mrb[3].mxu0 }
 0x98f   : > { %13137 = vst [vmem:[%s22532_s15] sm:$0xff] %v13011_v11  ;;  %v13014_v14 = vadd.f32 %v22527_v33, %v13013_v40 }
 0x990   : > { %13140 = vst [vmem:[%s22532_s15 + $0x18] sm:$0xff] %v13022_v49 }
 0x991   : > { %13138 = vst [vmem:[%s22532_s15 + $0x8] sm:$0xff] %v13014_v14 }
 0x99b   : > { %v14524_v28 = vpop.f32.mrb[4].mxu0 }
 0x99c   : > { %v13035_v23 = vadd.f32 %v14524_v28, %v22527_v33  ;;  %v13026_v46 = vpop.f32.mrb[5].mxu0 }
 0x99d   : > { %v13027_v21 = vadd.f32 %v22527_v33, %v13026_v46  ;;  %v14525_v39 = vpop.f32.mrb[6].mxu0 }
 0x99e   : > { %13143 = vst [vmem:[%s22532_s15 + $0x30] sm:$0xff] %v13035_v23  ;;  %v13038_v53 = vadd.f32 %v14525_v39, %v22527_v33  ;;  %v13029_v55 = vpop.f32.mrb[7].mxu0 }
 0x99f   : > { %13141 = vst [vmem:[%s22532_s15 + $0x20] sm:$0xff] %v13027_v21  ;;  %v13030_v52 = vadd.f32 %v22527_v33, %v13029_v55 }
 0x9a0   : > { %13144 = vst [vmem:[%s22532_s15 + $0x38] sm:$0xff] %v13038_v53 }
 0x9a1   : > { %13142 = vst [vmem:[%s22532_s15 + $0x28] sm:$0xff] %v13030_v52 }
 0x9ab   : > { %v14528_v22 = vpop.f32.mrb[8].mxu0 }
 0x9ac   : > { %v13051_v59 = vadd.f32 %v14528_v22, %v22527_v33  ;;  %v13042_v63 = vpop.f32.mrb[9].mxu0 }
 0x9ad   : > { %v13043_v36 = vadd.f32 %v22527_v33, %v13042_v63  ;;  %v14529_v32 = vpop.f32.mrb[10].mxu0 }
 0x9ae   : > { %13147 = vst [vmem:[%s22532_s15 + $0x50] sm:$0xff] %v13051_v59  ;;  %v13054_v61 = vadd.f32 %v14529_v32, %v22527_v33  ;;  %v13045_v57 = vpop.f32.mrb[11].mxu0 }
 0x9af   : > { %13145 = vst [vmem:[%s22532_s15 + $0x40] sm:$0xff] %v13043_v36  ;;  %v13046_v25 = vadd.f32 %v22527_v33, %v13045_v57 }
 0x9b0   : > { %13148 = vst [vmem:[%s22532_s15 + $0x58] sm:$0xff] %v13054_v61 }
 0x9b1   : > { %13146 = vst [vmem:[%s22532_s15 + $0x48] sm:$0xff] %v13046_v25 }
 0x9bb   : > { %v14532_v30 = vpop.f32.mrb[12].mxu0 }
 0x9bc   : > { %v13067_v27 = vadd.f32 %v14532_v30, %v22527_v33  ;;  %v13058_v2 = vpop.f32.mrb[13].mxu0 }
 0x9bd   : > { %v13059_v5 = vadd.f32 %v22527_v33, %v13058_v2  ;;  %v14533_v41 = vpop.f32.mrb[14].mxu0 }
 0x9be   : > { %13151 = vst [vmem:[%s22532_s15 + $0x70] sm:$0xff] %v13067_v27  ;;  %v13070_v29 = vadd.f32 %v14533_v41, %v22527_v33  ;;  %v13061_v51 = vpop.f32.mrb[15].mxu0 }
 0x9bf   : > { %13149 = vst [vmem:[%s22532_s15 + $0x60] sm:$0xff] %v13059_v5  ;;  %v13062_v42 = vadd.f32 %v22527_v33, %v13061_v51 }
 0x9c0   : > { %13152 = vst [vmem:[%s22532_s15 + $0x78] sm:$0xff] %v13070_v29 }
 0x9c1   : > { %13150 = vst [vmem:[%s22532_s15 + $0x68] sm:$0xff] %v13062_v42 }
 0x9cb   : > { %v14536_v3 = vpop.f32.mrb[16].mxu0 }
 0x9cc   : > { %v13083_v48 = vadd.f32 %v14536_v3, %v22527_v33  ;;  %v13074_v19 = vpop.f32.mrb[17].mxu0 }
 0x9cd   : > { %v13075_v26 = vadd.f32 %v22527_v33, %v13074_v19  ;;  %v14537_v0 = vpop.f32.mrb[18].mxu0 }
 0x9ce   : > { %13155 = vst [vmem:[%s22532_s15 + $0x90] sm:$0xff] %v13083_v48  ;;  %v13086_v38 = vadd.f32 %v14537_v0, %v22527_v33  ;;  %v13077_v17 = vpop.f32.mrb[19].mxu0 }
 0x9cf   : > { %13153 = vst [vmem:[%s22532_s15 + $0x80] sm:$0xff] %v13075_v26  ;;  %v13078_v31 = vadd.f32 %v22527_v33, %v13077_v17 }
 0x9d0   : > { %13156 = vst [vmem:[%s22532_s15 + $0x98] sm:$0xff] %v13086_v38 }
 0x9d1   : > { %13154 = vst [vmem:[%s22532_s15 + $0x88] sm:$0xff] %v13078_v31 }
 0x9db   : > { %v14540_v58 = vpop.f32.mrb[20].mxu0 }
 0x9dc   : > { %v13099_v4 = vadd.f32 %v14540_v58, %v22527_v33  ;;  %v13090_v8 = vpop.f32.mrb[21].mxu0 }
 0x9dd   : > { %v13091_v44 = vadd.f32 %v22527_v33, %v13090_v8  ;;  %v14541_v34 = vpop.f32.mrb[22].mxu0 }
 0x9de   : > { %13159 = vst [vmem:[%s22532_s15 + $0xb0] sm:$0xff] %v13099_v4  ;;  %v13102_v9 = vadd.f32 %v14541_v34, %v22527_v33  ;;  %v13093_v47 = vpop.f32.mrb[23].mxu0 }
 0x9df   : > { %13157 = vst [vmem:[%s22532_s15 + $0xa0] sm:$0xff] %v13091_v44  ;;  %v13094_v45 = vadd.f32 %v22527_v33, %v13093_v47 }
 0x9e0   : > { %13160 = vst [vmem:[%s22532_s15 + $0xb8] sm:$0xff] %v13102_v9 }
 0x9e1   : > { %13158 = vst [vmem:[%s22532_s15 + $0xa8] sm:$0xff] %v13094_v45 }
 0x9eb   : > { %v14544_v13 = vpop.f32.mrb[24].mxu0 }
 0x9ec   : > { %v13115_v6 = vadd.f32 %v14544_v13, %v22527_v33  ;;  %v13106_v35 = vpop.f32.mrb[25].mxu0 }
 0x9ed   : > { %v13107_v15 = vadd.f32 %v22527_v33, %v13106_v35  ;;  %v14545_v7 = vpop.f32.mrb[26].mxu0 }
 0x9ee   : > { %13163 = vst [vmem:[%s22532_s15 + $0xd0] sm:$0xff] %v13115_v6  ;;  %v13118_v10 = vadd.f32 %v14545_v7, %v22527_v33  ;;  %v13109_v56 = vpop.f32.mrb[27].mxu0 }
 0x9ef   : > { %13161 = vst [vmem:[%s22532_s15 + $0xc0] sm:$0xff] %v13107_v15  ;;  %v13110_v1 = vadd.f32 %v22527_v33, %v13109_v56 }
 0x9f0   : > { %13164 = vst [vmem:[%s22532_s15 + $0xd8] sm:$0xff] %v13118_v10 }
 0x9f1   : > { %13162 = vst [vmem:[%s22532_s15 + $0xc8] sm:$0xff] %v13110_v1 }
 0x9fb   : > { %v14548_v37 = vpop.f32.mrb[32].mxu0 }
 0x9fc   : > { %v13131_v54 = vadd.f32 %v14548_v37, %v22527_v33  ;;  %v13122_v12 = vpop.f32.mrb[33].mxu0 }
 0x9fd   : > { %v13123_v16 = vadd.f32 %v22527_v33, %v13122_v12  ;;  %v14549_v18 = vpop.f32.mrb[34].mxu0 }
 0x9fe   : > { %13167 = vst [vmem:[%s22532_s15 + $0xf0] sm:$0xff] %v13131_v54  ;;  %v13134_v50 = vadd.f32 %v14549_v18, %v22527_v33  ;;  %v13125_v43 = vpop.f32.mrb[35].mxu0 }
 0x9ff   : > { %13165 = vst [vmem:[%s22532_s15 + $0xe0] sm:$0xff] %v13123_v16  ;;  %v13126_v60 = vadd.f32 %v22527_v33, %v13125_v43 }
 0xa00   : > { %13168 = vst [vmem:[%s22532_s15 + $0xf8] sm:$0xff] %v13134_v50 }
 0xa01   : > { %13166 = vst [vmem:[%s22532_s15 + $0xe8] sm:$0xff] %v13126_v60 }
 0xa02 PF: > { %s19_s30 = sadd.s32 1, %s17159_s30  }
 0xa03   : > { %p16_p4 = scmp.ge.s32.totalorder %s19_s30, 4  }
 0xa05   :  { %18 = sbr.rel (!%p16_p4) target bundleno = 1 (0x1), region = 86 }

</bundles_post_ra>
